<compile_context>
chip_gen: v7x
topology: tpu7x:2x2x1
jax: 0.10.0
libtpu: 0.0.40
codegen_flags: <defaults>
</compile_context>

<pallas_src>
import jax
import jax.numpy as jnp
from jax.experimental import pallas as pl
from jax.experimental.pallas import tpu as pltpu


def _round_up(x, m):
    return (x + m - 1) // m * m


# ---------------------------------------------------------------------------
# Fused encoder + teacher-forced dot-attention decoder kernel (one decoder per
# grid step; grid=(N,) with N = number of decoders).
# ---------------------------------------------------------------------------
def fused_enc_dec_kernel(src_emb_ref, len_ref,
                         wxh_ref, whh_ref, bh_ref,
                         trg_emb_ref, wyh_ref, wsh_ref, bs_ref, wout_ref, bo_ref,
                         logits_ref, attn_ref):
    """
    src_emb_ref : [B, S, E]   embedded source (shared across grid steps)
    len_ref     : [B, 1]      int32 source lengths (shared)
    wxh/whh/bh  : encoder weights (shared)
    trg_emb_ref : [B, T, E]   embedded teacher inputs (per decoder)
    wyh/wsh/bs  : decoder recurrence weights (per decoder)
    wout_ref    : [2H, V]     fused [wos; woc] vocab projection (per decoder)
    bo_ref      : [1, V]
    logits_ref  : [B, T, V]   vocab logits (out, lane-dense V)
    attn_ref    : [B, T, S]   attention weights (out)
    """
    B, S, E = src_emb_ref.shape
    H = whh_ref.shape[0]
    T = trg_emb_ref.shape[1]
    V = logits_ref.shape[2]

    lens = len_ref[...]                                    # [B,1] int32

    # ---- encoder (tiny; recomputed per grid step so everything is one launch) ----
    xh = (jnp.dot(src_emb_ref[...].reshape(B * S, E), wxh_ref[...],
                  preferred_element_type=jnp.float32)
          + bh_ref[...]).reshape(B, S, H)                  # hoisted input projection
    whh = whh_ref[...]
    h = jnp.zeros((B, H), jnp.float32)
    hs = []
    for t in range(S):                                     # static trip count, unrolled
        h_new = jnp.tanh(xh[:, t, :] +
                         jnp.dot(h, whh, preferred_element_type=jnp.float32))
        h = jnp.where(t < lens, h_new, h)                  # freeze past each src length
        hs.append(h)
    enc = jnp.stack(hs, axis=1)                            # [B,S,H] one bulk materialization
    s0 = h                                                 # encoder final state

    # additive attention mask built in-kernel from lengths (no HBM mask round-trip)
    pos = jax.lax.broadcasted_iota(jnp.int32, (B, S), 1)
    mask = jnp.where(pos < lens, 0.0, -1e9).astype(jnp.float32)   # [B,S]

    # ---- decoder: hoisted input projection + short serial recurrence ----
    yh = (jnp.dot(trg_emb_ref[...].reshape(B * T, E), wyh_ref[...],
                  preferred_element_type=jnp.float32)
          + bs_ref[...]).reshape(B, T, H)
    wsh = wsh_ref[...]
    s = s0
    ss = []
    for t in range(T):                                     # only tiny matmul + tanh serial
        s = jnp.tanh(yh[:, t, :] +
                     jnp.dot(s, wsh, preferred_element_type=jnp.float32))
        ss.append(s)
    s_all = jnp.stack(ss, axis=1)                          # [B,T,H] (no VMEM scratch)

    # ---- hoisted attention over ALL time steps (ctx never feeds the recurrence) ----
    scores = jnp.einsum('bth,bsh->bts', s_all, enc,
                        preferred_element_type=jnp.float32) + mask[:, None, :]
    m = jnp.max(scores, axis=-1, keepdims=True)
    e = jnp.exp(scores - m)
    denom = jnp.sum(e, axis=-1, keepdims=True)
    alpha = e * pl.reciprocal(denom, approx=True)          # divide on the EUP slot
    ctx = jnp.einsum('bts,bsh->bth', alpha, enc,
                     preferred_element_type=jnp.float32)   # [B,T,H]

    # ---- fused vocab projection: one [B*T, 2H] @ [2H, V] MXU matmul ----
    sc = jnp.concatenate([s_all, ctx], axis=-1).reshape(B * T, 2 * H)
    logits = (jnp.dot(sc, wout_ref[...], preferred_element_type=jnp.float32)
              + bo_ref[...]).reshape(B, T, V)
    logits_ref[...] = logits                               # lane-dense store (V % 128 == 0)
    attn_ref[...] = alpha


# ---------------------------------------------------------------------------
# Wrapper: one pallas_call running N independent decoders (plus the encoder).
# ---------------------------------------------------------------------------
_SEM_CACHE = {}   # shape-key -> dimension semantics that compiled on this chip


def _run_fused(src_emb, src_len, enc_params, trg_emb_nbte, dec_stacked):
    N, B, T, E = trg_emb_nbte.shape
    S = src_emb.shape[1]
    H = enc_params['whh'].shape[0]
    V = dec_stacked['wout'].shape[-1]

    def per_dec(*shape):       # per-decoder block, leading (decoder) dim squeezed
        n = len(shape)
        return pl.BlockSpec((None,) + shape, lambda d: (d,) + (0,) * n)

    def shared(*shape):        # same block for every decoder (stays resident)
        n = len(shape)
        return pl.BlockSpec(shape, lambda d: (0,) * n)

    grid_spec = pltpu.PrefetchScalarGridSpec(
        num_scalar_prefetch=0,
        grid=(N,),
        in_specs=[
            shared(B, S, E),       # src_emb
            shared(B, 1),          # src lengths
            shared(E, H),          # wxh
            shared(H, H),          # whh
            shared(1, H),          # bh
            per_dec(B, T, E),      # trg_emb
            per_dec(E, H),         # wyh
            per_dec(H, H),         # wsh
            per_dec(1, H),         # bs
            per_dec(2 * H, V),     # wout = [wos; woc]
            per_dec(1, V),         # bo
        ],
        out_specs=(per_dec(B, T, V), per_dec(B, T, S)),
    )

    flops = N * 2 * (B * S * E * H + S * B * H * H + B * T * E * H
                     + T * B * H * H + 2 * B * T * S * H + B * T * 2 * H * V)
    transcend = N * (B * S + B * T + B * T * S)
    bytes_acc = 4 * (B * S * E + B + E * H + H * H + H
                     + N * (B * T * E + E * H + H * H + H + 2 * H * V + V)
                     + N * (B * T * V + B * T * S))
    cost = pl.CostEstimate(flops=int(flops), transcendentals=int(transcend),
                           bytes_accessed=int(bytes_acc))

    args = (src_emb.astype(jnp.float32), src_len.astype(jnp.int32),
            enc_params['wxh'], enc_params['whh'], enc_params['bh'],
            trg_emb_nbte.astype(jnp.float32),
            dec_stacked['wyh'], dec_stacked['wsh'], dec_stacked['bs'],
            dec_stacked['wout'], dec_stacked['bo'])

    def call(sem):
        return pl.pallas_call(
            fused_enc_dec_kernel,
            out_shape=(jax.ShapeDtypeStruct((N, B, T, V), jnp.float32),
                       jax.ShapeDtypeStruct((N, B, T, S), jnp.float32)),
            grid_spec=grid_spec,
            compiler_params=pltpu.CompilerParams(dimension_semantics=(sem,)),
            cost_estimate=cost,
        )(*args)

    key = (N, B, T, S, E, H, V)
    if key in _SEM_CACHE:
        return call(_SEM_CACHE[key])

    # Prefer CORE_PARALLEL so the independent decoders split across v7x's two
    # TensorCores; fall back to PARALLEL if this chip/grid rejects it.
    last_err = None
    for sem in (pltpu.CORE_PARALLEL, pltpu.PARALLEL):
        try:
            out = jax.block_until_ready(call(sem))
            _SEM_CACHE[key] = sem
            return out
        except Exception as err:   # lowering/compile failure -> try next semantics
            last_err = err
    raise last_err


# ---------------------------------------------------------------------------
# AutoEncoder (parser + generator) with deterministic synthetic parameters
# ---------------------------------------------------------------------------
class AutoEncoder:
    def __init__(self, key, vocab_src, vocab_mr, vocab_nl, emb_dim=32, hidden=32):
        def init(k, shape):
            return 0.1 * jax.random.normal(k, shape, jnp.float32)

        ks = list(jax.random.split(key, 20))
        self.vocab_mr, self.vocab_nl = vocab_mr, vocab_nl
        # embeddings
        self.emb_src = init(ks[0], (vocab_src, emb_dim))
        self.emb_mr = init(ks[1], (vocab_mr, emb_dim))
        self.emb_nl = init(ks[2], (vocab_nl, emb_dim))
        # shared (parser) encoder
        self.enc = dict(
            wxh=init(ks[3], (emb_dim, hidden)),
            whh=init(ks[4], (hidden, hidden)),
            bh=init(ks[5], (1, hidden)),
        )
        # parser decoder (src -> MR)
        self.parser_dec = dict(
            wyh=init(ks[6], (emb_dim, hidden)),
            wsh=init(ks[7], (hidden, hidden)),
            bs=init(ks[8], (1, hidden)),
            wos=init(ks[9], (hidden, vocab_mr)),
            woc=init(ks[10], (hidden, vocab_mr)),
            bo=init(ks[11], (1, vocab_mr)),
        )
        # generator decoder (encoder states -> NL)
        self.gen_dec = dict(
            wyh=init(ks[12], (emb_dim, hidden)),
            wsh=init(ks[13], (hidden, hidden)),
            bs=init(ks[14], (1, hidden)),
            wos=init(ks[15], (hidden, vocab_nl)),
            woc=init(ks[16], (hidden, vocab_nl)),
            bo=init(ks[17], (1, vocab_nl)),
        )

        # Always build the fused two-decoder stack: pad both vocab projections to a
        # common 128-multiple (lane-dense, unmasked vst) and pre-concatenate wos/woc
        # along H so the in-kernel vocab projection is one [B*T, 2H] @ [2H, V] matmul.
        self.v_pad = _round_up(max(vocab_mr, vocab_nl), 128)

        def pad_v(w):
            pad = self.v_pad - w.shape[-1]
            if pad == 0:
                return w
            return jnp.pad(w, [(0, 0)] * (w.ndim - 1) + [(0, pad)])

        def pack(p):
            return dict(
                wyh=p['wyh'], wsh=p['wsh'], bs=p['bs'],
                wout=jnp.concatenate([pad_v(p['wos']), pad_v(p['woc'])], axis=0),
                bo=pad_v(p['bo']),
            )

        packed = [pack(self.parser_dec), pack(self.gen_dec)]
        self.dec_stacked = {k: jnp.stack([packed[0][k], packed[1][k]], axis=0)
                            for k in packed[0]}

    def __call__(self, src_batch, trg_batch, src_lengths, trg_lengths,
                 nl_trg=None, nl_trg_lengths=None, teacher_force=True,
                 ignore_gen=False):
        B, S = src_batch.shape
        src_emb = jnp.take(self.emb_src, src_batch, axis=0)          # [B,S,E]
        src_len = src_lengths.reshape(B, 1).astype(jnp.int32)
        trg_emb = jnp.take(self.emb_mr, trg_batch, axis=0)           # [B,T,E]
        t_mr = trg_emb.shape[1]

        if ignore_gen:
            stacked1 = {k: v[0:1] for k, v in self.dec_stacked.items()}
            lg, at = _run_fused(src_emb, src_len, self.enc, trg_emb[None], stacked1)
            inter_outs = lg[0][:, :, :self.vocab_mr][:, None]        # [B,1,T,Vmr]
            inter_attns = at[0][:, None]                             # [B,1,T,S]
            inter_words = jnp.argmax(inter_outs, axis=-1)            # [B,1,T]
            return inter_outs, inter_words, inter_attns

        nl_emb = jnp.take(self.emb_nl, nl_trg, axis=0)               # [B,Tn,E]
        t_nl = nl_emb.shape[1]
        t_max = max(t_mr, t_nl)

        def pad_t(x):
            if x.shape[1] == t_max:
                return x
            return jnp.pad(x, ((0, 0), (0, t_max - x.shape[1]), (0, 0)))

        # One launch: parser + generator decoders (and the encoder) fused in a single
        # pallas_call with grid=(2,), one decoder per TensorCore on v7x.
        trg_stack = jnp.stack([pad_t(trg_emb), pad_t(nl_emb)], axis=0)
        lg, at = _run_fused(src_emb, src_len, self.enc, trg_stack, self.dec_stacked)

        p_logits = lg[0][:, :t_mr, :self.vocab_mr]
        p_attn = at[0][:, :t_mr]
        g_logits = lg[1][:, :t_nl, :self.vocab_nl]
        g_attn = at[1][:, :t_nl]

        inter_outs = p_logits[:, None]                               # [B,1,T,Vmr]
        inter_attns = p_attn[:, None]                                # [B,1,T,S]
        inter_words = jnp.argmax(inter_outs, axis=-1)                # [B,1,T]
        outs = g_logits[:, None]                                     # [B,1,Tn,Vnl]
        attns = g_attn[:, None]                                      # [B,1,Tn,S]
        words = jnp.argmax(outs, axis=-1)                            # [B,1,Tn]
        return inter_outs, inter_words, inter_attns, outs, words, attns


# ---------------------------------------------------------------------------
# Pure-JAX reference (for correctness check only)
# ---------------------------------------------------------------------------
def _forward_ref(model, src_batch, trg_batch, src_lengths, nl_trg):
    B, S = src_batch.shape
    H = model.enc['whh'].shape[0]
    src_emb = jnp.take(model.emb_src, src_batch, axis=0)
    lens = src_lengths.astype(jnp.int32)
    h = jnp.zeros((B, H), jnp.float32)
    hid = []
    for t in range(S):
        h_new = jnp.tanh(src_emb[:, t] @ model.enc['wxh']
                         + h @ model.enc['whh'] + model.enc['bh'])
        h = jnp.where((t < lens)[:, None], h_new, h)
        hid.append(h)
    enc = jnp.stack(hid, axis=1)                                     # [B,S,H]
    mask = jnp.where(jnp.arange(S)[None, :] < lens[:, None], 0.0, -1e9)

    def dec(table, ids, p):
        y = jnp.take(table, ids, axis=0)
        s = h
        logits_l, attn_l = [], []
        for t in range(ids.shape[1]):
            s = jnp.tanh(y[:, t] @ p['wyh'] + s @ p['wsh'] + p['bs'])
            sc = jnp.einsum('bh,bsh->bs', s, enc) + mask
            a = jax.nn.softmax(sc, axis=-1)
            c = jnp.einsum('bs,bsh->bh', a, enc)
            logits_l.append(s @ p['wos'] + c @ p['woc'] + p['bo'])
            attn_l.append(a)
        return jnp.stack(logits_l, axis=1), jnp.stack(attn_l, axis=1)

    p_logits, p_attn = dec(model.emb_mr, trg_batch, model.parser_dec)
    g_logits, g_attn = dec(model.emb_nl, nl_trg, model.gen_dec)
    return p_logits, p_attn, g_logits, g_attn


# ---------------------------------------------------------------------------
if __name__ == "__main__":
    # Full f32 matmul precision for the pure-JAX reference comparison.
    jax.config.update("jax_default_matmul_precision", "highest")

    # Small but sublane/lane-dense shapes: B multiple of 8, vocab = 128 lanes.
    B, S, T_MR, T_NL = 8, 8, 8, 8
    V_SRC, V_MR, V_NL = 48, 128, 128
    EMB, HID = 32, 32

    model = AutoEncoder(jax.random.PRNGKey(0), V_SRC, V_MR, V_NL,
                        emb_dim=EMB, hidden=HID)

    k1, k2, k3 = jax.random.split(jax.random.PRNGKey(0), 3)
    src_batch = jax.random.randint(k1, (B, S), 0, V_SRC, dtype=jnp.int32)
    trg_batch = jax.random.randint(k2, (B, T_MR), 0, V_MR, dtype=jnp.int32)
    nl_trg = jax.random.randint(k3, (B, T_NL), 0, V_NL, dtype=jnp.int32)
    src_lengths = jnp.array([S, S - 1, S - 2, S - 3, S, S - 2, S - 4, S - 1],
                            dtype=jnp.int32)
    trg_lengths = jnp.full((B,), T_MR, dtype=jnp.int32)
    nl_lengths = jnp.full((B,), T_NL, dtype=jnp.int32)

    result = model(src_batch, trg_batch, src_lengths, trg_lengths,
                   nl_trg=nl_trg, nl_trg_lengths=nl_lengths,
                   teacher_force=True, ignore_gen=False)
    result = jax.block_until_ready(result)

    inter_outs, inter_words, inter_attns, outs, words, attns = result
    assert inter_outs.shape == (B, 1, T_MR, V_MR)
    assert inter_words.shape == (B, 1, T_MR)
    assert inter_attns.shape == (B, 1, T_MR, S)
    assert outs.shape == (B, 1, T_NL, V_NL)
    assert words.shape == (B, 1, T_NL)
    assert attns.shape == (B, 1, T_NL, S)
    # attention rows are probability distributions over valid source positions
    # (tolerance accounts for the EUP approx-reciprocal softmax normalization)
    assert bool(jnp.all(jnp.abs(jnp.sum(inter_attns, axis=-1) - 1.0) < 5e-3))
    assert bool(jnp.all(jnp.abs(jnp.sum(attns, axis=-1) - 1.0) < 5e-3))
    assert bool(jnp.all(jnp.isfinite(inter_outs))) and bool(jnp.all(jnp.isfinite(outs)))

    # numerics vs. pure-JAX reference (teacher-forced path)
    rp_logits, rp_attn, rg_logits, rg_attn = _forward_ref(
        model, src_batch, trg_batch, src_lengths, nl_trg)
    assert bool(jnp.allclose(inter_outs[:, 0], rp_logits, rtol=5e-3, atol=5e-3))
    assert bool(jnp.allclose(inter_attns[:, 0], rp_attn, rtol=5e-3, atol=5e-3))
    assert bool(jnp.allclose(outs[:, 0], rg_logits, rtol=5e-3, atol=5e-3))
    assert bool(jnp.allclose(attns[:, 0], rg_attn, rtol=5e-3, atol=5e-3))

    print("KERNEL_OK")
</pallas_src>

<mosaic_0001>
module attributes {stable_mosaic.version = 11 : i64} {
  func.func @fused_enc_dec_kernel(%arg0: i32, %arg1: memref<8x8x32xf32, #tpu.memory_space<vmem>>, %arg2: memref<8x1xi32, #tpu.memory_space<vmem>>, %arg3: memref<32x32xf32, #tpu.memory_space<vmem>>, %arg4: memref<32x32xf32, #tpu.memory_space<vmem>>, %arg5: memref<1x32xf32, #tpu.memory_space<vmem>>, %arg6: memref<1x8x8x32xf32, #tpu.memory_space<vmem>>, %arg7: memref<1x32x32xf32, #tpu.memory_space<vmem>>, %arg8: memref<1x32x32xf32, #tpu.memory_space<vmem>>, %arg9: memref<1x1x32xf32, #tpu.memory_space<vmem>>, %arg10: memref<1x64x128xf32, #tpu.memory_space<vmem>>, %arg11: memref<1x1x128xf32, #tpu.memory_space<vmem>>, %arg12: memref<1x8x8x128xf32, #tpu.memory_space<vmem>>, %arg13: memref<1x8x8x8xf32, #tpu.memory_space<vmem>>) attributes {dimension_semantics = [#tpu.dimension_semantics<core_parallel>], iteration_bounds = array<i64: 2>, scalar_prefetch = 0 : i64, scratch_operands = 0 : i64, tpu.core_type = #tpu.core_type<tc>, window_params = [{pipeline_mode = #tpu.pipeline_mode<synchronous>, transform_indices = @transform_0, window_bounds = array<i64: 8, 8, 32>}, {pipeline_mode = #tpu.pipeline_mode<synchronous>, transform_indices = @transform_1, window_bounds = array<i64: 8, 1>}, {pipeline_mode = #tpu.pipeline_mode<synchronous>, transform_indices = @transform_2, window_bounds = array<i64: 32, 32>}, {pipeline_mode = #tpu.pipeline_mode<synchronous>, transform_indices = @transform_3, window_bounds = array<i64: 32, 32>}, {pipeline_mode = #tpu.pipeline_mode<synchronous>, transform_indices = @transform_4, window_bounds = array<i64: 1, 32>}, {transform_indices = @transform_5, window_bounds = array<i64: 1, 8, 8, 32>}, {transform_indices = @transform_6, window_bounds = array<i64: 1, 32, 32>}, {transform_indices = @transform_7, window_bounds = array<i64: 1, 32, 32>}, {transform_indices = @transform_8, window_bounds = array<i64: 1, 1, 32>}, {transform_indices = @transform_9, window_bounds = array<i64: 1, 64, 128>}, {transform_indices = @transform_10, window_bounds = array<i64: 1, 1, 128>}, {transform_indices = @transform_11, window_bounds = array<i64: 1, 8, 8, 128>}, {transform_indices = @transform_12, window_bounds = array<i64: 1, 8, 8, 8>}]} {
    %c0 = arith.constant 0 : index
    %c0_0 = arith.constant 0 : index
    %0 = vector.load %arg2[%c0, %c0_0] : memref<8x1xi32, #tpu.memory_space<vmem>>, vector<8x1xi32>
    %c0_1 = arith.constant 0 : index
    %c0_2 = arith.constant 0 : index
    %c0_3 = arith.constant 0 : index
    %1 = vector.load %arg1[%c0_1, %c0_2, %c0_3] : memref<8x8x32xf32, #tpu.memory_space<vmem>>, vector<8x8x32xf32>
    %2 = vector.shape_cast %1 : vector<8x8x32xf32> to vector<64x32xf32>
    %c0_4 = arith.constant 0 : index
    %c0_5 = arith.constant 0 : index
    %3 = vector.load %arg3[%c0_4, %c0_5] : memref<32x32xf32, #tpu.memory_space<vmem>>, vector<32x32xf32>
    %cst = arith.constant dense<0.000000e+00> : vector<64x32xf32>
    %4 = tpu.matmul %2, %3, %cst {dimension_numbers = #tpu.dot_dimension_numbers<[1], [0], [0], [1], [0, 0, 1, 1], [], []>, precision = #tpu.contract_precision<fp32>} : vector<64x32xf32>, vector<32x32xf32>, vector<64x32xf32> -> vector<64x32xf32>
    %c0_6 = arith.constant 0 : index
    %c0_7 = arith.constant 0 : index
    %5 = vector.load %arg5[%c0_6, %c0_7] : memref<1x32xf32, #tpu.memory_space<vmem>>, vector<1x32xf32>
    %6 = vector.broadcast %5 : vector<1x32xf32> to vector<64x32xf32>
    %7 = arith.addf %4, %6 : vector<64x32xf32>
    %8 = vector.shape_cast %7 : vector<64x32xf32> to vector<8x8x32xf32>
    %c0_8 = arith.constant 0 : index
    %c0_9 = arith.constant 0 : index
    %9 = vector.load %arg4[%c0_8, %c0_9] : memref<32x32xf32, #tpu.memory_space<vmem>>, vector<32x32xf32>
    %cst_10 = arith.constant 0.000000e+00 : f32
    %10 = vector.broadcast %cst_10 : f32 to vector<8x32xf32>
    %11 = vector.extract_strided_slice %8 {offsets = [0, 0, 0], sizes = [8, 1, 32], strides = [1, 1, 1]} : vector<8x8x32xf32> to vector<8x1x32xf32>
    %12 = vector.shape_cast %11 : vector<8x1x32xf32> to vector<8x32xf32>
    %cst_11 = arith.constant dense<0.000000e+00> : vector<8x32xf32>
    %13 = tpu.matmul %10, %9, %cst_11 {dimension_numbers = #tpu.dot_dimension_numbers<[1], [0], [0], [1], [0, 0, 1, 1], [], []>, precision = #tpu.contract_precision<fp32>} : vector<8x32xf32>, vector<32x32xf32>, vector<8x32xf32> -> vector<8x32xf32>
    %14 = arith.addf %12, %13 : vector<8x32xf32>
    %15 = math.tanh %14 : vector<8x32xf32>
    %c0_i32 = arith.constant 0 : i32
    %16 = vector.broadcast %c0_i32 : i32 to vector<8x1xi32>
    %17 = arith.cmpi sgt, %0, %16 : vector<8x1xi32>
    %18 = vector.shape_cast %17 : vector<8x1xi1> to vector<8x1xi1>
    %19 = vector.broadcast %18 : vector<8x1xi1> to vector<8x32xi1>
    %20 = arith.select %19, %15, %10 : vector<8x32xi1>, vector<8x32xf32>
    %21 = vector.extract_strided_slice %8 {offsets = [0, 1, 0], sizes = [8, 1, 32], strides = [1, 1, 1]} : vector<8x8x32xf32> to vector<8x1x32xf32>
    %22 = vector.shape_cast %21 : vector<8x1x32xf32> to vector<8x32xf32>
    %cst_12 = arith.constant dense<0.000000e+00> : vector<8x32xf32>
    %23 = tpu.matmul %20, %9, %cst_12 {dimension_numbers = #tpu.dot_dimension_numbers<[1], [0], [0], [1], [0, 0, 1, 1], [], []>, precision = #tpu.contract_precision<fp32>} : vector<8x32xf32>, vector<32x32xf32>, vector<8x32xf32> -> vector<8x32xf32>
    %24 = arith.addf %22, %23 : vector<8x32xf32>
    %25 = math.tanh %24 : vector<8x32xf32>
    %c1_i32 = arith.constant 1 : i32
    %26 = vector.broadcast %c1_i32 : i32 to vector<8x1xi32>
    %27 = arith.cmpi sgt, %0, %26 : vector<8x1xi32>
    %28 = vector.shape_cast %27 : vector<8x1xi1> to vector<8x1xi1>
    %29 = vector.broadcast %28 : vector<8x1xi1> to vector<8x32xi1>
    %30 = arith.select %29, %25, %20 : vector<8x32xi1>, vector<8x32xf32>
    %31 = vector.extract_strided_slice %8 {offsets = [0, 2, 0], sizes = [8, 1, 32], strides = [1, 1, 1]} : vector<8x8x32xf32> to vector<8x1x32xf32>
    %32 = vector.shape_cast %31 : vector<8x1x32xf32> to vector<8x32xf32>
    %cst_13 = arith.constant dense<0.000000e+00> : vector<8x32xf32>
    %33 = tpu.matmul %30, %9, %cst_13 {dimension_numbers = #tpu.dot_dimension_numbers<[1], [0], [0], [1], [0, 0, 1, 1], [], []>, precision = #tpu.contract_precision<fp32>} : vector<8x32xf32>, vector<32x32xf32>, vector<8x32xf32> -> vector<8x32xf32>
    %34 = arith.addf %32, %33 : vector<8x32xf32>
    %35 = math.tanh %34 : vector<8x32xf32>
    %c2_i32 = arith.constant 2 : i32
    %36 = vector.broadcast %c2_i32 : i32 to vector<8x1xi32>
    %37 = arith.cmpi sgt, %0, %36 : vector<8x1xi32>
    %38 = vector.shape_cast %37 : vector<8x1xi1> to vector<8x1xi1>
    %39 = vector.broadcast %38 : vector<8x1xi1> to vector<8x32xi1>
    %40 = arith.select %39, %35, %30 : vector<8x32xi1>, vector<8x32xf32>
    %41 = vector.extract_strided_slice %8 {offsets = [0, 3, 0], sizes = [8, 1, 32], strides = [1, 1, 1]} : vector<8x8x32xf32> to vector<8x1x32xf32>
    %42 = vector.shape_cast %41 : vector<8x1x32xf32> to vector<8x32xf32>
    %cst_14 = arith.constant dense<0.000000e+00> : vector<8x32xf32>
    %43 = tpu.matmul %40, %9, %cst_14 {dimension_numbers = #tpu.dot_dimension_numbers<[1], [0], [0], [1], [0, 0, 1, 1], [], []>, precision = #tpu.contract_precision<fp32>} : vector<8x32xf32>, vector<32x32xf32>, vector<8x32xf32> -> vector<8x32xf32>
    %44 = arith.addf %42, %43 : vector<8x32xf32>
    %45 = math.tanh %44 : vector<8x32xf32>
    %c3_i32 = arith.constant 3 : i32
    %46 = vector.broadcast %c3_i32 : i32 to vector<8x1xi32>
    %47 = arith.cmpi sgt, %0, %46 : vector<8x1xi32>
    %48 = vector.shape_cast %47 : vector<8x1xi1> to vector<8x1xi1>
    %49 = vector.broadcast %48 : vector<8x1xi1> to vector<8x32xi1>
    %50 = arith.select %49, %45, %40 : vector<8x32xi1>, vector<8x32xf32>
    %51 = vector.extract_strided_slice %8 {offsets = [0, 4, 0], sizes = [8, 1, 32], strides = [1, 1, 1]} : vector<8x8x32xf32> to vector<8x1x32xf32>
    %52 = vector.shape_cast %51 : vector<8x1x32xf32> to vector<8x32xf32>
    %cst_15 = arith.constant dense<0.000000e+00> : vector<8x32xf32>
    %53 = tpu.matmul %50, %9, %cst_15 {dimension_numbers = #tpu.dot_dimension_numbers<[1], [0], [0], [1], [0, 0, 1, 1], [], []>, precision = #tpu.contract_precision<fp32>} : vector<8x32xf32>, vector<32x32xf32>, vector<8x32xf32> -> vector<8x32xf32>
    %54 = arith.addf %52, %53 : vector<8x32xf32>
    %55 = math.tanh %54 : vector<8x32xf32>
    %c4_i32 = arith.constant 4 : i32
    %56 = vector.broadcast %c4_i32 : i32 to vector<8x1xi32>
    %57 = arith.cmpi sgt, %0, %56 : vector<8x1xi32>
    %58 = vector.shape_cast %57 : vector<8x1xi1> to vector<8x1xi1>
    %59 = vector.broadcast %58 : vector<8x1xi1> to vector<8x32xi1>
    %60 = arith.select %59, %55, %50 : vector<8x32xi1>, vector<8x32xf32>
    %61 = vector.extract_strided_slice %8 {offsets = [0, 5, 0], sizes = [8, 1, 32], strides = [1, 1, 1]} : vector<8x8x32xf32> to vector<8x1x32xf32>
    %62 = vector.shape_cast %61 : vector<8x1x32xf32> to vector<8x32xf32>
    %cst_16 = arith.constant dense<0.000000e+00> : vector<8x32xf32>
    %63 = tpu.matmul %60, %9, %cst_16 {dimension_numbers = #tpu.dot_dimension_numbers<[1], [0], [0], [1], [0, 0, 1, 1], [], []>, precision = #tpu.contract_precision<fp32>} : vector<8x32xf32>, vector<32x32xf32>, vector<8x32xf32> -> vector<8x32xf32>
    %64 = arith.addf %62, %63 : vector<8x32xf32>
    %65 = math.tanh %64 : vector<8x32xf32>
    %c5_i32 = arith.constant 5 : i32
    %66 = vector.broadcast %c5_i32 : i32 to vector<8x1xi32>
    %67 = arith.cmpi sgt, %0, %66 : vector<8x1xi32>
    %68 = vector.shape_cast %67 : vector<8x1xi1> to vector<8x1xi1>
    %69 = vector.broadcast %68 : vector<8x1xi1> to vector<8x32xi1>
    %70 = arith.select %69, %65, %60 : vector<8x32xi1>, vector<8x32xf32>
    %71 = vector.extract_strided_slice %8 {offsets = [0, 6, 0], sizes = [8, 1, 32], strides = [1, 1, 1]} : vector<8x8x32xf32> to vector<8x1x32xf32>
    %72 = vector.shape_cast %71 : vector<8x1x32xf32> to vector<8x32xf32>
    %cst_17 = arith.constant dense<0.000000e+00> : vector<8x32xf32>
    %73 = tpu.matmul %70, %9, %cst_17 {dimension_numbers = #tpu.dot_dimension_numbers<[1], [0], [0], [1], [0, 0, 1, 1], [], []>, precision = #tpu.contract_precision<fp32>} : vector<8x32xf32>, vector<32x32xf32>, vector<8x32xf32> -> vector<8x32xf32>
    %74 = arith.addf %72, %73 : vector<8x32xf32>
    %75 = math.tanh %74 : vector<8x32xf32>
    %c6_i32 = arith.constant 6 : i32
    %76 = vector.broadcast %c6_i32 : i32 to vector<8x1xi32>
    %77 = arith.cmpi sgt, %0, %76 : vector<8x1xi32>
    %78 = vector.shape_cast %77 : vector<8x1xi1> to vector<8x1xi1>
    %79 = vector.broadcast %78 : vector<8x1xi1> to vector<8x32xi1>
    %80 = arith.select %79, %75, %70 : vector<8x32xi1>, vector<8x32xf32>
    %81 = vector.extract_strided_slice %8 {offsets = [0, 7, 0], sizes = [8, 1, 32], strides = [1, 1, 1]} : vector<8x8x32xf32> to vector<8x1x32xf32>
    %82 = vector.shape_cast %81 : vector<8x1x32xf32> to vector<8x32xf32>
    %cst_18 = arith.constant dense<0.000000e+00> : vector<8x32xf32>
    %83 = tpu.matmul %80, %9, %cst_18 {dimension_numbers = #tpu.dot_dimension_numbers<[1], [0], [0], [1], [0, 0, 1, 1], [], []>, precision = #tpu.contract_precision<fp32>} : vector<8x32xf32>, vector<32x32xf32>, vector<8x32xf32> -> vector<8x32xf32>
    %84 = arith.addf %82, %83 : vector<8x32xf32>
    %85 = math.tanh %84 : vector<8x32xf32>
    %c7_i32 = arith.constant 7 : i32
    %86 = vector.broadcast %c7_i32 : i32 to vector<8x1xi32>
    %87 = arith.cmpi sgt, %0, %86 : vector<8x1xi32>
    %88 = vector.shape_cast %87 : vector<8x1xi1> to vector<8x1xi1>
    %89 = vector.broadcast %88 : vector<8x1xi1> to vector<8x32xi1>
    %90 = arith.select %89, %85, %80 : vector<8x32xi1>, vector<8x32xf32>
    %91 = vector.shape_cast %20 : vector<8x32xf32> to vector<8x1x32xf32>
    %92 = vector.shape_cast %30 : vector<8x32xf32> to vector<8x1x32xf32>
    %93 = vector.shape_cast %40 : vector<8x32xf32> to vector<8x1x32xf32>
    %94 = vector.shape_cast %50 : vector<8x32xf32> to vector<8x1x32xf32>
    %95 = vector.shape_cast %60 : vector<8x32xf32> to vector<8x1x32xf32>
    %96 = vector.shape_cast %70 : vector<8x32xf32> to vector<8x1x32xf32>
    %97 = vector.shape_cast %80 : vector<8x32xf32> to vector<8x1x32xf32>
    %98 = vector.shape_cast %90 : vector<8x32xf32> to vector<8x1x32xf32>
    %99 = tpu.concatenate %91, %92, %93, %94, %95, %96, %97, %98 in 1 : vector<8x1x32xf32>, vector<8x1x32xf32>, vector<8x1x32xf32>, vector<8x1x32xf32>, vector<8x1x32xf32>, vector<8x1x32xf32>, vector<8x1x32xf32>, vector<8x1x32xf32> -> vector<8x8x32xf32>
    %100 = tpu.iota {dimensions = array<i32: 1>} : vector<8x8xi32>
    %101 = vector.broadcast %0 : vector<8x1xi32> to vector<8x8xi32>
    %102 = arith.cmpi slt, %100, %101 : vector<8x8xi32>
    %cst_19 = arith.constant 0.000000e+00 : f32
    %cst_20 = arith.constant -1.000000e+09 : f32
    %103 = vector.broadcast %cst_19 : f32 to vector<8x8xf32>
    %104 = vector.broadcast %cst_20 : f32 to vector<8x8xf32>
    %105 = arith.select %102, %103, %104 : vector<8x8xi1>, vector<8x8xf32>
    %c0_21 = arith.constant 0 : index
    %c0_22 = arith.constant 0 : index
    %c0_23 = arith.constant 0 : index
    %c0_24 = arith.constant 0 : index
    %106 = vector.load %arg6[%c0_21, %c0_22, %c0_23, %c0_24] : memref<1x8x8x32xf32, #tpu.memory_space<vmem>>, vector<1x8x8x32xf32>
    %107 = vector.shape_cast %106 : vector<1x8x8x32xf32> to vector<8x8x32xf32>
    %108 = vector.shape_cast %107 : vector<8x8x32xf32> to vector<64x32xf32>
    %c0_25 = arith.constant 0 : index
    %c0_26 = arith.constant 0 : index
    %c0_27 = arith.constant 0 : index
    %109 = vector.load %arg7[%c0_25, %c0_26, %c0_27] : memref<1x32x32xf32, #tpu.memory_space<vmem>>, vector<1x32x32xf32>
    %110 = vector.shape_cast %109 : vector<1x32x32xf32> to vector<32x32xf32>
    %cst_28 = arith.constant dense<0.000000e+00> : vector<64x32xf32>
    %111 = tpu.matmul %108, %110, %cst_28 {dimension_numbers = #tpu.dot_dimension_numbers<[1], [0], [0], [1], [0, 0, 1, 1], [], []>, precision = #tpu.contract_precision<fp32>} : vector<64x32xf32>, vector<32x32xf32>, vector<64x32xf32> -> vector<64x32xf32>
    %c0_29 = arith.constant 0 : index
    %c0_30 = arith.constant 0 : index
    %c0_31 = arith.constant 0 : index
    %112 = vector.load %arg9[%c0_29, %c0_30, %c0_31] : memref<1x1x32xf32, #tpu.memory_space<vmem>>, vector<1x1x32xf32>
    %113 = vector.shape_cast %112 : vector<1x1x32xf32> to vector<1x32xf32>
    %114 = vector.broadcast %113 : vector<1x32xf32> to vector<64x32xf32>
    %115 = arith.addf %111, %114 : vector<64x32xf32>
    %116 = vector.shape_cast %115 : vector<64x32xf32> to vector<8x8x32xf32>
    %c0_32 = arith.constant 0 : index
    %c0_33 = arith.constant 0 : index
    %c0_34 = arith.constant 0 : index
    %117 = vector.load %arg8[%c0_32, %c0_33, %c0_34] : memref<1x32x32xf32, #tpu.memory_space<vmem>>, vector<1x32x32xf32>
    %118 = vector.shape_cast %117 : vector<1x32x32xf32> to vector<32x32xf32>
    %119 = vector.extract_strided_slice %116 {offsets = [0, 0, 0], sizes = [8, 1, 32], strides = [1, 1, 1]} : vector<8x8x32xf32> to vector<8x1x32xf32>
    %120 = vector.shape_cast %119 : vector<8x1x32xf32> to vector<8x32xf32>
    %cst_35 = arith.constant dense<0.000000e+00> : vector<8x32xf32>
    %121 = tpu.matmul %90, %118, %cst_35 {dimension_numbers = #tpu.dot_dimension_numbers<[1], [0], [0], [1], [0, 0, 1, 1], [], []>, precision = #tpu.contract_precision<fp32>} : vector<8x32xf32>, vector<32x32xf32>, vector<8x32xf32> -> vector<8x32xf32>
    %122 = arith.addf %120, %121 : vector<8x32xf32>
    %123 = math.tanh %122 : vector<8x32xf32>
    %124 = vector.extract_strided_slice %116 {offsets = [0, 1, 0], sizes = [8, 1, 32], strides = [1, 1, 1]} : vector<8x8x32xf32> to vector<8x1x32xf32>
    %125 = vector.shape_cast %124 : vector<8x1x32xf32> to vector<8x32xf32>
    %cst_36 = arith.constant dense<0.000000e+00> : vector<8x32xf32>
    %126 = tpu.matmul %123, %118, %cst_36 {dimension_numbers = #tpu.dot_dimension_numbers<[1], [0], [0], [1], [0, 0, 1, 1], [], []>, precision = #tpu.contract_precision<fp32>} : vector<8x32xf32>, vector<32x32xf32>, vector<8x32xf32> -> vector<8x32xf32>
    %127 = arith.addf %125, %126 : vector<8x32xf32>
    %128 = math.tanh %127 : vector<8x32xf32>
    %129 = vector.extract_strided_slice %116 {offsets = [0, 2, 0], sizes = [8, 1, 32], strides = [1, 1, 1]} : vector<8x8x32xf32> to vector<8x1x32xf32>
    %130 = vector.shape_cast %129 : vector<8x1x32xf32> to vector<8x32xf32>
    %cst_37 = arith.constant dense<0.000000e+00> : vector<8x32xf32>
    %131 = tpu.matmul %128, %118, %cst_37 {dimension_numbers = #tpu.dot_dimension_numbers<[1], [0], [0], [1], [0, 0, 1, 1], [], []>, precision = #tpu.contract_precision<fp32>} : vector<8x32xf32>, vector<32x32xf32>, vector<8x32xf32> -> vector<8x32xf32>
    %132 = arith.addf %130, %131 : vector<8x32xf32>
    %133 = math.tanh %132 : vector<8x32xf32>
    %134 = vector.extract_strided_slice %116 {offsets = [0, 3, 0], sizes = [8, 1, 32], strides = [1, 1, 1]} : vector<8x8x32xf32> to vector<8x1x32xf32>
    %135 = vector.shape_cast %134 : vector<8x1x32xf32> to vector<8x32xf32>
    %cst_38 = arith.constant dense<0.000000e+00> : vector<8x32xf32>
    %136 = tpu.matmul %133, %118, %cst_38 {dimension_numbers = #tpu.dot_dimension_numbers<[1], [0], [0], [1], [0, 0, 1, 1], [], []>, precision = #tpu.contract_precision<fp32>} : vector<8x32xf32>, vector<32x32xf32>, vector<8x32xf32> -> vector<8x32xf32>
    %137 = arith.addf %135, %136 : vector<8x32xf32>
    %138 = math.tanh %137 : vector<8x32xf32>
    %139 = vector.extract_strided_slice %116 {offsets = [0, 4, 0], sizes = [8, 1, 32], strides = [1, 1, 1]} : vector<8x8x32xf32> to vector<8x1x32xf32>
    %140 = vector.shape_cast %139 : vector<8x1x32xf32> to vector<8x32xf32>
    %cst_39 = arith.constant dense<0.000000e+00> : vector<8x32xf32>
    %141 = tpu.matmul %138, %118, %cst_39 {dimension_numbers = #tpu.dot_dimension_numbers<[1], [0], [0], [1], [0, 0, 1, 1], [], []>, precision = #tpu.contract_precision<fp32>} : vector<8x32xf32>, vector<32x32xf32>, vector<8x32xf32> -> vector<8x32xf32>
    %142 = arith.addf %140, %141 : vector<8x32xf32>
    %143 = math.tanh %142 : vector<8x32xf32>
    %144 = vector.extract_strided_slice %116 {offsets = [0, 5, 0], sizes = [8, 1, 32], strides = [1, 1, 1]} : vector<8x8x32xf32> to vector<8x1x32xf32>
    %145 = vector.shape_cast %144 : vector<8x1x32xf32> to vector<8x32xf32>
    %cst_40 = arith.constant dense<0.000000e+00> : vector<8x32xf32>
    %146 = tpu.matmul %143, %118, %cst_40 {dimension_numbers = #tpu.dot_dimension_numbers<[1], [0], [0], [1], [0, 0, 1, 1], [], []>, precision = #tpu.contract_precision<fp32>} : vector<8x32xf32>, vector<32x32xf32>, vector<8x32xf32> -> vector<8x32xf32>
    %147 = arith.addf %145, %146 : vector<8x32xf32>
    %148 = math.tanh %147 : vector<8x32xf32>
    %149 = vector.extract_strided_slice %116 {offsets = [0, 6, 0], sizes = [8, 1, 32], strides = [1, 1, 1]} : vector<8x8x32xf32> to vector<8x1x32xf32>
    %150 = vector.shape_cast %149 : vector<8x1x32xf32> to vector<8x32xf32>
    %cst_41 = arith.constant dense<0.000000e+00> : vector<8x32xf32>
    %151 = tpu.matmul %148, %118, %cst_41 {dimension_numbers = #tpu.dot_dimension_numbers<[1], [0], [0], [1], [0, 0, 1, 1], [], []>, precision = #tpu.contract_precision<fp32>} : vector<8x32xf32>, vector<32x32xf32>, vector<8x32xf32> -> vector<8x32xf32>
    %152 = arith.addf %150, %151 : vector<8x32xf32>
    %153 = math.tanh %152 : vector<8x32xf32>
    %154 = vector.extract_strided_slice %116 {offsets = [0, 7, 0], sizes = [8, 1, 32], strides = [1, 1, 1]} : vector<8x8x32xf32> to vector<8x1x32xf32>
    %155 = vector.shape_cast %154 : vector<8x1x32xf32> to vector<8x32xf32>
    %cst_42 = arith.constant dense<0.000000e+00> : vector<8x32xf32>
    %156 = tpu.matmul %153, %118, %cst_42 {dimension_numbers = #tpu.dot_dimension_numbers<[1], [0], [0], [1], [0, 0, 1, 1], [], []>, precision = #tpu.contract_precision<fp32>} : vector<8x32xf32>, vector<32x32xf32>, vector<8x32xf32> -> vector<8x32xf32>
    %157 = arith.addf %155, %156 : vector<8x32xf32>
    %158 = math.tanh %157 : vector<8x32xf32>
    %159 = vector.shape_cast %123 : vector<8x32xf32> to vector<8x1x32xf32>
    %160 = vector.shape_cast %128 : vector<8x32xf32> to vector<8x1x32xf32>
    %161 = vector.shape_cast %133 : vector<8x32xf32> to vector<8x1x32xf32>
    %162 = vector.shape_cast %138 : vector<8x32xf32> to vector<8x1x32xf32>
    %163 = vector.shape_cast %143 : vector<8x32xf32> to vector<8x1x32xf32>
    %164 = vector.shape_cast %148 : vector<8x32xf32> to vector<8x1x32xf32>
    %165 = vector.shape_cast %153 : vector<8x32xf32> to vector<8x1x32xf32>
    %166 = vector.shape_cast %158 : vector<8x32xf32> to vector<8x1x32xf32>
    %167 = tpu.concatenate %159, %160, %161, %162, %163, %164, %165, %166 in 1 : vector<8x1x32xf32>, vector<8x1x32xf32>, vector<8x1x32xf32>, vector<8x1x32xf32>, vector<8x1x32xf32>, vector<8x1x32xf32>, vector<8x1x32xf32>, vector<8x1x32xf32> -> vector<8x8x32xf32>
    "tpu.trace_start"() <{level = 10 : i32, message = "bth,bsh->bts"}> : () -> ()
    %cst_43 = arith.constant dense<0.000000e+00> : vector<8x8x8xf32>
    %168 = tpu.matmul %167, %99, %cst_43 {dimension_numbers = #tpu.dot_dimension_numbers<[2], [2], [1], [1], [0, 0, 0, 1, 1, 1], [0], [0]>, precision = #tpu.contract_precision<fp32>} : vector<8x8x32xf32>, vector<8x8x32xf32>, vector<8x8x8xf32> -> vector<8x8x8xf32>
    "tpu.trace_stop"() : () -> ()
    %169 = vector.shape_cast %105 : vector<8x8xf32> to vector<8x1x8xf32>
    %170 = vector.broadcast %169 : vector<8x1x8xf32> to vector<8x8x8xf32>
    %171 = arith.addf %168, %170 : vector<8x8x8xf32>
    %cst_44 = arith.constant dense<0xFF800000> : vector<8x8xf32>
    %172 = vector.multi_reduction <maximumf>, %171, %cst_44 [2] : vector<8x8x8xf32> to vector<8x8xf32>
    %173 = vector.shape_cast %172 : vector<8x8xf32> to vector<8x8x1xf32>
    %174 = vector.broadcast %173 : vector<8x8x1xf32> to vector<8x8x8xf32>
    %175 = arith.subf %171, %174 : vector<8x8x8xf32>
    %176 = math.exp %175 : vector<8x8x8xf32>
    %cst_45 = arith.constant dense<0.000000e+00> : vector<8x8xf32>
    %177 = vector.multi_reduction <add>, %176, %cst_45 [2] : vector<8x8x8xf32> to vector<8x8xf32>
    %178 = vector.shape_cast %177 : vector<8x8xf32> to vector<8x8x1xf32>
    %179 = tpu.reciprocal %178 {approx = true} : vector<8x8x1xf32> -> vector<8x8x1xf32>
    %180 = vector.broadcast %179 : vector<8x8x1xf32> to vector<8x8x8xf32>
    %181 = arith.mulf %176, %180 : vector<8x8x8xf32>
    "tpu.trace_start"() <{level = 10 : i32, message = "bts,bsh->bth"}> : () -> ()
    %cst_46 = arith.constant dense<0.000000e+00> : vector<8x8x32xf32>
    %182 = tpu.matmul %181, %99, %cst_46 {dimension_numbers = #tpu.dot_dimension_numbers<[2], [1], [1], [2], [0, 0, 0, 1, 1, 2], [0], [0]>, precision = #tpu.contract_precision<fp32>} : vector<8x8x8xf32>, vector<8x8x32xf32>, vector<8x8x32xf32> -> vector<8x8x32xf32>
    "tpu.trace_stop"() : () -> ()
    %183 = tpu.concatenate %167, %182 in 2 : vector<8x8x32xf32>, vector<8x8x32xf32> -> vector<8x8x64xf32>
    %184 = vector.shape_cast %183 : vector<8x8x64xf32> to vector<64x64xf32>
    %c0_47 = arith.constant 0 : index
    %c0_48 = arith.constant 0 : index
    %c0_49 = arith.constant 0 : index
    %185 = vector.load %arg10[%c0_47, %c0_48, %c0_49] : memref<1x64x128xf32, #tpu.memory_space<vmem>>, vector<1x64x128xf32>
    %186 = vector.shape_cast %185 : vector<1x64x128xf32> to vector<64x128xf32>
    %cst_50 = arith.constant dense<0.000000e+00> : vector<64x128xf32>
    %187 = tpu.matmul %184, %186, %cst_50 {dimension_numbers = #tpu.dot_dimension_numbers<[1], [0], [0], [1], [0, 0, 1, 1], [], []>, precision = #tpu.contract_precision<fp32>} : vector<64x64xf32>, vector<64x128xf32>, vector<64x128xf32> -> vector<64x128xf32>
    %c0_51 = arith.constant 0 : index
    %c0_52 = arith.constant 0 : index
    %c0_53 = arith.constant 0 : index
    %188 = vector.load %arg11[%c0_51, %c0_52, %c0_53] : memref<1x1x128xf32, #tpu.memory_space<vmem>>, vector<1x1x128xf32>
    %189 = vector.shape_cast %188 : vector<1x1x128xf32> to vector<1x128xf32>
    %190 = vector.broadcast %189 : vector<1x128xf32> to vector<64x128xf32>
    %191 = arith.addf %187, %190 : vector<64x128xf32>
    %192 = vector.shape_cast %191 : vector<64x128xf32> to vector<8x8x128xf32>
    %c0_54 = arith.constant 0 : index
    %c0_55 = arith.constant 0 : index
    %c0_56 = arith.constant 0 : index
    %c0_57 = arith.constant 0 : index
    %193 = vector.load %arg12[%c0_54, %c0_55, %c0_56, %c0_57] : memref<1x8x8x128xf32, #tpu.memory_space<vmem>>, vector<1x8x8x128xf32>
    %194 = vector.shape_cast %193 : vector<1x8x8x128xf32> to vector<8x8x128xf32>
    %195 = vector.shape_cast %192 : vector<8x8x128xf32> to vector<1x8x8x128xf32>
    tpu.vector_store %arg12[%c0_54, %c0_55, %c0_56, %c0_57], %195 {strides = array<i32>} : memref<1x8x8x128xf32, #tpu.memory_space<vmem>>, vector<1x8x8x128xf32>,
    %c0_58 = arith.constant 0 : index
    %c0_59 = arith.constant 0 : index
    %c0_60 = arith.constant 0 : index
    %c0_61 = arith.constant 0 : index
    %196 = vector.load %arg13[%c0_58, %c0_59, %c0_60, %c0_61] : memref<1x8x8x8xf32, #tpu.memory_space<vmem>>, vector<1x8x8x8xf32>
    %197 = vector.shape_cast %196 : vector<1x8x8x8xf32> to vector<8x8x8xf32>
    %198 = vector.shape_cast %181 : vector<8x8x8xf32> to vector<1x8x8x8xf32>
    tpu.vector_store %arg13[%c0_58, %c0_59, %c0_60, %c0_61], %198 {strides = array<i32>} : memref<1x8x8x8xf32, #tpu.memory_space<vmem>>, vector<1x8x8x8xf32>,
    return
  }
  func.func @transform_0(%arg0: i32) -> (i32, i32, i32) {
    %c0_i32 = arith.constant 0 : i32
    %c0_i32_0 = arith.constant 0 : i32
    %c0_i32_1 = arith.constant 0 : i32
    %c0_i32_2 = arith.constant 0 : i32
    return %c0_i32, %c0_i32_0, %c0_i32_1 : i32, i32, i32
  }
  func.func @transform_1(%arg0: i32) -> (i32, i32) {
    %c0_i32 = arith.constant 0 : i32
    %c0_i32_0 = arith.constant 0 : i32
    %c0_i32_1 = arith.constant 0 : i32
    return %c0_i32, %c0_i32_0 : i32, i32
  }
  func.func @transform_2(%arg0: i32) -> (i32, i32) {
    %c0_i32 = arith.constant 0 : i32
    %c0_i32_0 = arith.constant 0 : i32
    %c0_i32_1 = arith.constant 0 : i32
    return %c0_i32, %c0_i32_0 : i32, i32
  }
  func.func @transform_3(%arg0: i32) -> (i32, i32) {
    %c0_i32 = arith.constant 0 : i32
    %c0_i32_0 = arith.constant 0 : i32
    %c0_i32_1 = arith.constant 0 : i32
    return %c0_i32, %c0_i32_0 : i32, i32
  }
  func.func @transform_4(%arg0: i32) -> (i32, i32) {
    %c0_i32 = arith.constant 0 : i32
    %c0_i32_0 = arith.constant 0 : i32
    %c0_i32_1 = arith.constant 0 : i32
    return %c0_i32, %c0_i32_0 : i32, i32
  }
  func.func @transform_5(%arg0: i32) -> (i32, i32, i32, i32) {
    %c0_i32 = arith.constant 0 : i32
    %c0_i32_0 = arith.constant 0 : i32
    %c0_i32_1 = arith.constant 0 : i32
    %c0_i32_2 = arith.constant 0 : i32
    return %arg0, %c0_i32, %c0_i32_0, %c0_i32_1 : i32, i32, i32, i32
  }
  func.func @transform_6(%arg0: i32) -> (i32, i32, i32) {
    %c0_i32 = arith.constant 0 : i32
    %c0_i32_0 = arith.constant 0 : i32
    %c0_i32_1 = arith.constant 0 : i32
    return %arg0, %c0_i32, %c0_i32_0 : i32, i32, i32
  }
  func.func @transform_7(%arg0: i32) -> (i32, i32, i32) {
    %c0_i32 = arith.constant 0 : i32
    %c0_i32_0 = arith.constant 0 : i32
    %c0_i32_1 = arith.constant 0 : i32
    return %arg0, %c0_i32, %c0_i32_0 : i32, i32, i32
  }
  func.func @transform_8(%arg0: i32) -> (i32, i32, i32) {
    %c0_i32 = arith.constant 0 : i32
    %c0_i32_0 = arith.constant 0 : i32
    %c0_i32_1 = arith.constant 0 : i32
    return %arg0, %c0_i32, %c0_i32_0 : i32, i32, i32
  }
  func.func @transform_9(%arg0: i32) -> (i32, i32, i32) {
    %c0_i32 = arith.constant 0 : i32
    %c0_i32_0 = arith.constant 0 : i32
    %c0_i32_1 = arith.constant 0 : i32
    return %arg0, %c0_i32, %c0_i32_0 : i32, i32, i32
  }
  func.func @transform_10(%arg0: i32) -> (i32, i32, i32) {
    %c0_i32 = arith.constant 0 : i32
    %c0_i32_0 = arith.constant 0 : i32
    %c0_i32_1 = arith.constant 0 : i32
    return %arg0, %c0_i32, %c0_i32_0 : i32, i32, i32
  }
  func.func @transform_11(%arg0: i32) -> (i32, i32, i32, i32) {
    %c0_i32 = arith.constant 0 : i32
    %c0_i32_0 = arith.constant 0 : i32
    %c0_i32_1 = arith.constant 0 : i32
    %c0_i32_2 = arith.constant 0 : i32
    return %arg0, %c0_i32, %c0_i32_0, %c0_i32_1 : i32, i32, i32, i32
  }
  func.func @transform_12(%arg0: i32) -> (i32, i32, i32, i32) {
    %c0_i32 = arith.constant 0 : i32
    %c0_i32_0 = arith.constant 0 : i32
    %c0_i32_1 = arith.constant 0 : i32
    %c0_i32_2 = arith.constant 0 : i32
    return %arg0, %c0_i32, %c0_i32_0, %c0_i32_1 : i32, i32, i32, i32
  }
}

module attributes {stable_mosaic.version = 11 : i64} {
  func.func @fused_enc_dec_kernel(%arg0: i32, %arg1: memref<8x8x32xf32, #tpu.memory_space<vmem>>, %arg2: memref<8x1xi32, #tpu.memory_space<vmem>>, %arg3: memref<32x32xf32, #tpu.memory_space<vmem>>, %arg4: memref<32x32xf32, #tpu.memory_space<vmem>>, %arg5: memref<1x32xf32, #tpu.memory_space<vmem>>, %arg6: memref<1x8x8x32xf32, #tpu.memory_space<vmem>>, %arg7: memref<1x32x32xf32, #tpu.memory_space<vmem>>, %arg8: memref<1x32x32xf32, #tpu.memory_space<vmem>>, %arg9: memref<1x1x32xf32, #tpu.memory_space<vmem>>, %arg10: memref<1x64x128xf32, #tpu.memory_space<vmem>>, %arg11: memref<1x1x128xf32, #tpu.memory_space<vmem>>, %arg12: memref<1x8x8x128xf32, #tpu.memory_space<vmem>>, %arg13: memref<1x8x8x8xf32, #tpu.memory_space<vmem>>) attributes {dimension_semantics = [#tpu.dimension_semantics<parallel>], iteration_bounds = array<i64: 2>, scalar_prefetch = 0 : i64, scratch_operands = 0 : i64, tpu.core_type = #tpu.core_type<tc>, window_params = [{pipeline_mode = #tpu.pipeline_mode<synchronous>, transform_indices = @transform_0, window_bounds = array<i64: 8, 8, 32>}, {pipeline_mode = #tpu.pipeline_mode<synchronous>, transform_indices = @transform_1, window_bounds = array<i64: 8, 1>}, {pipeline_mode = #tpu.pipeline_mode<synchronous>, transform_indices = @transform_2, window_bounds = array<i64: 32, 32>}, {pipeline_mode = #tpu.pipeline_mode<synchronous>, transform_indices = @transform_3, window_bounds = array<i64: 32, 32>}, {pipeline_mode = #tpu.pipeline_mode<synchronous>, transform_indices = @transform_4, window_bounds = array<i64: 1, 32>}, {transform_indices = @transform_5, window_bounds = array<i64: 1, 8, 8, 32>}, {transform_indices = @transform_6, window_bounds = array<i64: 1, 32, 32>}, {transform_indices = @transform_7, window_bounds = array<i64: 1, 32, 32>}, {transform_indices = @transform_8, window_bounds = array<i64: 1, 1, 32>}, {transform_indices = @transform_9, window_bounds = array<i64: 1, 64, 128>}, {transform_indices = @transform_10, window_bounds = array<i64: 1, 1, 128>}, {transform_indices = @transform_11, window_bounds = array<i64: 1, 8, 8, 128>}, {transform_indices = @transform_12, window_bounds = array<i64: 1, 8, 8, 8>}]} {
    %c0 = arith.constant 0 : index
    %c0_0 = arith.constant 0 : index
    %0 = vector.load %arg2[%c0, %c0_0] : memref<8x1xi32, #tpu.memory_space<vmem>>, vector<8x1xi32>
    %c0_1 = arith.constant 0 : index
    %c0_2 = arith.constant 0 : index
    %c0_3 = arith.constant 0 : index
    %1 = vector.load %arg1[%c0_1, %c0_2, %c0_3] : memref<8x8x32xf32, #tpu.memory_space<vmem>>, vector<8x8x32xf32>
    %2 = vector.shape_cast %1 : vector<8x8x32xf32> to vector<64x32xf32>
    %c0_4 = arith.constant 0 : index
    %c0_5 = arith.constant 0 : index
    %3 = vector.load %arg3[%c0_4, %c0_5] : memref<32x32xf32, #tpu.memory_space<vmem>>, vector<32x32xf32>
    %cst = arith.constant dense<0.000000e+00> : vector<64x32xf32>
    %4 = tpu.matmul %2, %3, %cst {dimension_numbers = #tpu.dot_dimension_numbers<[1], [0], [0], [1], [0, 0, 1, 1], [], []>, precision = #tpu.contract_precision<fp32>} : vector<64x32xf32>, vector<32x32xf32>, vector<64x32xf32> -> vector<64x32xf32>
    %c0_6 = arith.constant 0 : index
    %c0_7 = arith.constant 0 : index
    %5 = vector.load %arg5[%c0_6, %c0_7] : memref<1x32xf32, #tpu.memory_space<vmem>>, vector<1x32xf32>
    %6 = vector.broadcast %5 : vector<1x32xf32> to vector<64x32xf32>
    %7 = arith.addf %4, %6 : vector<64x32xf32>
    %8 = vector.shape_cast %7 : vector<64x32xf32> to vector<8x8x32xf32>
    %c0_8 = arith.constant 0 : index
    %c0_9 = arith.constant 0 : index
    %9 = vector.load %arg4[%c0_8, %c0_9] : memref<32x32xf32, #tpu.memory_space<vmem>>, vector<32x32xf32>
    %cst_10 = arith.constant 0.000000e+00 : f32
    %10 = vector.broadcast %cst_10 : f32 to vector<8x32xf32>
    %11 = vector.extract_strided_slice %8 {offsets = [0, 0, 0], sizes = [8, 1, 32], strides = [1, 1, 1]} : vector<8x8x32xf32> to vector<8x1x32xf32>
    %12 = vector.shape_cast %11 : vector<8x1x32xf32> to vector<8x32xf32>
    %cst_11 = arith.constant dense<0.000000e+00> : vector<8x32xf32>
    %13 = tpu.matmul %10, %9, %cst_11 {dimension_numbers = #tpu.dot_dimension_numbers<[1], [0], [0], [1], [0, 0, 1, 1], [], []>, precision = #tpu.contract_precision<fp32>} : vector<8x32xf32>, vector<32x32xf32>, vector<8x32xf32> -> vector<8x32xf32>
    %14 = arith.addf %12, %13 : vector<8x32xf32>
    %15 = math.tanh %14 : vector<8x32xf32>
    %c0_i32 = arith.constant 0 : i32
    %16 = vector.broadcast %c0_i32 : i32 to vector<8x1xi32>
    %17 = arith.cmpi sgt, %0, %16 : vector<8x1xi32>
    %18 = vector.shape_cast %17 : vector<8x1xi1> to vector<8x1xi1>
    %19 = vector.broadcast %18 : vector<8x1xi1> to vector<8x32xi1>
    %20 = arith.select %19, %15, %10 : vector<8x32xi1>, vector<8x32xf32>
    %21 = vector.extract_strided_slice %8 {offsets = [0, 1, 0], sizes = [8, 1, 32], strides = [1, 1, 1]} : vector<8x8x32xf32> to vector<8x1x32xf32>
    %22 = vector.shape_cast %21 : vector<8x1x32xf32> to vector<8x32xf32>
    %cst_12 = arith.constant dense<0.000000e+00> : vector<8x32xf32>
    %23 = tpu.matmul %20, %9, %cst_12 {dimension_numbers = #tpu.dot_dimension_numbers<[1], [0], [0], [1], [0, 0, 1, 1], [], []>, precision = #tpu.contract_precision<fp32>} : vector<8x32xf32>, vector<32x32xf32>, vector<8x32xf32> -> vector<8x32xf32>
    %24 = arith.addf %22, %23 : vector<8x32xf32>
    %25 = math.tanh %24 : vector<8x32xf32>
    %c1_i32 = arith.constant 1 : i32
    %26 = vector.broadcast %c1_i32 : i32 to vector<8x1xi32>
    %27 = arith.cmpi sgt, %0, %26 : vector<8x1xi32>
    %28 = vector.shape_cast %27 : vector<8x1xi1> to vector<8x1xi1>
    %29 = vector.broadcast %28 : vector<8x1xi1> to vector<8x32xi1>
    %30 = arith.select %29, %25, %20 : vector<8x32xi1>, vector<8x32xf32>
    %31 = vector.extract_strided_slice %8 {offsets = [0, 2, 0], sizes = [8, 1, 32], strides = [1, 1, 1]} : vector<8x8x32xf32> to vector<8x1x32xf32>
    %32 = vector.shape_cast %31 : vector<8x1x32xf32> to vector<8x32xf32>
    %cst_13 = arith.constant dense<0.000000e+00> : vector<8x32xf32>
    %33 = tpu.matmul %30, %9, %cst_13 {dimension_numbers = #tpu.dot_dimension_numbers<[1], [0], [0], [1], [0, 0, 1, 1], [], []>, precision = #tpu.contract_precision<fp32>} : vector<8x32xf32>, vector<32x32xf32>, vector<8x32xf32> -> vector<8x32xf32>
    %34 = arith.addf %32, %33 : vector<8x32xf32>
    %35 = math.tanh %34 : vector<8x32xf32>
    %c2_i32 = arith.constant 2 : i32
    %36 = vector.broadcast %c2_i32 : i32 to vector<8x1xi32>
    %37 = arith.cmpi sgt, %0, %36 : vector<8x1xi32>
    %38 = vector.shape_cast %37 : vector<8x1xi1> to vector<8x1xi1>
    %39 = vector.broadcast %38 : vector<8x1xi1> to vector<8x32xi1>
    %40 = arith.select %39, %35, %30 : vector<8x32xi1>, vector<8x32xf32>
    %41 = vector.extract_strided_slice %8 {offsets = [0, 3, 0], sizes = [8, 1, 32], strides = [1, 1, 1]} : vector<8x8x32xf32> to vector<8x1x32xf32>
    %42 = vector.shape_cast %41 : vector<8x1x32xf32> to vector<8x32xf32>
    %cst_14 = arith.constant dense<0.000000e+00> : vector<8x32xf32>
    %43 = tpu.matmul %40, %9, %cst_14 {dimension_numbers = #tpu.dot_dimension_numbers<[1], [0], [0], [1], [0, 0, 1, 1], [], []>, precision = #tpu.contract_precision<fp32>} : vector<8x32xf32>, vector<32x32xf32>, vector<8x32xf32> -> vector<8x32xf32>
    %44 = arith.addf %42, %43 : vector<8x32xf32>
    %45 = math.tanh %44 : vector<8x32xf32>
    %c3_i32 = arith.constant 3 : i32
    %46 = vector.broadcast %c3_i32 : i32 to vector<8x1xi32>
    %47 = arith.cmpi sgt, %0, %46 : vector<8x1xi32>
    %48 = vector.shape_cast %47 : vector<8x1xi1> to vector<8x1xi1>
    %49 = vector.broadcast %48 : vector<8x1xi1> to vector<8x32xi1>
    %50 = arith.select %49, %45, %40 : vector<8x32xi1>, vector<8x32xf32>
    %51 = vector.extract_strided_slice %8 {offsets = [0, 4, 0], sizes = [8, 1, 32], strides = [1, 1, 1]} : vector<8x8x32xf32> to vector<8x1x32xf32>
    %52 = vector.shape_cast %51 : vector<8x1x32xf32> to vector<8x32xf32>
    %cst_15 = arith.constant dense<0.000000e+00> : vector<8x32xf32>
    %53 = tpu.matmul %50, %9, %cst_15 {dimension_numbers = #tpu.dot_dimension_numbers<[1], [0], [0], [1], [0, 0, 1, 1], [], []>, precision = #tpu.contract_precision<fp32>} : vector<8x32xf32>, vector<32x32xf32>, vector<8x32xf32> -> vector<8x32xf32>
    %54 = arith.addf %52, %53 : vector<8x32xf32>
    %55 = math.tanh %54 : vector<8x32xf32>
    %c4_i32 = arith.constant 4 : i32
    %56 = vector.broadcast %c4_i32 : i32 to vector<8x1xi32>
    %57 = arith.cmpi sgt, %0, %56 : vector<8x1xi32>
    %58 = vector.shape_cast %57 : vector<8x1xi1> to vector<8x1xi1>
    %59 = vector.broadcast %58 : vector<8x1xi1> to vector<8x32xi1>
    %60 = arith.select %59, %55, %50 : vector<8x32xi1>, vector<8x32xf32>
    %61 = vector.extract_strided_slice %8 {offsets = [0, 5, 0], sizes = [8, 1, 32], strides = [1, 1, 1]} : vector<8x8x32xf32> to vector<8x1x32xf32>
    %62 = vector.shape_cast %61 : vector<8x1x32xf32> to vector<8x32xf32>
    %cst_16 = arith.constant dense<0.000000e+00> : vector<8x32xf32>
    %63 = tpu.matmul %60, %9, %cst_16 {dimension_numbers = #tpu.dot_dimension_numbers<[1], [0], [0], [1], [0, 0, 1, 1], [], []>, precision = #tpu.contract_precision<fp32>} : vector<8x32xf32>, vector<32x32xf32>, vector<8x32xf32> -> vector<8x32xf32>
    %64 = arith.addf %62, %63 : vector<8x32xf32>
    %65 = math.tanh %64 : vector<8x32xf32>
    %c5_i32 = arith.constant 5 : i32
    %66 = vector.broadcast %c5_i32 : i32 to vector<8x1xi32>
    %67 = arith.cmpi sgt, %0, %66 : vector<8x1xi32>
    %68 = vector.shape_cast %67 : vector<8x1xi1> to vector<8x1xi1>
    %69 = vector.broadcast %68 : vector<8x1xi1> to vector<8x32xi1>
    %70 = arith.select %69, %65, %60 : vector<8x32xi1>, vector<8x32xf32>
    %71 = vector.extract_strided_slice %8 {offsets = [0, 6, 0], sizes = [8, 1, 32], strides = [1, 1, 1]} : vector<8x8x32xf32> to vector<8x1x32xf32>
    %72 = vector.shape_cast %71 : vector<8x1x32xf32> to vector<8x32xf32>
    %cst_17 = arith.constant dense<0.000000e+00> : vector<8x32xf32>
    %73 = tpu.matmul %70, %9, %cst_17 {dimension_numbers = #tpu.dot_dimension_numbers<[1], [0], [0], [1], [0, 0, 1, 1], [], []>, precision = #tpu.contract_precision<fp32>} : vector<8x32xf32>, vector<32x32xf32>, vector<8x32xf32> -> vector<8x32xf32>
    %74 = arith.addf %72, %73 : vector<8x32xf32>
    %75 = math.tanh %74 : vector<8x32xf32>
    %c6_i32 = arith.constant 6 : i32
    %76 = vector.broadcast %c6_i32 : i32 to vector<8x1xi32>
    %77 = arith.cmpi sgt, %0, %76 : vector<8x1xi32>
    %78 = vector.shape_cast %77 : vector<8x1xi1> to vector<8x1xi1>
    %79 = vector.broadcast %78 : vector<8x1xi1> to vector<8x32xi1>
    %80 = arith.select %79, %75, %70 : vector<8x32xi1>, vector<8x32xf32>
    %81 = vector.extract_strided_slice %8 {offsets = [0, 7, 0], sizes = [8, 1, 32], strides = [1, 1, 1]} : vector<8x8x32xf32> to vector<8x1x32xf32>
    %82 = vector.shape_cast %81 : vector<8x1x32xf32> to vector<8x32xf32>
    %cst_18 = arith.constant dense<0.000000e+00> : vector<8x32xf32>
    %83 = tpu.matmul %80, %9, %cst_18 {dimension_numbers = #tpu.dot_dimension_numbers<[1], [0], [0], [1], [0, 0, 1, 1], [], []>, precision = #tpu.contract_precision<fp32>} : vector<8x32xf32>, vector<32x32xf32>, vector<8x32xf32> -> vector<8x32xf32>
    %84 = arith.addf %82, %83 : vector<8x32xf32>
    %85 = math.tanh %84 : vector<8x32xf32>
    %c7_i32 = arith.constant 7 : i32
    %86 = vector.broadcast %c7_i32 : i32 to vector<8x1xi32>
    %87 = arith.cmpi sgt, %0, %86 : vector<8x1xi32>
    %88 = vector.shape_cast %87 : vector<8x1xi1> to vector<8x1xi1>
    %89 = vector.broadcast %88 : vector<8x1xi1> to vector<8x32xi1>
    %90 = arith.select %89, %85, %80 : vector<8x32xi1>, vector<8x32xf32>
    %91 = vector.shape_cast %20 : vector<8x32xf32> to vector<8x1x32xf32>
    %92 = vector.shape_cast %30 : vector<8x32xf32> to vector<8x1x32xf32>
    %93 = vector.shape_cast %40 : vector<8x32xf32> to vector<8x1x32xf32>
    %94 = vector.shape_cast %50 : vector<8x32xf32> to vector<8x1x32xf32>
    %95 = vector.shape_cast %60 : vector<8x32xf32> to vector<8x1x32xf32>
    %96 = vector.shape_cast %70 : vector<8x32xf32> to vector<8x1x32xf32>
    %97 = vector.shape_cast %80 : vector<8x32xf32> to vector<8x1x32xf32>
    %98 = vector.shape_cast %90 : vector<8x32xf32> to vector<8x1x32xf32>
    %99 = tpu.concatenate %91, %92, %93, %94, %95, %96, %97, %98 in 1 : vector<8x1x32xf32>, vector<8x1x32xf32>, vector<8x1x32xf32>, vector<8x1x32xf32>, vector<8x1x32xf32>, vector<8x1x32xf32>, vector<8x1x32xf32>, vector<8x1x32xf32> -> vector<8x8x32xf32>
    %100 = tpu.iota {dimensions = array<i32: 1>} : vector<8x8xi32>
    %101 = vector.broadcast %0 : vector<8x1xi32> to vector<8x8xi32>
    %102 = arith.cmpi slt, %100, %101 : vector<8x8xi32>
    %cst_19 = arith.constant 0.000000e+00 : f32
    %cst_20 = arith.constant -1.000000e+09 : f32
    %103 = vector.broadcast %cst_19 : f32 to vector<8x8xf32>
    %104 = vector.broadcast %cst_20 : f32 to vector<8x8xf32>
    %105 = arith.select %102, %103, %104 : vector<8x8xi1>, vector<8x8xf32>
    %c0_21 = arith.constant 0 : index
    %c0_22 = arith.constant 0 : index
    %c0_23 = arith.constant 0 : index
    %c0_24 = arith.constant 0 : index
    %106 = vector.load %arg6[%c0_21, %c0_22, %c0_23, %c0_24] : memref<1x8x8x32xf32, #tpu.memory_space<vmem>>, vector<1x8x8x32xf32>
    %107 = vector.shape_cast %106 : vector<1x8x8x32xf32> to vector<8x8x32xf32>
    %108 = vector.shape_cast %107 : vector<8x8x32xf32> to vector<64x32xf32>
    %c0_25 = arith.constant 0 : index
    %c0_26 = arith.constant 0 : index
    %c0_27 = arith.constant 0 : index
    %109 = vector.load %arg7[%c0_25, %c0_26, %c0_27] : memref<1x32x32xf32, #tpu.memory_space<vmem>>, vector<1x32x32xf32>
    %110 = vector.shape_cast %109 : vector<1x32x32xf32> to vector<32x32xf32>
    %cst_28 = arith.constant dense<0.000000e+00> : vector<64x32xf32>
    %111 = tpu.matmul %108, %110, %cst_28 {dimension_numbers = #tpu.dot_dimension_numbers<[1], [0], [0], [1], [0, 0, 1, 1], [], []>, precision = #tpu.contract_precision<fp32>} : vector<64x32xf32>, vector<32x32xf32>, vector<64x32xf32> -> vector<64x32xf32>
    %c0_29 = arith.constant 0 : index
    %c0_30 = arith.constant 0 : index
    %c0_31 = arith.constant 0 : index
    %112 = vector.load %arg9[%c0_29, %c0_30, %c0_31] : memref<1x1x32xf32, #tpu.memory_space<vmem>>, vector<1x1x32xf32>
    %113 = vector.shape_cast %112 : vector<1x1x32xf32> to vector<1x32xf32>
    %114 = vector.broadcast %113 : vector<1x32xf32> to vector<64x32xf32>
    %115 = arith.addf %111, %114 : vector<64x32xf32>
    %116 = vector.shape_cast %115 : vector<64x32xf32> to vector<8x8x32xf32>
    %c0_32 = arith.constant 0 : index
    %c0_33 = arith.constant 0 : index
    %c0_34 = arith.constant 0 : index
    %117 = vector.load %arg8[%c0_32, %c0_33, %c0_34] : memref<1x32x32xf32, #tpu.memory_space<vmem>>, vector<1x32x32xf32>
    %118 = vector.shape_cast %117 : vector<1x32x32xf32> to vector<32x32xf32>
    %119 = vector.extract_strided_slice %116 {offsets = [0, 0, 0], sizes = [8, 1, 32], strides = [1, 1, 1]} : vector<8x8x32xf32> to vector<8x1x32xf32>
    %120 = vector.shape_cast %119 : vector<8x1x32xf32> to vector<8x32xf32>
    %cst_35 = arith.constant dense<0.000000e+00> : vector<8x32xf32>
    %121 = tpu.matmul %90, %118, %cst_35 {dimension_numbers = #tpu.dot_dimension_numbers<[1], [0], [0], [1], [0, 0, 1, 1], [], []>, precision = #tpu.contract_precision<fp32>} : vector<8x32xf32>, vector<32x32xf32>, vector<8x32xf32> -> vector<8x32xf32>
    %122 = arith.addf %120, %121 : vector<8x32xf32>
    %123 = math.tanh %122 : vector<8x32xf32>
    %124 = vector.extract_strided_slice %116 {offsets = [0, 1, 0], sizes = [8, 1, 32], strides = [1, 1, 1]} : vector<8x8x32xf32> to vector<8x1x32xf32>
    %125 = vector.shape_cast %124 : vector<8x1x32xf32> to vector<8x32xf32>
    %cst_36 = arith.constant dense<0.000000e+00> : vector<8x32xf32>
    %126 = tpu.matmul %123, %118, %cst_36 {dimension_numbers = #tpu.dot_dimension_numbers<[1], [0], [0], [1], [0, 0, 1, 1], [], []>, precision = #tpu.contract_precision<fp32>} : vector<8x32xf32>, vector<32x32xf32>, vector<8x32xf32> -> vector<8x32xf32>
    %127 = arith.addf %125, %126 : vector<8x32xf32>
    %128 = math.tanh %127 : vector<8x32xf32>
    %129 = vector.extract_strided_slice %116 {offsets = [0, 2, 0], sizes = [8, 1, 32], strides = [1, 1, 1]} : vector<8x8x32xf32> to vector<8x1x32xf32>
    %130 = vector.shape_cast %129 : vector<8x1x32xf32> to vector<8x32xf32>
    %cst_37 = arith.constant dense<0.000000e+00> : vector<8x32xf32>
    %131 = tpu.matmul %128, %118, %cst_37 {dimension_numbers = #tpu.dot_dimension_numbers<[1], [0], [0], [1], [0, 0, 1, 1], [], []>, precision = #tpu.contract_precision<fp32>} : vector<8x32xf32>, vector<32x32xf32>, vector<8x32xf32> -> vector<8x32xf32>
    %132 = arith.addf %130, %131 : vector<8x32xf32>
    %133 = math.tanh %132 : vector<8x32xf32>
    %134 = vector.extract_strided_slice %116 {offsets = [0, 3, 0], sizes = [8, 1, 32], strides = [1, 1, 1]} : vector<8x8x32xf32> to vector<8x1x32xf32>
    %135 = vector.shape_cast %134 : vector<8x1x32xf32> to vector<8x32xf32>
    %cst_38 = arith.constant dense<0.000000e+00> : vector<8x32xf32>
    %136 = tpu.matmul %133, %118, %cst_38 {dimension_numbers = #tpu.dot_dimension_numbers<[1], [0], [0], [1], [0, 0, 1, 1], [], []>, precision = #tpu.contract_precision<fp32>} : vector<8x32xf32>, vector<32x32xf32>, vector<8x32xf32> -> vector<8x32xf32>
    %137 = arith.addf %135, %136 : vector<8x32xf32>
    %138 = math.tanh %137 : vector<8x32xf32>
    %139 = vector.extract_strided_slice %116 {offsets = [0, 4, 0], sizes = [8, 1, 32], strides = [1, 1, 1]} : vector<8x8x32xf32> to vector<8x1x32xf32>
    %140 = vector.shape_cast %139 : vector<8x1x32xf32> to vector<8x32xf32>
    %cst_39 = arith.constant dense<0.000000e+00> : vector<8x32xf32>
    %141 = tpu.matmul %138, %118, %cst_39 {dimension_numbers = #tpu.dot_dimension_numbers<[1], [0], [0], [1], [0, 0, 1, 1], [], []>, precision = #tpu.contract_precision<fp32>} : vector<8x32xf32>, vector<32x32xf32>, vector<8x32xf32> -> vector<8x32xf32>
    %142 = arith.addf %140, %141 : vector<8x32xf32>
    %143 = math.tanh %142 : vector<8x32xf32>
    %144 = vector.extract_strided_slice %116 {offsets = [0, 5, 0], sizes = [8, 1, 32], strides = [1, 1, 1]} : vector<8x8x32xf32> to vector<8x1x32xf32>
    %145 = vector.shape_cast %144 : vector<8x1x32xf32> to vector<8x32xf32>
    %cst_40 = arith.constant dense<0.000000e+00> : vector<8x32xf32>
    %146 = tpu.matmul %143, %118, %cst_40 {dimension_numbers = #tpu.dot_dimension_numbers<[1], [0], [0], [1], [0, 0, 1, 1], [], []>, precision = #tpu.contract_precision<fp32>} : vector<8x32xf32>, vector<32x32xf32>, vector<8x32xf32> -> vector<8x32xf32>
    %147 = arith.addf %145, %146 : vector<8x32xf32>
    %148 = math.tanh %147 : vector<8x32xf32>
    %149 = vector.extract_strided_slice %116 {offsets = [0, 6, 0], sizes = [8, 1, 32], strides = [1, 1, 1]} : vector<8x8x32xf32> to vector<8x1x32xf32>
    %150 = vector.shape_cast %149 : vector<8x1x32xf32> to vector<8x32xf32>
    %cst_41 = arith.constant dense<0.000000e+00> : vector<8x32xf32>
    %151 = tpu.matmul %148, %118, %cst_41 {dimension_numbers = #tpu.dot_dimension_numbers<[1], [0], [0], [1], [0, 0, 1, 1], [], []>, precision = #tpu.contract_precision<fp32>} : vector<8x32xf32>, vector<32x32xf32>, vector<8x32xf32> -> vector<8x32xf32>
    %152 = arith.addf %150, %151 : vector<8x32xf32>
    %153 = math.tanh %152 : vector<8x32xf32>
    %154 = vector.extract_strided_slice %116 {offsets = [0, 7, 0], sizes = [8, 1, 32], strides = [1, 1, 1]} : vector<8x8x32xf32> to vector<8x1x32xf32>
    %155 = vector.shape_cast %154 : vector<8x1x32xf32> to vector<8x32xf32>
    %cst_42 = arith.constant dense<0.000000e+00> : vector<8x32xf32>
    %156 = tpu.matmul %153, %118, %cst_42 {dimension_numbers = #tpu.dot_dimension_numbers<[1], [0], [0], [1], [0, 0, 1, 1], [], []>, precision = #tpu.contract_precision<fp32>} : vector<8x32xf32>, vector<32x32xf32>, vector<8x32xf32> -> vector<8x32xf32>
    %157 = arith.addf %155, %156 : vector<8x32xf32>
    %158 = math.tanh %157 : vector<8x32xf32>
    %159 = vector.shape_cast %123 : vector<8x32xf32> to vector<8x1x32xf32>
    %160 = vector.shape_cast %128 : vector<8x32xf32> to vector<8x1x32xf32>
    %161 = vector.shape_cast %133 : vector<8x32xf32> to vector<8x1x32xf32>
    %162 = vector.shape_cast %138 : vector<8x32xf32> to vector<8x1x32xf32>
    %163 = vector.shape_cast %143 : vector<8x32xf32> to vector<8x1x32xf32>
    %164 = vector.shape_cast %148 : vector<8x32xf32> to vector<8x1x32xf32>
    %165 = vector.shape_cast %153 : vector<8x32xf32> to vector<8x1x32xf32>
    %166 = vector.shape_cast %158 : vector<8x32xf32> to vector<8x1x32xf32>
    %167 = tpu.concatenate %159, %160, %161, %162, %163, %164, %165, %166 in 1 : vector<8x1x32xf32>, vector<8x1x32xf32>, vector<8x1x32xf32>, vector<8x1x32xf32>, vector<8x1x32xf32>, vector<8x1x32xf32>, vector<8x1x32xf32>, vector<8x1x32xf32> -> vector<8x8x32xf32>
    "tpu.trace_start"() <{level = 10 : i32, message = "bth,bsh->bts"}> : () -> ()
    %cst_43 = arith.constant dense<0.000000e+00> : vector<8x8x8xf32>
    %168 = tpu.matmul %167, %99, %cst_43 {dimension_numbers = #tpu.dot_dimension_numbers<[2], [2], [1], [1], [0, 0, 0, 1, 1, 1], [0], [0]>, precision = #tpu.contract_precision<fp32>} : vector<8x8x32xf32>, vector<8x8x32xf32>, vector<8x8x8xf32> -> vector<8x8x8xf32>
    "tpu.trace_stop"() : () -> ()
    %169 = vector.shape_cast %105 : vector<8x8xf32> to vector<8x1x8xf32>
    %170 = vector.broadcast %169 : vector<8x1x8xf32> to vector<8x8x8xf32>
    %171 = arith.addf %168, %170 : vector<8x8x8xf32>
    %cst_44 = arith.constant dense<0xFF800000> : vector<8x8xf32>
    %172 = vector.multi_reduction <maximumf>, %171, %cst_44 [2] : vector<8x8x8xf32> to vector<8x8xf32>
    %173 = vector.shape_cast %172 : vector<8x8xf32> to vector<8x8x1xf32>
    %174 = vector.broadcast %173 : vector<8x8x1xf32> to vector<8x8x8xf32>
    %175 = arith.subf %171, %174 : vector<8x8x8xf32>
    %176 = math.exp %175 : vector<8x8x8xf32>
    %cst_45 = arith.constant dense<0.000000e+00> : vector<8x8xf32>
    %177 = vector.multi_reduction <add>, %176, %cst_45 [2] : vector<8x8x8xf32> to vector<8x8xf32>
    %178 = vector.shape_cast %177 : vector<8x8xf32> to vector<8x8x1xf32>
    %179 = tpu.reciprocal %178 {approx = true} : vector<8x8x1xf32> -> vector<8x8x1xf32>
    %180 = vector.broadcast %179 : vector<8x8x1xf32> to vector<8x8x8xf32>
    %181 = arith.mulf %176, %180 : vector<8x8x8xf32>
    "tpu.trace_start"() <{level = 10 : i32, message = "bts,bsh->bth"}> : () -> ()
    %cst_46 = arith.constant dense<0.000000e+00> : vector<8x8x32xf32>
    %182 = tpu.matmul %181, %99, %cst_46 {dimension_numbers = #tpu.dot_dimension_numbers<[2], [1], [1], [2], [0, 0, 0, 1, 1, 2], [0], [0]>, precision = #tpu.contract_precision<fp32>} : vector<8x8x8xf32>, vector<8x8x32xf32>, vector<8x8x32xf32> -> vector<8x8x32xf32>
    "tpu.trace_stop"() : () -> ()
    %183 = tpu.concatenate %167, %182 in 2 : vector<8x8x32xf32>, vector<8x8x32xf32> -> vector<8x8x64xf32>
    %184 = vector.shape_cast %183 : vector<8x8x64xf32> to vector<64x64xf32>
    %c0_47 = arith.constant 0 : index
    %c0_48 = arith.constant 0 : index
    %c0_49 = arith.constant 0 : index
    %185 = vector.load %arg10[%c0_47, %c0_48, %c0_49] : memref<1x64x128xf32, #tpu.memory_space<vmem>>, vector<1x64x128xf32>
    %186 = vector.shape_cast %185 : vector<1x64x128xf32> to vector<64x128xf32>
    %cst_50 = arith.constant dense<0.000000e+00> : vector<64x128xf32>
    %187 = tpu.matmul %184, %186, %cst_50 {dimension_numbers = #tpu.dot_dimension_numbers<[1], [0], [0], [1], [0, 0, 1, 1], [], []>, precision = #tpu.contract_precision<fp32>} : vector<64x64xf32>, vector<64x128xf32>, vector<64x128xf32> -> vector<64x128xf32>
    %c0_51 = arith.constant 0 : index
    %c0_52 = arith.constant 0 : index
    %c0_53 = arith.constant 0 : index
    %188 = vector.load %arg11[%c0_51, %c0_52, %c0_53] : memref<1x1x128xf32, #tpu.memory_space<vmem>>, vector<1x1x128xf32>
    %189 = vector.shape_cast %188 : vector<1x1x128xf32> to vector<1x128xf32>
    %190 = vector.broadcast %189 : vector<1x128xf32> to vector<64x128xf32>
    %191 = arith.addf %187, %190 : vector<64x128xf32>
    %192 = vector.shape_cast %191 : vector<64x128xf32> to vector<8x8x128xf32>
    %c0_54 = arith.constant 0 : index
    %c0_55 = arith.constant 0 : index
    %c0_56 = arith.constant 0 : index
    %c0_57 = arith.constant 0 : index
    %193 = vector.load %arg12[%c0_54, %c0_55, %c0_56, %c0_57] : memref<1x8x8x128xf32, #tpu.memory_space<vmem>>, vector<1x8x8x128xf32>
    %194 = vector.shape_cast %193 : vector<1x8x8x128xf32> to vector<8x8x128xf32>
    %195 = vector.shape_cast %192 : vector<8x8x128xf32> to vector<1x8x8x128xf32>
    tpu.vector_store %arg12[%c0_54, %c0_55, %c0_56, %c0_57], %195 {strides = array<i32>} : memref<1x8x8x128xf32, #tpu.memory_space<vmem>>, vector<1x8x8x128xf32>,
    %c0_58 = arith.constant 0 : index
    %c0_59 = arith.constant 0 : index
    %c0_60 = arith.constant 0 : index
    %c0_61 = arith.constant 0 : index
    %196 = vector.load %arg13[%c0_58, %c0_59, %c0_60, %c0_61] : memref<1x8x8x8xf32, #tpu.memory_space<vmem>>, vector<1x8x8x8xf32>
    %197 = vector.shape_cast %196 : vector<1x8x8x8xf32> to vector<8x8x8xf32>
    %198 = vector.shape_cast %181 : vector<8x8x8xf32> to vector<1x8x8x8xf32>
    tpu.vector_store %arg13[%c0_58, %c0_59, %c0_60, %c0_61], %198 {strides = array<i32>} : memref<1x8x8x8xf32, #tpu.memory_space<vmem>>, vector<1x8x8x8xf32>,
    return
  }
  func.func @transform_0(%arg0: i32) -> (i32, i32, i32) {
    %c0_i32 = arith.constant 0 : i32
    %c0_i32_0 = arith.constant 0 : i32
    %c0_i32_1 = arith.constant 0 : i32
    %c0_i32_2 = arith.constant 0 : i32
    return %c0_i32, %c0_i32_0, %c0_i32_1 : i32, i32, i32
  }
  func.func @transform_1(%arg0: i32) -> (i32, i32) {
    %c0_i32 = arith.constant 0 : i32
    %c0_i32_0 = arith.constant 0 : i32
    %c0_i32_1 = arith.constant 0 : i32
    return %c0_i32, %c0_i32_0 : i32, i32
  }
  func.func @transform_2(%arg0: i32) -> (i32, i32) {
    %c0_i32 = arith.constant 0 : i32
    %c0_i32_0 = arith.constant 0 : i32
    %c0_i32_1 = arith.constant 0 : i32
    return %c0_i32, %c0_i32_0 : i32, i32
  }
  func.func @transform_3(%arg0: i32) -> (i32, i32) {
    %c0_i32 = arith.constant 0 : i32
    %c0_i32_0 = arith.constant 0 : i32
    %c0_i32_1 = arith.constant 0 : i32
    return %c0_i32, %c0_i32_0 : i32, i32
  }
  func.func @transform_4(%arg0: i32) -> (i32, i32) {
    %c0_i32 = arith.constant 0 : i32
    %c0_i32_0 = arith.constant 0 : i32
    %c0_i32_1 = arith.constant 0 : i32
    return %c0_i32, %c0_i32_0 : i32, i32
  }
  func.func @transform_5(%arg0: i32) -> (i32, i32, i32, i32) {
    %c0_i32 = arith.constant 0 : i32
    %c0_i32_0 = arith.constant 0 : i32
    %c0_i32_1 = arith.constant 0 : i32
    %c0_i32_2 = arith.constant 0 : i32
    return %arg0, %c0_i32, %c0_i32_0, %c0_i32_1 : i32, i32, i32, i32
  }
  func.func @transform_6(%arg0: i32) -> (i32, i32, i32) {
    %c0_i32 = arith.constant 0 : i32
    %c0_i32_0 = arith.constant 0 : i32
    %c0_i32_1 = arith.constant 0 : i32
    return %arg0, %c0_i32, %c0_i32_0 : i32, i32, i32
  }
  func.func @transform_7(%arg0: i32) -> (i32, i32, i32) {
    %c0_i32 = arith.constant 0 : i32
    %c0_i32_0 = arith.constant 0 : i32
    %c0_i32_1 = arith.constant 0 : i32
    return %arg0, %c0_i32, %c0_i32_0 : i32, i32, i32
  }
  func.func @transform_8(%arg0: i32) -> (i32, i32, i32) {
    %c0_i32 = arith.constant 0 : i32
    %c0_i32_0 = arith.constant 0 : i32
    %c0_i32_1 = arith.constant 0 : i32
    return %arg0, %c0_i32, %c0_i32_0 : i32, i32, i32
  }
  func.func @transform_9(%arg0: i32) -> (i32, i32, i32) {
    %c0_i32 = arith.constant 0 : i32
    %c0_i32_0 = arith.constant 0 : i32
    %c0_i32_1 = arith.constant 0 : i32
    return %arg0, %c0_i32, %c0_i32_0 : i32, i32, i32
  }
  func.func @transform_10(%arg0: i32) -> (i32, i32, i32) {
    %c0_i32 = arith.constant 0 : i32
    %c0_i32_0 = arith.constant 0 : i32
    %c0_i32_1 = arith.constant 0 : i32
    return %arg0, %c0_i32, %c0_i32_0 : i32, i32, i32
  }
  func.func @transform_11(%arg0: i32) -> (i32, i32, i32, i32) {
    %c0_i32 = arith.constant 0 : i32
    %c0_i32_0 = arith.constant 0 : i32
    %c0_i32_1 = arith.constant 0 : i32
    %c0_i32_2 = arith.constant 0 : i32
    return %arg0, %c0_i32, %c0_i32_0, %c0_i32_1 : i32, i32, i32, i32
  }
  func.func @transform_12(%arg0: i32) -> (i32, i32, i32, i32) {
    %c0_i32 = arith.constant 0 : i32
    %c0_i32_0 = arith.constant 0 : i32
    %c0_i32_1 = arith.constant 0 : i32
    %c0_i32_2 = arith.constant 0 : i32
    return %arg0, %c0_i32, %c0_i32_0, %c0_i32_1 : i32, i32, i32, i32
  }
}

</mosaic_0001>

<bundles_post_ra>
// kernel: tpu_custom_call.1
= control target key start
LH: loop header
LB: loop body
LE: loop exit
PB: predicated region body
PF: predicated region fallthrough
CT: control target
= control target key end

     0   :  { %s28727_s0 = inlined_call_operand.hbm [shape: f32[8,8,32], index: 0, kind: input, shape index: {}]   ;;  %s28728_s1 = inlined_call_operand.vmem [shape: s32[8,1], index: 1, kind: input, shape index: {}]   ;;  %s28729_s2 = inlined_call_operand.hbm [shape: f32[32,32], index: 2, kind: input, shape index: {}]   ;;  %s28730_s3 = inlined_call_operand.hbm [shape: f32[32,32], index: 3, kind: input, shape index: {}]   ;;  %s28731_s4 = inlined_call_operand.vmem [shape: f32[1,32], index: 4, kind: input, shape index: {}]   ;;  %s28732_s5 = inlined_call_operand.hbm [shape: f32[2,8,8,32], index: 5, kind: input, shape index: {}]   ;;  %s28733_s6 = inlined_call_operand.hbm [shape: f32[2,32,32], index: 6, kind: input, shape index: {}]   ;;  %s28734_s7 = inlined_call_operand.hbm [shape: f32[2,32,32], index: 7, kind: input, shape index: {}]   ;;  %s28735_s8 = inlined_call_operand.vmem [shape: f32[2,1,32], index: 8, kind: input, shape index: {}]   ;;  %s28736_s9 = inlined_call_operand.hbm [shape: f32[2,64,128], index: 9, kind: input, shape index: {}]   ;;  %s28737_s10 = inlined_call_operand.vmem [shape: f32[2,1,128], index: 10, kind: input, shape index: {}]   ;;  %s28738_s11 = inlined_call_operand.hbm [shape: f32[2,8,8,128], index: 11, kind: output, shape index: {0}]   ;;  %s28739_s12 = inlined_call_operand.hbm [shape: f32[2,8,8,8], index: 12, kind: output, shape index: {1}]  }
   0x1   :  { %28795 = sst [smem:[#allocation39_spill]] %s28728_s1 }
   0x2   :  { %28796 = sst [smem:[#allocation40_spill]] %s28729_s2 }
   0x3   :  { %28797 = sst [smem:[#allocation41_spill]] %s28731_s4 }
   0x4   :  { %28798 = sst [smem:[#allocation42_spill]] %s28732_s5 }
   0x5   :  { %28799 = sst [smem:[#allocation43_spill]] %s28735_s8 }
   0x6   :  { %28800 = sst [smem:[#allocation44_spill]] %s28737_s10 }
   0x7   :  { %28801 = sst [smem:[#allocation45_spill]] %s28738_s11 }
   0x8   :  { %28802 = sst [smem:[#allocation46_spill]] %s28739_s12 }
   0x9   :  { %18 = vsyncpa [#allocation3], 0 }
   0xa   :  { %19 = vsyncpa [#allocation6], 0 }
   0xb   :  { %20 = vsyncpa [#allocation9], 0 }
   0xc   :  { %22 = vsyncpa [#allocation9 + $0x1], 0 }
   0xd   :  { %23 = vsyncpa [#allocation12], 0 }
   0xe   :  { %25 = vsyncpa [#allocation12 + $0x1], 0 }
   0xf   :  { %26 = vsyncpa [#allocation4], 0 }
  0x10   :  { %28 = vsyncpa [#allocation4 + $0x1], 0 }
  0x11   :  { %29 = vsyncpa [#allocation16], 0 }
  0x12   :  { %31 = vsyncpa [#allocation16 + $0x1], 0  ;;  %s25334_s21 = smov 0   ;;  %s25336_s22 = smov 0  }
  0x13   :  { %s25338_s23 = smov 0   ;;  %s25340_s24 = smov 0  }
  0x14 LB: > { %28803 = sst [smem:[#allocation23_spill]] %s25235_s21  ;;  %s25355_s25 = sadd.s32 4294967295, %s25247_s24   ;;  %s25247_s24 = sphi %s25340_s24, %s28885_s24   ;;  %s25243_s23 = sphi %s25338_s23, %s28889_s23   ;;  %s25239_s22 = sphi %s25336_s22, %s28888_s22   ;;  %s25235_s21 = sphi %s25334_s21, %s28886_s21  }
  0x15   : > { %28804 = sst [smem:[#allocation24_spill]] %s25239_s22  ;;  %s20390_s26 = sadd.s32 4294967294, %s25247_s24  }
  0x16   : > { %28805 = sst [smem:[#allocation25_spill]] %s25355_s25  ;;  %p162_p0 = scmp.ne.s32.totalorder %s25239_s22, %s25235_s21 }
  0x17   : > { %p28743_p1 = scmp.eq.s32.totalorder %s25355_s25, 0  ;;  %p322_p3 = scmp.eq.s32.totalorder %s20390_s26, 1 }
  0x18   : > { %p20391_p5 = scmp.ge.s32.totalorder %s25247_s24, 1  ;;  %p355_p7 = scmp.lt.s32.totalorder %s25247_s24, 3 }
  0x19   : > { %p25364_p4 = por %p28743_p1, %p162_p0  ;;  %p25369_p6 = por %p322_p3, %p162_p0 }
  0x1a   : > { %p25374_p8 = pnand %p20391_p5, %p355_p7  ;;  %s25249_s30 = smov [#allocation5]  }
  0x1b   : > { %s28806_s27 = scalar_select %p25364_p4, 1, 0 }
  0x1c   : > { %s28808_s28 = scalar_select %p25369_p6, 1, 0 }
  0x1d   : > { %28807 = sst [smem:[#allocation26_spill]] %s28806_s27  ;;  %p24559_p10 = pneg %p25374_p8 }
  0x1e   : > { %28809 = sst [smem:[#allocation27_spill]] %s28808_s28  ;;  %s383_s13 = sshll.u32 %s25249_s30, 4  ;;  %s384_s13 = int_to_ptr.vmem [resolvable:$true] %s383_s13 }
  0x1f   : > { %s28810_s29 = scalar_select %p25374_p8, 1, 0 }
  0x20   : > { %p25383_p11 = pnand %p24559_p10, %p28743_p1  ;;  %s25388_s15 = sadd.s32 1, %s25247_s24  }
  0x21   : > { %28811 = sst [smem:[#allocation28_spill]] %s28810_s29  ;;  %s149_s16 = sadd.s32 1, %s25243_s23 }
  0x22   : > { %s28812_s14 = scalar_select %p25383_p11, 1, 0 }
  0x23   : > { %28813 = sst [smem:[#allocation29_spill]] %s25388_s15  ;;  %s146_s17 = ssub.s32 %s25247_s24, %s25388_s15 }
  0x24   : > { %s28814_s2 = sld [smem:[#allocation40_spill]]  ;;  %p25401_p13 = pneg %p25383_p11 }
  0x26   : > { %s28815_s30 = scalar_select %p25401_p13, 1, 0 }
  0x2a   : > { %s24933_s20 = scalar_lea.hbm %s28814_s2, 512 }
  0x2b   : > { %p24934_p12 = scmp.ne.s32.totalorder %s28814_s2, %s24933_s20  ;;  %p24940_p5 = scmp.lt.u32.totalorder %s24933_s20, %s28814_s2 }
  0x2d   : > { %p24936_p0 = pnand %p25401_p13, %p24934_p12 }
  0x2f   : > { %p24937_p3 = pneg %p24936_p0 }
  0x31   : > { %p24942_p7 = pnand %p24940_p5, %p24937_p3 }
  0x33   : > { %24945 = shalt.err (!%p24942_p7)
}
  0x34   : > { %s24946_s18 = scalar_lea.vmem %s384_s13, 512  ;;  %p24954_p2 = scmp.lt.s32.totalorder %s384_s13, %s384_s13 }
  0x35   : > { %p24947_p10 = scmp.ne.s32.totalorder %s384_s13, %s24946_s18  ;;  %p24955_p6 = scmp.lt.s32.totalorder %s24946_s18, %s24946_s18 }
  0x37   : > { %p24949_p9 = pnand %p24947_p10, %p25401_p13  ;;  %p24956_p4 = por %p24955_p6, %p24954_p2 }
  0x39   : > { %p24950_p1 = pneg %p24949_p9 }
  0x3b   : > { %p24957_p8 = pnand %p24956_p4, %p24950_p1 }
  0x3d   : > { %24960 = shalt.err (!%p24957_p8)
}
  0x3e   : > { %s28748_s28 = smov 128   ;;  %s28750_s11 = smov 8  }
  0x3f   : > { %24565 = dma.hbm_to_vmem [thread:$0]  (!%p25383_p11), %s28814_s2, 512, %s384_s13, [#allocation6], %s28748_s28, %s28748_s28, %s28750_s11  }
  0x40   : > { %p147_p1 = scmp.eq.s32.totalorder %s146_s17, 0  ;;  %p156_p2 = scmp.ne.s32.totalorder %s25243_s23, %s25239_s22 }
  0x41   : > { %p157_p4 = scmp.eq.s32.totalorder %s25247_s24, 0  ;;  %p24592_p6 = scmp.lt.s32.totalorder %s25247_s24, 2 }
  0x42   : > { %s25425_s20 = scalar_select %p147_p1, %s25243_s23, %s149_s16  }
  0x43   : > { %p158_p8 = por %p157_p4, %p156_p2  ;;  %p28817_p9 = scmp.eq.s32.totalorder %s25355_s25, 1 }
  0x44   : > { %28816 = sst [smem:[#allocation30_spill]] %s25425_s20  ;;  %s28755_s18 = sand.u32 1, %s25247_s24  }
  0x45   : > { %p25429_p12 = por %p28817_p9, %p156_p2  ;;  %s28752_s15 = sand.u32 1, %s25243_s23  }
  0x46   : > { %s25437_s10 = sshll.u32 %s28752_s15, 6  ;;  %s28753_s13 = sshll.u32 %s25247_s24, 10 }
  0x47   : > { %s28818_s26 = scalar_select %p25429_p12, 1, 0 }
  0x48   : > { %s28820_s5 = sld [smem:[#allocation42_spill]]  ;;  %s417_s16 = scalar_lea.vmem [#allocation8], %s25437_s10 }
  0x49   : > { %28819 = sst [smem:[#allocation31_spill]] %s28818_s26  ;;  %s424_s28 = sshll.u32 %s417_s16, 4  ;;  %s25448_s28 = int_to_ptr.vmem [resolvable:$true] %s424_s28 }
  0x4a   : > { %p25450_p0 = pnand %p24592_p6, %p158_p8  ;;  %s25456_s15 = scalar_lea.sflag [#allocation9], %s28755_s18 }
  0x4c   : > { %s28821_s11 = scalar_select %p25450_p0, 1, 0 }
  0x4d   : > { %p25462_p5 = pneg %p25450_p0 }
  0x4e   : > { %s25445_s19 = scalar_lea.hbm %s28820_s5, %s28753_s13  ;;  %s24966_s13 = scalar_lea.hbm %s28820_s5, 2048 }
  0x4f   : > { %s24961_s2 = scalar_lea.hbm %s25445_s19, 1024  ;;  %p24967_p1 = scmp.lt.u32.totalorder %s25445_s19, %s28820_s5 }
  0x50   : > { %p24962_p3 = scmp.ne.s32.totalorder %s25445_s19, %s24961_s2  ;;  %p24968_p2 = scmp.lt.u32.totalorder %s24966_s13, %s24961_s2 }
  0x51   : > { %s28822_s17 = scalar_select %p25462_p5, 1, 0 }
  0x52   : > { %p24964_p7 = pnand %p25462_p5, %p24962_p3  ;;  %p24969_p4 = por %p24968_p2, %p24967_p1 }
  0x53   : > { %p24970_p6 = scmp.lt.u32.totalorder %s24961_s2, %s25445_s19 }
  0x54   : > { %p24965_p10 = pneg %p24964_p7 }
  0x55   : > { %p24971_p8 = por %p24970_p6, %p24969_p4 }
  0x57   : > { %p24972_p9 = pnand %p24971_p8, %p24965_p10 }
  0x59   : > { %24975 = shalt.err (!%p24972_p9)
}
  0x5a   : > { %s24976_s18 = scalar_lea.vmem %s25448_s28, 1024  ;;  %s25252_s21 = smov [#allocation8]  }
  0x5b   : > { %p24977_p3 = scmp.ne.s32.totalorder %s25448_s28, %s24976_s18  ;;  %s24981_s16 = sshll.u32 %s25252_s21, 4  ;;  %s24982_s16 = int_to_ptr.vmem [resolvable:$false] %s24981_s16 }
  0x5c   : > { %s24983_s12 = scalar_lea.vmem %s24982_s16, 2048  ;;  %p24984_p11 = scmp.lt.s32.totalorder %s25448_s28, %s24982_s16 }
  0x5d   : > { %p24979_p7 = pnand %p24977_p3, %p25462_p5  ;;  %p24985_p13 = scmp.lt.s32.totalorder %s24983_s12, %s24976_s18 }
  0x5f   : > { %p24980_p12 = pneg %p24979_p7  ;;  %p24986_p1 = por %p24985_p13, %p24984_p11 }
  0x61   : > { %p24987_p2 = pnand %p24986_p1, %p24980_p12 }
  0x63   : > { %24990 = shalt.err (!%p24987_p2)
}
  0x64   : > { %s28823_s2 = smov 8   ;;  %s28824_s20 = smov 128  }
  0x65   : > { %24572 = dma.hbm_to_vmem [thread:$0]  (!%p25450_p0), %s25445_s19, 1024, %s25448_s28, %s25456_s15, %s28824_s20, %s28824_s20, %s28823_s2  }
  0x66   : > { %s28825_s13 = sshll.u32 %s25247_s24, 10  ;;  %s28826_s12 = sand.u32 1, %s25243_s23  }
  0x67   : > { %s25494_s16 = scalar_lea.hbm %s28736_s9, %s28825_s13  ;;  %s20399_s5 = sshll.u32 %s28826_s12, 5 }
  0x68   : > { %s20430_s26 = sshll.u32 %s25247_s24, 9  ;;  %s486_s8 = scalar_lea.vmem [#allocation13], %s25437_s10 }
  0x69   : > { %s25500_s4 = sshll.u32 %s486_s8, 4  ;;  %s25505_s22 = scalar_lea.hbm %s28733_s6, %s20430_s26  ;;  %s25573_s4 = int_to_ptr.vmem [resolvable:$true] %s25500_s4 }
  0x6a   : > { %s438_s25 = scalar_lea.vmem [#allocation10], %s20399_s5  ;;  %s25512_s13 = scalar_lea.hbm %s28734_s7, %s20430_s26 }
  0x6b   : > { %s25507_s28 = sshll.u32 %s438_s25, 4  ;;  %s459_s10 = scalar_lea.vmem [#allocation11], %s20399_s5  ;;  %s25570_s28 = int_to_ptr.vmem [resolvable:$true] %s25507_s28 }
  0x6c   : > { %s466_s8 = sshll.u32 %s459_s10, 4  ;;  %s25253_s21 = smov [#allocation2]   ;;  %s25514_s8 = int_to_ptr.vmem [resolvable:$true] %s466_s8 }
  0x6d   : > { %s25516_s1 = sshll.u32 %s25253_s21, 4  ;;  %s28827_s27 = sand.u32 1, %s25247_s24   ;;  %s368_s1 = int_to_ptr.vmem [resolvable:$true] %s25516_s1 }
  0x6e   : > { %s25520_s18 = scalar_lea.sflag [#allocation12], %s28827_s27  ;;  %s24991_s25 = scalar_lea.hbm %s25512_s13, 512 }
  0x6f   : > { %p24992_p11 = scmp.ne.s32.totalorder %s25512_s13, %s24991_s25  ;;  %s24996_s12 = scalar_lea.hbm %s28734_s7, 1024 }
  0x70   : > { %p24997_p10 = scmp.lt.u32.totalorder %s25512_s13, %s28734_s7  ;;  %p24998_p4 = scmp.lt.u32.totalorder %s24996_s12, %s24991_s25 }
  0x71   : > { %p24994_p13 = pnand %p24992_p11, %p25462_p5  ;;  %p25000_p8 = scmp.lt.u32.totalorder %s24991_s25, %s25512_s13 }
  0x72   : > { %p24999_p6 = por %p24998_p4, %p24997_p10 }
  0x73   : > { %p24995_p12 = pneg %p24994_p13 }
  0x74   : > { %p25001_p9 = por %p25000_p8, %p24999_p6 }
  0x76   : > { %p25002_p3 = pnand %p25001_p9, %p24995_p12 }
  0x78   : > { %25005 = shalt.err (!%p25002_p3)
}
  0x79   : > { %s25006_s10 = scalar_lea.vmem %s25514_s8, 512  ;;  %s25254_s21 = smov [#allocation11]  }
  0x7a   : > { %p25007_p7 = scmp.ne.s32.totalorder %s25514_s8, %s25006_s10  ;;  %s25011_s27 = sshll.u32 %s25254_s21, 4  ;;  %s25012_s27 = int_to_ptr.vmem [resolvable:$false] %s25011_s27 }
  0x7b   : > { %s25013_s29 = scalar_lea.vmem %s25012_s27, 1024  ;;  %p25014_p11 = scmp.lt.s32.totalorder %s25514_s8, %s25012_s27 }
  0x7c   : > { %p25009_p1 = pnand %p25007_p7, %p25462_p5  ;;  %p25015_p13 = scmp.lt.s32.totalorder %s25013_s29, %s25006_s10 }
  0x7e   : > { %p25010_p2 = pneg %p25009_p1  ;;  %p25016_p10 = por %p25015_p13, %p25014_p11 }
  0x80   : > { %p25017_p4 = pnand %p25016_p10, %p25010_p2 }
  0x82   : > { %25020 = shalt.err (!%p25017_p4)
}
  0x83   : > { %24578 = dma.hbm_to_vmem [thread:$0]  (!%p25450_p0), %s25512_s13, 512, %s25514_s8, %s25520_s18, %s28824_s20, %s28824_s20, %s28823_s2  }
  0x84   : > { %s25021_s12 = scalar_lea.hbm %s28727_s0, 1024  ;;  %p28828_p6 = scmp.ne.s32.totalorder %s28815_s30, 0 }
  0x85   : > { %p25022_p12 = scmp.ne.s32.totalorder %s28727_s0, %s25021_s12  ;;  %p25028_p3 = scmp.lt.u32.totalorder %s25021_s12, %s28727_s0 }
  0x87   : > { %p25024_p8 = pnand %p25022_p12, %p28828_p6 }
  0x89   : > { %p25025_p9 = pneg %p25024_p8 }
  0x8b   : > { %p25030_p7 = pnand %p25028_p3, %p25025_p9 }
  0x8d   : > { %25033 = shalt.err (!%p25030_p7)
}
  0x8e   : > { %s25034_s27 = scalar_lea.vmem %s368_s1, 1024  ;;  %p25042_p13 = scmp.lt.s32.totalorder %s368_s1, %s368_s1 }
  0x8f   : > { %p25035_p1 = scmp.ne.s32.totalorder %s368_s1, %s25034_s27  ;;  %p25043_p10 = scmp.lt.s32.totalorder %s25034_s27, %s25034_s27 }
  0x91   : > { %p25037_p2 = pnand %p25035_p1, %p28828_p6  ;;  %p25044_p4 = por %p25043_p10, %p25042_p13 }
  0x93   : > { %p25038_p11 = pneg %p25037_p2 }
  0x95   : > { %p25045_p0 = pnand %p25044_p4, %p25038_p11 }
  0x97   : > { %25048 = shalt.err (!%p25045_p0)
}
  0x98   : > { %p28829_p12 = scmp.ne.s32.totalorder %s28812_s14, 0  ;;  %s25255_s29 = smov [#allocation7]  }
  0x99   : > { %s396_s25 = sshll.u32 %s25255_s29, 4  ;;  %s25049_s19 = scalar_lea.hbm %s28730_s3, 512  ;;  %s397_s25 = int_to_ptr.vmem [resolvable:$true] %s396_s25 }
  0x9a   : > { %24562 = dma.hbm_to_vmem [thread:$0]  (!%p28829_p12), %s28727_s0, 1024, %s368_s1, [#allocation3], %s28824_s20, %s28824_s20, %s28823_s2  }
  0x9b   : > { %p25050_p0 = scmp.ne.s32.totalorder %s28730_s3, %s25049_s19  ;;  %p25056_p3 = scmp.lt.u32.totalorder %s25049_s19, %s28730_s3 }
  0x9d   : > { %p25052_p8 = pnand %p25050_p0, %p28828_p6 }
  0x9f   : > { %p25053_p9 = pneg %p25052_p8 }
  0xa1   : > { %p25058_p7 = pnand %p25056_p3, %p25053_p9 }
  0xa3   : > { %25061 = shalt.err (!%p25058_p7)
}
  0xa4   : > { %s25062_s27 = scalar_lea.vmem %s397_s25, 512  ;;  %p25070_p13 = scmp.lt.s32.totalorder %s397_s25, %s397_s25 }
  0xa5   : > { %p25063_p1 = scmp.ne.s32.totalorder %s397_s25, %s25062_s27  ;;  %p25071_p10 = scmp.lt.s32.totalorder %s25062_s27, %s25062_s27 }
  0xa7   : > { %p25065_p2 = pnand %p25063_p1, %p28828_p6  ;;  %p25072_p4 = por %p25071_p10, %p25070_p13 }
  0xa9   : > { %p25066_p11 = pneg %p25065_p2 }
  0xab   : > { %p25073_p5 = pnand %p25072_p4, %p25066_p11 }
  0xad   : > { %25076 = shalt.err (!%p25073_p5)
}
  0xae   : > { %24568 = dma.hbm_to_vmem [thread:$0]  (!%p28829_p12), %s28730_s3, 512, %s397_s25, [#allocation6], %s28824_s20, %s28824_s20, %s28823_s2  }
  0xaf   : > { %s25077_s30 = scalar_lea.hbm %s25505_s22, 512  ;;  %p28830_p0 = scmp.ne.s32.totalorder %s28822_s17, 0 }
  0xb0   : > { %p25078_p6 = scmp.ne.s32.totalorder %s25505_s22, %s25077_s30  ;;  %s25082_s14 = scalar_lea.hbm %s28733_s6, 1024 }
  0xb1   : > { %p25083_p5 = scmp.lt.u32.totalorder %s25505_s22, %s28733_s6  ;;  %p25084_p3 = scmp.lt.u32.totalorder %s25082_s14, %s25077_s30 }
  0xb2   : > { %p25080_p8 = pnand %p25078_p6, %p28830_p0  ;;  %p25086_p1 = scmp.lt.u32.totalorder %s25077_s30, %s25505_s22 }
  0xb3   : > { %p25085_p7 = por %p25084_p3, %p25083_p5 }
  0xb4   : > { %p25081_p9 = pneg %p25080_p8 }
  0xb5   : > { %p25087_p2 = por %p25086_p1, %p25085_p7 }
  0xb7   : > { %p25088_p11 = pnand %p25087_p2, %p25081_p9 }
  0xb9   : > { %25091 = shalt.err (!%p25088_p11)
}
  0xba   : > { %s25092_s25 = scalar_lea.vmem %s25570_s28, 512  ;;  %s25256_s5 = smov [#allocation10]  }
  0xbb   : > { %p25093_p12 = scmp.ne.s32.totalorder %s25570_s28, %s25092_s25  ;;  %s25097_s10 = sshll.u32 %s25256_s5, 4  ;;  %s25098_s10 = int_to_ptr.vmem [resolvable:$false] %s25097_s10 }
  0xbc   : > { %s25099_s21 = scalar_lea.vmem %s25098_s10, 1024  ;;  %p25100_p4 = scmp.lt.s32.totalorder %s25570_s28, %s25098_s10 }
  0xbd   : > { %p25095_p13 = pnand %p25093_p12, %p28830_p0  ;;  %p25101_p6 = scmp.lt.s32.totalorder %s25099_s21, %s25092_s25 }
  0xbf   : > { %p25096_p10 = pneg %p25095_p13  ;;  %p25102_p8 = por %p25101_p6, %p25100_p4 }
  0xc1   : > { %p25103_p5 = pnand %p25102_p8, %p25096_p10 }
  0xc3   : > { %25106 = shalt.err (!%p25103_p5)
}
  0xc4   : > { %p28831_p9 = scmp.ne.s32.totalorder %s28821_s11, 0  ;;  %s25107_s1 = scalar_lea.hbm %s25494_s16, 1024 }
  0xc5   : > { %p25108_p3 = scmp.ne.s32.totalorder %s25494_s16, %s25107_s1  ;;  %s25112_s8 = scalar_lea.hbm %s28736_s9, 2048 }
  0xc6   : > { %24575 = dma.hbm_to_vmem [thread:$0]  (!%p28831_p9), %s25505_s22, 512, %s25570_s28, %s25456_s15, %s28824_s20, %s28824_s20, %s28823_s2  }
  0xc7   : > { %p25110_p7 = pnand %p25108_p3, %p28830_p0  ;;  %p25113_p2 = scmp.lt.u32.totalorder %s25494_s16, %s28736_s9 }
  0xc8   : > { %p25114_p11 = scmp.lt.u32.totalorder %s25112_s8, %s25107_s1  ;;  %p25116_p13 = scmp.lt.u32.totalorder %s25107_s1, %s25494_s16 }
  0xc9   : > { %p25111_p1 = pneg %p25110_p7 }
  0xca   : > { %p25115_p12 = por %p25114_p11, %p25113_p2 }
  0xcc   : > { %p25117_p10 = por %p25116_p13, %p25115_p12 }
  0xce   : > { %p25118_p4 = pnand %p25117_p10, %p25111_p1 }
  0xd0   : > { %25121 = shalt.err (!%p25118_p4)
}
  0xd1   : > { %s25122_s22 = scalar_lea.vmem %s25573_s4, 1024  ;;  %s25257_s15 = smov [#allocation13]  }
  0xd2   : > { %p25123_p6 = scmp.ne.s32.totalorder %s25573_s4, %s25122_s22  ;;  %s25127_s28 = sshll.u32 %s25257_s15, 4  ;;  %s25128_s28 = int_to_ptr.vmem [resolvable:$false] %s25127_s28 }
  0xd3   : > { %s25129_s26 = scalar_lea.vmem %s25128_s28, 2048  ;;  %p25130_p3 = scmp.lt.s32.totalorder %s25573_s4, %s25128_s28 }
  0xd4   : > { %p25125_p8 = pnand %p25123_p6, %p28830_p0  ;;  %p25131_p7 = scmp.lt.s32.totalorder %s25129_s26, %s25122_s22 }
  0xd6   : > { %p25126_p5 = pneg %p25125_p8  ;;  %p25132_p2 = por %p25131_p7, %p25130_p3 }
  0xd8   : > { %p25133_p11 = pnand %p25132_p2, %p25126_p5 }
  0xda   : > { %25136 = shalt.err (!%p25133_p11)
}
  0xdb   : > { %24581 = dma.hbm_to_vmem [thread:$0]  (!%p28831_p9), %s25494_s16, 1024, %s25573_s4, %s25520_s18, %s28824_s20, %s28824_s20, %s28823_s2  }
  0xdc   : > { %s28832_s17 = sld [smem:[#allocation28_spill]] }
  0xe2   : > { %p28833_p0 = scmp.ne.s32.totalorder %s28832_s17, 0 }
  0xe4   : > { %511 = sbr.rel (%p28833_p0) target bundleno = 6337 (0x18c1), region = 64 }
  0xeb   : > { %s28834_s14 = sld [smem:[#allocation25_spill]] }
  0xf1   : > { %p28835_p1 = scmp.eq.s32.totalorder %s28834_s14, 0 }
  0xf3   : > { %25210 = dma.done.wait (%p28835_p1), [#allocation3], 1024   ;;  %p28836_p12 = pmov %p28835_p1 }
  0xf4   : > { %p28837_p13 = pmov %p28835_p1 }
  0xf5   : > { %25212 = vsyncadd (%p28836_p12), [#allocation3], 4294966272 }
  0xf6   : > { %25214 = dma.done.wait (%p28837_p13), [#allocation6], 1024   ;;  %p28838_p10 = pmov %p28835_p1 }
  0xf7   : > { %s28839_s11 = sld [smem:[#allocation24_spill]]  ;;  %s28840_s12 = sld [smem:[#allocation26_spill]] }
  0xf8   : > { %25216 = vsyncadd (%p28838_p10), [#allocation6], 4294966272  ;;  %s525_s19 = sand.u32 1, %s28834_s14  }
  0xf9   : > { %s526_s20 = scalar_lea.sflag [#allocation9], %s525_s19 }
  0xfd   : > { %s25658_s4 = sand.u32 1, %s28839_s11   ;;  %p28841_p9 = scmp.ne.s32.totalorder %s28840_s12, 0 }
  0xfe   : > { %s25661_s2 = sshll.u32 %s25658_s4, 6 }
  0xff   : > { %s25664_s16 = scalar_lea.vmem [#allocation8], %s25661_s2 }
 0x100   : > { %25218 = dma.done.wait (%p28841_p9), %s526_s20, 1536  }
 0x101   : > { %25220 = vsyncadd (%p28841_p9), %s526_s20, 4294965760  ;;  %s20413_s18 = sshll.u32 %s25658_s4, 5  ;;  %s544_s5 = scalar_lea.sflag [#allocation12], %s525_s19 }
 0x102   : > { %s25671_s25 = scalar_lea.vmem [#allocation10], %s20413_s18  ;;  %s25673_s10 = scalar_lea.vmem [#allocation11], %s20413_s18 }
 0x103   : > { %25222 = dma.done.wait (%p28841_p9), %s544_s5, 1536  }
 0x104   : > { %25224 = vsyncadd (%p28841_p9), %s544_s5, 4294965760  ;;  %v25258_v0 = vmov 0   ;;  %vm649_vm0 = vcmask 261120   ;;  %v638_v1 = vld [vmem:[#allocation5] sm:$0xff]  ;;  %v639_v2 = vld [vmem:[#allocation5 + $0x8] sm:$0xff]  ;;  %s28842_s27 = sld [smem:[#allocation39_spill]] }
 0x105   : > { %24643 = vset.pattern.permute.xlu0 %v25258_v0  ;;  %24644 = vset.pattern.permute.xlu1 %v25258_v0  ;;  %v640_v3 = vld [vmem:[#allocation5 + $0x10] sm:$0xff]  ;;  %v675_v4 = vand.u32 4294901760, %v638_v1  ;;  %v678_v5 = vand.u32 4294901760, %v639_v2  ;;  %v25681_v6 = vld [vmem:[#allocation5 + $0x18] sm:$0xff]  ;;  %v630_v8 = vld [vmem:[#allocation2] sm:$0xff]  ;;  %vm25260_vm5 = vmmov 0  }
 0x106   : > { %v681_v7 = vand.u32 4294901760, %v640_v3  ;;  %v631_v9 = vld [vmem:[#allocation2 + $0x8] sm:$0xff]  ;;  %v684_v10 = vand.u32 4294901760, %v25681_v6  ;;  %v651_v11 = vsel %vm649_vm0, %v630_v8, 0  ;;  %v632_v13 = vld [vmem:[#allocation2 + $0x10] sm:$0xff]  ;;  %v633_v14 = vld [vmem:[#allocation2 + $0x18] sm:$0xff] }
 0x107   : > { %v654_v12 = vsel %vm649_vm0, %v631_v9, 0  ;;  %v25686_v15 = vpack.c.bf16 %v678_v5, %v675_v4  ;;  %v25688_v16 = vand.u32 4294901760, %v651_v11  ;;  %v25692_v18 = vsub.f32 %v638_v1, %v675_v4  ;;  %v634_v19 = vld [vmem:[#allocation2 + $0x20] sm:$0xff]  ;;  %v635_v20 = vld [vmem:[#allocation2 + $0x28] sm:$0xff]  ;;  %v636_v53 = vld [vmem:[#allocation2 + $0x30] sm:$0xff]  ;;  %s28843_s30 = sld [smem:[#allocation41_spill]] }
 0x108   : > { %v25690_v17 = vand.u32 4294901760, %v654_v12  ;;  %v25694_v21 = vpack.c.bf16 %v684_v10, %v681_v7  ;;  %v25696_v22 = vsub.f32 %v639_v2, %v678_v5  ;;  %v657_v23 = vsel %vm649_vm0, %v632_v13, 0  ;;  %v637_v58 = vld [vmem:[#allocation2 + $0x38] sm:$0xff]  ;;  %p623_p4 = scmp.lt.s32.totalorder %s28834_s14, 1  ;;  %s28867_s28 = sld [smem:[#allocation43_spill]] }
 0x109   : > { %v660_v24 = vsel %vm649_vm0, %v633_v14, 0  ;;  %23292 = vmatprep.subr.bf16.mxu1 %v25686_v15  ;;  %v25702_v25 = vsub.f32 %v651_v11, %v25688_v16  ;;  %v826_v27 = vand.u32 4294901760, %v25692_v18  ;;  %23316 = vmatprep.subr.bf16.mxu0 %v25686_v15  ;;  %v25709_v28 = vand.u32 4294901760, %v657_v23  ;;  %s28074_s17 = scalar_lea.vmem [#allocation15], %s25661_s2  ;;  %s556_s11 = scalar_lea.vmem [#allocation13], %s25661_s2 }
 0x10a   : > { %v25705_v26 = vsub.f32 %v654_v12, %v25690_v17  ;;  %23294 = vmatpush3.bf16.msra.mxu1 %v25686_v15  ;;  %v833_v29 = vand.u32 4294901760, %v25696_v22  ;;  %23318 = vmatpush3.bf16.msra.mxu0 %v25686_v15  ;;  %v25714_v30 = vand.u32 4294901760, %v660_v24  ;;  %v663_v31 = vsel %vm649_vm0, %v634_v19, 0  ;;  %s26806_s29 = scalar_select %p623_p4, %s28834_s14, 1 }
 0x10b   : > { %v666_v32 = vsel %vm649_vm0, %v635_v20, 0  ;;  %23296 = vmatprep.subr.bf16.mxu1 %v25694_v21  ;;  %v745_v33 = vand.u32 4294901760, %v25702_v25  ;;  %v827_v35 = vsub.f32 %v25692_v18, %v826_v27  ;;  %v25723_v36 = vsub.f32 %v657_v23, %v25709_v28  ;;  %23320 = vmatprep.subr.bf16.mxu0 %v25694_v21  ;;  %s25264_s12 = smov 32   ;;  %s28876_s19 = sld [smem:[#allocation31_spill]] }
 0x10c   : > { %v755_v34 = vand.u32 4294901760, %v25705_v26  ;;  %v834_v37 = vsub.f32 %v25696_v22, %v833_v29  ;;  %v25728_v38 = vsub.f32 %v660_v24, %v25714_v30  ;;  %v25730_v39 = vand.u32 4294901760, %v663_v31  ;;  %s20433_s20 = sshll.u32 %s28834_s14, 10  ;;  %s20144_s21 = scalar_lea.sflag [#allocation16], %s25658_s4 }
 0x10d   : > { %v25732_v40 = vand.u32 4294901760, %v666_v32  ;;  %v746_v41 = vsub.f32 %v25702_v25, %v745_v33  ;;  %v828_v43 = vand.u32 4294901760, %v827_v35  ;;  %v765_v44 = vand.u32 4294901760, %v25723_v36  ;;  %21415 = vmatprep.mubr.f32.mxu0 %v745_v33 }
 0x10e   : > { %v756_v42 = vsub.f32 %v25705_v26, %v755_v34  ;;  %23298 = vmatpush3.bf16.msra.mxu1 %v25694_v21  ;;  %v835_v45 = vand.u32 4294901760, %v834_v37  ;;  %v775_v46 = vand.u32 4294901760, %v25728_v38  ;;  %v25740_v47 = vsub.f32 %v663_v31, %v25730_v39  ;;  %23322 = vmatpush3.bf16.msra.mxu0 %v25694_v21  ;;  %s625_s26 = scalar_lea.vmem %s28867_s28, %s26806_s29 }
 0x10f   : > { %v25744_v48 = vsub.f32 %v666_v32, %v25732_v40  ;;  %v747_v49 = vand.u32 4294901760, %v746_v41  ;;  %v766_v51 = vsub.f32 %v25723_v36, %v765_v44  ;;  %v25747_v52 = vsub.f32 %v640_v3, %v681_v7  ;;  %v1460_v41 = vld [vmem:[#allocation7] sm:$0xff] }
 0x110   : > { %v757_v50 = vand.u32 4294901760, %v756_v42  ;;  %v23299_v54 = vpack.c.bf16 %v835_v45, %v828_v43  ;;  %v776_v55 = vsub.f32 %v25728_v38, %v775_v46  ;;  %v785_v56 = vand.u32 4294901760, %v25740_v47  ;;  %v1461_v42 = vld [vmem:[#allocation7 + $0x8] sm:$0xff] }
 0x111   : > { %v795_v57 = vand.u32 4294901760, %v25744_v48  ;;  %21355 = vmatprep.mubr.f32.mxu1 %v747_v49  ;;  %v767_v59 = vand.u32 4294901760, %v766_v51  ;;  %v840_v60 = vand.u32 4294901760, %v25747_v52  ;;  %v846_v61 = vsub.f32 %v25681_v6, %v684_v10  ;;  %21416 = vmatmul.mubr.f32.vlgmr.msra.gmra.mrb[0].mxu0 %v755_v34  ;;  %v1463_v49 = vld [vmem:[#allocation7 + $0x18] sm:$0xff]  ;;  %p28878_p8 = scmp.ne.s32.totalorder %s28876_s19, 0 }
 0x112   : > { %v23323_v62 = vpack.c.bf16 %v833_v29, %v826_v27  ;;  %21356 = vmatmul.mubr.f32.vlgmr.msra.gmra.mrb[0].mxu1 %v757_v50  ;;  %23300 = vmatprep.subr.bf16.mxu1 %v23299_v54  ;;  %v777_v63 = vand.u32 4294901760, %v776_v55  ;;  %v786_v1 = vsub.f32 %v25740_v47, %v785_v56  ;;  %v669_v3 = vsel %vm649_vm0, %v636_v53, 0  ;;  %v25779_v27 = vld [vmem:[%s28842_s27] sm:$0xff]  ;;  %s25265_s27 = smov [#allocation15]  }
 0x113   : > { %v796_v2 = vsub.f32 %v25744_v48, %v795_v57  ;;  %23302 = vmatpush3.bf16.msra.mxu1 %v23299_v54  ;;  %21358 = vmatprep.mubr.f32.mxu1 %v767_v59  ;;  %v841_v4 = vsub.f32 %v25747_v52, %v840_v60  ;;  %v847_v5 = vand.u32 4294901760, %v846_v61  ;;  %v25762_v6 = vand.u32 4294901760, %v669_v3  ;;  %s25141_s13 = sshll.u32 %s25265_s27, 4  ;;  %s25142_s13 = int_to_ptr.vmem [resolvable:$false] %s25141_s13 }
 0x114   : > { %v672_v7 = vsel %vm649_vm0, %v637_v58, 0  ;;  %v787_v8 = vand.u32 4294901760, %v786_v1  ;;  %23324 = vmatprep.subr.bf16.mxu0 %v23323_v62  ;;  %21418 = vmatprep.mubr.f32.mxu0 %v765_v44  ;;  %v23307_v32 = vpack.c.bf16 %v25696_v22, %v25692_v18  ;;  %vm1984_vm1 = vcmp.gt.s32.totalorder %v25779_v27, 0  ;;  %s25143_s8 = scalar_lea.vmem %s25142_s13, 2048 }
 0x115   : > { %v25765_v9 = vand.u32 4294901760, %v672_v7  ;;  %v842_v10 = vand.u32 4294901760, %v841_v4  ;;  %v848_v11 = vsub.f32 %v846_v61, %v847_v5  ;;  %v25768_v12 = vsub.f32 %v669_v3, %v25762_v6  ;;  %23326 = vmatpush3.bf16.msra.mxu0 %v23323_v62  ;;  %v20418_v4 = vld [vmem:[%s28843_s30] ss:$0 sm:$0xff] }
 0x116   : > { %v23327_v13 = vpack.c.bf16 %v847_v5, %v840_v60  ;;  %21359 = vmatmul.mubr.f32.gmra.mrb[2].mxu1 %v777_v63  ;;  %v797_v14 = vand.u32 4294901760, %v796_v2  ;;  %21419 = vmatmul.mubr.f32.gmra.mrb[2].mxu0 %v775_v46  ;;  %v1985_v18 = vsel %vm1984_vm1, 1, %v25258_v0  ;;  %v23311_v22 = vpack.c.bf16 %v846_v61, %v25747_v52  ;;  %v1462_v46 = vld [vmem:[#allocation7 + $0x10] sm:$0xff] }
 0x117   : > { %v25771_v19 = vsub.f32 %v672_v7, %v25765_v9  ;;  %21361 = vmatprep.mubr.f32.mxu1 %v787_v8  ;;  %v849_v20 = vand.u32 4294901760, %v848_v11  ;;  %v805_v23 = vand.u32 4294901760, %v25768_v12  ;;  %21435 = vmatprep.mubr.f32.mxu0 %v25688_v16  ;;  %vm2541_vm2 = vcmp.gt.s32.totalorder %v25779_v27, 1 }
 0x118   : > { %23328 = vmatprep.subr.bf16.mxu0 %v23327_v13  ;;  %1987 = vperm.xlu0 %24643, %v1985_v18   ;;  %v2542_v37 = vsel %vm2541_vm2, 1, %v25258_v0  ;;  %vm4191_vm3 = vcmp.gt.s32.totalorder %v25779_v27, 4  ;;  %v1468_v43 = vand.u32 4294901760, %v1460_v41  ;;  %v1471_v44 = vand.u32 4294901760, %v1461_v42 }
 0x119   : > { %v815_v24 = vand.u32 4294901760, %v25771_v19  ;;  %v23303_v29 = vpack.c.bf16 %v849_v20, %v842_v10  ;;  %v806_v31 = vsub.f32 %v25768_v12, %v805_v23  ;;  %23330 = vmatpush3.bf16.msra.mxu0 %v23327_v13  ;;  %v4192_v45 = vsel %vm4191_vm3, 1, %v25258_v0 }
 0x11a   : > { %21362 = vmatmul.mubr.f32.gmra.mrb[4].mxu1 %v797_v14  ;;  %23332 = vmatprep.subr.bf16.mxu0 %v25686_v15  ;;  %vm5291_vm4 = vcmp.gt.s32.totalorder %v25779_v27, 6  ;;  %v28776_v50 = vmov 0.0|0.0   ;;  %v25818_v51 = vpack.c.bf16 %v1471_v44, %v1468_v43  ;;  %v1474_v52 = vand.u32 4294901760, %v1462_v46 }
 0x11b   : > { %v816_v33 = vsub.f32 %v25771_v19, %v815_v24  ;;  %23304 = vmatprep.subr.bf16.mxu1 %v23303_v29  ;;  %v807_v34 = vand.u32 4294901760, %v806_v31  ;;  %v1477_v53 = vand.u32 4294901760, %v1463_v49  ;;  %v5292_v54 = vsel %vm5291_vm4, 1, %v25258_v0 }
 0x11c   : > { %23306 = vmatpush3.bf16.msra.mxu1 %v23303_v29  ;;  %21436 = vmatmul.mubr.f32.vlgmr.msra.gmra.mrb[0].mxu0 %v25690_v17  ;;  %vm1999_vm6 = vcmask 1041409   ;;  %vm2002_vm7 = vcmask 1042434   ;;  %vm2005_vm8 = vcmask 1043459   ;;  %vm2008_vm9 = vcmask 1044484  }
 0x11d   : > { %v817_v35 = vand.u32 4294901760, %v816_v33  ;;  %21364 = vmatprep.mubr.f32.mxu1 %v807_v34  ;;  %23308 = vmatprep.subr.bf16.mxu1 %v23307_v32  ;;  %vm2011_vm10 = vcmask 1045509   ;;  %vm2014_vm11 = vcmask 1046534   ;;  %vm2017_vm12 = vcmask 1047559  }
 0x11e   : > { %21438 = vmatprep.mubr.f32.mxu0 %v25709_v28  ;;  %23334 = vmatpush3.bf16.msra.mxu0 %v25686_v15  ;;  %vm3091_vm14 = vcmp.gt.s32.totalorder %v25779_v27, 2  ;;  %vm3641_vm15 = vcmp.gt.s32.totalorder %v25779_v27, 3  ;;  %vm4741_vm1 = vcmp.gt.s32.totalorder %v25779_v27, 5  ;;  %vm5841_vm2 = vcmp.gt.s32.totalorder %v25779_v27, 7 }
 0x11f   : > { %21365 = vmatmul.mubr.f32.gmra.mrb[6].mxu1 %v817_v35  ;;  %23336 = vmatprep.subr.bf16.mxu0 %v25694_v21 }
 0x120   : > { %21375 = vmatprep.mubr.f32.mxu1 %v25688_v16  ;;  %21439 = vmatmul.mubr.f32.gmra.mrb[2].mxu0 %v25714_v30 }
 0x121   : > { %21441 = vmatprep.mubr.f32.mxu0 %v25730_v39  ;;  %2544 = vperm.xlu0 %24643, %v2542_v37  }
 0x122   : > { %23338 = vmatpush3.bf16.msra.mxu0 %v25694_v21 }
 0x123   : > { %21376 = vmatmul.mubr.f32.vlgmr.msra.gmra.mrb[0].mxu1 %v25690_v17  ;;  %23411 = vmatprep.subr.bf16.mxu0 %v28776_v50 }
 0x124   : > { %23310 = vmatpush3.bf16.msra.mxu1 %v23307_v32  ;;  %21378 = vmatprep.mubr.f32.mxu1 %v25709_v28 }
 0x125   : > { %23312 = vmatprep.subr.bf16.mxu1 %v23311_v22  ;;  %21442 = vmatmul.mubr.f32.gmra.mrb[4].mxu0 %v25732_v40 }
 0x126   : > { %21444 = vmatprep.mubr.f32.mxu0 %v25762_v6  ;;  %4194 = vperm.xlu0 %24643, %v4192_v45  }
 0x127   : > { %21379 = vmatmul.mubr.f32.gmra.mrb[2].mxu1 %v25714_v30 }
 0x128   : > { %21381 = vmatprep.mubr.f32.mxu1 %v25730_v39  ;;  %23314 = vmatpush3.bf16.msra.mxu1 %v23311_v22 }
 0x129   : > { %21445 = vmatmul.mubr.f32.gmra.mrb[6].mxu0 %v25765_v9  ;;  %24059 = vmatprep.subr.bf16.mxu1 %v25686_v15 }
 0x12a   : > { %21455 = vmatprep.mubr.f32.mxu0 %v25688_v16  ;;  %5294 = vperm.xlu0 %24643, %v5292_v54   ;;  %v25826_v16 = vpack.c.bf16 %v1477_v53, %v1474_v52 }
 0x12b   : > { %21382 = vmatmul.mubr.f32.gmra.mrb[4].mxu1 %v25732_v40 }
 0x12c   : > { %21384 = vmatprep.mubr.f32.mxu1 %v25762_v6 }
 0x12d   : > { %21456 = vmatmul.mubr.f32.vlgmr.msra.gmra.mrb[0].mxu0 %v25690_v17  ;;  %v1548_v17 = vsub.f32 %v1460_v41, %v1468_v43 }
 0x12e   : > { %21458 = vmatprep.mubr.f32.mxu0 %v25709_v28  ;;  %23413 = vmatpush3.bf16.msra.mxu0 %v25818_v51 }
 0x12f   : > { %21385 = vmatmul.mubr.f32.gmra.mrb[6].mxu1 %v25765_v9  ;;  %23414 = vmatprep.subr.bf16.mxu0 %v28776_v50 }
 0x130   : > { %21395 = vmatprep.mubr.f32.mxu1 %v25702_v25  ;;  %6618 = vperm.xlu0 %24643, %v25779_v27   ;;  %v1555_v25 = vsub.f32 %v1461_v42, %v1471_v44 }
 0x131   : > { %21459 = vmatmul.mubr.f32.gmra.mrb[2].mxu0 %v25714_v30  ;;  %v1562_v30 = vsub.f32 %v1462_v46, %v1474_v52 }
 0x132   : > { %21461 = vmatprep.mubr.f32.mxu0 %v25730_v39  ;;  %23416 = vmatpush3.bf16.msra.mxu0 %v25826_v16  ;;  %v1556_v28 = vand.u32 4294901760, %v1555_v25  ;;  %v25874_v61 = vpack.c.bf16 %v1555_v25, %v1548_v17 }
 0x133   : > { %21396 = vmatmul.mubr.f32.vlgmr.msra.gmra.mrb[0].mxu1 %v25705_v26  ;;  %23417 = vmatprep.subr.bf16.mxu0 %v28776_v50  ;;  %v1549_v26 = vand.u32 4294901760, %v1548_v17  ;;  %v1563_v39 = vand.u32 4294901760, %v1562_v30 }
 0x134   : > { %24061 = vmatpush3.bf16.msra.mxu1 %v25686_v15  ;;  %21398 = vmatprep.mubr.f32.mxu1 %v25723_v36  ;;  %v28774_v15 = vmov 0.0   ;;  %v1569_v36 = vsub.f32 %v1463_v49, %v1477_v53 }
 0x135   : > { %24060 = vmatprep.subr.bf16.mxu1 %v25694_v21  ;;  %21462 = vmatmul.mubr.f32.gmra.mrb[4].mxu0 %v25732_v40  ;;  %v1564_v59 = vsub.f32 %v1562_v30, %v1563_v39  ;;  %v25892_v63 = vpack.c.bf16 %v1556_v28, %v1549_v26 }
 0x136   : > { %21464 = vmatprep.mubr.f32.mxu0 %v25762_v6  ;;  %v1570_v40 = vand.u32 4294901760, %v1569_v36  ;;  %v25879_v62 = vpack.c.bf16 %v1569_v36, %v1562_v30 }
 0x137   : > { %21399 = vmatmul.mubr.f32.gmra.mrb[2].mxu1 %v25728_v38  ;;  %v1557_v38 = vsub.f32 %v1555_v25, %v1556_v28 }
 0x138   : > { %21401 = vmatprep.mubr.f32.mxu1 %v25740_v47  ;;  %24062 = vmatpush3.bf16.msra.mxu1 %v25694_v21  ;;  %v1550_v21 = vsub.f32 %v1548_v17, %v1549_v26  ;;  %v1571_v60 = vsub.f32 %v1569_v36, %v1570_v40  ;;  %v25897_v1 = vpack.c.bf16 %v1570_v40, %v1563_v39 }
 0x139   : > { %23339 = vmatprep.subr.bf16.mxu1 %v28776_v50  ;;  %21465 = vmatmul.mubr.f32.gmra.mrb[6].mxu0 %v25765_v9  ;;  %v1558_v58 = vand.u32 4294901760, %v1557_v38 }
 0x13a   : > { %21607 = vmatprep.mubr.msk.f32.mxu0 %vm25260_vm5, %v28774_v15  ;;  %v1551_v55 = vand.u32 4294901760, %v1550_v21 }
 0x13b   : > { %21402 = vmatmul.mubr.f32.gmra.mrb[4].mxu1 %v25744_v48  ;;  %v1565_v48 = vand.u32 4294901760, %v1564_v59 }
 0x13c   : > { %21404 = vmatprep.mubr.f32.mxu1 %v25768_v12  ;;  %v25863_v47 = vpack.c.bf16 %v1558_v58, %v1551_v55 }
 0x13f   : > { %21405 = vmatmul.mubr.f32.gmra.mrb[6].mxu1 %v25771_v19 }
 0x140   : > { %21421 = vmatprep.mubr.f32.mxu1 %v785_v56  ;;  %v1572_v56 = vand.u32 4294901760, %v1571_v60 }
 0x143   : > { %21422 = vmatmul.mubr.f32.vlgmr.msra.gmra.mrb[4].mxu1 %v795_v57  ;;  %v25868_v57 = vpack.c.bf16 %v1572_v56, %v1565_v48 }
 0x144   : > { %23341 = vmatpush3.bf16.msra.mxu1 %v25818_v51  ;;  %21424 = vmatprep.mubr.f32.mxu1 %v805_v23 }
 0x145   : > { %23342 = vmatprep.subr.bf16.mxu1 %v28776_v50 }
 0x147   : > { %21425 = vmatmul.mubr.f32.gmra.mrb[6].mxu1 %v815_v24 }
 0x148   : > { %23344 = vmatpush3.bf16.msra.mxu1 %v25826_v16  ;;  %21475 = vmatprep.mubr.msk.f32.mxu1 %vm25260_vm5, %v28774_v15 }
 0x149   : > { %23345 = vmatprep.subr.bf16.mxu1 %v28776_v50 }
 0x14b   : > { %21476 = vmatmul.mubr.f32.vlgmr.msra.gmra.mrb[8].mxu1 %v28774_v15 }
 0x14c   : > { %23347 = vmatpush3.bf16.msra.mxu1 %v25863_v47  ;;  %21486 = vmatprep.mubr.msk.f32.mxu1 %vm25260_vm5, %v28774_v15 }
 0x14d   : > { %23348 = vmatprep.subr.bf16.mxu1 %v28776_v50 }
 0x150   : > { %23350 = vmatpush3.bf16.msra.mxu1 %v25868_v57 }
 0x151   : > { %23351 = vmatprep.subr.bf16.mxu1 %v28776_v50 }
 0x153   : > { %21487 = vmatmul.mubr.f32.vlgmr.msra.gmra.mrb[8].mxu1 %v28774_v15 }
 0x154   : > { %23353 = vmatpush3.bf16.msra.mxu1 %v25874_v61  ;;  %21497 = vmatprep.mubr.msk.f32.mxu1 %vm25260_vm5, %v28774_v15 }
 0x155   : > { %23354 = vmatprep.subr.bf16.mxu1 %v28776_v50 }
 0x158   : > { %23356 = vmatpush3.bf16.msra.mxu1 %v25879_v62 }
 0x159   : > { %23357 = vmatprep.subr.bf16.mxu1 %v28776_v50 }
 0x15b   : > { %21498 = vmatmul.mubr.f32.vlgmr.msra.gmra.mrb[8].mxu1 %v28774_v15 }
 0x15c   : > { %23359 = vmatpush3.bf16.msra.mxu1 %v25818_v51  ;;  %21508 = vmatprep.mubr.msk.f32.mxu1 %vm25260_vm5, %v28774_v15 }
 0x15d   : > { %23360 = vmatprep.subr.bf16.mxu1 %v28776_v50 }
 0x160   : > { %23362 = vmatpush3.bf16.msra.mxu1 %v25826_v16 }
 0x161   : > { %23363 = vmatprep.subr.bf16.mxu1 %v28776_v50 }
 0x163   : > { %21509 = vmatmul.mubr.f32.vlgmr.msra.gmra.mrb[8].mxu1 %v28774_v15 }
 0x164   : > { %23365 = vmatpush3.bf16.msra.mxu1 %v25892_v63  ;;  %21519 = vmatprep.mubr.msk.f32.mxu1 %vm25260_vm5, %v28774_v15 }
 0x165   : > { %23366 = vmatprep.subr.bf16.mxu1 %v28776_v50 }
 0x168   : > { %23368 = vmatpush3.bf16.msra.mxu1 %v25897_v1 }
 0x169   : > { %23369 = vmatprep.subr.bf16.mxu1 %v28776_v50 }
 0x16b   : > { %21520 = vmatmul.mubr.f32.vlgmr.msra.gmra.mrb[8].mxu1 %v28774_v15 }
 0x16c   : > { %23371 = vmatpush3.bf16.msra.mxu1 %v25818_v51  ;;  %21530 = vmatprep.mubr.msk.f32.mxu1 %vm25260_vm5, %v28774_v15 }
 0x16d   : > { %23372 = vmatprep.subr.bf16.mxu1 %v28776_v50 }
 0x170   : > { %23374 = vmatpush3.bf16.msra.mxu1 %v25826_v16 }
 0x171   : > { %23375 = vmatprep.subr.bf16.mxu1 %v28776_v50 }
 0x173   : > { %21531 = vmatmul.mubr.f32.vlgmr.msra.gmra.mrb[8].mxu1 %v28774_v15 }
 0x174   : > { %23377 = vmatpush3.bf16.msra.mxu1 %v25818_v51  ;;  %21541 = vmatprep.mubr.msk.f32.mxu1 %vm25260_vm5, %v28774_v15 }
 0x175   : > { %23378 = vmatprep.subr.bf16.mxu1 %v28776_v50 }
 0x178   : > { %23380 = vmatpush3.bf16.msra.mxu1 %v25826_v16 }
 0x179   : > { %23381 = vmatprep.subr.bf16.mxu1 %v28776_v50 }
 0x200   : > { %v21457_v2 = vpop.f32.mrb[0].mxu0 }
 0x201   : > { %v1414_v3 = vpop.f32.mrb[1].mxu0 }
 0x204   : > { %v21460_v5 = vpop.f32.mrb[2].mxu0 }
 0x205   : > { %v1426_v6 = vpop.f32.mrb[3].mxu0 }
 0x206   : > { %v21397_v7 = vpop.f32.mrb[0].mxu1 }
 0x207   : > { %v24063_v8 = vadd.f32 %v21397_v7, %v20418_v4  ;;  %v1032_v9 = vpop.f32.mrb[1].mxu1 }
 0x208   : > { %v24065_v10 = vadd.f32 %v20418_v4, %v1032_v9  ;;  %v21463_v11 = vpop.f32.mrb[4].mxu0 }
 0x209   : > { %v25921_v12 = vadd.f32 %v24063_v8, %v21457_v2  ;;  %v1438_v13 = vpop.f32.mrb[5].mxu0 }
 0x20a   : > { %v25923_v14 = vadd.f32 %v24065_v10, %v1414_v3  ;;  %v21400_v19 = vpop.f32.mrb[2].mxu1 }
 0x20b   : > { %v24067_v20 = vadd.f32 %v21400_v19, %v20418_v4  ;;  %v1046_v23 = vpop.f32.mrb[3].mxu1 }
 0x20c   : > { %v24069_v24 = vadd.f32 %v20418_v4, %v1046_v23  ;;  %v21466_v29 = vpop.f32.mrb[6].mxu0 }
 0x20d   : > { %v25925_v31 = vadd.f32 %v24067_v20, %v21460_v5  ;;  %v1450_v32 = vpop.f32.mrb[7].mxu0 }
 0x20e   : > { %v25927_v33 = vadd.f32 %v24069_v24, %v1426_v6 }
 0x216   : > { %v21423_v34 = vpop.f32.mrb[4].mxu1 }
 0x217   : > { %v24071_v35 = vadd.f32 %v21423_v34, %v20418_v4  ;;  %v1190_v18 = vpop.f32.mrb[5].mxu1 }
 0x218   : > { %v24073_v22 = vadd.f32 %v20418_v4, %v1190_v18 }
 0x219   : > { %v25929_v37 = vadd.f32 %v24071_v35, %v21463_v11 }
 0x21a   : > { %v25931_v41 = vadd.f32 %v24073_v22, %v1438_v13  ;;  %v21426_v42 = vpop.f32.mrb[6].mxu1 }
 0x21b   : > { %v24075_v43 = vadd.f32 %v21426_v42, %v20418_v4  ;;  %v1206_v44 = vpop.f32.mrb[7].mxu1 }
 0x21c   : > { %v24077_v45 = vadd.f32 %v20418_v4, %v1206_v44 }
 0x21d   : > { %v25933_v46 = vadd.f32 %v24075_v43, %v21466_v29 }
 0x21e   : > { %v25935_v49 = vadd.f32 %v24077_v45, %v1450_v32  ;;  %v1988_v32 = vpop.permute.xlu0 %1987 }
 0x21f   : > { %vm1989_vm13 = vcmp.eq.s32.totalorder %v1988_v32, 1 }
 0x246   : > { %v1948_v52 = vpop.f32.mrb[8].mxu1 }
 0x247   : > { %v1953_v53 = vrot.slane %v1948_v52, 1  ;;  %v1954_v54 = vrot.slane %v1948_v52, 2  ;;  %v1955_v17 = vrot.slane %v1948_v52, 3  ;;  %v1968_v25 = vadd.f32 %v25923_v14, %v1948_v52  ;;  %v21532_v26 = vpop.f32.mrb[9].mxu1 }
 0x248   : > { %v1956_v28 = vrot.slane %v1948_v52, 4  ;;  %v1957_v30 = vrot.slane %v1948_v52, 5  ;;  %v1958_v36 = vrot.slane %v1948_v52, 6  ;;  %v1959_v38 = vrot.slane %v1948_v52, 7 }
 0x249   : > { %v1969_v21 = vadd.f32 %v25921_v12, %v1953_v53  ;;  %v1970_v39 = vadd.f32 %v25927_v33, %v1954_v54  ;;  %v1971_v40 = vadd.f32 %v25925_v31, %v1955_v17  ;;  %24645 = vtanh.f32 %v1968_v25 }
 0x24a   : > { %v1972_v55 = vadd.f32 %v25931_v41, %v1956_v28  ;;  %v1973_v58 = vadd.f32 %v25929_v37, %v1957_v30  ;;  %v1974_v59 = vadd.f32 %v25935_v49, %v1958_v36  ;;  %v1975_v60 = vadd.f32 %v25933_v46, %v1959_v38 }
 0x24b   : > { %24647 = vtanh.f32 %v1969_v21  ;;  %v3092_v17 = vsel %vm3091_vm14, 1, %v25258_v0  ;;  %v3642_v25 = vsel %vm3641_vm15, 1, %v25258_v0  ;;  %v4742_v26 = vsel %vm4741_vm1, 1, %v25258_v0 }
 0x24c   : > { %24649 = vtanh.f32 %v1970_v39  ;;  %3094 = vperm.xlu1 %24644, %v3092_v17   ;;  %v5842_v28 = vsel %vm5841_vm2, 1, %v25258_v0  ;;  %vm6561_vm14 = vcmask 1041408   ;;  %vm6570_vm1 = vcmask 1042432  }
 0x24d   : > { %24651 = vtanh.f32 %v1971_v40 }
 0x24e   : > { %24653 = vtanh.f32 %v1972_v55 }
 0x24f   : > { %24655 = vtanh.f32 %v1973_v58 }
 0x250   : > { %24657 = vtanh.f32 %v1974_v59  ;;  %3644 = vperm.xlu1 %24644, %v3642_v25  }
 0x251   : > { %24659 = vtanh.f32 %v1975_v60 }
 0x253   : > { %v24646_v48 = vpop.eup %24645 }
 0x254   : > { %4744 = vperm.xlu1 %24644, %v4742_v26  }
 0x255   : > { %v24648_v56 = vpop.eup %24647 }
 0x256   : > { %v24650_v2 = vpop.eup %24649  ;;  %v1998_v3 = vrot.slane %v24648_v56, 7 }
 0x257   : > { %v24652_v4 = vpop.eup %24651  ;;  %v2001_v5 = vrot.slane %v24650_v2, 6 }
 0x258   : > { %v24654_v6 = vpop.eup %24653  ;;  %v2000_v7 = vsel %vm1999_vm6, %v1998_v3, %v24646_v48  ;;  %v2004_v8 = vrot.slane %v24652_v4, 5  ;;  %5844 = vperm.xlu1 %24644, %v5842_v28  }
 0x259   : > { %v24656_v9 = vpop.eup %24655  ;;  %v2003_v10 = vsel %vm2002_vm7, %v2001_v5, %v2000_v7  ;;  %v2007_v11 = vrot.slane %v24654_v6, 4 }
 0x25a   : > { %v24658_v13 = vpop.eup %24657  ;;  %v2006_v19 = vsel %vm2005_vm8, %v2004_v8, %v2003_v10  ;;  %v2010_v20 = vrot.slane %v24656_v9, 3 }
 0x25b   : > { %v24660_v23 = vpop.eup %24659  ;;  %v2009_v24 = vsel %vm2008_vm9, %v2007_v11, %v2006_v19  ;;  %v2013_v29 = vrot.slane %v24658_v13, 2 }
 0x25c   : > { %v2012_v34 = vsel %vm2011_vm10, %v2010_v20, %v2009_v24  ;;  %v2016_v35 = vrot.slane %v24660_v23, 1 }
 0x25d   : > { %v2015_v18 = vsel %vm2014_vm11, %v2013_v29, %v2012_v34 }
 0x25e   : > { %v2018_v22 = vsel %vm2017_vm12, %v2016_v35, %v2015_v18 }
 0x25f   : > { %v25952_v42 = vsel %vm1989_vm13, %v2018_v22, 0.0  ;;  %vm6552_vm13 = vcmask 1040384  }
 0x260   : > { %28844 = vst [vmem:[#allocation32_spill] sm:$0xff] %v25952_v42  ;;  %v2022_v43 = vsel %vm649_vm0, %v25952_v42, 0 }
 0x261   : > { %v2093_v44 = vand.u32 4294901760, %v2022_v43 }
 0x263   : > { %v2094_v45 = vsub.f32 %v2022_v43, %v2093_v44 }
 0x265   : > { %v2095_v52 = vand.u32 4294901760, %v2094_v45 }
 0x267   : > { %v2096_v53 = vsub.f32 %v2094_v45, %v2095_v52 }
 0x269   : > { %v2097_v54 = vand.u32 4294901760, %v2096_v53 }
 0x26b   : > { %21542 = vmatmul.mubr.f32.vlgmr.msra.gmra.mrb[10].mxu1 %v2097_v54 }
 0x26c   : > { %23383 = vmatpush3.bf16.msra.mxu1 %v25863_v47  ;;  %21552 = vmatprep.mubr.msk.f32.mxu1 %vm25260_vm5, %v28774_v15 }
 0x26d   : > { %23384 = vmatprep.subr.bf16.mxu1 %v28776_v50 }
 0x270   : > { %23386 = vmatpush3.bf16.msra.mxu1 %v25868_v57 }
 0x271   : > { %23387 = vmatprep.subr.bf16.mxu1 %v28776_v50 }
 0x273   : > { %21553 = vmatmul.mubr.f32.vlgmr.msra.gmra.mrb[10].mxu1 %v2093_v44 }
 0x274   : > { %23389 = vmatpush3.bf16.msra.mxu1 %v25874_v61  ;;  %21563 = vmatprep.mubr.msk.f32.mxu1 %vm25260_vm5, %v28774_v15 }
 0x275   : > { %23390 = vmatprep.subr.bf16.mxu1 %v28776_v50 }
 0x278   : > { %23392 = vmatpush3.bf16.msra.mxu1 %v25879_v62 }
 0x279   : > { %23393 = vmatprep.subr.bf16.mxu1 %v28776_v50 }
 0x27b   : > { %21564 = vmatmul.mubr.f32.vlgmr.msra.gmra.mrb[10].mxu1 %v2094_v45  ;;  %v2545_v45 = vpop.permute.xlu0 %2544 }
 0x27c   : > { %23395 = vmatpush3.bf16.msra.mxu1 %v25818_v51  ;;  %21574 = vmatprep.mubr.msk.f32.mxu1 %vm25260_vm5, %v28774_v15  ;;  %vm2546_vm3 = vcmp.eq.s32.totalorder %v2545_v45, 1 }
 0x27d   : > { %23396 = vmatprep.subr.bf16.mxu1 %v28776_v50 }
 0x280   : > { %23398 = vmatpush3.bf16.msra.mxu1 %v25826_v16 }
 0x281   : > { %23399 = vmatprep.subr.bf16.mxu1 %v28776_v50 }
 0x283   : > { %21575 = vmatmul.mubr.f32.vlgmr.msra.gmra.mrb[10].mxu1 %v2095_v52 }
 0x284   : > { %23401 = vmatpush3.bf16.msra.mxu1 %v25892_v63  ;;  %21585 = vmatprep.mubr.msk.f32.mxu1 %vm25260_vm5, %v28774_v15 }
 0x285   : > { %23402 = vmatprep.subr.bf16.mxu1 %v28776_v50 }
 0x288   : > { %23404 = vmatpush3.bf16.msra.mxu1 %v25897_v1 }
 0x289   : > { %23405 = vmatprep.subr.bf16.mxu1 %v28776_v50 }
 0x28b   : > { %21586 = vmatmul.mubr.f32.vlgmr.msra.gmra.mrb[10].mxu1 %v2093_v44 }
 0x28c   : > { %23407 = vmatpush3.bf16.msra.mxu1 %v25818_v51  ;;  %21596 = vmatprep.mubr.msk.f32.mxu1 %vm25260_vm5, %v28774_v15 }
 0x28d   : > { %23408 = vmatprep.subr.bf16.mxu1 %v28776_v50 }
 0x290   : > { %23410 = vmatpush3.bf16.msra.mxu1 %v25826_v16 }
 0x291   : > { %23447 = vmatprep.subr.bf16.mxu1 %v28776_v50 }
 0x293   : > { %21597 = vmatmul.mubr.f32.vlgmr.msra.gmra.mrb[10].mxu1 %v2093_v44 }
 0x294   : > { %23449 = vmatpush3.bf16.msra.mxu1 %v25818_v51  ;;  %21673 = vmatprep.mubr.msk.f32.mxu1 %vm25260_vm5, %v28774_v15 }
 0x295   : > { %23450 = vmatprep.subr.bf16.mxu1 %v28776_v50 }
 0x298   : > { %23452 = vmatpush3.bf16.msra.mxu1 %v25826_v16 }
 0x299   : > { %23453 = vmatprep.subr.bf16.mxu1 %v28776_v50 }
 0x366   : > { %v2505_v30 = vpop.f32.mrb[10].mxu1 }
 0x367   : > { %v2510_v36 = vrot.slane %v2505_v30, 7  ;;  %v2511_v21 = vrot.slane %v2505_v30, 1  ;;  %v2512_v38 = vrot.slane %v2505_v30, 2  ;;  %v2513_v39 = vrot.slane %v2505_v30, 3  ;;  %v21598_v40 = vpop.f32.mrb[11].mxu1 }
 0x368   : > { %v2514_v55 = vrot.slane %v2505_v30, 4  ;;  %v2515_v58 = vrot.slane %v2505_v30, 5  ;;  %v2526_v59 = vadd.f32 %v25921_v12, %v2505_v30  ;;  %v2516_v60 = vrot.slane %v2505_v30, 6 }
 0x369   : > { %v2525_v48 = vadd.f32 %v25923_v14, %v2510_v36  ;;  %v2527_v56 = vadd.f32 %v25927_v33, %v2511_v21  ;;  %v2528_v27 = vadd.f32 %v25925_v31, %v2512_v38  ;;  %v2529_v0 = vadd.f32 %v25931_v41, %v2513_v39 }
 0x36a   : > { %24661 = vtanh.f32 %v2526_v59  ;;  %v2530_v2 = vadd.f32 %v25929_v37, %v2514_v55  ;;  %v2531_v3 = vadd.f32 %v25935_v49, %v2515_v58  ;;  %v2532_v4 = vadd.f32 %v25933_v46, %v2516_v60 }
 0x36b   : > { %24663 = vtanh.f32 %v2525_v48 }
 0x36c   : > { %24665 = vtanh.f32 %v2527_v56 }
 0x36d   : > { %24667 = vtanh.f32 %v2528_v27 }
 0x36e   : > { %24669 = vtanh.f32 %v2529_v0 }
 0x36f   : > { %24671 = vtanh.f32 %v2530_v2 }
 0x370   : > { %24673 = vtanh.f32 %v2531_v3 }
 0x371   : > { %24675 = vtanh.f32 %v2532_v4 }
 0x374   : > { %v24662_v5 = vpop.eup %24661 }
 0x375   : > { %v24664_v6 = vpop.eup %24663 }
 0x376   : > { %v24666_v7 = vpop.eup %24665  ;;  %v2555_v8 = vrot.slane %v24664_v6, 1 }
 0x377   : > { %v24668_v9 = vpop.eup %24667  ;;  %v2557_v10 = vrot.slane %v24666_v7, 7  ;;  %v28773_v7 = vlaneseq }
 0x378   : > { %v24670_v11 = vpop.eup %24669  ;;  %v2556_v13 = vsel %vm1999_vm6, %v24662_v5, %v2555_v8  ;;  %v2559_v19 = vrot.slane %v24668_v9, 6  ;;  %v25262_v5 = vmov 1966171168  }
 0x379   : > { %v24672_v20 = vpop.eup %24671  ;;  %v2558_v23 = vsel %vm2002_vm7, %v2557_v10, %v2556_v13  ;;  %v2561_v24 = vrot.slane %v24670_v11, 5  ;;  %v5873_v6 = vunpack.c.l.s4 %v25262_v5  ;;  %v5876_v11 = vshrl.u32 %v28773_v7, 7 }
 0x37a   : > { %v24674_v29 = vpop.eup %24673  ;;  %v2560_v32 = vsel %vm2005_vm8, %v2559_v19, %v2558_v23  ;;  %v2563_v34 = vrot.slane %v24672_v20, 4 }
 0x37b   : > { %v24676_v35 = vpop.eup %24675  ;;  %v2562_v18 = vsel %vm2008_vm9, %v2561_v24, %v2560_v32  ;;  %v2565_v22 = vrot.slane %v24674_v29, 3  ;;  %v5874_v10 = vunpack.c.0.s8 %v5873_v6  ;;  %v26094_v5 = vsub.s32 0, %v5876_v11 }
 0x37c   : > { %v2567_v43 = vrot.slane %v24676_v35, 2  ;;  %v2564_v44 = vsel %vm2011_vm10, %v2563_v34, %v2562_v18 }
 0x37d   : > { %v2566_v52 = vsel %vm2014_vm11, %v2565_v22, %v2564_v44  ;;  %v26065_v19 = vsub.s32 %v5874_v10, %v5876_v11 }
 0x37e   : > { %v2568_v53 = vsel %vm2017_vm12, %v2567_v43, %v2566_v52 }
 0x37f   : > { %v26016_v54 = vsel %vm2546_vm3, %v2568_v53, %v25952_v42  ;;  %vm6579_vm3 = vcmask 1043456  }
 0x380   : > { %28845 = vst [vmem:[#allocation33_spill] sm:$0xff] %v26016_v54  ;;  %v2572_v17 = vsel %vm649_vm0, %v26016_v54, 0  ;;  %v5935_v29 = vrot.slane %v26016_v54, %v26065_v19 }
 0x381   : > { %v2643_v25 = vand.u32 4294901760, %v2572_v17 }
 0x382   : > { %v5943_v53 = vcombine.high %v5935_v29, %v5935_v29 }
 0x383   : > { %v2644_v26 = vsub.f32 %v2572_v17, %v2643_v25 }
 0x385   : > { %v2645_v28 = vand.u32 4294901760, %v2644_v26 }
 0x387   : > { %v2646_v30 = vsub.f32 %v2644_v26, %v2645_v28 }
 0x389   : > { %v2647_v36 = vand.u32 4294901760, %v2646_v30  ;;  %v3095_v30 = vpop.permute.xlu1 %3094 }
 0x38a   : > { %vm3096_vm4 = vcmp.eq.s32.totalorder %v3095_v30, 1 }
 0x38b   : > { %21608 = vmatmul.mubr.f32.vlgmr.msra.gmra.mrb[8].mxu0 %v2647_v36 }
 0x38c   : > { %23419 = vmatpush3.bf16.msra.mxu0 %v25863_v47  ;;  %21618 = vmatprep.mubr.msk.f32.mxu0 %vm25260_vm5, %v28774_v15 }
 0x38d   : > { %23420 = vmatprep.subr.bf16.mxu0 %v28776_v50 }
 0x390   : > { %23422 = vmatpush3.bf16.msra.mxu0 %v25868_v57 }
 0x391   : > { %23423 = vmatprep.subr.bf16.mxu0 %v28776_v50 }
 0x393   : > { %21619 = vmatmul.mubr.f32.vlgmr.msra.gmra.mrb[8].mxu0 %v2643_v25 }
 0x394   : > { %23425 = vmatpush3.bf16.msra.mxu0 %v25874_v61  ;;  %21629 = vmatprep.mubr.msk.f32.mxu0 %vm25260_vm5, %v28774_v15 }
 0x395   : > { %23426 = vmatprep.subr.bf16.mxu0 %v28776_v50 }
 0x398   : > { %23428 = vmatpush3.bf16.msra.mxu0 %v25879_v62 }
 0x399   : > { %23429 = vmatprep.subr.bf16.mxu0 %v28776_v50 }
 0x39b   : > { %21630 = vmatmul.mubr.f32.vlgmr.msra.gmra.mrb[8].mxu0 %v2644_v26 }
 0x39c   : > { %23431 = vmatpush3.bf16.msra.mxu0 %v25818_v51  ;;  %21640 = vmatprep.mubr.msk.f32.mxu0 %vm25260_vm5, %v28774_v15 }
 0x39d   : > { %23432 = vmatprep.subr.bf16.mxu0 %v28776_v50 }
 0x3a0   : > { %23434 = vmatpush3.bf16.msra.mxu0 %v25826_v16 }
 0x3a1   : > { %23435 = vmatprep.subr.bf16.mxu0 %v28776_v50 }
 0x3a3   : > { %21641 = vmatmul.mubr.f32.vlgmr.msra.gmra.mrb[8].mxu0 %v2645_v28  ;;  %v5878_v28 = vrot.slane %v25952_v42, %v26065_v19 }
 0x3a4   : > { %23437 = vmatpush3.bf16.msra.mxu0 %v25892_v63  ;;  %21651 = vmatprep.mubr.msk.f32.mxu0 %vm25260_vm5, %v28774_v15 }
 0x3a5   : > { %23438 = vmatprep.subr.bf16.mxu0 %v28776_v50 }
 0x3a8   : > { %23440 = vmatpush3.bf16.msra.mxu0 %v25897_v1 }
 0x3a9   : > { %23441 = vmatprep.subr.bf16.mxu0 %v28776_v50 }
 0x3ab   : > { %21652 = vmatmul.mubr.f32.vlgmr.msra.gmra.mrb[8].mxu0 %v2643_v25 }
 0x3ac   : > { %23443 = vmatpush3.bf16.msra.mxu0 %v25818_v51  ;;  %21662 = vmatprep.mubr.msk.f32.mxu0 %vm25260_vm5, %v28774_v15 }
 0x3ad   : > { %23444 = vmatprep.subr.bf16.mxu0 %v28776_v50 }
 0x3b0   : > { %23446 = vmatpush3.bf16.msra.mxu0 %v25826_v16 }
 0x3b1   : > { %23483 = vmatprep.subr.bf16.mxu0 %v28776_v50 }
 0x3b3   : > { %21663 = vmatmul.mubr.f32.vlgmr.msra.gmra.mrb[8].mxu0 %v2643_v25 }
 0x3b4   : > { %23485 = vmatpush3.bf16.msra.mxu0 %v25818_v51  ;;  %21739 = vmatprep.mubr.msk.f32.mxu0 %vm25260_vm5, %v28774_v15 }
 0x3b5   : > { %23486 = vmatprep.subr.bf16.mxu0 %v28776_v50 }
 0x3b8   : > { %23488 = vmatpush3.bf16.msra.mxu0 %v25826_v16 }
 0x3b9   : > { %23489 = vmatprep.subr.bf16.mxu0 %v28776_v50 }
 0x486   : > { %v3055_v21 = vpop.f32.mrb[8].mxu0 }
 0x487   : > { %v3060_v38 = vrot.slane %v3055_v21, 6  ;;  %v3061_v39 = vrot.slane %v3055_v21, 7  ;;  %v3062_v40 = vrot.slane %v3055_v21, 1  ;;  %v3063_v55 = vrot.slane %v3055_v21, 2  ;;  %v21664_v58 = vpop.f32.mrb[9].mxu0 }
 0x488   : > { %v3077_v59 = vadd.f32 %v25927_v33, %v3055_v21  ;;  %v3064_v60 = vrot.slane %v3055_v21, 3  ;;  %v3065_v48 = vrot.slane %v3055_v21, 4  ;;  %v3066_v0 = vrot.slane %v3055_v21, 5 }
 0x489   : > { %v3075_v56 = vadd.f32 %v25923_v14, %v3060_v38  ;;  %v3076_v27 = vadd.f32 %v25921_v12, %v3061_v39  ;;  %v3078_v2 = vadd.f32 %v25925_v31, %v3062_v40  ;;  %v3079_v3 = vadd.f32 %v25931_v41, %v3063_v55 }
 0x48a   : > { %24677 = vtanh.f32 %v3077_v59  ;;  %v3080_v4 = vadd.f32 %v25929_v37, %v3064_v60  ;;  %v3081_v8 = vadd.f32 %v25935_v49, %v3065_v48  ;;  %v3082_v9 = vadd.f32 %v25933_v46, %v3066_v0 }
 0x48b   : > { %24679 = vtanh.f32 %v3075_v56  ;;  %v26077_v40 = vrot.slane %v5935_v29, %v26065_v19  ;;  %v5965_v58 = vrot.slane %v5943_v53, %v26065_v19  ;;  %v5886_v60 = vcombine.high %v5878_v28, %v5878_v28 }
 0x48c   : > { %24681 = vtanh.f32 %v3076_v27 }
 0x48d   : > { %24683 = vtanh.f32 %v3078_v2  ;;  %v5973_v27 = vcombine.high %v26077_v40, %v26077_v40 }
 0x48e   : > { %24685 = vtanh.f32 %v3079_v3  ;;  %v5975_v3 = vcombine.high %v5965_v58, %v5965_v58 }
 0x48f   : > { %24687 = vtanh.f32 %v3080_v4  ;;  %v26092_v4 = vrot.slane %v5878_v28, %v26065_v19 }
 0x490   : > { %24689 = vtanh.f32 %v3081_v8  ;;  %v6287_v29 = vrot.slane %v5975_v3, %v26094_v5 }
 0x491   : > { %24691 = vtanh.f32 %v3082_v9  ;;  %28847 = vst [vmem:[#allocation35_spill] sm:$0xff] %v26092_v4  ;;  %v5908_v9 = vrot.slane %v5886_v60, %v26065_v19 }
 0x494   : > { %v24678_v13 = vpop.eup %24677 }
 0x495   : > { %v24680_v20 = vpop.eup %24679 }
 0x496   : > { %v24682_v23 = vpop.eup %24681  ;;  %v3105_v24 = vrot.slane %v24680_v20, 2 }
 0x497   : > { %v24684_v32 = vpop.eup %24683  ;;  %v3106_v34 = vrot.slane %v24682_v23, 1  ;;  %v6279_v23 = vrot.slane %v5965_v58, %v26094_v5 }
 0x498   : > { %v24686_v35 = vpop.eup %24685  ;;  %v3109_v43 = vrot.slane %v24684_v32, 7  ;;  %v5916_v32 = vcombine.high %v26092_v4, %v26092_v4 }
 0x499   : > { %v24688_v18 = vpop.eup %24687  ;;  %v3107_v22 = vsel %vm1999_vm6, %v3106_v34, %v3105_v24  ;;  %v3111_v52 = vrot.slane %v24686_v35, 6  ;;  %v6283_v24 = vrot.slane %v5973_v27, %v26094_v5 }
 0x49a   : > { %v24690_v44 = vpop.eup %24689  ;;  %v3108_v45 = vsel %vm2002_vm7, %v24678_v13, %v3107_v22  ;;  %v3113_v26 = vrot.slane %v24688_v18, 5  ;;  %v5918_v18 = vcombine.high %v5908_v9, %v5908_v9 }
 0x49b   : > { %v24692_v17 = vpop.eup %24691  ;;  %v3110_v25 = vsel %vm2005_vm8, %v3109_v43, %v3108_v45  ;;  %v3115_v21 = vrot.slane %v24690_v44, 4  ;;  %v6554_v45 = vsel %vm6552_vm13, %v5908_v9, %v6279_v23 }
 0x49c   : > { %v3112_v36 = vsel %vm2008_vm9, %v3111_v52, %v3110_v25  ;;  %v3117_v39 = vrot.slane %v24692_v17, 3  ;;  %v6555_v52 = vsel %vm6552_vm13, %v5916_v32, %v6283_v24  ;;  %v6556_v53 = vsel %vm6552_vm13, %v5918_v18, %v6287_v29 }
 0x49d   : > { %v3114_v38 = vsel %vm2011_vm10, %v3113_v26, %v3112_v36 }
 0x49e   : > { %v3116_v55 = vsel %vm2014_vm11, %v3115_v21, %v3114_v38 }
 0x49f   : > { %v3118_v59 = vsel %vm2017_vm12, %v3117_v39, %v3116_v55 }
 0x4a0   : > { %v26083_v48 = vsel %vm3096_vm4, %v3118_v59, %v26016_v54 }
 0x4a1   : > { %28846 = vst [vmem:[#allocation34_spill] sm:$0xff] %v26083_v48  ;;  %v3122_v56 = vsel %vm649_vm0, %v26083_v48, 0  ;;  %v5984_v0 = vrot.slane %v26083_v48, %v26065_v19 }
 0x4a2   : > { %v3193_v2 = vand.u32 4294901760, %v3122_v56 }
 0x4a3   : > { %v5992_v6 = vcombine.high %v5984_v0, %v5984_v0  ;;  %v26097_v8 = vrot.slane %v5984_v0, %v26065_v19 }
 0x4a4   : > { %v3194_v10 = vsub.f32 %v3122_v56, %v3193_v2 }
 0x4a5   : > { %v6014_v13 = vrot.slane %v5992_v6, %v26065_v19  ;;  %v6022_v20 = vcombine.high %v26097_v8, %v26097_v8 }
 0x4a6   : > { %v3195_v11 = vand.u32 4294901760, %v3194_v10 }
 0x4a7   : > { %v6024_v34 = vcombine.high %v6014_v13, %v6014_v13  ;;  %v6319_v35 = vrot.slane %v6014_v13, %v26094_v5  ;;  %v6323_v22 = vrot.slane %v6022_v20, %v26094_v5 }
 0x4a8   : > { %v3196_v43 = vsub.f32 %v3194_v10, %v3195_v11 }
 0x4a9   : > { %v6327_v44 = vrot.slane %v6024_v34, %v26094_v5  ;;  %v26115_v17 = vsel %vm6561_vm14, %v6554_v45, %v6319_v35  ;;  %v26118_v25 = vsel %vm6561_vm14, %v6555_v52, %v6323_v22 }
 0x4aa   : > { %v3197_v26 = vand.u32 4294901760, %v3196_v43 }
 0x4ab   : > { %v26121_v28 = vsel %vm6561_vm14, %v6556_v53, %v6327_v44 }
 0x4ac   : > { %21674 = vmatmul.mubr.f32.vlgmr.msra.gmra.mrb[12].mxu1 %v3197_v26 }
 0x4ad   : > { %23455 = vmatpush3.bf16.msra.mxu1 %v25863_v47  ;;  %21684 = vmatprep.mubr.msk.f32.mxu1 %vm25260_vm5, %v28774_v15 }
 0x4ae   : > { %23456 = vmatprep.subr.bf16.mxu1 %v28776_v50 }
 0x4b1   : > { %23458 = vmatpush3.bf16.msra.mxu1 %v25868_v57 }
 0x4b2   : > { %23459 = vmatprep.subr.bf16.mxu1 %v28776_v50 }
 0x4b4   : > { %21685 = vmatmul.mubr.f32.vlgmr.msra.gmra.mrb[12].mxu1 %v3193_v2 }
 0x4b5   : > { %23461 = vmatpush3.bf16.msra.mxu1 %v25874_v61  ;;  %21695 = vmatprep.mubr.msk.f32.mxu1 %vm25260_vm5, %v28774_v15 }
 0x4b6   : > { %23462 = vmatprep.subr.bf16.mxu1 %v28776_v50 }
 0x4b9   : > { %23464 = vmatpush3.bf16.msra.mxu1 %v25879_v62 }
 0x4ba   : > { %23465 = vmatprep.subr.bf16.mxu1 %v28776_v50 }
 0x4bc   : > { %21696 = vmatmul.mubr.f32.vlgmr.msra.gmra.mrb[12].mxu1 %v3194_v10 }
 0x4bd   : > { %23467 = vmatpush3.bf16.msra.mxu1 %v25818_v51  ;;  %21706 = vmatprep.mubr.msk.f32.mxu1 %vm25260_vm5, %v28774_v15 }
 0x4be   : > { %23468 = vmatprep.subr.bf16.mxu1 %v28776_v50 }
 0x4c1   : > { %23470 = vmatpush3.bf16.msra.mxu1 %v25826_v16 }
 0x4c2   : > { %23471 = vmatprep.subr.bf16.mxu1 %v28776_v50 }
 0x4c4   : > { %21707 = vmatmul.mubr.f32.vlgmr.msra.gmra.mrb[12].mxu1 %v3195_v11 }
 0x4c5   : > { %23473 = vmatpush3.bf16.msra.mxu1 %v25892_v63  ;;  %21717 = vmatprep.mubr.msk.f32.mxu1 %vm25260_vm5, %v28774_v15 }
 0x4c6   : > { %23474 = vmatprep.subr.bf16.mxu1 %v28776_v50 }
 0x4c9   : > { %23476 = vmatpush3.bf16.msra.mxu1 %v25897_v1 }
 0x4ca   : > { %23477 = vmatprep.subr.bf16.mxu1 %v28776_v50 }
 0x4cc   : > { %21718 = vmatmul.mubr.f32.vlgmr.msra.gmra.mrb[12].mxu1 %v3193_v2 }
 0x4cd   : > { %23479 = vmatpush3.bf16.msra.mxu1 %v25818_v51  ;;  %21728 = vmatprep.mubr.msk.f32.mxu1 %vm25260_vm5, %v28774_v15 }
 0x4ce   : > { %23480 = vmatprep.subr.bf16.mxu1 %v28776_v50 }
 0x4d1   : > { %23482 = vmatpush3.bf16.msra.mxu1 %v25826_v16 }
 0x4d2   : > { %23519 = vmatprep.subr.bf16.mxu1 %v28776_v50 }
 0x4d4   : > { %21729 = vmatmul.mubr.f32.vlgmr.msra.gmra.mrb[12].mxu1 %v3193_v2 }
 0x4d5   : > { %23521 = vmatpush3.bf16.msra.mxu1 %v25818_v51  ;;  %21805 = vmatprep.mubr.msk.f32.mxu1 %vm25260_vm5, %v28774_v15 }
 0x4d6   : > { %23522 = vmatprep.subr.bf16.mxu1 %v28776_v50 }
 0x4d9   : > { %23524 = vmatpush3.bf16.msra.mxu1 %v25826_v16 }
 0x4da   : > { %23525 = vmatprep.subr.bf16.mxu1 %v28776_v50 }
 0x5a7   : > { %v3605_v30 = vpop.f32.mrb[12].mxu1 }
 0x5a8   : > { %v3610_v36 = vrot.slane %v3605_v30, 5  ;;  %v3611_v21 = vrot.slane %v3605_v30, 6  ;;  %v3612_v38 = vrot.slane %v3605_v30, 7  ;;  %v3613_v39 = vrot.slane %v3605_v30, 1  ;;  %v21730_v55 = vpop.f32.mrb[13].mxu1 }
 0x5a9   : > { %v3614_v58 = vrot.slane %v3605_v30, 2  ;;  %v3615_v59 = vrot.slane %v3605_v30, 3  ;;  %v3628_v60 = vadd.f32 %v25925_v31, %v3605_v30  ;;  %v3616_v56 = vrot.slane %v3605_v30, 4 }
 0x5aa   : > { %v3625_v27 = vadd.f32 %v25923_v14, %v3610_v36  ;;  %v3626_v0 = vadd.f32 %v25921_v12, %v3611_v21  ;;  %v3627_v2 = vadd.f32 %v25927_v33, %v3612_v38  ;;  %v3629_v3 = vadd.f32 %v25931_v41, %v3613_v39  ;;  %v3645_v38 = vpop.permute.xlu1 %3644 }
 0x5ab   : > { %24693 = vtanh.f32 %v3628_v60  ;;  %v3630_v6 = vadd.f32 %v25929_v37, %v3614_v58  ;;  %v3631_v9 = vadd.f32 %v25935_v49, %v3615_v59  ;;  %v3632_v10 = vadd.f32 %v25933_v46, %v3616_v56 }
 0x5ac   : > { %24695 = vtanh.f32 %v3625_v27  ;;  %vm3646_vm15 = vcmp.eq.s32.totalorder %v3645_v38, 1 }
 0x5ad   : > { %24697 = vtanh.f32 %v3626_v0 }
 0x5ae   : > { %24699 = vtanh.f32 %v3627_v2 }
 0x5af   : > { %24701 = vtanh.f32 %v3629_v3 }
 0x5b0   : > { %24703 = vtanh.f32 %v3630_v6 }
 0x5b1   : > { %24705 = vtanh.f32 %v3631_v9 }
 0x5b2   : > { %24707 = vtanh.f32 %v3632_v10 }
 0x5b5   : > { %v24694_v13 = vpop.eup %24693 }
 0x5b6   : > { %v24696_v20 = vpop.eup %24695 }
 0x5b7   : > { %v24698_v23 = vpop.eup %24697  ;;  %v3655_v24 = vrot.slane %v24696_v20, 3 }
 0x5b8   : > { %v24700_v29 = vpop.eup %24699  ;;  %v3656_v11 = vrot.slane %v24698_v23, 2 }
 0x5b9   : > { %v24702_v32 = vpop.eup %24701  ;;  %v3658_v34 = vrot.slane %v24700_v29, 1 }
 0x5ba   : > { %v24704_v35 = vpop.eup %24703  ;;  %v3657_v18 = vsel %vm1999_vm6, %v3656_v11, %v3655_v24  ;;  %v3661_v44 = vrot.slane %v24702_v32, 7 }
 0x5bb   : > { %v24706_v22 = vpop.eup %24705  ;;  %v3659_v43 = vsel %vm2002_vm7, %v3658_v34, %v3657_v18  ;;  %v3663_v52 = vrot.slane %v24704_v35, 6 }
 0x5bc   : > { %v24708_v45 = vpop.eup %24707  ;;  %v3660_v53 = vsel %vm2005_vm8, %v24694_v13, %v3659_v43  ;;  %v3665_v26 = vrot.slane %v24706_v22, 5 }
 0x5bd   : > { %v3662_v30 = vsel %vm2008_vm9, %v3661_v44, %v3660_v53  ;;  %v3667_v21 = vrot.slane %v24708_v45, 4 }
 0x5be   : > { %v3664_v36 = vsel %vm2011_vm10, %v3663_v52, %v3662_v30 }
 0x5bf   : > { %v3666_v39 = vsel %vm2014_vm11, %v3665_v26, %v3664_v36 }
 0x5c0   : > { %v3668_v55 = vsel %vm2017_vm12, %v3667_v21, %v3666_v39 }
 0x5c1   : > { %v26175_v58 = vsel %vm3646_vm15, %v3668_v55, %v26083_v48  ;;  %vm6588_vm15 = vcmask 1044480  }
 0x5c2   : > { %28848 = vst [vmem:[#allocation36_spill] sm:$0xff] %v26175_v58  ;;  %v3672_v59 = vsel %vm649_vm0, %v26175_v58, 0  ;;  %v6033_v60 = vrot.slane %v26175_v58, %v26065_v19 }
 0x5c3   : > { %v3743_v56 = vand.u32 4294901760, %v3672_v59 }
 0x5c4   : > { %v6041_v27 = vcombine.high %v6033_v60, %v6033_v60  ;;  %v26182_v0 = vrot.slane %v6033_v60, %v26065_v19 }
 0x5c5   : > { %v3744_v2 = vsub.f32 %v3672_v59, %v3743_v56 }
 0x5c6   : > { %v6063_v3 = vrot.slane %v6041_v27, %v26065_v19  ;;  %v6071_v6 = vcombine.high %v26182_v0, %v26182_v0 }
 0x5c7   : > { %v3745_v9 = vand.u32 4294901760, %v3744_v2 }
 0x5c8   : > { %v6359_v10 = vrot.slane %v6063_v3, %v26094_v5  ;;  %v6363_v13 = vrot.slane %v6071_v6, %v26094_v5  ;;  %v6073_v20 = vcombine.high %v6063_v3, %v6063_v3 }
 0x5c9   : > { %v3746_v23 = vsub.f32 %v3744_v2, %v3745_v9 }
 0x5ca   : > { %v26191_v24 = vsel %vm6570_vm1, %v26115_v17, %v6359_v10  ;;  %v26195_v29 = vsel %vm6570_vm1, %v26118_v25, %v6363_v13  ;;  %v6367_v11 = vrot.slane %v6073_v20, %v26094_v5 }
 0x5cb   : > { %v3747_v32 = vand.u32 4294901760, %v3746_v23 }
 0x5cc   : > { %v26200_v34 = vsel %vm6570_vm1, %v26121_v28, %v6367_v11 }
 0x5cd   : > { %21740 = vmatmul.mubr.f32.vlgmr.msra.gmra.mrb[10].mxu0 %v3747_v32 }
 0x5ce   : > { %23491 = vmatpush3.bf16.msra.mxu0 %v25863_v47  ;;  %21750 = vmatprep.mubr.msk.f32.mxu0 %vm25260_vm5, %v28774_v15 }
 0x5cf   : > { %23492 = vmatprep.subr.bf16.mxu0 %v28776_v50 }
 0x5d2   : > { %23494 = vmatpush3.bf16.msra.mxu0 %v25868_v57 }
 0x5d3   : > { %23495 = vmatprep.subr.bf16.mxu0 %v28776_v50 }
 0x5d5   : > { %21751 = vmatmul.mubr.f32.vlgmr.msra.gmra.mrb[10].mxu0 %v3743_v56 }
 0x5d6   : > { %23497 = vmatpush3.bf16.msra.mxu0 %v25874_v61  ;;  %21761 = vmatprep.mubr.msk.f32.mxu0 %vm25260_vm5, %v28774_v15 }
 0x5d7   : > { %23498 = vmatprep.subr.bf16.mxu0 %v28776_v50 }
 0x5da   : > { %23500 = vmatpush3.bf16.msra.mxu0 %v25879_v62 }
 0x5db   : > { %23501 = vmatprep.subr.bf16.mxu0 %v28776_v50 }
 0x5dd   : > { %21762 = vmatmul.mubr.f32.vlgmr.msra.gmra.mrb[10].mxu0 %v3744_v2 }
 0x5de   : > { %23503 = vmatpush3.bf16.msra.mxu0 %v25818_v51  ;;  %21772 = vmatprep.mubr.msk.f32.mxu0 %vm25260_vm5, %v28774_v15 }
 0x5df   : > { %23504 = vmatprep.subr.bf16.mxu0 %v28776_v50 }
 0x5e2   : > { %23506 = vmatpush3.bf16.msra.mxu0 %v25826_v16 }
 0x5e3   : > { %23507 = vmatprep.subr.bf16.mxu0 %v28776_v50 }
 0x5e5   : > { %21773 = vmatmul.mubr.f32.vlgmr.msra.gmra.mrb[10].mxu0 %v3745_v9 }
 0x5e6   : > { %23509 = vmatpush3.bf16.msra.mxu0 %v25892_v63  ;;  %21783 = vmatprep.mubr.msk.f32.mxu0 %vm25260_vm5, %v28774_v15 }
 0x5e7   : > { %23510 = vmatprep.subr.bf16.mxu0 %v28776_v50 }
 0x5ea   : > { %23512 = vmatpush3.bf16.msra.mxu0 %v25897_v1 }
 0x5eb   : > { %23513 = vmatprep.subr.bf16.mxu0 %v28776_v50 }
 0x5ed   : > { %21784 = vmatmul.mubr.f32.vlgmr.msra.gmra.mrb[10].mxu0 %v3743_v56 }
 0x5ee   : > { %23515 = vmatpush3.bf16.msra.mxu0 %v25818_v51  ;;  %21794 = vmatprep.mubr.msk.f32.mxu0 %vm25260_vm5, %v28774_v15 }
 0x5ef   : > { %23516 = vmatprep.subr.bf16.mxu0 %v28776_v50 }
 0x5f2   : > { %23518 = vmatpush3.bf16.msra.mxu0 %v25826_v16 }
 0x5f3   : > { %23555 = vmatprep.subr.bf16.mxu0 %v28776_v50 }
 0x5f5   : > { %21795 = vmatmul.mubr.f32.vlgmr.msra.gmra.mrb[10].mxu0 %v3743_v56 }
 0x5f6   : > { %23557 = vmatpush3.bf16.msra.mxu0 %v25818_v51  ;;  %21871 = vmatprep.mubr.msk.f32.mxu0 %vm25260_vm5, %v28774_v15 }
 0x5f7   : > { %23558 = vmatprep.subr.bf16.mxu0 %v28776_v50 }
 0x5fa   : > { %23560 = vmatpush3.bf16.msra.mxu0 %v25826_v16 }
 0x5fb   : > { %23561 = vmatprep.subr.bf16.mxu0 %v28776_v50 }
 0x6c8   : > { %v4155_v17 = vpop.f32.mrb[10].mxu0 }
 0x6c9   : > { %v4160_v25 = vrot.slane %v4155_v17, 4  ;;  %v4161_v28 = vrot.slane %v4155_v17, 5  ;;  %v4162_v35 = vrot.slane %v4155_v17, 6  ;;  %v4163_v18 = vrot.slane %v4155_v17, 7  ;;  %v21796_v22 = vpop.f32.mrb[11].mxu0 }
 0x6ca   : > { %v4164_v43 = vrot.slane %v4155_v17, 1  ;;  %v4165_v44 = vrot.slane %v4155_v17, 2  ;;  %v4179_v45 = vadd.f32 %v25931_v41, %v4155_v17  ;;  %v4166_v52 = vrot.slane %v4155_v17, 3  ;;  %v4195_v22 = vpop.permute.xlu0 %4194 }
 0x6cb   : > { %v4175_v53 = vadd.f32 %v25923_v14, %v4160_v25  ;;  %v4176_v26 = vadd.f32 %v25921_v12, %v4161_v28  ;;  %v4177_v30 = vadd.f32 %v25927_v33, %v4162_v35  ;;  %v4178_v36 = vadd.f32 %v25925_v31, %v4163_v18 }
 0x6cc   : > { %24709 = vtanh.f32 %v4179_v45  ;;  %v4180_v21 = vadd.f32 %v25929_v37, %v4164_v43  ;;  %v4181_v38 = vadd.f32 %v25935_v49, %v4165_v44  ;;  %v4182_v39 = vadd.f32 %v25933_v46, %v4166_v52 }
 0x6cd   : > { %24711 = vtanh.f32 %v4175_v53  ;;  %vm4196_vm2 = vcmp.eq.s32.totalorder %v4195_v22, 1 }
 0x6ce   : > { %24713 = vtanh.f32 %v4176_v26 }
 0x6cf   : > { %24715 = vtanh.f32 %v4177_v30 }
 0x6d0   : > { %24717 = vtanh.f32 %v4178_v36 }
 0x6d1   : > { %24719 = vtanh.f32 %v4180_v21 }
 0x6d2   : > { %24721 = vtanh.f32 %v4181_v38 }
 0x6d3   : > { %24723 = vtanh.f32 %v4182_v39 }
 0x6d6   : > { %v24710_v55 = vpop.eup %24709 }
 0x6d7   : > { %v24712_v59 = vpop.eup %24711 }
 0x6d8   : > { %v24714_v60 = vpop.eup %24713  ;;  %v4205_v56 = vrot.slane %v24712_v59, 4 }
 0x6d9   : > { %v24716_v27 = vpop.eup %24715  ;;  %v4206_v2 = vrot.slane %v24714_v60, 3 }
 0x6da   : > { %v24718_v3 = vpop.eup %24717  ;;  %v4208_v6 = vrot.slane %v24716_v27, 2 }
 0x6db   : > { %v24720_v9 = vpop.eup %24719  ;;  %v4207_v10 = vsel %vm1999_vm6, %v4206_v2, %v4205_v56  ;;  %v4210_v13 = vrot.slane %v24718_v3, 1 }
 0x6dc   : > { %v24722_v20 = vpop.eup %24721  ;;  %v4209_v23 = vsel %vm2002_vm7, %v4208_v6, %v4207_v10  ;;  %v4213_v32 = vrot.slane %v24720_v9, 7 }
 0x6dd   : > { %v24724_v11 = vpop.eup %24723  ;;  %v4211_v17 = vsel %vm2005_vm8, %v4210_v13, %v4209_v23  ;;  %v4215_v25 = vrot.slane %v24722_v20, 6 }
 0x6de   : > { %v4212_v28 = vsel %vm2008_vm9, %v24710_v55, %v4211_v17  ;;  %v4217_v18 = vrot.slane %v24724_v11, 5 }
 0x6df   : > { %v4214_v35 = vsel %vm2011_vm10, %v4213_v32, %v4212_v28 }
 0x6e0   : > { %v4216_v43 = vsel %vm2014_vm11, %v4215_v25, %v4214_v35 }
 0x6e1   : > { %v4218_v44 = vsel %vm2017_vm12, %v4217_v18, %v4216_v43 }
 0x6e2   : > { %v26254_v45 = vsel %vm4196_vm2, %v4218_v44, %v26175_v58 }
 0x6e3   : > { %28849 = vst [vmem:[#allocation37_spill] sm:$0xff] %v26254_v45  ;;  %v4222_v52 = vsel %vm649_vm0, %v26254_v45, 0  ;;  %v6082_v53 = vrot.slane %v26254_v45, %v26065_v19 }
 0x6e4   : > { %v4293_v26 = vand.u32 4294901760, %v4222_v52 }
 0x6e5   : > { %v6090_v30 = vcombine.high %v6082_v53, %v6082_v53  ;;  %v26261_v36 = vrot.slane %v6082_v53, %v26065_v19 }
 0x6e6   : > { %v4294_v21 = vsub.f32 %v4222_v52, %v4293_v26 }
 0x6e7   : > { %v6112_v38 = vrot.slane %v6090_v30, %v26065_v19  ;;  %v6120_v39 = vcombine.high %v26261_v36, %v26261_v36 }
 0x6e8   : > { %v4295_v55 = vand.u32 4294901760, %v4294_v21 }
 0x6e9   : > { %v6399_v59 = vrot.slane %v6112_v38, %v26094_v5  ;;  %v6403_v60 = vrot.slane %v6120_v39, %v26094_v5  ;;  %v6122_v56 = vcombine.high %v6112_v38, %v6112_v38 }
 0x6ea   : > { %v4296_v27 = vsub.f32 %v4294_v21, %v4295_v55 }
 0x6eb   : > { %v26270_v2 = vsel %vm6579_vm3, %v26191_v24, %v6399_v59  ;;  %v26274_v3 = vsel %vm6579_vm3, %v26195_v29, %v6403_v60  ;;  %v6407_v6 = vrot.slane %v6122_v56, %v26094_v5 }
 0x6ec   : > { %v4297_v9 = vand.u32 4294901760, %v4296_v27 }
 0x6ed   : > { %v26279_v10 = vsel %vm6579_vm3, %v26200_v34, %v6407_v6 }
 0x6ee   : > { %21806 = vmatmul.mubr.f32.vlgmr.msra.gmra.mrb[14].mxu1 %v4297_v9 }
 0x6ef   : > { %23527 = vmatpush3.bf16.msra.mxu1 %v25863_v47  ;;  %21816 = vmatprep.mubr.msk.f32.mxu1 %vm25260_vm5, %v28774_v15 }
 0x6f0   : > { %23528 = vmatprep.subr.bf16.mxu1 %v28776_v50 }
 0x6f3   : > { %23530 = vmatpush3.bf16.msra.mxu1 %v25868_v57 }
 0x6f4   : > { %23531 = vmatprep.subr.bf16.mxu1 %v28776_v50 }
 0x6f6   : > { %21817 = vmatmul.mubr.f32.vlgmr.msra.gmra.mrb[14].mxu1 %v4293_v26 }
 0x6f7   : > { %23533 = vmatpush3.bf16.msra.mxu1 %v25874_v61  ;;  %21827 = vmatprep.mubr.msk.f32.mxu1 %vm25260_vm5, %v28774_v15 }
 0x6f8   : > { %23534 = vmatprep.subr.bf16.mxu1 %v28776_v50 }
 0x6fb   : > { %23536 = vmatpush3.bf16.msra.mxu1 %v25879_v62 }
 0x6fc   : > { %23537 = vmatprep.subr.bf16.mxu1 %v28776_v50 }
 0x6fe   : > { %21828 = vmatmul.mubr.f32.vlgmr.msra.gmra.mrb[14].mxu1 %v4294_v21 }
 0x6ff   : > { %23539 = vmatpush3.bf16.msra.mxu1 %v25818_v51  ;;  %21838 = vmatprep.mubr.msk.f32.mxu1 %vm25260_vm5, %v28774_v15 }
 0x700   : > { %23540 = vmatprep.subr.bf16.mxu1 %v28776_v50 }
 0x703   : > { %23542 = vmatpush3.bf16.msra.mxu1 %v25826_v16 }
 0x704   : > { %23543 = vmatprep.subr.bf16.mxu1 %v28776_v50 }
 0x706   : > { %21839 = vmatmul.mubr.f32.vlgmr.msra.gmra.mrb[14].mxu1 %v4295_v55 }
 0x707   : > { %23545 = vmatpush3.bf16.msra.mxu1 %v25892_v63  ;;  %21849 = vmatprep.mubr.msk.f32.mxu1 %vm25260_vm5, %v28774_v15 }
 0x708   : > { %23546 = vmatprep.subr.bf16.mxu1 %v28776_v50 }
 0x70b   : > { %23548 = vmatpush3.bf16.msra.mxu1 %v25897_v1 }
 0x70c   : > { %23549 = vmatprep.subr.bf16.mxu1 %v28776_v50 }
 0x70e   : > { %21850 = vmatmul.mubr.f32.vlgmr.msra.gmra.mrb[14].mxu1 %v4293_v26 }
 0x70f   : > { %23551 = vmatpush3.bf16.msra.mxu1 %v25818_v51  ;;  %21860 = vmatprep.mubr.msk.f32.mxu1 %vm25260_vm5, %v28774_v15 }
 0x710   : > { %23552 = vmatprep.subr.bf16.mxu1 %v28776_v50 }
 0x713   : > { %23554 = vmatpush3.bf16.msra.mxu1 %v25826_v16 }
 0x714   : > { %23591 = vmatprep.subr.bf16.mxu1 %v28776_v50 }
 0x716   : > { %21861 = vmatmul.mubr.f32.vlgmr.msra.gmra.mrb[14].mxu1 %v4293_v26 }
 0x717   : > { %23593 = vmatpush3.bf16.msra.mxu1 %v25818_v51  ;;  %21937 = vmatprep.mubr.msk.f32.mxu1 %vm25260_vm5, %v28774_v15 }
 0x718   : > { %23594 = vmatprep.subr.bf16.mxu1 %v28776_v50 }
 0x71b   : > { %23596 = vmatpush3.bf16.msra.mxu1 %v25826_v16 }
 0x71c   : > { %23597 = vmatprep.subr.bf16.mxu1 %v28776_v50 }
 0x7e9   : > { %v4705_v24 = vpop.f32.mrb[14].mxu1 }
 0x7ea   : > { %v4710_v29 = vrot.slane %v4705_v24, 3  ;;  %v4711_v34 = vrot.slane %v4705_v24, 4  ;;  %v4712_v13 = vrot.slane %v4705_v24, 5  ;;  %v4713_v20 = vrot.slane %v4705_v24, 6  ;;  %v21862_v23 = vpop.f32.mrb[15].mxu1 }
 0x7eb   : > { %v4714_v11 = vrot.slane %v4705_v24, 7  ;;  %v4715_v32 = vrot.slane %v4705_v24, 1  ;;  %v4716_v17 = vrot.slane %v4705_v24, 2  ;;  %v4730_v52 = vadd.f32 %v25929_v37, %v4705_v24 }
 0x7ec   : > { %v4725_v25 = vadd.f32 %v25923_v14, %v4710_v29  ;;  %v4726_v28 = vadd.f32 %v25921_v12, %v4711_v34  ;;  %v4727_v35 = vadd.f32 %v25927_v33, %v4712_v13  ;;  %v4728_v18 = vadd.f32 %v25925_v31, %v4713_v20 }
 0x7ed   : > { %v4729_v22 = vadd.f32 %v25931_v41, %v4714_v11  ;;  %v4731_v43 = vadd.f32 %v25935_v49, %v4715_v32  ;;  %v4732_v44 = vadd.f32 %v25933_v46, %v4716_v17  ;;  %v4745_v32 = vpop.permute.xlu1 %4744 }
 0x7ee   : > { %24725 = vtanh.f32 %v4725_v25  ;;  %vm4746_vm4 = vcmp.eq.s32.totalorder %v4745_v32, 1 }
 0x7ef   : > { %24727 = vtanh.f32 %v4726_v28 }
 0x7f0   : > { %24729 = vtanh.f32 %v4727_v35 }
 0x7f1   : > { %24731 = vtanh.f32 %v4728_v18 }
 0x7f2   : > { %24733 = vtanh.f32 %v4729_v22 }
 0x7f3   : > { %24735 = vtanh.f32 %v4731_v43 }
 0x7f4   : > { %24737 = vtanh.f32 %v4732_v44 }
 0x7f5   : > { %24739 = vtanh.f32 %v4730_v52 }
 0x7f8   : > { %v24726_v53 = vpop.eup %24725 }
 0x7f9   : > { %v24728_v26 = vpop.eup %24727  ;;  %v4755_v30 = vrot.slane %v24726_v53, 5 }
 0x7fa   : > { %v24730_v21 = vpop.eup %24729  ;;  %v4756_v38 = vrot.slane %v24728_v26, 4 }
 0x7fb   : > { %v24732_v39 = vpop.eup %24731  ;;  %v4758_v55 = vrot.slane %v24730_v21, 3 }
 0x7fc   : > { %v24734_v59 = vpop.eup %24733  ;;  %v4757_v60 = vsel %vm1999_vm6, %v4756_v38, %v4755_v30  ;;  %v4760_v56 = vrot.slane %v24732_v39, 2 }
 0x7fd   : > { %v24736_v27 = vpop.eup %24735  ;;  %v4759_v6 = vsel %vm2002_vm7, %v4758_v55, %v4757_v60  ;;  %v4762_v9 = vrot.slane %v24734_v59, 1 }
 0x7fe   : > { %v24738_v24 = vpop.eup %24737  ;;  %v4761_v29 = vsel %vm2005_vm8, %v4760_v56, %v4759_v6  ;;  %v4765_v13 = vrot.slane %v24736_v27, 7 }
 0x7ff   : > { %v24740_v34 = vpop.eup %24739  ;;  %v4763_v20 = vsel %vm2008_vm9, %v4762_v9, %v4761_v29  ;;  %v4767_v11 = vrot.slane %v24738_v24, 6  ;;  %v26395_v29 = vld [vmem:[%s25671_s25 + $0x18] sm:$0xff] }
 0x800   : > { %v4764_v23 = vsel %vm2011_vm10, %v24740_v34, %v4763_v20  ;;  %v6623_v20 = vld [vmem:[%s25664_s16 + $0x8] sm:$0xff] }
 0x801   : > { %v4766_v17 = vsel %vm2014_vm11, %v4765_v13, %v4764_v23  ;;  %v6622_v13 = vld [vmem:[%s25664_s16] sm:$0xff]  ;;  %v28780_v23 = vand.u32 4294901760, %v26395_v29  ;;  %v6645_v32 = vsel %vm649_vm0, %v6623_v20, 0 }
 0x802   : > { %v4768_v25 = vsel %vm2017_vm12, %v4767_v11, %v4766_v17  ;;  %v6642_v11 = vsel %vm649_vm0, %v6622_v13, 0  ;;  %v6624_v17 = vld [vmem:[%s25664_s16 + $0x10] sm:$0xff] }
 0x803   : > { %v26333_v28 = vsel %vm4746_vm4, %v4768_v25, %v26254_v45  ;;  %v6625_v25 = vld [vmem:[%s25664_s16 + $0x18] sm:$0xff]  ;;  %vm6597_vm4 = vcmask 1045504  }
 0x804   : > { %v4772_v35 = vsel %vm649_vm0, %v26333_v28, 0  ;;  %v6131_v18 = vrot.slane %v26333_v28, %v26065_v19 }
 0x805   : > { %v4843_v22 = vand.u32 4294901760, %v4772_v35 }
 0x806   : > { %v6139_v43 = vcombine.high %v6131_v18, %v6131_v18  ;;  %v26340_v44 = vrot.slane %v6131_v18, %v26065_v19 }
 0x807   : > { %v4844_v52 = vsub.f32 %v4772_v35, %v4843_v22  ;;  %v6626_v35 = vld [vmem:[%s25664_s16 + $0x20] sm:$0xff] }
 0x808   : > { %28850 = vst [vmem:[#allocation38_spill] sm:$0xff] %v26340_v44  ;;  %v6161_v53 = vrot.slane %v6139_v43, %v26065_v19  ;;  %v6169_v26 = vcombine.high %v26340_v44, %v26340_v44  ;;  %v26410_v43 = vand.u32 4294901760, %v6645_v32 }
 0x809   : > { %v4845_v30 = vand.u32 4294901760, %v4844_v52 }
 0x80a   : > { %v6439_v21 = vrot.slane %v6161_v53, %v26094_v5  ;;  %v6443_v38 = vrot.slane %v6169_v26, %v26094_v5  ;;  %v6171_v39 = vcombine.high %v6161_v53, %v6161_v53  ;;  %v6627_v53 = vld [vmem:[%s25664_s16 + $0x28] sm:$0xff] }
 0x80b   : > { %v4846_v55 = vsub.f32 %v4844_v52, %v4845_v30  ;;  %v6657_v20 = vsel %vm649_vm0, %v6627_v53, 0 }
 0x80c   : > { %v26349_v59 = vsel %vm6588_vm15, %v26270_v2, %v6439_v21  ;;  %v26353_v60 = vsel %vm6588_vm15, %v26274_v3, %v6443_v38  ;;  %v6447_v56 = vrot.slane %v6171_v39, %v26094_v5  ;;  %v6630_v2 = vld [vmem:[%s25671_s25] sm:$0xff]  ;;  %v6631_v3 = vld [vmem:[%s25671_s25 + $0x8] sm:$0xff]  ;;  %v6651_v21 = vsel %vm649_vm0, %v6625_v25, 0 }
 0x80d   : > { %v4847_v27 = vand.u32 4294901760, %v4846_v55  ;;  %v6666_v9 = vand.u32 4294901760, %v6630_v2  ;;  %v6669_v24 = vand.u32 4294901760, %v6631_v3  ;;  %v6654_v38 = vsel %vm649_vm0, %v6626_v35, 0 }
 0x80e   : > { %v26358_v6 = vsel %vm6588_vm15, %v26279_v10, %v6447_v56  ;;  %v26392_v10 = vld [vmem:[%s25671_s25 + $0x10] sm:$0xff]  ;;  %v26429_v55 = vsub.f32 %v6645_v32, %v26410_v43  ;;  %v26431_v56 = vand.u32 4294901760, %v6651_v21  ;;  %s28877_s25 = sld [smem:[#allocation46_spill]] }
 0x80f   : > { %21872 = vmatmul.mubr.f32.vlgmr.msra.gmra.mrb[12].mxu0 %v4847_v27  ;;  %v28781_v34 = vand.u32 4294901760, %v26392_v10  ;;  %v26406_v18 = vpack.c.bf16 %v6669_v24, %v6666_v9  ;;  %v26433_v27 = vand.u32 4294901760, %v6654_v38  ;;  %v26442_v25 = vsub.f32 %v6631_v3, %v6669_v24 }
 0x810   : > { %23563 = vmatpush3.bf16.msra.mxu0 %v25863_v47  ;;  %21882 = vmatprep.mubr.msk.f32.mxu0 %vm25260_vm5, %v28774_v15  ;;  %v28779_v32 = vand.u32 4294901760, %v26429_v55  ;;  %v26448_v35 = vsub.f32 %v6651_v21, %v26431_v56 }
 0x811   : > { %23564 = vmatprep.subr.bf16.mxu0 %v28776_v50  ;;  %v26418_v26 = vpack.c.bf16 %v28780_v23, %v28781_v34  ;;  %v6628_v23 = vld [vmem:[%s25664_s16 + $0x30] sm:$0xff]  ;;  %v6629_v34 = vld [vmem:[%s25664_s16 + $0x38] sm:$0xff] }
 0x812   : > { %v6747_v21 = vsub.f32 %v26429_v55, %v28779_v32  ;;  %v28851_v45 = vand.u32 4294901760, %v26448_v35 }
 0x814   : > { %23566 = vmatpush3.bf16.msra.mxu0 %v25868_v57  ;;  %v6748_v7 = vand.u32 4294901760, %v6747_v21  ;;  %v6767_v58 = vsub.f32 %v26448_v35, %v28851_v45  ;;  %s28636_s5 = scalar_lea.hbm %s28877_s25, %s20433_s20 }
 0x815   : > { %23567 = vmatprep.subr.bf16.mxu0 %v28776_v50 }
 0x816   : > { %v6768_v44 = vand.u32 4294901760, %v6767_v58 }
 0x817   : > { %21883 = vmatmul.mubr.f32.vlgmr.msra.gmra.mrb[12].mxu0 %v4843_v22 }
 0x818   : > { %23569 = vmatpush3.bf16.msra.mxu0 %v25874_v61  ;;  %21893 = vmatprep.mubr.msk.f32.mxu0 %vm25260_vm5, %v28774_v15 }
 0x819   : > { %23570 = vmatprep.subr.bf16.mxu0 %v28776_v50 }
 0x81c   : > { %23572 = vmatpush3.bf16.msra.mxu0 %v25879_v62 }
 0x81d   : > { %23573 = vmatprep.subr.bf16.mxu0 %v28776_v50 }
 0x81f   : > { %21894 = vmatmul.mubr.f32.vlgmr.msra.gmra.mrb[12].mxu0 %v4844_v52  ;;  %v6648_v52 = vsel %vm649_vm0, %v6624_v17, 0  ;;  %v26440_v17 = vsub.f32 %v6630_v2, %v6666_v9  ;;  %v26454_v2 = vand.u32 4294901760, %v6657_v20  ;;  %v28790_v9 = vand.u32 4294901760, %v26442_v25 }
 0x820   : > { %23575 = vmatpush3.bf16.msra.mxu0 %v25818_v51  ;;  %21904 = vmatprep.mubr.msk.f32.mxu0 %vm25260_vm5, %v28774_v15 }
 0x821   : > { %23576 = vmatprep.subr.bf16.mxu0 %v28776_v50  ;;  %v28787_v3 = vand.u32 4294901760, %v26440_v17  ;;  %v6825_v32 = vsub.f32 %v26442_v25, %v28790_v9  ;;  %v6660_v9 = vsel %vm649_vm0, %v6628_v23, 0  ;;  %v28854_v23 = vand.u32 4294901760, %v26395_v29 }
 0x822   : > { %v26493_v4 = vand.u32 4294901760, %v6660_v9 }
 0x823   : > { %v6826_v54 = vand.u32 4294901760, %v6825_v32 }
 0x824   : > { %23578 = vmatpush3.bf16.msra.mxu0 %v25826_v16 }
 0x825   : > { %23579 = vmatprep.subr.bf16.mxu0 %v28776_v50 }
 0x827   : > { %21905 = vmatmul.mubr.f32.vlgmr.msra.gmra.mrb[12].mxu0 %v4845_v30  ;;  %v26420_v30 = vand.u32 4294901760, %v6648_v52 }
 0x828   : > { %23581 = vmatpush3.bf16.msra.mxu0 %v25892_v63  ;;  %21915 = vmatprep.mubr.msk.f32.mxu0 %vm25260_vm5, %v28774_v15 }
 0x829   : > { %23582 = vmatprep.subr.bf16.mxu0 %v28776_v50  ;;  %v26437_v13 = vsub.f32 %v6648_v52, %v26420_v30  ;;  %v26451_v52 = vsub.f32 %v6654_v38, %v26433_v27 }
 0x82b   : > { %v28784_v53 = vand.u32 4294901760, %v26437_v13 }
 0x82c   : > { %23584 = vmatpush3.bf16.msra.mxu0 %v25897_v1 }
 0x82d   : > { %23585 = vmatprep.subr.bf16.mxu0 %v28776_v50 }
 0x82f   : > { %21916 = vmatmul.mubr.f32.vlgmr.msra.gmra.mrb[12].mxu0 %v4843_v22 }
 0x830   : > { %23587 = vmatpush3.bf16.msra.mxu0 %v25818_v51  ;;  %21926 = vmatprep.mubr.msk.f32.mxu0 %vm25260_vm5, %v28774_v15  ;;  %v6757_v15 = vsub.f32 %v26437_v13, %v28784_v53  ;;  %v28852_v53 = vand.u32 4294901760, %v26451_v52 }
 0x831   : > { %23588 = vmatprep.subr.bf16.mxu0 %v28776_v50  ;;  %v26471_v50 = vsub.f32 %v6657_v20, %v26454_v2 }
 0x832   : > { %v6777_v20 = vsub.f32 %v26451_v52, %v28852_v53  ;;  %v6758_v42 = vand.u32 4294901760, %v6757_v15 }
 0x833   : > { %v28794_v48 = vand.u32 4294901760, %v26471_v50 }
 0x834   : > { %23590 = vmatpush3.bf16.msra.mxu0 %v25826_v16  ;;  %v6778_v15 = vand.u32 4294901760, %v6777_v20 }
 0x835   : > { %23628 = vmatprep.subr.bf16.mxu0 %v26406_v18  ;;  %v6787_v45 = vsub.f32 %v26471_v50, %v28794_v48 }
 0x837   : > { %21927 = vmatmul.mubr.f32.vlgmr.msra.gmra.mrb[12].mxu0 %v4843_v22  ;;  %v26408_v22 = vand.u32 4294901760, %v6642_v11 }
 0x838   : > { %23630 = vmatpush3.bf16.msra.mxu0 %v26406_v18 }
 0x839   : > { %v26426_v39 = vsub.f32 %v6642_v11, %v26408_v22  ;;  %23632 = vmatprep.subr.bf16.mxu0 %v26418_v26 }
 0x83b   : > { %v28778_v11 = vand.u32 4294901760, %v26426_v39 }
 0x83c   : > { %23634 = vmatpush3.bf16.msra.mxu0 %v26418_v26 }
 0x83d   : > { %v6737_v24 = vsub.f32 %v26426_v39, %v28778_v11  ;;  %v6818_v11 = vsub.f32 %v26440_v17, %v28787_v3 }
 0x83f   : > { %v6738_v38 = vand.u32 4294901760, %v6737_v24  ;;  %v6819_v3 = vand.u32 4294901760, %v6818_v11  ;;  %v6663_v24 = vsel %vm649_vm0, %v6629_v34, 0  ;;  %v28853_v11 = vand.u32 4294901760, %v26392_v10 }
 0x840   : > { %v26495_v53 = vand.u32 4294901760, %v6663_v24  ;;  %v26508_v34 = vsub.f32 %v6660_v9, %v26493_v4 }
 0x841   : > { %22003 = vmatprep.mubr.f32.mxu0 %v6738_v38  ;;  %v23635_v21 = vpack.c.bf16 %v6826_v54, %v6819_v3  ;;  %v26500_v58 = vsub.f32 %v26392_v10, %v28853_v11  ;;  %v6788_v10 = vand.u32 4294901760, %v6787_v45 }
 0x842   : > { %22004 = vmatmul.mubr.f32.vlgmr.msra.gmra.mrb[14].mxu0 %v6748_v7  ;;  %v26505_v7 = vsub.f32 %v26395_v29, %v28854_v23  ;;  %v26511_v54 = vsub.f32 %v6663_v24, %v26495_v53  ;;  %v28792_v3 = vand.u32 4294901760, %v26508_v34  ;;  %v23643_v23 = vpack.c.bf16 %v26442_v25, %v26440_v17 }
 0x843   : > { %22006 = vmatprep.mubr.f32.mxu0 %v6758_v42  ;;  %23636 = vmatprep.subr.bf16.mxu0 %v23635_v21  ;;  %v6831_v42 = vand.u32 4294901760, %v26500_v58 }
 0x844   : > { %23638 = vmatpush3.bf16.msra.mxu0 %v23635_v21  ;;  %v6838_v32 = vand.u32 4294901760, %v26505_v7  ;;  %v28793_v38 = vand.u32 4294901760, %v26511_v54  ;;  %v6797_v20 = vsub.f32 %v26508_v34, %v28792_v3  ;;  %v23647_v3 = vpack.c.bf16 %v26505_v7, %v26500_v58 }
 0x845   : > { %v6832_v29 = vsub.f32 %v26500_v58, %v6831_v42 }
 0x846   : > { %22007 = vmatmul.mubr.f32.gmra.mrb[16].mxu0 %v6768_v44  ;;  %v6839_v9 = vsub.f32 %v26505_v7, %v6838_v32  ;;  %v6807_v44 = vsub.f32 %v26511_v54, %v28793_v38  ;;  %v6798_v21 = vand.u32 4294901760, %v6797_v20  ;;  %v28861_v7 = vand.u32 4294901760, %v26451_v52 }
 0x847   : > { %22009 = vmatprep.mubr.f32.mxu0 %v6778_v15  ;;  %v6833_v24 = vand.u32 4294901760, %v6832_v29 }
 0x848   : > { %v6840_v45 = vand.u32 4294901760, %v6839_v9  ;;  %v6808_v15 = vand.u32 4294901760, %v6807_v44 }
 0x84a   : > { %22010 = vmatmul.mubr.f32.gmra.mrb[18].mxu0 %v6788_v10  ;;  %v23639_v11 = vpack.c.bf16 %v6840_v45, %v6833_v24  ;;  %v28855_v10 = vand.u32 4294901760, %v26440_v17 }
 0x84b   : > { %22012 = vmatprep.mubr.f32.mxu0 %v6798_v21 }
 0x84c   : > { %23640 = vmatprep.subr.bf16.mxu0 %v23639_v11 }
 0x84d   : > { %23642 = vmatpush3.bf16.msra.mxu0 %v23639_v11 }
 0x84e   : > { %22013 = vmatmul.mubr.f32.gmra.mrb[20].mxu0 %v6808_v15  ;;  %23644 = vmatprep.subr.bf16.mxu0 %v23643_v23 }
 0x84f   : > { %22023 = vmatprep.mubr.f32.mxu0 %v26408_v22 }
 0x852   : > { %22024 = vmatmul.mubr.f32.vlgmr.msra.gmra.mrb[14].mxu0 %v26410_v43 }
 0x853   : > { %22026 = vmatprep.mubr.f32.mxu0 %v26420_v30  ;;  %23646 = vmatpush3.bf16.msra.mxu0 %v23643_v23 }
 0x854   : > { %23648 = vmatprep.subr.bf16.mxu0 %v23647_v3 }
 0x856   : > { %22027 = vmatmul.mubr.f32.gmra.mrb[16].mxu0 %v26431_v56 }
 0x857   : > { %22029 = vmatprep.mubr.f32.mxu0 %v26433_v27  ;;  %23650 = vmatpush3.bf16.msra.mxu0 %v23647_v3  ;;  %v28856_v3 = vand.u32 4294901760, %v26442_v25 }
 0x858   : > { %23652 = vmatprep.subr.bf16.mxu0 %v26406_v18 }
 0x859   : > { %v23659_v29 = vpack.c.bf16 %v28856_v3, %v28855_v10 }
 0x85a   : > { %22030 = vmatmul.mubr.f32.gmra.mrb[18].mxu0 %v26454_v2 }
 0x85b   : > { %22032 = vmatprep.mubr.f32.mxu0 %v26493_v4 }
 0x85e   : > { %22033 = vmatmul.mubr.f32.gmra.mrb[20].mxu0 %v26495_v53 }
 0x85f   : > { %22043 = vmatprep.mubr.f32.mxu0 %v26426_v39 }
 0x862   : > { %22044 = vmatmul.mubr.f32.vlgmr.msra.gmra.mrb[14].mxu0 %v26429_v55 }
 0x863   : > { %22046 = vmatprep.mubr.f32.mxu0 %v26437_v13  ;;  %23654 = vmatpush3.bf16.msra.mxu0 %v26406_v18 }
 0x864   : > { %23656 = vmatprep.subr.bf16.mxu0 %v26418_v26 }
 0x866   : > { %22047 = vmatmul.mubr.f32.gmra.mrb[16].mxu0 %v26448_v35 }
 0x867   : > { %22049 = vmatprep.mubr.f32.mxu0 %v26451_v52  ;;  %23658 = vmatpush3.bf16.msra.mxu0 %v26418_v26 }
 0x868   : > { %23660 = vmatprep.subr.bf16.mxu0 %v23659_v29 }
 0x86a   : > { %22050 = vmatmul.mubr.f32.gmra.mrb[18].mxu0 %v26471_v50 }
 0x86b   : > { %22052 = vmatprep.mubr.f32.mxu0 %v26508_v34 }
 0x86e   : > { %22053 = vmatmul.mubr.f32.gmra.mrb[20].mxu0 %v26511_v54 }
 0x90a   : > { %v5255_v9 = vpop.f32.mrb[12].mxu0 }
 0x90b   : > { %v5260_v20 = vrot.slane %v5255_v9, 2  ;;  %v5261_v44 = vrot.slane %v5255_v9, 3  ;;  %v5262_v24 = vrot.slane %v5255_v9, 4  ;;  %v5263_v45 = vrot.slane %v5255_v9, 5  ;;  %v21928_v21 = vpop.f32.mrb[13].mxu0 }
 0x90c   : > { %v5264_v15 = vrot.slane %v5255_v9, 6  ;;  %v5265_v11 = vrot.slane %v5255_v9, 7  ;;  %v5266_v23 = vrot.slane %v5255_v9, 1 }
 0x90d   : > { %v5275_v17 = vadd.f32 %v25923_v14, %v5260_v20  ;;  %v5276_v25 = vadd.f32 %v25921_v12, %v5261_v44  ;;  %v5277_v10 = vadd.f32 %v25927_v33, %v5262_v24  ;;  %v5278_v3 = vadd.f32 %v25925_v31, %v5263_v45 }
 0x90e   : > { %v5279_v21 = vadd.f32 %v25931_v41, %v5264_v15  ;;  %v5280_v38 = vadd.f32 %v25929_v37, %v5265_v11  ;;  %v5282_v48 = vadd.f32 %v25933_v46, %v5266_v23  ;;  %v5281_v20 = vadd.f32 %v25935_v49, %v5255_v9 }
 0x90f   : > { %24741 = vtanh.f32 %v5275_v17  ;;  %v28857_v44 = vand.u32 4294901760, %v26426_v39  ;;  %v23663_v24 = vpack.c.bf16 %v6838_v32, %v6831_v42  ;;  %v28858_v45 = vand.u32 4294901760, %v26429_v55 }
 0x910   : > { %24743 = vtanh.f32 %v5276_v25  ;;  %v28859_v15 = vand.u32 4294901760, %v26437_v13 }
 0x911   : > { %24745 = vtanh.f32 %v5277_v10  ;;  %22063 = vmatprep.mubr.f32.mxu0 %v28857_v44 }
 0x912   : > { %24747 = vtanh.f32 %v5278_v3  ;;  %22064 = vmatmul.mubr.f32.vlgmr.msra.gmra.mrb[14].mxu0 %v28858_v45 }
 0x913   : > { %24749 = vtanh.f32 %v5279_v21  ;;  %22066 = vmatprep.mubr.f32.mxu0 %v28859_v15  ;;  %23662 = vmatpush3.bf16.msra.mxu0 %v23659_v29  ;;  %v28863_v21 = vand.u32 4294901760, %v26508_v34  ;;  %v5295_v15 = vpop.permute.xlu0 %5294 }
 0x914   : > { %24751 = vtanh.f32 %v5280_v38  ;;  %23664 = vmatprep.subr.bf16.mxu0 %v23663_v24  ;;  %v28860_v38 = vand.u32 4294901760, %v26448_v35  ;;  %v28862_v35 = vand.u32 4294901760, %v26471_v50  ;;  %vm5296_vm2 = vcmp.eq.s32.totalorder %v5295_v15, 1 }
 0x915   : > { %24753 = vtanh.f32 %v5282_v48 }
 0x916   : > { %24755 = vtanh.f32 %v5281_v20  ;;  %22067 = vmatmul.mubr.f32.gmra.mrb[16].mxu0 %v28860_v38 }
 0x917   : > { %22069 = vmatprep.mubr.f32.mxu0 %v28861_v7  ;;  %23666 = vmatpush3.bf16.msra.mxu0 %v23663_v24 }
 0x918   : > { %23668 = vmatprep.subr.bf16.mxu0 %v26406_v18 }
 0x919   : > { %v24742_v9 = vpop.eup %24741 }
 0x91a   : > { %v24744_v11 = vpop.eup %24743  ;;  %v5305_v39 = vrot.slane %v24742_v9, 6  ;;  %22070 = vmatmul.mubr.f32.gmra.mrb[18].mxu0 %v28862_v35 }
 0x91b   : > { %v24746_v58 = vpop.eup %24745  ;;  %v5306_v23 = vrot.slane %v24744_v11, 5  ;;  %22072 = vmatprep.mubr.f32.mxu0 %v28863_v21  ;;  %v28864_v11 = vand.u32 4294901760, %v26511_v54 }
 0x91c   : > { %v24748_v48 = vpop.eup %24747  ;;  %v5308_v55 = vrot.slane %v24746_v58, 4 }
 0x91d   : > { %v24750_v13 = vpop.eup %24749  ;;  %v5307_v42 = vsel %vm1999_vm6, %v5306_v23, %v5305_v39  ;;  %v5310_v32 = vrot.slane %v24748_v48, 3 }
 0x91e   : > { %v24752_v29 = vpop.eup %24751  ;;  %v5309_v17 = vsel %vm2002_vm7, %v5308_v55, %v5307_v42  ;;  %v5312_v25 = vrot.slane %v24750_v13, 2  ;;  %22073 = vmatmul.mubr.f32.gmra.mrb[20].mxu0 %v28864_v11 }
 0x91f   : > { %v24754_v10 = vpop.eup %24753  ;;  %v5314_v3 = vrot.slane %v24752_v29, 1  ;;  %v5311_v52 = vsel %vm2005_vm8, %v5310_v32, %v5309_v17  ;;  %22083 = vmatprep.mubr.f32.mxu0 %v26408_v22  ;;  %v28865_v29 = vmov 0.0|0.0  }
 0x920   : > { %v5313_v20 = vsel %vm2008_vm9, %v5312_v25, %v5311_v52  ;;  %v24756_v44 = vpop.eup %24755  ;;  %v5317_v45 = vrot.slane %v24754_v10, 7 }
 0x921   : > { %v5315_v24 = vsel %vm2011_vm10, %v5314_v3, %v5313_v20 }
 0x922   : > { %v5316_v9 = vsel %vm2014_vm11, %v24756_v44, %v5315_v24  ;;  %22084 = vmatmul.mubr.f32.vlgmr.msra.gmra.mrb[14].mxu0 %v26410_v43 }
 0x923   : > { %v5318_v50 = vsel %vm2017_vm12, %v5317_v45, %v5316_v9  ;;  %22086 = vmatprep.mubr.f32.mxu0 %v26420_v30  ;;  %23670 = vmatpush3.bf16.msra.mxu0 %v26406_v18 }
 0x924   : > { %v26595_v34 = vsel %vm5296_vm2, %v5318_v50, %v26333_v28  ;;  %23672 = vmatprep.subr.bf16.mxu0 %v26418_v26 }
 0x925   : > { %v5322_v39 = vsel %vm649_vm0, %v26595_v34, 0  ;;  %v6180_v38 = vrot.slane %v26595_v34, %v26065_v19 }
 0x926   : > { %v26601_v58 = vand.u32 4294901760, %v5322_v39  ;;  %22087 = vmatmul.mubr.f32.gmra.mrb[16].mxu0 %v26431_v56 }
 0x927   : > { %v26607_v54 = vrot.slane %v6180_v38, %v26065_v19  ;;  %v6188_v23 = vcombine.high %v6180_v38, %v6180_v38  ;;  %22089 = vmatprep.mubr.f32.mxu0 %v26433_v27  ;;  %23674 = vmatpush3.bf16.msra.mxu0 %v26418_v26 }
 0x928   : > { %v5394_v7 = vsub.f32 %v5322_v39, %v26601_v58  ;;  %23747 = vmatprep.subr.bf16.mxu0 %v28865_v29 }
 0x929   : > { %v6210_v48 = vrot.slane %v6188_v23, %v26065_v19  ;;  %v6218_v55 = vcombine.high %v26607_v54, %v26607_v54 }
 0x92a   : > { %v5395_v13 = vand.u32 4294901760, %v5394_v7  ;;  %22090 = vmatmul.mubr.f32.gmra.mrb[18].mxu0 %v26454_v2 }
 0x92b   : > { %v6479_v18 = vrot.slane %v6210_v48, %v26094_v5  ;;  %v6483_v42 = vrot.slane %v6218_v55, %v26094_v5  ;;  %v6220_v17 = vcombine.high %v6210_v48, %v6210_v48  ;;  %22092 = vmatprep.mubr.f32.mxu0 %v26493_v4 }
 0x92c   : > { %v5396_v32 = vsub.f32 %v5394_v7, %v5395_v13 }
 0x92d   : > { %v26622_v25 = vsel %vm6597_vm4, %v26349_v59, %v6479_v18  ;;  %v26626_v35 = vsel %vm6597_vm4, %v26353_v60, %v6483_v42  ;;  %v6487_v26 = vrot.slane %v6220_v17, %v26094_v5  ;;  %v28866_v59 = vmov 0.0  }
 0x92e   : > { %v5397_v10 = vand.u32 4294901760, %v5396_v32  ;;  %22093 = vmatmul.mubr.f32.gmra.mrb[20].mxu0 %v26495_v53 }
 0x92f   : > { %v26633_v3 = vsel %vm6597_vm4, %v26358_v6, %v6487_v26  ;;  %22103 = vmatprep.mubr.f32.mxu0 %v26408_v22 }
 0x930   : > { %21938 = vmatmul.mubr.f32.vlgmr.msra.gmra.mrb[16].mxu1 %v5397_v10 }
 0x931   : > { %23599 = vmatpush3.bf16.msra.mxu1 %v25863_v47  ;;  %21948 = vmatprep.mubr.msk.f32.mxu1 %vm25260_vm5, %v28866_v59  ;;  %v7451_v47 = vld [vmem:[%s25673_s10] sm:$0xff] }
 0x932   : > { %23600 = vmatprep.subr.bf16.mxu1 %v28865_v29  ;;  %22104 = vmatmul.mubr.f32.vlgmr.msra.gmra.mrb[14].mxu0 %v26410_v43 }
 0x933   : > { %22106 = vmatprep.mubr.f32.mxu0 %v26420_v30 }
 0x935   : > { %23602 = vmatpush3.bf16.msra.mxu1 %v25868_v57  ;;  %v7452_v57 = vld [vmem:[%s25673_s10 + $0x8] sm:$0xff] }
 0x936   : > { %23603 = vmatprep.subr.bf16.mxu1 %v28865_v29  ;;  %22107 = vmatmul.mubr.f32.gmra.mrb[16].mxu0 %v26431_v56 }
 0x937   : > { %22109 = vmatprep.mubr.f32.mxu0 %v26433_v27 }
 0x938   : > { %21949 = vmatmul.mubr.f32.vlgmr.msra.gmra.mrb[16].mxu1 %v26601_v58 }
 0x939   : > { %23605 = vmatpush3.bf16.msra.mxu1 %v25874_v61  ;;  %21959 = vmatprep.mubr.msk.f32.mxu1 %vm25260_vm5, %v28866_v59  ;;  %v7453_v61 = vld [vmem:[%s25673_s10 + $0x10] sm:$0xff] }
 0x93a   : > { %23606 = vmatprep.subr.bf16.mxu1 %v28865_v29  ;;  %22110 = vmatmul.mubr.f32.gmra.mrb[18].mxu0 %v26454_v2 }
 0x93b   : > { %22112 = vmatprep.mubr.f32.mxu0 %v26493_v4 }
 0x93d   : > { %23608 = vmatpush3.bf16.msra.mxu1 %v25879_v62  ;;  %v7458_v62 = vand.u32 4294901760, %v7451_v47 }
 0x93e   : > { %23609 = vmatprep.subr.bf16.mxu1 %v28865_v29  ;;  %22113 = vmatmul.mubr.f32.gmra.mrb[20].mxu0 %v26495_v53 }
 0x93f   : > { %22255 = vmatprep.mubr.msk.f32.mxu0 %vm25260_vm5, %v28866_v59  ;;  %v7538_v6 = vsub.f32 %v7451_v47, %v7458_v62 }
 0x940   : > { %21960 = vmatmul.mubr.f32.vlgmr.msra.gmra.mrb[16].mxu1 %v5394_v7 }
 0x941   : > { %23611 = vmatpush3.bf16.msra.mxu1 %v25818_v51  ;;  %21970 = vmatprep.mubr.msk.f32.mxu1 %vm25260_vm5, %v28866_v59  ;;  %v7539_v43 = vand.u32 4294901760, %v7538_v6 }
 0x942   : > { %23612 = vmatprep.subr.bf16.mxu1 %v28865_v29 }
 0x943   : > { %v7540_v56 = vsub.f32 %v7538_v6, %v7539_v43 }
 0x945   : > { %23614 = vmatpush3.bf16.msra.mxu1 %v25826_v16  ;;  %v7541_v52 = vand.u32 4294901760, %v7540_v56 }
 0x946   : > { %23615 = vmatprep.subr.bf16.mxu1 %v28865_v29 }
 0x948   : > { %21971 = vmatmul.mubr.f32.vlgmr.msra.gmra.mrb[16].mxu1 %v5395_v13 }
 0x949   : > { %23617 = vmatpush3.bf16.msra.mxu1 %v25892_v63  ;;  %21981 = vmatprep.mubr.msk.f32.mxu1 %vm25260_vm5, %v28866_v59  ;;  %v7461_v63 = vand.u32 4294901760, %v7452_v57 }
 0x94a   : > { %23618 = vmatprep.subr.bf16.mxu1 %v28865_v29 }
 0x94b   : > { %v26685_v60 = vpack.c.bf16 %v7461_v63, %v7458_v62  ;;  %v7545_v22 = vsub.f32 %v7452_v57, %v7461_v63 }
 0x94d   : > { %23620 = vmatpush3.bf16.msra.mxu1 %v25897_v1  ;;  %v7464_v1 = vand.u32 4294901760, %v7453_v61  ;;  %23749 = vmatpush3.bf16.msra.mxu0 %v26685_v60  ;;  %v7546_v30 = vand.u32 4294901760, %v7545_v22  ;;  %v26701_v39 = vpack.c.bf16 %v7545_v22, %v7538_v6 }
 0x94e   : > { %23621 = vmatprep.subr.bf16.mxu1 %v28865_v29  ;;  %23750 = vmatprep.subr.bf16.mxu0 %v28865_v29 }
 0x94f   : > { %v7547_v27 = vsub.f32 %v7545_v22, %v7546_v30  ;;  %v7552_v2 = vsub.f32 %v7453_v61, %v7464_v1 }
 0x950   : > { %21982 = vmatmul.mubr.f32.vlgmr.msra.gmra.mrb[16].mxu1 %v26601_v58 }
 0x951   : > { %23623 = vmatpush3.bf16.msra.mxu1 %v25818_v51  ;;  %21992 = vmatprep.mubr.msk.f32.mxu1 %vm25260_vm5, %v28866_v59  ;;  %v7454_v51 = vld [vmem:[%s25673_s10 + $0x18] sm:$0xff]  ;;  %v7548_v21 = vand.u32 4294901760, %v7547_v27  ;;  %v7553_v20 = vand.u32 4294901760, %v7552_v2  ;;  %s20173_s10 = sshll.u32 %s28074_s17, 4  ;;  %s28639_s10 = int_to_ptr.vmem [resolvable:$true] %s20173_s10 }
 0x952   : > { %23624 = vmatprep.subr.bf16.mxu1 %v28865_v29  ;;  %v7467_v4 = vand.u32 4294901760, %v7454_v51  ;;  %s25137_s1 = scalar_lea.vmem %s28639_s10, 1024  ;;  %p25144_p7 = scmp.lt.s32.totalorder %s28639_s10, %s25142_s13 }
 0x953   : > { %v26697_v24 = vpack.c.bf16 %v7548_v21, %v7541_v52  ;;  %v7554_v45 = vsub.f32 %v7552_v2, %v7553_v20  ;;  %p25138_p6 = scmp.ne.s32.totalorder %s28639_s10, %s25137_s1  ;;  %p25145_p2 = scmp.lt.s32.totalorder %s25143_s8, %s25137_s1 }
 0x954   : > { %v7559_v53 = vsub.f32 %v7454_v51, %v7467_v4 }
 0x955   : > { %23626 = vmatpush3.bf16.msra.mxu1 %v25826_v16  ;;  %v26688_v16 = vpack.c.bf16 %v7467_v4, %v7464_v1  ;;  %v7555_v9 = vand.u32 4294901760, %v7554_v45  ;;  %p25139_p5 = pnand %p25138_p6, %p28878_p8  ;;  %p25146_p11 = por %p25145_p2, %p25144_p7 }
 0x956   : > { %23675 = vmatprep.subr.bf16.mxu1 %v28865_v29  ;;  %v7560_v44 = vand.u32 4294901760, %v7559_v53  ;;  %v26703_v38 = vpack.c.bf16 %v7559_v53, %v7552_v2 }
 0x957   : > { %23752 = vmatpush3.bf16.msra.mxu0 %v26688_v16  ;;  %p25140_p3 = pneg %p25139_p5 }
 0x958   : > { %21993 = vmatmul.mubr.f32.vlgmr.msra.gmra.mrb[16].mxu1 %v26601_v58  ;;  %23753 = vmatprep.subr.bf16.mxu0 %v28865_v29  ;;  %v7561_v15 = vsub.f32 %v7559_v53, %v7560_v44  ;;  %v26705_v58 = vpack.c.bf16 %v7546_v30, %v7539_v43  ;;  %v26707_v23 = vpack.c.bf16 %v7560_v44, %v7553_v20 }
 0x959   : > { %22123 = vmatprep.mubr.msk.f32.mxu1 %vm25260_vm5, %v28866_v59  ;;  %23677 = vmatpush3.bf16.msra.mxu1 %v26685_v60  ;;  %p25147_p0 = pnand %p25146_p11, %p25140_p3 }
 0x95a   : > { %23678 = vmatprep.subr.bf16.mxu1 %v28865_v29  ;;  %v7562_v11 = vand.u32 4294901760, %v7561_v15 }
 0x95c   : > { %v26699_v50 = vpack.c.bf16 %v7562_v11, %v7555_v9  ;;  %v5845_v11 = vpop.permute.xlu1 %5844 }
 0x95d   : > { %23680 = vmatpush3.bf16.msra.mxu1 %v26688_v16  ;;  %vm5846_vm2 = vcmp.eq.s32.totalorder %v5845_v11, 1 }
 0x95e   : > { %23681 = vmatprep.subr.bf16.mxu1 %v28865_v29 }
 0xa05   : > { %v26709_v7 = vpop.f32.mrb[14].mxu0 }
 0xa06   : > { %v26711_v48 = vpop.f32.mrb[15].mxu0 }
 0xa09   : > { %v26713_v55 = vpop.f32.mrb[16].mxu0 }
 0xa0a   : > { %v26715_v13 = vpop.f32.mrb[17].mxu0 }
 0xa0d   : > { %v26717_v18 = vpop.f32.mrb[18].mxu0 }
 0xa0e   : > { %v26719_v42 = vpop.f32.mrb[19].mxu0 }
 0xa11   : > { %v26721_v32 = vpop.f32.mrb[20].mxu0 }
 0xa12   : > { %v26723_v17 = vpop.f32.mrb[21].mxu0 }
 0xa2b   : > { %v5805_v10 = vpop.f32.mrb[16].mxu1 }
 0xa2c   : > { %v5810_v26 = vrot.slane %v5805_v10, 1  ;;  %v5811_v47 = vrot.slane %v5805_v10, 2  ;;  %v5812_v57 = vrot.slane %v5805_v10, 3  ;;  %v5813_v61 = vrot.slane %v5805_v10, 4  ;;  %v21994_v62 = vpop.f32.mrb[17].mxu1 }
 0xa2d   : > { %v5814_v63 = vrot.slane %v5805_v10, 5  ;;  %v5815_v51 = vrot.slane %v5805_v10, 6  ;;  %v5816_v1 = vrot.slane %v5805_v10, 7  ;;  %v5832_v2 = vadd.f32 %v25933_v46, %v5805_v10 }
 0xa2e   : > { %v5825_v4 = vadd.f32 %v25923_v14, %v5810_v26  ;;  %v5826_v6 = vadd.f32 %v25921_v12, %v5811_v47  ;;  %v5827_v22 = vadd.f32 %v25927_v33, %v5812_v57  ;;  %v5828_v43 = vadd.f32 %v25925_v31, %v5813_v61 }
 0xa2f   : > { %v5829_v30 = vadd.f32 %v25931_v41, %v5814_v63  ;;  %v5830_v56 = vadd.f32 %v25929_v37, %v5815_v51  ;;  %v5831_v27 = vadd.f32 %v25935_v49, %v5816_v1 }
 0xa30   : > { %24757 = vtanh.f32 %v5825_v4 }
 0xa31   : > { %24759 = vtanh.f32 %v5826_v6 }
 0xa32   : > { %24761 = vtanh.f32 %v5827_v22 }
 0xa33   : > { %24763 = vtanh.f32 %v5828_v43 }
 0xa34   : > { %24765 = vtanh.f32 %v5829_v30 }
 0xa35   : > { %24767 = vtanh.f32 %v5830_v56 }
 0xa36   : > { %24769 = vtanh.f32 %v5831_v27 }
 0xa37   : > { %24771 = vtanh.f32 %v5832_v2 }
 0xa3a   : > { %v24758_v12 = vpop.eup %24757 }
 0xa3b   : > { %v24760_v14 = vpop.eup %24759  ;;  %v5855_v33 = vrot.slane %v24758_v12, 7 }
 0xa3c   : > { %v24762_v31 = vpop.eup %24761  ;;  %v5856_v53 = vrot.slane %v24760_v14, 6 }
 0xa3d   : > { %v24764_v41 = vpop.eup %24763  ;;  %v5858_v52 = vrot.slane %v24762_v31, 5 }
 0xa3e   : > { %v24766_v21 = vpop.eup %24765  ;;  %v5857_v37 = vsel %vm1999_vm6, %v5856_v53, %v5855_v33  ;;  %v5860_v20 = vrot.slane %v24764_v41, 4 }
 0xa3f   : > { %v24768_v49 = vpop.eup %24767  ;;  %v5862_v44 = vrot.slane %v24766_v21, 3  ;;  %v5859_v45 = vsel %vm2002_vm7, %v5858_v52, %v5857_v37 }
 0xa40   : > { %v24770_v15 = vpop.eup %24769  ;;  %v5864_v46 = vrot.slane %v24768_v49, 2  ;;  %v5861_v9 = vsel %vm2005_vm8, %v5860_v20, %v5859_v45 }
 0xa41   : > { %v5863_v10 = vsel %vm2008_vm9, %v5862_v44, %v5861_v9  ;;  %v5866_v26 = vrot.slane %v24770_v15, 1  ;;  %v24772_v57 = vpop.eup %24771 }
 0xa42   : > { %v5865_v47 = vsel %vm2011_vm10, %v5864_v46, %v5863_v10 }
 0xa43   : > { %v5867_v61 = vsel %vm2014_vm11, %v5866_v26, %v5865_v47 }
 0xa44   : > { %v5868_v62 = vsel %vm2017_vm12, %v24772_v57, %v5867_v61 }
 0xa45   : > { %v26741_v63 = vsel %vm5846_vm2, %v5868_v62, %v26595_v34  ;;  %vm6606_vm2 = vcmask 1046528  }
 0xa46   : > { %v6230_v51 = vrot.slane %v26741_v63, %v26065_v19  ;;  %v7455_v1 = vsel %vm649_vm0, %v26741_v63, 0 }
 0xa47   : > { %v7526_v4 = vand.u32 4294901760, %v7455_v1 }
 0xa48   : > { %v26748_v6 = vrot.slane %v6230_v51, %v26065_v19  ;;  %v6238_v22 = vcombine.high %v6230_v51, %v6230_v51 }
 0xa49   : > { %v7527_v43 = vsub.f32 %v7455_v1, %v7526_v4 }
 0xa4a   : > { %v6260_v30 = vrot.slane %v6238_v22, %v26065_v19  ;;  %v6268_v56 = vcombine.high %v26748_v6, %v26748_v6 }
 0xa4b   : > { %v7528_v27 = vand.u32 4294901760, %v7527_v43 }
 0xa4c   : > { %v6519_v2 = vrot.slane %v6260_v30, %v26094_v5  ;;  %v6523_v12 = vrot.slane %v6268_v56, %v26094_v5  ;;  %v6270_v14 = vcombine.high %v6260_v30, %v6260_v30 }
 0xa4d   : > { %v7529_v33 = vsub.f32 %v7527_v43, %v7528_v27 }
 0xa4e   : > { %v26757_v31 = vsel %vm6606_vm2, %v26622_v25, %v6519_v2  ;;  %v26761_v53 = vsel %vm6606_vm2, %v26626_v35, %v6523_v12  ;;  %v6527_v41 = vrot.slane %v6270_v14, %v26094_v5  ;;  %v20419_v25 = vld [vmem:[%s625_s26] ss:$0 sm:$0xff] }
 0xa4f   : > { %v7530_v52 = vand.u32 4294901760, %v7529_v33  ;;  %v26813_v35 = vadd.f32 %v26709_v7, %v20419_v25  ;;  %v26819_v37 = vadd.f32 %v26713_v55, %v20419_v25  ;;  %v26822_v20 = vadd.f32 %v20419_v25, %v26715_v13 }
 0xa50   : > { %v26766_v21 = vsel %vm6606_vm2, %v26633_v3, %v6527_v41  ;;  %v26816_v3 = vadd.f32 %v20419_v25, %v26711_v48  ;;  %v26825_v49 = vadd.f32 %v26717_v18, %v20419_v25  ;;  %v26828_v7 = vadd.f32 %v20419_v25, %v26719_v42 }
 0xa51   : > { %22124 = vmatmul.mubr.f32.vlgmr.msra.gmra.mrb[18].mxu1 %v7530_v52  ;;  %v26835_v57 = vadd.f32 %v20419_v25, %v26723_v17  ;;  %v26839_v42 = vadd.f32 %v26721_v32, %v20419_v25 }
 0xa52   : > { %23683 = vmatpush3.bf16.msra.mxu1 %v26697_v24  ;;  %22134 = vmatprep.mubr.msk.f32.mxu1 %vm25260_vm5, %v28866_v59 }
 0xa53   : > { %23684 = vmatprep.subr.bf16.mxu1 %v28865_v29 }
 0xa56   : > { %23686 = vmatpush3.bf16.msra.mxu1 %v26699_v50 }
 0xa57   : > { %23687 = vmatprep.subr.bf16.mxu1 %v28865_v29 }
 0xa59   : > { %22135 = vmatmul.mubr.f32.vlgmr.msra.gmra.mrb[18].mxu1 %v7526_v4 }
 0xa5a   : > { %23689 = vmatpush3.bf16.msra.mxu1 %v26701_v39  ;;  %22145 = vmatprep.mubr.msk.f32.mxu1 %vm25260_vm5, %v28866_v59 }
 0xa5b   : > { %23690 = vmatprep.subr.bf16.mxu1 %v28865_v29 }
 0xa5e   : > { %23692 = vmatpush3.bf16.msra.mxu1 %v26703_v38 }
 0xa5f   : > { %23693 = vmatprep.subr.bf16.mxu1 %v28865_v29 }
 0xa61   : > { %22146 = vmatmul.mubr.f32.vlgmr.msra.gmra.mrb[18].mxu1 %v7527_v43 }
 0xa62   : > { %23695 = vmatpush3.bf16.msra.mxu1 %v26685_v60  ;;  %22156 = vmatprep.mubr.msk.f32.mxu1 %vm25260_vm5, %v28866_v59 }
 0xa63   : > { %23696 = vmatprep.subr.bf16.mxu1 %v28865_v29 }
 0xa66   : > { %23698 = vmatpush3.bf16.msra.mxu1 %v26688_v16 }
 0xa67   : > { %23699 = vmatprep.subr.bf16.mxu1 %v28865_v29 }
 0xa69   : > { %22157 = vmatmul.mubr.f32.vlgmr.msra.gmra.mrb[18].mxu1 %v7528_v27 }
 0xa6a   : > { %23701 = vmatpush3.bf16.msra.mxu1 %v26705_v58  ;;  %22167 = vmatprep.mubr.msk.f32.mxu1 %vm25260_vm5, %v28866_v59 }
 0xa6b   : > { %23702 = vmatprep.subr.bf16.mxu1 %v28865_v29 }
 0xa6e   : > { %23704 = vmatpush3.bf16.msra.mxu1 %v26707_v23 }
 0xa6f   : > { %23705 = vmatprep.subr.bf16.mxu1 %v28865_v29 }
 0xa71   : > { %22168 = vmatmul.mubr.f32.vlgmr.msra.gmra.mrb[18].mxu1 %v7526_v4 }
 0xa72   : > { %23707 = vmatpush3.bf16.msra.mxu1 %v26685_v60  ;;  %22178 = vmatprep.mubr.msk.f32.mxu1 %vm25260_vm5, %v28866_v59 }
 0xa73   : > { %23708 = vmatprep.subr.bf16.mxu1 %v28865_v29 }
 0xa76   : > { %23710 = vmatpush3.bf16.msra.mxu1 %v26688_v16 }
 0xa77   : > { %23711 = vmatprep.subr.bf16.mxu1 %v28865_v29 }
 0xa79   : > { %22179 = vmatmul.mubr.f32.vlgmr.msra.gmra.mrb[18].mxu1 %v7526_v4 }
 0xa7a   : > { %23713 = vmatpush3.bf16.msra.mxu1 %v26685_v60  ;;  %22189 = vmatprep.mubr.msk.f32.mxu1 %vm25260_vm5, %v28866_v59 }
 0xa7b   : > { %23714 = vmatprep.subr.bf16.mxu1 %v28865_v29 }
 0xa7e   : > { %23716 = vmatpush3.bf16.msra.mxu1 %v26688_v16 }
 0xa7f   : > { %23717 = vmatprep.subr.bf16.mxu1 %v28865_v29 }
 0xb4c   : > { %v7938_v44 = vpop.f32.mrb[18].mxu1 }
 0xb4d   : > { %v7943_v45 = vrot.slane %v7938_v44, 1  ;;  %v7944_v15 = vrot.slane %v7938_v44, 2  ;;  %v7945_v46 = vrot.slane %v7938_v44, 3  ;;  %v7946_v9 = vrot.slane %v7938_v44, 4  ;;  %v22180_v11 = vpop.f32.mrb[19].mxu1 }
 0xb4e   : > { %v7947_v48 = vrot.slane %v7938_v44, 5  ;;  %v7948_v10 = vrot.slane %v7938_v44, 6  ;;  %v7958_v55 = vadd.f32 %v26816_v3, %v7938_v44  ;;  %v7949_v26 = vrot.slane %v7938_v44, 7 }
 0xb4f   : > { %v7959_v13 = vadd.f32 %v26813_v35, %v7943_v45  ;;  %v7960_v47 = vadd.f32 %v26822_v20, %v7944_v15  ;;  %v7961_v18 = vadd.f32 %v26819_v37, %v7945_v46  ;;  %v7962_v61 = vadd.f32 %v26828_v7, %v7946_v9 }
 0xb50   : > { %24773 = vtanh.f32 %v7958_v55  ;;  %v7963_v62 = vadd.f32 %v26825_v49, %v7947_v48  ;;  %v7964_v51 = vadd.f32 %v26835_v57, %v7948_v10  ;;  %v7965_v1 = vadd.f32 %v26839_v42, %v7949_v26 }
 0xb51   : > { %24775 = vtanh.f32 %v7959_v13 }
 0xb52   : > { %24777 = vtanh.f32 %v7960_v47 }
 0xb53   : > { %24779 = vtanh.f32 %v7961_v18 }
 0xb54   : > { %24781 = vtanh.f32 %v7962_v61 }
 0xb55   : > { %24783 = vtanh.f32 %v7963_v62 }
 0xb56   : > { %24785 = vtanh.f32 %v7964_v51 }
 0xb57   : > { %24787 = vtanh.f32 %v7965_v1 }
 0xb5a   : > { %v26844_v17 = vpop.eup %24773 }
 0xb5b   : > { %v26846_v4 = vpop.eup %24775 }
 0xb5c   : > { %v26848_v22 = vpop.eup %24777  ;;  %v7982_v32 = vrot.slane %v26846_v4, 7 }
 0xb5d   : > { %v26851_v43 = vpop.eup %24779  ;;  %v7984_v30 = vrot.slane %v26848_v22, 6 }
 0xb5e   : > { %v26854_v56 = vpop.eup %24781  ;;  %v7983_v27 = vsel %vm1999_vm6, %v7982_v32, %v26844_v17  ;;  %v7986_v2 = vrot.slane %v26851_v43, 5 }
 0xb5f   : > { %v26859_v12 = vpop.eup %24783  ;;  %v7985_v14 = vsel %vm2002_vm7, %v7984_v30, %v7983_v27  ;;  %v7988_v33 = vrot.slane %v26854_v56, 4 }
 0xb60   : > { %v26863_v41 = vpop.eup %24785  ;;  %v7987_v52 = vsel %vm2005_vm8, %v7986_v2, %v7985_v14  ;;  %v7990_v25 = vrot.slane %v26859_v12, 3 }
 0xb61   : > { %v26867_v44 = vpop.eup %24787  ;;  %v7989_v45 = vsel %vm2008_vm9, %v7988_v33, %v7987_v52  ;;  %v7992_v15 = vrot.slane %v26863_v41, 2 }
 0xb62   : > { %v7991_v46 = vsel %vm2011_vm10, %v7990_v25, %v7989_v45  ;;  %v7994_v9 = vrot.slane %v26867_v44, 1 }
 0xb63   : > { %v7993_v11 = vsel %vm2014_vm11, %v7992_v15, %v7991_v46 }
 0xb64   : > { %v7995_v48 = vsel %vm2017_vm12, %v7994_v9, %v7993_v11 }
 0xb65   : > { %v7996_v10 = vsel %vm649_vm0, %v7995_v48, 0 }
 0xb66   : > { %v8067_v55 = vand.u32 4294901760, %v7996_v10 }
 0xb68   : > { %v8068_v26 = vsub.f32 %v7996_v10, %v8067_v55 }
 0xb6a   : > { %v8069_v13 = vand.u32 4294901760, %v8068_v26 }
 0xb6c   : > { %v8070_v47 = vsub.f32 %v8068_v26, %v8069_v13 }
 0xb6e   : > { %v8071_v18 = vand.u32 4294901760, %v8070_v47 }
 0xb70   : > { %22190 = vmatmul.mubr.f32.vlgmr.msra.gmra.mrb[20].mxu1 %v8071_v18 }
 0xb71   : > { %23719 = vmatpush3.bf16.msra.mxu1 %v26697_v24  ;;  %22200 = vmatprep.mubr.msk.f32.mxu1 %vm25260_vm5, %v28866_v59 }
 0xb72   : > { %23720 = vmatprep.subr.bf16.mxu1 %v28865_v29 }
 0xb75   : > { %23722 = vmatpush3.bf16.msra.mxu1 %v26699_v50 }
 0xb76   : > { %23723 = vmatprep.subr.bf16.mxu1 %v28865_v29 }
 0xb78   : > { %22201 = vmatmul.mubr.f32.vlgmr.msra.gmra.mrb[20].mxu1 %v8067_v55 }
 0xb79   : > { %23725 = vmatpush3.bf16.msra.mxu1 %v26701_v39  ;;  %22211 = vmatprep.mubr.msk.f32.mxu1 %vm25260_vm5, %v28866_v59 }
 0xb7a   : > { %23726 = vmatprep.subr.bf16.mxu1 %v28865_v29 }
 0xb7d   : > { %23728 = vmatpush3.bf16.msra.mxu1 %v26703_v38 }
 0xb7e   : > { %23729 = vmatprep.subr.bf16.mxu1 %v28865_v29 }
 0xb80   : > { %22212 = vmatmul.mubr.f32.vlgmr.msra.gmra.mrb[20].mxu1 %v8068_v26 }
 0xb81   : > { %23731 = vmatpush3.bf16.msra.mxu1 %v26685_v60  ;;  %22222 = vmatprep.mubr.msk.f32.mxu1 %vm25260_vm5, %v28866_v59 }
 0xb82   : > { %23732 = vmatprep.subr.bf16.mxu1 %v28865_v29 }
 0xb85   : > { %23734 = vmatpush3.bf16.msra.mxu1 %v26688_v16 }
 0xb86   : > { %23735 = vmatprep.subr.bf16.mxu1 %v28865_v29 }
 0xb88   : > { %22223 = vmatmul.mubr.f32.vlgmr.msra.gmra.mrb[20].mxu1 %v8069_v13 }
 0xb89   : > { %23737 = vmatpush3.bf16.msra.mxu1 %v26705_v58  ;;  %22233 = vmatprep.mubr.msk.f32.mxu1 %vm25260_vm5, %v28866_v59 }
 0xb8a   : > { %23738 = vmatprep.subr.bf16.mxu1 %v28865_v29 }
 0xb8d   : > { %23740 = vmatpush3.bf16.msra.mxu1 %v26707_v23 }
 0xb8e   : > { %23741 = vmatprep.subr.bf16.mxu1 %v28865_v29 }
 0xb90   : > { %22234 = vmatmul.mubr.f32.vlgmr.msra.gmra.mrb[20].mxu1 %v8067_v55 }
 0xb91   : > { %23743 = vmatpush3.bf16.msra.mxu1 %v26685_v60  ;;  %22244 = vmatprep.mubr.msk.f32.mxu1 %vm25260_vm5, %v28866_v59 }
 0xb92   : > { %23744 = vmatprep.subr.bf16.mxu1 %v28865_v29 }
 0xb95   : > { %23746 = vmatpush3.bf16.msra.mxu1 %v26688_v16 }
 0xb96   : > { %23783 = vmatprep.subr.bf16.mxu1 %v28865_v29 }
 0xb98   : > { %22245 = vmatmul.mubr.f32.vlgmr.msra.gmra.mrb[20].mxu1 %v8067_v55 }
 0xb99   : > { %23785 = vmatpush3.bf16.msra.mxu1 %v26685_v60  ;;  %22321 = vmatprep.mubr.msk.f32.mxu1 %vm25260_vm5, %v28866_v59 }
 0xb9a   : > { %23786 = vmatprep.subr.bf16.mxu1 %v28865_v29 }
 0xb9d   : > { %23788 = vmatpush3.bf16.msra.mxu1 %v26688_v16 }
 0xb9e   : > { %23789 = vmatprep.subr.bf16.mxu1 %v28865_v29 }
 0xc6b   : > { %v8479_v61 = vpop.f32.mrb[20].mxu1 }
 0xc6c   : > { %v8484_v62 = vrot.slane %v8479_v61, 7  ;;  %v8485_v51 = vrot.slane %v8479_v61, 1  ;;  %v8486_v1 = vrot.slane %v8479_v61, 2  ;;  %v8487_v32 = vrot.slane %v8479_v61, 3  ;;  %v22246_v30 = vpop.f32.mrb[21].mxu1 }
 0xc6d   : > { %v8488_v27 = vrot.slane %v8479_v61, 4  ;;  %v8489_v2 = vrot.slane %v8479_v61, 5  ;;  %v8500_v14 = vadd.f32 %v26813_v35, %v8479_v61  ;;  %v8490_v33 = vrot.slane %v8479_v61, 6 }
 0xc6e   : > { %v8499_v52 = vadd.f32 %v26816_v3, %v8484_v62  ;;  %v8501_v25 = vadd.f32 %v26822_v20, %v8485_v51  ;;  %v8502_v45 = vadd.f32 %v26819_v37, %v8486_v1  ;;  %v8503_v15 = vadd.f32 %v26828_v7, %v8487_v32 }
 0xc6f   : > { %24789 = vtanh.f32 %v8500_v14  ;;  %v8504_v46 = vadd.f32 %v26825_v49, %v8488_v27  ;;  %v8505_v9 = vadd.f32 %v26835_v57, %v8489_v2  ;;  %v8506_v11 = vadd.f32 %v26839_v42, %v8490_v33 }
 0xc70   : > { %24791 = vtanh.f32 %v8499_v52 }
 0xc71   : > { %24793 = vtanh.f32 %v8501_v25 }
 0xc72   : > { %24795 = vtanh.f32 %v8502_v45 }
 0xc73   : > { %24797 = vtanh.f32 %v8503_v15 }
 0xc74   : > { %24799 = vtanh.f32 %v8504_v46 }
 0xc75   : > { %24801 = vtanh.f32 %v8505_v9 }
 0xc76   : > { %24803 = vtanh.f32 %v8506_v11 }
 0xc79   : > { %v26920_v48 = vpop.eup %24789 }
 0xc7a   : > { %v26922_v10 = vpop.eup %24791 }
 0xc7b   : > { %v26924_v55 = vpop.eup %24793  ;;  %v8523_v26 = vrot.slane %v26922_v10, 1 }
 0xc7c   : > { %v26927_v13 = vpop.eup %24795  ;;  %v8525_v47 = vrot.slane %v26924_v55, 7 }
 0xc7d   : > { %v26930_v18 = vpop.eup %24797  ;;  %v8524_v61 = vsel %vm1999_vm6, %v26920_v48, %v8523_v26  ;;  %v8527_v62 = vrot.slane %v26927_v13, 6 }
 0xc7e   : > { %v26935_v51 = vpop.eup %24799  ;;  %v8526_v1 = vsel %vm2002_vm7, %v8525_v47, %v8524_v61  ;;  %v8529_v32 = vrot.slane %v26930_v18, 5 }
 0xc7f   : > { %v26939_v30 = vpop.eup %24801  ;;  %v8528_v27 = vsel %vm2005_vm8, %v8527_v62, %v8526_v1  ;;  %v8531_v2 = vrot.slane %v26935_v51, 4 }
 0xc80   : > { %v26943_v14 = vpop.eup %24803  ;;  %v8530_v33 = vsel %vm2008_vm9, %v8529_v32, %v8528_v27  ;;  %v8533_v52 = vrot.slane %v26939_v30, 3 }
 0xc81   : > { %v8532_v25 = vsel %vm2011_vm10, %v8531_v2, %v8530_v33  ;;  %v8535_v45 = vrot.slane %v26943_v14, 2 }
 0xc82   : > { %v8534_v15 = vsel %vm2014_vm11, %v8533_v52, %v8532_v25 }
 0xc83   : > { %v8536_v46 = vsel %vm2017_vm12, %v8535_v45, %v8534_v15 }
 0xc84   : > { %v8537_v9 = vsel %vm649_vm0, %v8536_v46, 0 }
 0xc85   : > { %v8608_v11 = vand.u32 4294901760, %v8537_v9 }
 0xc87   : > { %v8609_v26 = vsub.f32 %v8537_v9, %v8608_v11 }
 0xc89   : > { %v8610_v47 = vand.u32 4294901760, %v8609_v26 }
 0xc8b   : > { %v8611_v61 = vsub.f32 %v8609_v26, %v8610_v47 }
 0xc8d   : > { %v8612_v62 = vand.u32 4294901760, %v8611_v61 }
 0xc8f   : > { %22256 = vmatmul.mubr.f32.vlgmr.msra.gmra.mrb[22].mxu0 %v8612_v62 }
 0xc90   : > { %23755 = vmatpush3.bf16.msra.mxu0 %v26697_v24  ;;  %22266 = vmatprep.mubr.msk.f32.mxu0 %vm25260_vm5, %v28866_v59 }
 0xc91   : > { %23756 = vmatprep.subr.bf16.mxu0 %v28865_v29 }
 0xc94   : > { %23758 = vmatpush3.bf16.msra.mxu0 %v26699_v50 }
 0xc95   : > { %23759 = vmatprep.subr.bf16.mxu0 %v28865_v29 }
 0xc97   : > { %22267 = vmatmul.mubr.f32.vlgmr.msra.gmra.mrb[22].mxu0 %v8608_v11 }
 0xc98   : > { %23761 = vmatpush3.bf16.msra.mxu0 %v26701_v39  ;;  %22277 = vmatprep.mubr.msk.f32.mxu0 %vm25260_vm5, %v28866_v59 }
 0xc99   : > { %23762 = vmatprep.subr.bf16.mxu0 %v28865_v29 }
 0xc9c   : > { %23764 = vmatpush3.bf16.msra.mxu0 %v26703_v38 }
 0xc9d   : > { %23765 = vmatprep.subr.bf16.mxu0 %v28865_v29 }
 0xc9f   : > { %22278 = vmatmul.mubr.f32.vlgmr.msra.gmra.mrb[22].mxu0 %v8609_v26 }
 0xca0   : > { %23767 = vmatpush3.bf16.msra.mxu0 %v26685_v60  ;;  %22288 = vmatprep.mubr.msk.f32.mxu0 %vm25260_vm5, %v28866_v59 }
 0xca1   : > { %23768 = vmatprep.subr.bf16.mxu0 %v28865_v29 }
 0xca4   : > { %23770 = vmatpush3.bf16.msra.mxu0 %v26688_v16 }
 0xca5   : > { %23771 = vmatprep.subr.bf16.mxu0 %v28865_v29 }
 0xca7   : > { %22289 = vmatmul.mubr.f32.vlgmr.msra.gmra.mrb[22].mxu0 %v8610_v47 }
 0xca8   : > { %23773 = vmatpush3.bf16.msra.mxu0 %v26705_v58  ;;  %22299 = vmatprep.mubr.msk.f32.mxu0 %vm25260_vm5, %v28866_v59 }
 0xca9   : > { %23774 = vmatprep.subr.bf16.mxu0 %v28865_v29 }
 0xcac   : > { %23776 = vmatpush3.bf16.msra.mxu0 %v26707_v23 }
 0xcad   : > { %23777 = vmatprep.subr.bf16.mxu0 %v28865_v29 }
 0xcaf   : > { %22300 = vmatmul.mubr.f32.vlgmr.msra.gmra.mrb[22].mxu0 %v8608_v11 }
 0xcb0   : > { %23779 = vmatpush3.bf16.msra.mxu0 %v26685_v60  ;;  %22310 = vmatprep.mubr.msk.f32.mxu0 %vm25260_vm5, %v28866_v59 }
 0xcb1   : > { %23780 = vmatprep.subr.bf16.mxu0 %v28865_v29 }
 0xcb4   : > { %23782 = vmatpush3.bf16.msra.mxu0 %v26688_v16 }
 0xcb5   : > { %23819 = vmatprep.subr.bf16.mxu0 %v28865_v29 }
 0xcb7   : > { %22311 = vmatmul.mubr.f32.vlgmr.msra.gmra.mrb[22].mxu0 %v8608_v11 }
 0xcb8   : > { %23821 = vmatpush3.bf16.msra.mxu0 %v26685_v60  ;;  %22387 = vmatprep.mubr.msk.f32.mxu0 %vm25260_vm5, %v28866_v59 }
 0xcb9   : > { %23822 = vmatprep.subr.bf16.mxu0 %v28865_v29 }
 0xcbc   : > { %23824 = vmatpush3.bf16.msra.mxu0 %v26688_v16 }
 0xcbd   : > { %23825 = vmatprep.subr.bf16.mxu0 %v28865_v29 }
 0xd8a   : > { %v9020_v1 = vpop.f32.mrb[22].mxu0 }
 0xd8b   : > { %v9025_v32 = vrot.slane %v9020_v1, 6  ;;  %v9026_v27 = vrot.slane %v9020_v1, 7  ;;  %v9027_v2 = vrot.slane %v9020_v1, 1  ;;  %v9028_v33 = vrot.slane %v9020_v1, 2  ;;  %v22312_v52 = vpop.f32.mrb[23].mxu0 }
 0xd8c   : > { %v9029_v25 = vrot.slane %v9020_v1, 3  ;;  %v9030_v45 = vrot.slane %v9020_v1, 4  ;;  %v9042_v15 = vadd.f32 %v26822_v20, %v9020_v1  ;;  %v9031_v46 = vrot.slane %v9020_v1, 5 }
 0xd8d   : > { %v9040_v9 = vadd.f32 %v26816_v3, %v9025_v32  ;;  %v9041_v11 = vadd.f32 %v26813_v35, %v9026_v27  ;;  %v9043_v26 = vadd.f32 %v26819_v37, %v9027_v2  ;;  %v9044_v47 = vadd.f32 %v26828_v7, %v9028_v33 }
 0xd8e   : > { %24805 = vtanh.f32 %v9042_v15  ;;  %v9045_v61 = vadd.f32 %v26825_v49, %v9029_v25  ;;  %v9046_v62 = vadd.f32 %v26835_v57, %v9030_v45  ;;  %v9047_v52 = vadd.f32 %v26839_v42, %v9031_v46 }
 0xd8f   : > { %24807 = vtanh.f32 %v9040_v9  ;;  %v11763_v32 = vsel %vm6552_vm13, %v26848_v22, %v26924_v55  ;;  %v11761_v2 = vsel %vm6552_vm13, %v26844_v17, %v26922_v10  ;;  %v11762_v46 = vsel %vm6552_vm13, %v26846_v4, %v26920_v48 }
 0xd90   : > { %24809 = vtanh.f32 %v9041_v11  ;;  %v11764_v17 = vsel %vm6552_vm13, %v26851_v43, %v26927_v13 }
 0xd91   : > { %24811 = vtanh.f32 %v9043_v26  ;;  %v11765_v26 = vsel %vm6552_vm13, %v26854_v56, %v26930_v18  ;;  %v11767_v56 = vsel %vm6552_vm13, %v26863_v41, %v26939_v30 }
 0xd92   : > { %24813 = vtanh.f32 %v9044_v47 }
 0xd93   : > { %24815 = vtanh.f32 %v9045_v61 }
 0xd94   : > { %24817 = vtanh.f32 %v9046_v62  ;;  %v11766_v62 = vsel %vm6552_vm13, %v26859_v12, %v26935_v51  ;;  %v11768_v12 = vsel %vm6552_vm13, %v26867_v44, %v26943_v14 }
 0xd95   : > { %24819 = vtanh.f32 %v9047_v52 }
 0xd98   : > { %v24806_v1 = vpop.eup %24805 }
 0xd99   : > { %v24808_v27 = vpop.eup %24807  ;;  %v27003_v33 = vsel %vm6561_vm14, %v11763_v32, %v24806_v1 }
 0xd9a   : > { %v24810_v25 = vpop.eup %24809  ;;  %v9064_v45 = vrot.slane %v24808_v27, 2  ;;  %v27006_v15 = vsel %vm6561_vm14, %v11761_v2, %v24808_v27 }
 0xd9b   : > { %v24812_v9 = vpop.eup %24811  ;;  %v9065_v11 = vrot.slane %v24810_v25, 1  ;;  %v27012_v22 = vsel %vm6561_vm14, %v11762_v46, %v24810_v25 }
 0xd9c   : > { %v24814_v10 = vpop.eup %24813  ;;  %v27018_v55 = vsel %vm6561_vm14, %v11764_v17, %v24812_v9  ;;  %v9068_v48 = vrot.slane %v24812_v9, 7 }
 0xd9d   : > { %v24816_v47 = vpop.eup %24815  ;;  %v9066_v4 = vsel %vm1999_vm6, %v9065_v11, %v9064_v45  ;;  %v27025_v61 = vsel %vm6561_vm14, %v11765_v26, %v24814_v10  ;;  %v9070_v52 = vrot.slane %v24814_v10, 6 }
 0xd9e   : > { %v24818_v43 = vpop.eup %24817  ;;  %v9067_v13 = vsel %vm2002_vm7, %v24806_v1, %v9066_v4  ;;  %v27032_v32 = vsel %vm6561_vm14, %v11766_v62, %v24816_v47  ;;  %v9072_v2 = vrot.slane %v24816_v47, 5 }
 0xd9f   : > { %v24820_v18 = vpop.eup %24819  ;;  %v9069_v27 = vsel %vm2005_vm8, %v9068_v48, %v9067_v13  ;;  %v27039_v25 = vsel %vm6561_vm14, %v11767_v56, %v24818_v43  ;;  %v9074_v1 = vrot.slane %v24818_v43, 4 }
 0xda0   : > { %v9071_v51 = vsel %vm2008_vm9, %v9070_v52, %v9069_v27  ;;  %v27046_v45 = vsel %vm6561_vm14, %v11768_v12, %v24820_v18  ;;  %v9076_v41 = vrot.slane %v24820_v18, 3 }
 0xda1   : > { %v9073_v46 = vsel %vm2011_vm10, %v9072_v2, %v9071_v51 }
 0xda2   : > { %v9075_v30 = vsel %vm2014_vm11, %v9074_v1, %v9073_v46 }
 0xda3   : > { %v9077_v9 = vsel %vm2017_vm12, %v9076_v41, %v9075_v30 }
 0xda4   : > { %v9078_v11 = vsel %vm649_vm0, %v9077_v9, 0 }
 0xda5   : > { %v9149_v17 = vand.u32 4294901760, %v9078_v11 }
 0xda7   : > { %v9150_v10 = vsub.f32 %v9078_v11, %v9149_v17 }
 0xda9   : > { %v9151_v26 = vand.u32 4294901760, %v9150_v10 }
 0xdab   : > { %v9152_v47 = vsub.f32 %v9150_v10, %v9151_v26 }
 0xdad   : > { %v9153_v44 = vand.u32 4294901760, %v9152_v47 }
 0xdaf   : > { %22322 = vmatmul.mubr.f32.vlgmr.msra.gmra.mrb[22].mxu1 %v9153_v44 }
 0xdb0   : > { %23791 = vmatpush3.bf16.msra.mxu1 %v26697_v24  ;;  %22332 = vmatprep.mubr.msk.f32.mxu1 %vm25260_vm5, %v28866_v59 }
 0xdb1   : > { %23792 = vmatprep.subr.bf16.mxu1 %v28865_v29 }
 0xdb4   : > { %23794 = vmatpush3.bf16.msra.mxu1 %v26699_v50 }
 0xdb5   : > { %23795 = vmatprep.subr.bf16.mxu1 %v28865_v29 }
 0xdb7   : > { %22333 = vmatmul.mubr.f32.vlgmr.msra.gmra.mrb[22].mxu1 %v9149_v17 }
 0xdb8   : > { %23797 = vmatpush3.bf16.msra.mxu1 %v26701_v39  ;;  %22343 = vmatprep.mubr.msk.f32.mxu1 %vm25260_vm5, %v28866_v59 }
 0xdb9   : > { %23798 = vmatprep.subr.bf16.mxu1 %v28865_v29 }
 0xdbc   : > { %23800 = vmatpush3.bf16.msra.mxu1 %v26703_v38 }
 0xdbd   : > { %23801 = vmatprep.subr.bf16.mxu1 %v28865_v29 }
 0xdbf   : > { %22344 = vmatmul.mubr.f32.vlgmr.msra.gmra.mrb[22].mxu1 %v9150_v10 }
 0xdc0   : > { %23803 = vmatpush3.bf16.msra.mxu1 %v26685_v60  ;;  %22354 = vmatprep.mubr.msk.f32.mxu1 %vm25260_vm5, %v28866_v59 }
 0xdc1   : > { %23804 = vmatprep.subr.bf16.mxu1 %v28865_v29 }
 0xdc4   : > { %23806 = vmatpush3.bf16.msra.mxu1 %v26688_v16 }
 0xdc5   : > { %23807 = vmatprep.subr.bf16.mxu1 %v28865_v29 }
 0xdc7   : > { %22355 = vmatmul.mubr.f32.vlgmr.msra.gmra.mrb[22].mxu1 %v9151_v26 }
 0xdc8   : > { %23809 = vmatpush3.bf16.msra.mxu1 %v26705_v58  ;;  %22365 = vmatprep.mubr.msk.f32.mxu1 %vm25260_vm5, %v28866_v59 }
 0xdc9   : > { %23810 = vmatprep.subr.bf16.mxu1 %v28865_v29 }
 0xdcc   : > { %23812 = vmatpush3.bf16.msra.mxu1 %v26707_v23 }
 0xdcd   : > { %23813 = vmatprep.subr.bf16.mxu1 %v28865_v29 }
 0xdcf   : > { %22366 = vmatmul.mubr.f32.vlgmr.msra.gmra.mrb[22].mxu1 %v9149_v17 }
 0xdd0   : > { %23815 = vmatpush3.bf16.msra.mxu1 %v26685_v60  ;;  %22376 = vmatprep.mubr.msk.f32.mxu1 %vm25260_vm5, %v28866_v59 }
 0xdd1   : > { %23816 = vmatprep.subr.bf16.mxu1 %v28865_v29 }
 0xdd4   : > { %23818 = vmatpush3.bf16.msra.mxu1 %v26688_v16 }
 0xdd5   : > { %23855 = vmatprep.subr.bf16.mxu1 %v28865_v29 }
 0xdd7   : > { %22377 = vmatmul.mubr.f32.vlgmr.msra.gmra.mrb[22].mxu1 %v9149_v17 }
 0xdd8   : > { %23857 = vmatpush3.bf16.msra.mxu1 %v26685_v60  ;;  %22453 = vmatprep.mubr.msk.f32.mxu1 %vm25260_vm5, %v28866_v59 }
 0xdd9   : > { %23858 = vmatprep.subr.bf16.mxu1 %v28865_v29 }
 0xddc   : > { %23860 = vmatpush3.bf16.msra.mxu1 %v26688_v16 }
 0xddd   : > { %23861 = vmatprep.subr.bf16.mxu1 %v28865_v29 }
 0xeaa   : > { %v9561_v14 = vpop.f32.mrb[22].mxu1 }
 0xeab   : > { %v9566_v4 = vrot.slane %v9561_v14, 5  ;;  %v9567_v48 = vrot.slane %v9561_v14, 6  ;;  %v9568_v62 = vrot.slane %v9561_v14, 7  ;;  %v9569_v43 = vrot.slane %v9561_v14, 1  ;;  %v22378_v13 = vpop.f32.mrb[23].mxu1 }
 0xeac   : > { %v9570_v52 = vrot.slane %v9561_v14, 2  ;;  %v9571_v56 = vrot.slane %v9561_v14, 3  ;;  %v9584_v18 = vadd.f32 %v26819_v37, %v9561_v14  ;;  %v9572_v27 = vrot.slane %v9561_v14, 4 }
 0xead   : > { %v9581_v2 = vadd.f32 %v26816_v3, %v9566_v4  ;;  %v9582_v12 = vadd.f32 %v26813_v35, %v9567_v48  ;;  %v9583_v51 = vadd.f32 %v26822_v20, %v9568_v62  ;;  %v9585_v1 = vadd.f32 %v26828_v7, %v9569_v43 }
 0xeae   : > { %24821 = vtanh.f32 %v9584_v18  ;;  %v9586_v46 = vadd.f32 %v26825_v49, %v9570_v52  ;;  %v9587_v41 = vadd.f32 %v26835_v57, %v9571_v56  ;;  %v9588_v30 = vadd.f32 %v26839_v42, %v9572_v27 }
 0xeaf   : > { %24823 = vtanh.f32 %v9581_v2 }
 0xeb0   : > { %24825 = vtanh.f32 %v9582_v12 }
 0xeb1   : > { %24827 = vtanh.f32 %v9583_v51 }
 0xeb2   : > { %24829 = vtanh.f32 %v9585_v1 }
 0xeb3   : > { %24831 = vtanh.f32 %v9586_v46 }
 0xeb4   : > { %24833 = vtanh.f32 %v9587_v41 }
 0xeb5   : > { %24835 = vtanh.f32 %v9588_v30 }
 0xeb8   : > { %v24822_v9 = vpop.eup %24821 }
 0xeb9   : > { %v24824_v11 = vpop.eup %24823  ;;  %v27098_v17 = vsel %vm6570_vm1, %v27018_v55, %v24822_v9 }
 0xeba   : > { %v24826_v10 = vpop.eup %24825  ;;  %v9605_v26 = vrot.slane %v24824_v11, 3  ;;  %v27102_v47 = vsel %vm6570_vm1, %v27006_v15, %v24824_v11 }
 0xebb   : > { %v24828_v44 = vpop.eup %24827  ;;  %v9606_v14 = vrot.slane %v24826_v10, 2  ;;  %v27106_v4 = vsel %vm6570_vm1, %v27012_v22, %v24826_v10 }
 0xebc   : > { %v24830_v48 = vpop.eup %24829  ;;  %v9608_v62 = vrot.slane %v24828_v44, 1  ;;  %v27110_v43 = vsel %vm6570_vm1, %v27003_v33, %v24828_v44 }
 0xebd   : > { %v24832_v55 = vpop.eup %24831  ;;  %v9607_v13 = vsel %vm1999_vm6, %v9606_v14, %v9605_v26  ;;  %v27115_v52 = vsel %vm6570_vm1, %v27025_v61, %v24830_v48  ;;  %v9611_v18 = vrot.slane %v24830_v48, 7 }
 0xebe   : > { %v24834_v15 = vpop.eup %24833  ;;  %v9609_v56 = vsel %vm2002_vm7, %v9608_v62, %v9607_v13  ;;  %v27120_v22 = vsel %vm6570_vm1, %v27032_v32, %v24832_v55  ;;  %v9613_v33 = vrot.slane %v24832_v55, 6 }
 0xebf   : > { %v24836_v27 = vpop.eup %24835  ;;  %v9610_v2 = vsel %vm2005_vm8, %v24822_v9, %v9609_v56  ;;  %v27125_v12 = vsel %vm6570_vm1, %v27039_v25, %v24834_v15  ;;  %v9615_v61 = vrot.slane %v24834_v15, 5 }
 0xec0   : > { %v9612_v51 = vsel %vm2008_vm9, %v9611_v18, %v9610_v2  ;;  %v27130_v1 = vsel %vm6570_vm1, %v27046_v45, %v24836_v27  ;;  %v9617_v41 = vrot.slane %v24836_v27, 4 }
 0xec1   : > { %v9614_v46 = vsel %vm2011_vm10, %v9613_v33, %v9612_v51 }
 0xec2   : > { %v9616_v32 = vsel %vm2014_vm11, %v9615_v61, %v9614_v46 }
 0xec3   : > { %v9618_v30 = vsel %vm2017_vm12, %v9617_v41, %v9616_v32 }
 0xec4   : > { %v9619_v9 = vsel %vm649_vm0, %v9618_v30, 0 }
 0xec5   : > { %v9690_v11 = vand.u32 4294901760, %v9619_v9 }
 0xec7   : > { %v9691_v10 = vsub.f32 %v9619_v9, %v9690_v11 }
 0xec9   : > { %v9692_v25 = vand.u32 4294901760, %v9691_v10 }
 0xecb   : > { %v9693_v26 = vsub.f32 %v9691_v10, %v9692_v25 }
 0xecd   : > { %v9694_v44 = vand.u32 4294901760, %v9693_v26 }
 0xecf   : > { %22388 = vmatmul.mubr.f32.vlgmr.msra.gmra.mrb[24].mxu0 %v9694_v44 }
 0xed0   : > { %23827 = vmatpush3.bf16.msra.mxu0 %v26697_v24  ;;  %22398 = vmatprep.mubr.msk.f32.mxu0 %vm25260_vm5, %v28866_v59 }
 0xed1   : > { %23828 = vmatprep.subr.bf16.mxu0 %v28865_v29 }
 0xed4   : > { %23830 = vmatpush3.bf16.msra.mxu0 %v26699_v50 }
 0xed5   : > { %23831 = vmatprep.subr.bf16.mxu0 %v28865_v29 }
 0xed7   : > { %22399 = vmatmul.mubr.f32.vlgmr.msra.gmra.mrb[24].mxu0 %v9690_v11 }
 0xed8   : > { %23833 = vmatpush3.bf16.msra.mxu0 %v26701_v39  ;;  %22409 = vmatprep.mubr.msk.f32.mxu0 %vm25260_vm5, %v28866_v59 }
 0xed9   : > { %23834 = vmatprep.subr.bf16.mxu0 %v28865_v29 }
 0xedc   : > { %23836 = vmatpush3.bf16.msra.mxu0 %v26703_v38 }
 0xedd   : > { %23837 = vmatprep.subr.bf16.mxu0 %v28865_v29 }
 0xedf   : > { %22410 = vmatmul.mubr.f32.vlgmr.msra.gmra.mrb[24].mxu0 %v9691_v10 }
 0xee0   : > { %23839 = vmatpush3.bf16.msra.mxu0 %v26685_v60  ;;  %22420 = vmatprep.mubr.msk.f32.mxu0 %vm25260_vm5, %v28866_v59 }
 0xee1   : > { %23840 = vmatprep.subr.bf16.mxu0 %v28865_v29 }
 0xee4   : > { %23842 = vmatpush3.bf16.msra.mxu0 %v26688_v16 }
 0xee5   : > { %23843 = vmatprep.subr.bf16.mxu0 %v28865_v29 }
 0xee7   : > { %22421 = vmatmul.mubr.f32.vlgmr.msra.gmra.mrb[24].mxu0 %v9692_v25 }
 0xee8   : > { %23845 = vmatpush3.bf16.msra.mxu0 %v26705_v58  ;;  %22431 = vmatprep.mubr.msk.f32.mxu0 %vm25260_vm5, %v28866_v59 }
 0xee9   : > { %23846 = vmatprep.subr.bf16.mxu0 %v28865_v29 }
 0xeec   : > { %23848 = vmatpush3.bf16.msra.mxu0 %v26707_v23 }
 0xeed   : > { %23849 = vmatprep.subr.bf16.mxu0 %v28865_v29 }
 0xeef   : > { %22432 = vmatmul.mubr.f32.vlgmr.msra.gmra.mrb[24].mxu0 %v9690_v11 }
 0xef0   : > { %23851 = vmatpush3.bf16.msra.mxu0 %v26685_v60  ;;  %22442 = vmatprep.mubr.msk.f32.mxu0 %vm25260_vm5, %v28866_v59 }
 0xef1   : > { %23852 = vmatprep.subr.bf16.mxu0 %v28865_v29 }
 0xef4   : > { %23854 = vmatpush3.bf16.msra.mxu0 %v26688_v16 }
 0xef5   : > { %23891 = vmatprep.subr.bf16.mxu0 %v28865_v29 }
 0xef7   : > { %22443 = vmatmul.mubr.f32.vlgmr.msra.gmra.mrb[24].mxu0 %v9690_v11 }
 0xef8   : > { %23893 = vmatpush3.bf16.msra.mxu0 %v26685_v60  ;;  %22519 = vmatprep.mubr.msk.f32.mxu0 %vm25260_vm5, %v28866_v59 }
 0xef9   : > { %23894 = vmatprep.subr.bf16.mxu0 %v28865_v29 }
 0xefc   : > { %23896 = vmatpush3.bf16.msra.mxu0 %v26688_v16 }
 0xefd   : > { %23897 = vmatprep.subr.bf16.mxu0 %v28865_v29 }
 0xfca   : > { %v10102_v45 = vpop.f32.mrb[24].mxu0 }
 0xfcb   : > { %v10107_v14 = vrot.slane %v10102_v45, 4  ;;  %v10108_v48 = vrot.slane %v10102_v45, 5  ;;  %v10109_v62 = vrot.slane %v10102_v45, 6  ;;  %v10110_v55 = vrot.slane %v10102_v45, 7  ;;  %v22444_v13 = vpop.f32.mrb[25].mxu0 }
 0xfcc   : > { %v10111_v15 = vrot.slane %v10102_v45, 1  ;;  %v10112_v56 = vrot.slane %v10102_v45, 2  ;;  %v10126_v18 = vadd.f32 %v26828_v7, %v10102_v45  ;;  %v10113_v27 = vrot.slane %v10102_v45, 3 }
 0xfcd   : > { %v10122_v2 = vadd.f32 %v26816_v3, %v10107_v14  ;;  %v10123_v33 = vadd.f32 %v26813_v35, %v10108_v48  ;;  %v10124_v51 = vadd.f32 %v26822_v20, %v10109_v62  ;;  %v10125_v61 = vadd.f32 %v26819_v37, %v10110_v55 }
 0xfce   : > { %24837 = vtanh.f32 %v10126_v18  ;;  %v10127_v46 = vadd.f32 %v26825_v49, %v10111_v15  ;;  %v10128_v41 = vadd.f32 %v26835_v57, %v10112_v56  ;;  %v10129_v32 = vadd.f32 %v26839_v42, %v10113_v27 }
 0xfcf   : > { %24839 = vtanh.f32 %v10122_v2 }
 0xfd0   : > { %24841 = vtanh.f32 %v10123_v33 }
 0xfd1   : > { %24843 = vtanh.f32 %v10124_v51 }
 0xfd2   : > { %24845 = vtanh.f32 %v10125_v61 }
 0xfd3   : > { %24847 = vtanh.f32 %v10127_v46 }
 0xfd4   : > { %24849 = vtanh.f32 %v10128_v41 }
 0xfd5   : > { %24851 = vtanh.f32 %v10129_v32 }
 0xfd8   : > { %v24838_v30 = vpop.eup %24837 }
 0xfd9   : > { %v24840_v9 = vpop.eup %24839  ;;  %v27182_v11 = vsel %vm6579_vm3, %v27115_v52, %v24838_v30 }
 0xfda   : > { %v24842_v10 = vpop.eup %24841  ;;  %v10146_v25 = vrot.slane %v24840_v9, 4  ;;  %v27186_v26 = vsel %vm6579_vm3, %v27102_v47, %v24840_v9 }
 0xfdb   : > { %v24844_v44 = vpop.eup %24843  ;;  %v10147_v45 = vrot.slane %v24842_v10, 3  ;;  %v27190_v14 = vsel %vm6579_vm3, %v27106_v4, %v24842_v10 }
 0xfdc   : > { %v24846_v48 = vpop.eup %24845  ;;  %v10149_v62 = vrot.slane %v24844_v44, 2  ;;  %v27194_v55 = vsel %vm6579_vm3, %v27110_v43, %v24844_v44 }
 0xfdd   : > { %v24848_v52 = vpop.eup %24847  ;;  %v10148_v13 = vsel %vm1999_vm6, %v10147_v45, %v10146_v25  ;;  %v10151_v15 = vrot.slane %v24846_v48, 1  ;;  %v27199_v47 = vsel %vm6579_vm3, %v27098_v17, %v24846_v48 }
 0xfde   : > { %v24850_v56 = vpop.eup %24849  ;;  %v10150_v18 = vsel %vm2002_vm7, %v10149_v62, %v10148_v13  ;;  %v27204_v4 = vsel %vm6579_vm3, %v27120_v22, %v24848_v52  ;;  %v10154_v43 = vrot.slane %v24848_v52, 7 }
 0xfdf   : > { %v24852_v27 = vpop.eup %24851  ;;  %v10152_v2 = vsel %vm2005_vm8, %v10151_v15, %v10150_v18  ;;  %v27209_v33 = vsel %vm6579_vm3, %v27125_v12, %v24850_v56  ;;  %v10156_v61 = vrot.slane %v24850_v56, 6 }
 0xfe0   : > { %v10153_v51 = vsel %vm2008_vm9, %v24838_v30, %v10152_v2  ;;  %v27214_v17 = vsel %vm6579_vm3, %v27130_v1, %v24852_v27  ;;  %v10158_v41 = vrot.slane %v24852_v27, 5 }
 0xfe1   : > { %v10155_v46 = vsel %vm2011_vm10, %v10154_v43, %v10153_v51 }
 0xfe2   : > { %v10157_v22 = vsel %vm2014_vm11, %v10156_v61, %v10155_v46 }
 0xfe3   : > { %v10159_v32 = vsel %vm2017_vm12, %v10158_v41, %v10157_v22 }
 0xfe4   : > { %v10160_v9 = vsel %vm649_vm0, %v10159_v32, 0 }
 0xfe5   : > { %v10231_v10 = vand.u32 4294901760, %v10160_v9 }
 0xfe7   : > { %v10232_v25 = vsub.f32 %v10160_v9, %v10231_v10 }
 0xfe9   : > { %v10233_v12 = vand.u32 4294901760, %v10232_v25 }
 0xfeb   : > { %v10234_v44 = vsub.f32 %v10232_v25, %v10233_v12 }
 0xfed   : > { %v10235_v45 = vand.u32 4294901760, %v10234_v44 }
 0xfef   : > { %22454 = vmatmul.mubr.f32.vlgmr.msra.gmra.mrb[24].mxu1 %v10235_v45 }
 0xff0   : > { %23863 = vmatpush3.bf16.msra.mxu1 %v26697_v24  ;;  %22464 = vmatprep.mubr.msk.f32.mxu1 %vm25260_vm5, %v28866_v59 }
 0xff1   : > { %23864 = vmatprep.subr.bf16.mxu1 %v28865_v29 }
 0xff4   : > { %23866 = vmatpush3.bf16.msra.mxu1 %v26699_v50 }
 0xff5   : > { %23867 = vmatprep.subr.bf16.mxu1 %v28865_v29 }
 0xff7   : > { %22465 = vmatmul.mubr.f32.vlgmr.msra.gmra.mrb[24].mxu1 %v10231_v10 }
 0xff8   : > { %23869 = vmatpush3.bf16.msra.mxu1 %v26701_v39  ;;  %22475 = vmatprep.mubr.msk.f32.mxu1 %vm25260_vm5, %v28866_v59 }
 0xff9   : > { %23870 = vmatprep.subr.bf16.mxu1 %v28865_v29 }
 0xffc   : > { %23872 = vmatpush3.bf16.msra.mxu1 %v26703_v38 }
 0xffd   : > { %23873 = vmatprep.subr.bf16.mxu1 %v28865_v29 }
 0xfff   : > { %22476 = vmatmul.mubr.f32.vlgmr.msra.gmra.mrb[24].mxu1 %v10232_v25 }
0x1000   : > { %23875 = vmatpush3.bf16.msra.mxu1 %v26685_v60  ;;  %22486 = vmatprep.mubr.msk.f32.mxu1 %vm25260_vm5, %v28866_v59 }
0x1001   : > { %23876 = vmatprep.subr.bf16.mxu1 %v28865_v29 }
0x1004   : > { %23878 = vmatpush3.bf16.msra.mxu1 %v26688_v16 }
0x1005   : > { %23879 = vmatprep.subr.bf16.mxu1 %v28865_v29 }
0x1007   : > { %22487 = vmatmul.mubr.f32.vlgmr.msra.gmra.mrb[24].mxu1 %v10233_v12 }
0x1008   : > { %23881 = vmatpush3.bf16.msra.mxu1 %v26705_v58  ;;  %22497 = vmatprep.mubr.msk.f32.mxu1 %vm25260_vm5, %v28866_v59 }
0x1009   : > { %23882 = vmatprep.subr.bf16.mxu1 %v28865_v29 }
0x100c   : > { %23884 = vmatpush3.bf16.msra.mxu1 %v26707_v23 }
0x100d   : > { %23885 = vmatprep.subr.bf16.mxu1 %v28865_v29 }
0x100f   : > { %22498 = vmatmul.mubr.f32.vlgmr.msra.gmra.mrb[24].mxu1 %v10231_v10 }
0x1010   : > { %23887 = vmatpush3.bf16.msra.mxu1 %v26685_v60  ;;  %22508 = vmatprep.mubr.msk.f32.mxu1 %vm25260_vm5, %v28866_v59 }
0x1011   : > { %23888 = vmatprep.subr.bf16.mxu1 %v28865_v29 }
0x1014   : > { %23890 = vmatpush3.bf16.msra.mxu1 %v26688_v16 }
0x1015   : > { %23927 = vmatprep.subr.bf16.mxu1 %v28865_v29 }
0x1017   : > { %22509 = vmatmul.mubr.f32.vlgmr.msra.gmra.mrb[24].mxu1 %v10231_v10 }
0x1018   : > { %23929 = vmatpush3.bf16.msra.mxu1 %v26685_v60  ;;  %22585 = vmatprep.mubr.msk.f32.mxu1 %vm25260_vm5, %v28866_v59 }
0x1019   : > { %23930 = vmatprep.subr.bf16.mxu1 %v28865_v29 }
0x101c   : > { %23932 = vmatpush3.bf16.msra.mxu1 %v26688_v16 }
0x101d   : > { %23933 = vmatprep.subr.bf16.mxu1 %v28865_v29 }
0x10ea   : > { %v10643_v1 = vpop.f32.mrb[24].mxu1 }
0x10eb   : > { %v10648_v30 = vrot.slane %v10643_v1, 3  ;;  %v10649_v48 = vrot.slane %v10643_v1, 4  ;;  %v10650_v62 = vrot.slane %v10643_v1, 5  ;;  %v10651_v52 = vrot.slane %v10643_v1, 6  ;;  %v22510_v13 = vpop.f32.mrb[25].mxu1 }
0x10ec   : > { %v10652_v15 = vrot.slane %v10643_v1, 7  ;;  %v10653_v56 = vrot.slane %v10643_v1, 1  ;;  %v10668_v18 = vadd.f32 %v26825_v49, %v10643_v1  ;;  %v10654_v27 = vrot.slane %v10643_v1, 2 }
0x10ed   : > { %v10663_v2 = vadd.f32 %v26816_v3, %v10648_v30  ;;  %v10664_v43 = vadd.f32 %v26813_v35, %v10649_v48  ;;  %v10665_v51 = vadd.f32 %v26822_v20, %v10650_v62  ;;  %v10666_v61 = vadd.f32 %v26819_v37, %v10651_v52 }
0x10ee   : > { %24853 = vtanh.f32 %v10668_v18  ;;  %v10667_v46 = vadd.f32 %v26828_v7, %v10652_v15  ;;  %v10669_v41 = vadd.f32 %v26835_v57, %v10653_v56  ;;  %v10670_v22 = vadd.f32 %v26839_v42, %v10654_v27 }
0x10ef   : > { %24855 = vtanh.f32 %v10663_v2 }
0x10f0   : > { %24857 = vtanh.f32 %v10664_v43 }
0x10f1   : > { %24859 = vtanh.f32 %v10665_v51 }
0x10f2   : > { %24861 = vtanh.f32 %v10666_v61 }
0x10f3   : > { %24863 = vtanh.f32 %v10667_v46 }
0x10f4   : > { %24865 = vtanh.f32 %v10669_v41 }
0x10f5   : > { %24867 = vtanh.f32 %v10670_v22 }
0x10f8   : > { %v24854_v32 = vpop.eup %24853 }
0x10f9   : > { %v24856_v9 = vpop.eup %24855  ;;  %v27266_v10 = vsel %vm6588_vm15, %v27204_v4, %v24854_v32 }
0x10fa   : > { %v24858_v25 = vpop.eup %24857  ;;  %v10687_v12 = vrot.slane %v24856_v9, 5  ;;  %v27270_v44 = vsel %vm6588_vm15, %v27186_v26, %v24856_v9 }
0x10fb   : > { %v24860_v45 = vpop.eup %24859  ;;  %v10688_v1 = vrot.slane %v24858_v25, 4  ;;  %v27274_v30 = vsel %vm6588_vm15, %v27190_v14, %v24858_v25 }
0x10fc   : > { %v24862_v48 = vpop.eup %24861  ;;  %v10690_v62 = vrot.slane %v24860_v45, 3  ;;  %v27278_v52 = vsel %vm6588_vm15, %v27194_v55, %v24860_v45 }
0x10fd   : > { %v24864_v4 = vpop.eup %24863  ;;  %v10689_v13 = vsel %vm1999_vm6, %v10688_v1, %v10687_v12  ;;  %v10692_v15 = vrot.slane %v24862_v48, 2  ;;  %v27283_v26 = vsel %vm6588_vm15, %v27199_v47, %v24862_v48  ;;  %v6355_v48 = vrot.slane %v26182_v0, %v26094_v5 }
0x10fe   : > { %v24866_v56 = vpop.eup %24865  ;;  %v10691_v18 = vsel %vm2002_vm7, %v10690_v62, %v10689_v13  ;;  %v10694_v27 = vrot.slane %v24864_v4, 1  ;;  %v27288_v14 = vsel %vm6588_vm15, %v27182_v11, %v24864_v4  ;;  %v6395_v62 = vrot.slane %v26261_v36, %v26094_v5  ;;  %v28868_v4 = vld [vmem:[#allocation35_spill] sm:$0xff] }
0x10ff   : > { %v24868_v2 = vpop.eup %24867  ;;  %v10693_v55 = vsel %vm2005_vm8, %v10692_v15, %v10691_v18  ;;  %v27293_v43 = vsel %vm6588_vm15, %v27209_v33, %v24866_v56  ;;  %v10697_v61 = vrot.slane %v24866_v56, 7  ;;  %v28869_v15 = vld [vmem:[#allocation38_spill] sm:$0xff]  ;;  %v6515_v0 = vrot.slane %v26748_v6, %v26094_v5 }
0x1100   : > { %v10695_v51 = vsel %vm2008_vm9, %v10694_v27, %v10693_v55  ;;  %v27298_v47 = vsel %vm6588_vm15, %v27214_v17, %v24868_v2  ;;  %v10699_v41 = vrot.slane %v24868_v2, 6  ;;  %v6275_v17 = vrot.slane %v26077_v40, %v26094_v5 }
0x1101   : > { %v10696_v46 = vsel %vm2011_vm10, %v24854_v32, %v10695_v51  ;;  %v6315_v32 = vrot.slane %v26097_v8, %v26094_v5  ;;  %v6435_v40 = vrot.slane %v28869_v15, %v26094_v5  ;;  %v6475_v8 = vrot.slane %v26607_v54, %v26094_v5 }
0x1102   : > { %v10698_v11 = vsel %vm2014_vm11, %v10697_v61, %v10696_v46  ;;  %v6553_v13 = vsel %vm6552_vm13, %v28868_v4, %v6275_v17 }
0x1103   : > { %v10700_v22 = vsel %vm2017_vm12, %v10699_v41, %v10698_v11  ;;  %v6562_v56 = vsel %vm6561_vm14, %v6553_v13, %v6315_v32 }
0x1104   : > { %v10701_v9 = vsel %vm649_vm0, %v10700_v22, 0  ;;  %v6571_v36 = vsel %vm6570_vm1, %v6562_v56, %v6355_v48 }
0x1105   : > { %v10772_v25 = vand.u32 4294901760, %v10701_v9  ;;  %v6580_v18 = vsel %vm6579_vm3, %v6571_v36, %v6395_v62 }
0x1106   : > { %v6589_v27 = vsel %vm6588_vm15, %v6580_v18, %v6435_v40 }
0x1107   : > { %v10773_v12 = vsub.f32 %v10701_v9, %v10772_v25  ;;  %v6598_v2 = vsel %vm6597_vm4, %v6589_v27, %v6475_v8 }
0x1108   : > { %v27356_v55 = vsel %vm6606_vm2, %v6598_v2, %v6515_v0 }
0x1109   : > { %v10774_v33 = vand.u32 4294901760, %v10773_v12  ;;  %v27360_v54 = vsel %vm649_vm0, %v27356_v55, 0 }
0x110a   : > { %v27365_v6 = vand.u32 4294901760, %v27360_v54 }
0x110b   : > { %v10775_v45 = vsub.f32 %v10773_v12, %v10774_v33 }
0x110d   : > { %v10776_v1 = vand.u32 4294901760, %v10775_v45 }
0x110f   : > { %22520 = vmatmul.mubr.f32.vlgmr.msra.gmra.mrb[26].mxu0 %v10776_v1 }
0x1110   : > { %23899 = vmatpush3.bf16.msra.mxu0 %v26697_v24  ;;  %22530 = vmatprep.mubr.msk.f32.mxu0 %vm25260_vm5, %v28866_v59 }
0x1111   : > { %23900 = vmatprep.subr.bf16.mxu0 %v28865_v29 }
0x1114   : > { %23902 = vmatpush3.bf16.msra.mxu0 %v26699_v50 }
0x1115   : > { %23903 = vmatprep.subr.bf16.mxu0 %v28865_v29 }
0x1117   : > { %22531 = vmatmul.mubr.f32.vlgmr.msra.gmra.mrb[26].mxu0 %v10772_v25 }
0x1118   : > { %23905 = vmatpush3.bf16.msra.mxu0 %v26701_v39  ;;  %22541 = vmatprep.mubr.msk.f32.mxu0 %vm25260_vm5, %v28866_v59 }
0x1119   : > { %23906 = vmatprep.subr.bf16.mxu0 %v28865_v29 }
0x111c   : > { %23908 = vmatpush3.bf16.msra.mxu0 %v26703_v38 }
0x111d   : > { %23909 = vmatprep.subr.bf16.mxu0 %v28865_v29 }
0x111f   : > { %22542 = vmatmul.mubr.f32.vlgmr.msra.gmra.mrb[26].mxu0 %v10773_v12 }
0x1120   : > { %23911 = vmatpush3.bf16.msra.mxu0 %v26685_v60  ;;  %22552 = vmatprep.mubr.msk.f32.mxu0 %vm25260_vm5, %v28866_v59 }
0x1121   : > { %23912 = vmatprep.subr.bf16.mxu0 %v28865_v29 }
0x1124   : > { %23914 = vmatpush3.bf16.msra.mxu0 %v26688_v16 }
0x1125   : > { %23915 = vmatprep.subr.bf16.mxu0 %v28865_v29 }
0x1127   : > { %22553 = vmatmul.mubr.f32.vlgmr.msra.gmra.mrb[26].mxu0 %v10774_v33 }
0x1128   : > { %23917 = vmatpush3.bf16.msra.mxu0 %v26705_v58  ;;  %22563 = vmatprep.mubr.msk.f32.mxu0 %vm25260_vm5, %v28866_v59 }
0x1129   : > { %23918 = vmatprep.subr.bf16.mxu0 %v28865_v29 }
0x112c   : > { %23920 = vmatpush3.bf16.msra.mxu0 %v26707_v23 }
0x112d   : > { %23921 = vmatprep.subr.bf16.mxu0 %v28865_v29 }
0x112f   : > { %22564 = vmatmul.mubr.f32.vlgmr.msra.gmra.mrb[26].mxu0 %v10772_v25 }
0x1130   : > { %23923 = vmatpush3.bf16.msra.mxu0 %v26685_v60  ;;  %22574 = vmatprep.mubr.msk.f32.mxu0 %vm25260_vm5, %v28866_v59 }
0x1131   : > { %23924 = vmatprep.subr.bf16.mxu0 %v28865_v29 }
0x1134   : > { %23926 = vmatpush3.bf16.msra.mxu0 %v26688_v16 }
0x1135   : > { %22643 = vmatprep.subr.mxu0 %v28866_v59 }
0x1137   : > { %22575 = vmatmul.mubr.f32.vlgmr.msra.gmra.mrb[26].mxu0 %v10772_v25 }
0x1138   : > { %22645 = vmatprep.mubr.msk.f32.mxu0 %vm25260_vm5, %v28866_v59 }
0x113d   : > { %22644 = vmatpush3.xpose.msra.mxu0 %v27365_v6 }
0x113e   : > { %22648 = vmatprep.subr.mxu0 %v28866_v59 }
0x120a   : > { %v11184_v51 = vpop.f32.mrb[26].mxu0 }
0x120b   : > { %v11189_v61 = vrot.slane %v11184_v51, 2  ;;  %v11190_v46 = vrot.slane %v11184_v51, 3  ;;  %v11191_v41 = vrot.slane %v11184_v51, 4  ;;  %v11192_v11 = vrot.slane %v11184_v51, 5  ;;  %v22576_v22 = vpop.f32.mrb[27].mxu0 }
0x120c   : > { %v11193_v9 = vrot.slane %v11184_v51, 6  ;;  %v11194_v25 = vrot.slane %v11184_v51, 7  ;;  %v11210_v12 = vadd.f32 %v26835_v57, %v11184_v51  ;;  %v11195_v33 = vrot.slane %v11184_v51, 1 }
0x120d   : > { %v11204_v45 = vadd.f32 %v26816_v3, %v11189_v61  ;;  %v11205_v1 = vadd.f32 %v26813_v35, %v11190_v46  ;;  %v11206_v17 = vadd.f32 %v26822_v20, %v11191_v41  ;;  %v11207_v32 = vadd.f32 %v26819_v37, %v11192_v11 }
0x120e   : > { %24869 = vtanh.f32 %v11210_v12  ;;  %v11208_v48 = vadd.f32 %v26828_v7, %v11193_v9  ;;  %v11209_v62 = vadd.f32 %v26825_v49, %v11194_v25  ;;  %v11211_v4 = vadd.f32 %v26839_v42, %v11195_v33 }
0x120f   : > { %24871 = vtanh.f32 %v11204_v45 }
0x1210   : > { %24873 = vtanh.f32 %v11205_v1 }
0x1211   : > { %24875 = vtanh.f32 %v11206_v17 }
0x1212   : > { %24877 = vtanh.f32 %v11207_v32 }
0x1213   : > { %24879 = vtanh.f32 %v11208_v48 }
0x1214   : > { %24881 = vtanh.f32 %v11209_v62 }
0x1215   : > { %24883 = vtanh.f32 %v11211_v4 }
0x1218   : > { %v24870_v13 = vpop.eup %24869 }
0x1219   : > { %v24872_v15 = vpop.eup %24871  ;;  %v27379_v40 = vsel %vm6597_vm4, %v27293_v43, %v24870_v13 }
0x121a   : > { %v24874_v56 = vpop.eup %24873  ;;  %v11228_v8 = vrot.slane %v24872_v15, 6  ;;  %v27383_v0 = vsel %vm6597_vm4, %v27270_v44, %v24872_v15 }
0x121b   : > { %v24876_v36 = vpop.eup %24875  ;;  %v11229_v18 = vrot.slane %v24874_v56, 5  ;;  %v27387_v27 = vsel %vm6597_vm4, %v27274_v30, %v24874_v56 }
0x121c   : > { %v24878_v2 = vpop.eup %24877  ;;  %v11231_v51 = vrot.slane %v24876_v36, 4  ;;  %v27391_v61 = vsel %vm6597_vm4, %v27278_v52, %v24876_v36 }
0x121d   : > { %v24880_v43 = vpop.eup %24879  ;;  %v11230_v46 = vsel %vm1999_vm6, %v11229_v18, %v11228_v8  ;;  %v11233_v41 = vrot.slane %v24878_v2, 3  ;;  %v27396_v44 = vsel %vm6597_vm4, %v27283_v26, %v24878_v2 }
0x121e   : > { %v24882_v11 = vpop.eup %24881  ;;  %v11232_v22 = vsel %vm2002_vm7, %v11231_v51, %v11230_v46  ;;  %v11235_v9 = vrot.slane %v24880_v43, 2  ;;  %v27401_v30 = vsel %vm6597_vm4, %v27288_v14, %v24880_v43  ;;  %vm15523_vm7 = vcmask 64512  }
0x121f   : > { %v24884_v25 = vpop.eup %24883  ;;  %v11234_v52 = vsel %vm2005_vm8, %v11233_v41, %v11232_v22  ;;  %v11237_v12 = vrot.slane %v24882_v11, 1  ;;  %v27406_v33 = vsel %vm6597_vm4, %v27266_v10, %v24882_v11 }
0x1220   : > { %v11236_v45 = vsel %vm2008_vm9, %v11235_v9, %v11234_v52  ;;  %v27411_v26 = vsel %vm6597_vm4, %v27298_v47, %v24884_v25  ;;  %v11240_v17 = vrot.slane %v24884_v25, 7 }
0x1221   : > { %v11238_v1 = vsel %vm2011_vm10, %v11237_v12, %v11236_v45 }
0x1222   : > { %v11239_v14 = vsel %vm2014_vm11, %v24870_v13, %v11238_v1 }
0x1223   : > { %v11241_v32 = vsel %vm2017_vm12, %v11240_v17, %v11239_v14 }
0x1224   : > { %v11242_v48 = vsel %vm649_vm0, %v11241_v32, 0 }
0x1225   : > { %v11313_v62 = vand.u32 4294901760, %v11242_v48 }
0x1227   : > { %v11314_v4 = vsub.f32 %v11242_v48, %v11313_v62 }
0x1229   : > { %v11315_v15 = vand.u32 4294901760, %v11314_v4 }
0x122b   : > { %v11316_v10 = vsub.f32 %v11314_v4, %v11315_v15 }
0x122d   : > { %v11317_v56 = vand.u32 4294901760, %v11316_v10 }
0x122f   : > { %22586 = vmatmul.mubr.f32.vlgmr.msra.gmra.mrb[26].mxu1 %v11317_v56 }
0x1230   : > { %23935 = vmatpush3.bf16.msra.mxu1 %v26697_v24  ;;  %22596 = vmatprep.mubr.msk.f32.mxu1 %vm25260_vm5, %v28866_v59  ;;  %v12363_v24 = vsel %vm649_vm0, %v26757_v31, 0 }
0x1231   : > { %23936 = vmatprep.subr.bf16.mxu1 %v28865_v29 }
0x1234   : > { %23938 = vmatpush3.bf16.msra.mxu1 %v26699_v50  ;;  %v27451_v50 = vand.u32 4294901760, %v12363_v24 }
0x1235   : > { %23939 = vmatprep.subr.bf16.mxu1 %v28865_v29 }
0x1237   : > { %22597 = vmatmul.mubr.f32.vlgmr.msra.gmra.mrb[26].mxu1 %v11313_v62 }
0x1238   : > { %23941 = vmatpush3.bf16.msra.mxu1 %v26701_v39  ;;  %22607 = vmatprep.mubr.msk.f32.mxu1 %vm25260_vm5, %v28866_v59 }
0x1239   : > { %23942 = vmatprep.subr.bf16.mxu1 %v28865_v29 }
0x123c   : > { %23944 = vmatpush3.bf16.msra.mxu1 %v26703_v38 }
0x123d   : > { %23945 = vmatprep.subr.bf16.mxu1 %v28865_v29 }
0x123f   : > { %22608 = vmatmul.mubr.f32.vlgmr.msra.gmra.mrb[26].mxu1 %v11314_v4 }
0x1240   : > { %23947 = vmatpush3.bf16.msra.mxu1 %v26685_v60  ;;  %22618 = vmatprep.mubr.msk.f32.mxu1 %vm25260_vm5, %v28866_v59 }
0x1241   : > { %23948 = vmatprep.subr.bf16.mxu1 %v28865_v29 }
0x1244   : > { %23950 = vmatpush3.bf16.msra.mxu1 %v26688_v16 }
0x1245   : > { %23951 = vmatprep.subr.bf16.mxu1 %v28865_v29 }
0x1247   : > { %22619 = vmatmul.mubr.f32.vlgmr.msra.gmra.mrb[26].mxu1 %v11315_v15 }
0x1248   : > { %23953 = vmatpush3.bf16.msra.mxu1 %v26705_v58  ;;  %22629 = vmatprep.mubr.msk.f32.mxu1 %vm25260_vm5, %v28866_v59 }
0x1249   : > { %23954 = vmatprep.subr.bf16.mxu1 %v28865_v29 }
0x124c   : > { %23956 = vmatpush3.bf16.msra.mxu1 %v26707_v23 }
0x124d   : > { %23957 = vmatprep.subr.bf16.mxu1 %v28865_v29 }
0x124f   : > { %22630 = vmatmul.mubr.f32.vlgmr.msra.gmra.mrb[26].mxu1 %v11313_v62 }
0x1250   : > { %23959 = vmatpush3.bf16.msra.mxu1 %v26685_v60  ;;  %22640 = vmatprep.mubr.msk.f32.mxu1 %vm25260_vm5, %v28866_v59 }
0x1251   : > { %23960 = vmatprep.subr.bf16.mxu1 %v28865_v29 }
0x1254   : > { %23962 = vmatpush3.bf16.msra.mxu1 %v26688_v16 }
0x1255   : > { %22673 = vmatprep.subr.mxu1 %v28866_v59 }
0x1257   : > { %22641 = vmatmul.mubr.f32.vlgmr.msra.gmra.mrb[26].mxu1 %v11313_v62 }
0x1258   : > { %22675 = vmatprep.mubr.msk.f32.mxu1 %vm25260_vm5, %v28866_v59 }
0x125d   : > { %22674 = vmatpush3.xpose.msra.mxu1 %v27451_v50 }
0x125e   : > { %22678 = vmatprep.subr.mxu1 %v28866_v59 }
0x132a   : > { %v11725_v60 = vpop.f32.mrb[26].mxu1 }
0x132b   : > { %v11730_v39 = vrot.slane %v11725_v60, 1  ;;  %v11731_v29 = vrot.slane %v11725_v60, 2  ;;  %v11732_v38 = vrot.slane %v11725_v60, 3  ;;  %v11733_v16 = vrot.slane %v11725_v60, 4  ;;  %v22642_v58 = vpop.f32.mrb[27].mxu1 }
0x132c   : > { %v11734_v23 = vrot.slane %v11725_v60, 5  ;;  %v11735_v47 = vrot.slane %v11725_v60, 6  ;;  %v11752_v13 = vadd.f32 %v26839_v42, %v11725_v60  ;;  %v11736_v8 = vrot.slane %v11725_v60, 7 }
0x132d   : > { %v11745_v36 = vadd.f32 %v26816_v3, %v11730_v39  ;;  %v11746_v18 = vadd.f32 %v26813_v35, %v11731_v29  ;;  %v11747_v2 = vadd.f32 %v26822_v20, %v11732_v38  ;;  %v11748_v51 = vadd.f32 %v26819_v37, %v11733_v16 }
0x132e   : > { %24885 = vtanh.f32 %v11752_v13  ;;  %v11749_v43 = vadd.f32 %v26828_v7, %v11734_v23  ;;  %v11750_v46 = vadd.f32 %v26825_v49, %v11735_v47  ;;  %v11751_v41 = vadd.f32 %v26835_v57, %v11736_v8 }
0x132f   : > { %24887 = vtanh.f32 %v11745_v36  ;;  %v11991_v20 = vsub.f32 %v27360_v54, %v27365_v6  ;;  %v12443_v49 = vsub.f32 %v12363_v24, %v27451_v50  ;;  %v13267_v16 = vsel %vm649_vm0, %v26766_v21, 0 }
0x1330   : > { %24889 = vtanh.f32 %v11746_v18  ;;  %v27550_v13 = vand.u32 4294901760, %v13267_v16 }
0x1331   : > { %24891 = vtanh.f32 %v11747_v2  ;;  %v11992_v12 = vand.u32 4294901760, %v11991_v20  ;;  %v12444_v17 = vand.u32 4294901760, %v12443_v49 }
0x1332   : > { %24893 = vtanh.f32 %v11748_v51  ;;  %v27563_v2 = vsub.f32 %v13267_v16, %v27550_v13 }
0x1333   : > { %24895 = vtanh.f32 %v11749_v43  ;;  %v11993_v4 = vsub.f32 %v11991_v20, %v11992_v12  ;;  %v12445_v56 = vsub.f32 %v12443_v49, %v12444_v17 }
0x1334   : > { %24897 = vtanh.f32 %v11750_v46 }
0x1335   : > { %24899 = vtanh.f32 %v11751_v41  ;;  %v12446_v29 = vand.u32 4294901760, %v12445_v56  ;;  %v28870_v41 = vld [vmem:[#allocation33_spill] sm:$0xff] }
0x1338   : > { %v24886_v3 = vpop.eup %24885 }
0x1339   : > { %v24888_v35 = vpop.eup %24887  ;;  %v27467_v37 = vsel %vm6606_vm2, %v27411_v26, %v24886_v3  ;;  %v5928_v3 = vcombine.high %v28870_v41, %v28870_v41 }
0x133a   : > { %v24890_v7 = vpop.eup %24889  ;;  %v27472_v57 = vsel %vm6606_vm2, %v27383_v0, %v24888_v35 }
0x133b   : > { %v24892_v42 = vpop.eup %24891  ;;  %v11908_v11 = vsel %vm649_vm0, %v27472_v57, 0  ;;  %v27478_v22 = vsel %vm6606_vm2, %v27387_v27, %v24890_v7  ;;  %v28871_v7 = vld [vmem:[#allocation34_spill] sm:$0xff] }
0x133c   : > { %v24894_v54 = vpop.eup %24893  ;;  %v27480_v9 = vand.u32 4294901760, %v11908_v11  ;;  %v12360_v25 = vsel %vm649_vm0, %v27478_v22, 0  ;;  %v27486_v52 = vsel %vm6606_vm2, %v27391_v61, %v24892_v42 }
0x133d   : > { %v24896_v0 = vpop.eup %24895  ;;  %v27488_v45 = vand.u32 4294901760, %v12360_v25  ;;  %v27492_v26 = vsel %vm6606_vm2, %v27396_v44, %v24894_v54 }
0x133e   : > { %v24898_v27 = vpop.eup %24897  ;;  %v11980_v1 = vsub.f32 %v11908_v11, %v27480_v9  ;;  %v27497_v14 = vsel %vm6606_vm2, %v27401_v30, %v24896_v0  ;;  %v11994_v30 = vand.u32 4294901760, %v11993_v4  ;;  %v13264_v38 = vsel %vm649_vm0, %v27492_v26, 0  ;;  %v28872_v11 = vld [vmem:[#allocation32_spill] sm:$0xff] }
0x133f   : > { %v24900_v32 = vpop.eup %24899  ;;  %v12432_v61 = vsub.f32 %v12360_v25, %v27488_v45  ;;  %v27502_v48 = vsel %vm6606_vm2, %v27406_v33, %v24898_v27  ;;  %v12815_v33 = vsel %vm649_vm0, %v26761_v53, 0  ;;  %v27547_v47 = vand.u32 4294901760, %v13264_v38  ;;  %v28873_v25 = vld [vmem:[#allocation36_spill] sm:$0xff]  ;;  %v28874_v27 = vld [vmem:[#allocation37_spill] sm:$0xff] }
0x1340   : > { %v11981_v62 = vand.u32 4294901760, %v11980_v1  ;;  %v27506_v44 = vsel %vm6606_vm2, %v27379_v40, %v24900_v32  ;;  %v12812_v40 = vsel %vm649_vm0, %v27486_v52, 0  ;;  %v27545_v23 = vand.u32 4294901760, %v12815_v33 }
0x1341   : > { %v12433_v15 = vand.u32 4294901760, %v12432_v61  ;;  %v27540_v58 = vand.u32 4294901760, %v12812_v40  ;;  %v27559_v18 = vsub.f32 %v13264_v38, %v27547_v47  ;;  %v5871_v54 = vcombine.high %v28872_v11, %v28872_v11 }
0x1342   : > { %v11982_v10 = vsub.f32 %v11980_v1, %v11981_v62  ;;  %v27556_v36 = vsub.f32 %v12815_v33, %v27545_v23  ;;  %v6026_v0 = vcombine.high %v28873_v25, %v28873_v25  ;;  %v6173_v4 = vcombine.high %v26595_v34, %v26595_v34 }
0x1343   : > { %v12434_v24 = vsub.f32 %v12432_v61, %v12433_v15  ;;  %v27553_v8 = vsub.f32 %v12812_v40, %v27540_v58  ;;  %v13337_v46 = vand.u32 4294901760, %v27559_v18 }
0x1344   : > { %v11983_v60 = vand.u32 4294901760, %v11982_v10  ;;  %v12896_v43 = vand.u32 4294901760, %v27556_v36  ;;  %v6223_v10 = vcombine.high %v26741_v63, %v26741_v63 }
0x1345   : > { %v12435_v39 = vand.u32 4294901760, %v12434_v24  ;;  %v12885_v51 = vand.u32 4294901760, %v27553_v8 }
0x1346   : > { %22646 = vmatmul.mubr.f32.vlgmr.msra.gmra.mrb[28].mxu0 %v11983_v60  ;;  %v12897_v35 = vsub.f32 %v27556_v36, %v12896_v43 }
0x1347   : > { %22649 = vmatpush3.xpose.msra.mxu0 %v11994_v30  ;;  %22676 = vmatmul.mubr.f32.vlgmr.msra.gmra.mrb[28].mxu1 %v12435_v39  ;;  %v6187_v30 = vrot.slane %v6173_v4, %v26065_v19 }
0x1348   : > { %22679 = vmatpush3.xpose.msra.mxu1 %v12446_v29  ;;  %22650 = vmatprep.mubr.msk.f32.mxu0 %vm25260_vm5, %v28866_v59  ;;  %v6237_v29 = vrot.slane %v6223_v10, %v26065_v19 }
0x1349   : > { %22653 = vmatprep.subr.mxu0 %v28866_v59  ;;  %22680 = vmatprep.mubr.msk.f32.mxu1 %vm25260_vm5, %v28866_v59 }
0x134a   : > { %22683 = vmatprep.subr.mxu1 %v28866_v59  ;;  %v6239_v11 = vcombine.high %v6237_v29, %v6237_v29 }
0x134c   : > { %v27698_v4 = vrot.slane %v6239_v11, %v26065_v19 }
0x134e   : > { %22651 = vmatmul.mubr.f32.vlgmr.msra.gmra.mrb[28].mxu0 %v27480_v9 }
0x134f   : > { %22654 = vmatpush3.xpose.msra.mxu0 %v11991_v20  ;;  %22681 = vmatmul.mubr.f32.vlgmr.msra.gmra.mrb[28].mxu1 %v27488_v45  ;;  %v13338_v20 = vsub.f32 %v27559_v18, %v13337_v46 }
0x1350   : > { %22684 = vmatpush3.xpose.msra.mxu1 %v12443_v49  ;;  %22655 = vmatprep.mubr.msk.f32.mxu0 %vm25260_vm5, %v28866_v59  ;;  %v5977_v49 = vcombine.high %v28871_v7, %v28871_v7  ;;  %v6189_v7 = vcombine.high %v6187_v30, %v6187_v30 }
0x1351   : > { %22658 = vmatprep.subr.mxu0 %v28866_v59  ;;  %22685 = vmatprep.mubr.msk.f32.mxu1 %vm25260_vm5, %v28866_v59 }
0x1352   : > { %22688 = vmatprep.subr.mxu1 %v28866_v59  ;;  %v5991_v32 = vrot.slane %v5977_v49, %v26065_v19 }
0x1354   : > { %v5993_v34 = vcombine.high %v5991_v32, %v5991_v32 }
0x1356   : > { %22656 = vmatmul.mubr.f32.vlgmr.msra.gmra.mrb[28].mxu0 %v11980_v1  ;;  %v6075_v1 = vcombine.high %v28874_v27, %v28874_v27  ;;  %v27643_v41 = vrot.slane %v5993_v34, %v26065_v19  ;;  %v27679_v27 = vrot.slane %v6187_v30, %v26065_v19 }
0x1357   : > { %22659 = vmatpush3.xpose.msra.mxu0 %v27365_v6  ;;  %22686 = vmatmul.mubr.f32.vlgmr.msra.gmra.mrb[28].mxu1 %v12432_v61  ;;  %v6124_v61 = vcombine.high %v26333_v28, %v26333_v28  ;;  %v5885_v28 = vrot.slane %v5871_v54, %v26065_v19 }
0x1358   : > { %22689 = vmatpush3.xpose.msra.mxu1 %v27451_v50  ;;  %22660 = vmatprep.mubr.msk.f32.mxu0 %vm25260_vm5, %v28866_v59  ;;  %v6089_v24 = vrot.slane %v6075_v1, %v26065_v19  ;;  %v6491_v30 = vrot.slane %v27679_v27, %v26094_v5 }
0x1359   : > { %22663 = vmatprep.subr.mxu0 %v28866_v59  ;;  %22690 = vmatprep.mubr.msk.f32.mxu1 %vm25260_vm5, %v28866_v59  ;;  %v6138_v60 = vrot.slane %v6124_v61, %v26065_v19  ;;  %v5887_v40 = vcombine.high %v5885_v28, %v5885_v28  ;;  %v27637_v16 = vrot.slane %v5885_v28, %v26065_v19 }
0x135a   : > { %22693 = vmatprep.subr.mxu1 %v28866_v59  ;;  %v6091_v38 = vcombine.high %v6089_v24, %v6089_v24  ;;  %v27657_v49 = vrot.slane %v6089_v24, %v26065_v19  ;;  %v27693_v61 = vrot.slane %v6189_v7, %v26065_v19 }
0x135b   : > { %v27668_v25 = vrot.slane %v6138_v60, %v26065_v19 }
0x135e   : > { %22661 = vmatmul.mubr.f32.vlgmr.msra.gmra.mrb[28].mxu0 %v11981_v62 }
0x135f   : > { %22664 = vmatpush3.xpose.msra.mxu0 %v11992_v12  ;;  %22691 = vmatmul.mubr.f32.vlgmr.msra.gmra.mrb[28].mxu1 %v12433_v15  ;;  %v5942_v12 = vrot.slane %v5928_v3, %v26065_v19  ;;  %v6040_v15 = vrot.slane %v6026_v0, %v26065_v19  ;;  %v6140_v3 = vcombine.high %v6138_v60, %v6138_v60 }
0x1360   : > { %22694 = vmatpush3.xpose.msra.mxu1 %v12444_v17  ;;  %22665 = vmatprep.mubr.msk.f32.mxu0 %vm25260_vm5, %v28866_v59  ;;  %v13339_v17 = vand.u32 4294901760, %v13338_v20  ;;  %v27671_v0 = vrot.slane %v6091_v38, %v26065_v19  ;;  %v6495_v38 = vrot.slane %v27693_v61, %v26094_v5 }
0x1361   : > { %22668 = vmatprep.subr.mxu0 %v28866_v59  ;;  %22695 = vmatprep.mubr.msk.f32.mxu1 %vm25260_vm5, %v28866_v59  ;;  %v5944_v56 = vcombine.high %v5942_v12, %v5942_v12  ;;  %v27629_v63 = vrot.slane %v5942_v12, %v26065_v19  ;;  %v6042_v39 = vcombine.high %v6040_v15, %v6040_v15 }
0x1362   : > { %22698 = vmatprep.subr.mxu1 %v28866_v59  ;;  %v27649_v20 = vrot.slane %v6040_v15, %v26065_v19  ;;  %v6335_v12 = vrot.slane %v27643_v41, %v26094_v5  ;;  %v27682_v1 = vrot.slane %v6140_v3, %v26065_v19  ;;  %v6415_v24 = vrot.slane %v27671_v0, %v26094_v5 }
0x1363   : > { %v27634_v33 = vrot.slane %v5944_v56, %v26065_v19  ;;  %v6451_v56 = vrot.slane %v27668_v25, %v26094_v5 }
0x1365   : > { %v6295_v54 = vrot.slane %v27634_v33, %v26094_v5 }
0x1366   : > { %22666 = vmatmul.mubr.f32.vlgmr.msra.gmra.mrb[28].mxu0 %v27480_v9 }
0x1367   : > { %22669 = vmatpush3.xpose.msra.mxu0 %v27365_v6  ;;  %22696 = vmatmul.mubr.f32.vlgmr.msra.gmra.mrb[28].mxu1 %v27488_v45  ;;  %v13348_v6 = vand.u32 4294901760, %v27563_v2 }
0x1368   : > { %22699 = vmatpush3.xpose.msra.mxu1 %v27451_v50  ;;  %22670 = vmatprep.mubr.msk.f32.mxu0 %vm25260_vm5, %v28866_v59  ;;  %v12886_v50 = vsub.f32 %v27553_v8, %v12885_v51 }
0x1369   : > { %22700 = vmatprep.mubr.msk.f32.mxu1 %vm25260_vm5, %v28866_v59  ;;  %22703 = vmatprep.subr.mxu0 %v28866_v59  ;;  %v13349_v42 = vsub.f32 %v27563_v2, %v13348_v6 }
0x136a   : > { %22733 = vmatprep.subr.mxu1 %v28866_v59 }
0x136b   : > { %v13350_v62 = vand.u32 4294901760, %v13349_v42  ;;  %v27660_v42 = vrot.slane %v6042_v39, %v26065_v19  ;;  %v6455_v39 = vrot.slane %v27682_v1, %v26094_v5 }
0x136d   : > { %v6375_v15 = vrot.slane %v27660_v42, %v26094_v5 }
0x136e   : > { %22671 = vmatmul.mubr.f32.vlgmr.msra.gmra.mrb[28].mxu0 %v27480_v9  ;;  %v12887_v9 = vand.u32 4294901760, %v12886_v50  ;;  %v27640_v50 = vrot.slane %v5991_v32, %v26065_v19  ;;  %v6371_v32 = vrot.slane %v27649_v20, %v26094_v5 }
0x136f   : > { %22701 = vmatmul.mubr.f32.vlgmr.msra.gmra.mrb[28].mxu1 %v27488_v45  ;;  %22704 = vmatpush3.xpose.msra.mxu0 %v27545_v23  ;;  %v12898_v45 = vand.u32 4294901760, %v12897_v35  ;;  %v6291_v35 = vrot.slane %v27629_v63, %v26094_v5 }
0x1370   : > { %22734 = vmatpush3.xpose.msra.mxu1 %v27550_v13  ;;  %22705 = vmatprep.mubr.msk.f32.mxu0 %vm25260_vm5, %v28866_v59 }
0x1371   : > { %22708 = vmatprep.subr.mxu0 %v28866_v59  ;;  %22735 = vmatprep.mubr.msk.f32.mxu1 %vm25260_vm5, %v28866_v59  ;;  %v6557_v10 = vsel %vm6552_vm13, %v27637_v16, %v6291_v35  ;;  %v6535_v35 = vrot.slane %v27698_v4, %v26094_v5 }
0x1372   : > { %22738 = vmatprep.subr.mxu1 %v28866_v59  ;;  %22706 = vmatmul.mubr.f32.vlgmr.msra.gmra.mrb[30].mxu0 %v12887_v9  ;;  %v6331_v9 = vrot.slane %v27640_v50, %v26094_v5 }
0x1373   : > { %22709 = vmatpush3.xpose.msra.mxu0 %v12898_v45  ;;  %22736 = vmatmul.mubr.f32.vlgmr.msra.gmra.mrb[30].mxu1 %v13339_v17  ;;  %v27685_v45 = vrot.slane %v5887_v40, %v26065_v19  ;;  %v27688_v17 = vrot.slane %v6237_v29, %v26065_v19 }
0x1374   : > { %22739 = vmatpush3.xpose.msra.mxu1 %v13350_v62  ;;  %22710 = vmatprep.mubr.msk.f32.mxu0 %vm25260_vm5, %v28866_v59  ;;  %v6411_v62 = vrot.slane %v27657_v49, %v26094_v5  ;;  %v6566_v34 = vsel %vm6561_vm14, %v6557_v10, %v6331_v9  ;;  %v13716_v10 = vsel %vm649_vm0, %v27497_v14, 0 }
0x1375   : > { %22713 = vmatprep.subr.mxu0 %v28866_v59  ;;  %22740 = vmatprep.mubr.msk.f32.mxu1 %vm25260_vm5, %v28866_v59  ;;  %v6558_v28 = vsel %vm6552_vm13, %v27685_v45, %v6295_v54  ;;  %v6531_v29 = vrot.slane %v27688_v17, %v26094_v5  ;;  %v6575_v40 = vsel %vm6570_vm1, %v6566_v34, %v6371_v32 }
0x1376   : > { %22743 = vmatprep.subr.mxu1 %v28866_v59  ;;  %v6567_v60 = vsel %vm6561_vm14, %v6558_v28, %v6335_v12  ;;  %v6584_v3 = vsel %vm6579_vm3, %v6575_v40, %v6411_v62 }
0x1377   : > { %v6576_v7 = vsel %vm6570_vm1, %v6567_v60, %v6375_v15  ;;  %v6593_v11 = vsel %vm6588_vm15, %v6584_v3, %v6451_v56  ;;  %v14168_v56 = vsel %vm649_vm0, %v27502_v48, 0 }
0x1378   : > { %v6585_v54 = vsel %vm6579_vm3, %v6576_v7, %v6415_v24  ;;  %v6602_v9 = vsel %vm6597_vm4, %v6593_v11, %v6491_v30  ;;  %v5976_v7 = vcombine.high %v27634_v33, %v27634_v33  ;;  %v6023_v11 = vcombine.high %v27640_v50, %v27640_v50 }
0x1379   : > { %v6594_v12 = vsel %vm6588_vm15, %v6585_v54, %v6455_v39  ;;  %v27740_v32 = vsel %vm6606_vm2, %v6602_v9, %v6531_v29  ;;  %v6025_v54 = vcombine.high %v27643_v41, %v27643_v41  ;;  %v5917_v9 = vcombine.high %v27637_v16, %v27637_v16 }
0x137a   : > { %22711 = vmatmul.mubr.f32.vlgmr.msra.gmra.mrb[30].mxu0 %v27540_v58  ;;  %v6603_v62 = vsel %vm6597_vm4, %v6594_v12, %v6495_v38  ;;  %v13719_v28 = vsel %vm649_vm0, %v27740_v32, 0  ;;  %v6121_v50 = vcombine.high %v27657_v49, %v27657_v49  ;;  %v6074_v16 = vcombine.high %v27660_v42, %v27660_v42 }
0x137b   : > { %22714 = vmatpush3.xpose.msra.mxu0 %v27556_v36  ;;  %22741 = vmatmul.mubr.f32.vlgmr.msra.gmra.mrb[30].mxu1 %v27547_v47  ;;  %v27744_v15 = vsel %vm6606_vm2, %v6603_v62, %v6535_v35  ;;  %v27769_v36 = vand.u32 4294901760, %v13719_v28  ;;  %v6303_v41 = vrot.slane %v5976_v7, %v26094_v5  ;;  %v6123_v12 = vcombine.high %v27671_v0, %v27671_v0 }
0x137c   : > { %22744 = vmatpush3.xpose.msra.mxu1 %v27563_v2  ;;  %22715 = vmatprep.mubr.msk.f32.mxu0 %vm25260_vm5, %v28866_v59  ;;  %v14171_v24 = vsel %vm649_vm0, %v27744_v15, 0  ;;  %v6339_v62 = vrot.slane %v6023_v11, %v26094_v5  ;;  %v6343_v49 = vrot.slane %v6025_v54, %v26094_v5  ;;  %v6219_v42 = vcombine.high %v27679_v27, %v27679_v27 }
0x137d   : > { %22718 = vmatprep.subr.mxu0 %v28866_v59  ;;  %22745 = vmatprep.mubr.msk.f32.mxu1 %vm25260_vm5, %v28866_v59  ;;  %v6383_v27 = vrot.slane %v6074_v16, %v26094_v5 }
0x137e   : > { %22748 = vmatprep.subr.mxu1 %v28866_v59 }
0x1382   : > { %22716 = vmatmul.mubr.f32.vlgmr.msra.gmra.mrb[30].mxu0 %v27553_v8  ;;  %v27764_v8 = vand.u32 4294901760, %v13716_v10 }
0x1383   : > { %22719 = vmatpush3.xpose.msra.mxu0 %v27545_v23  ;;  %22746 = vmatmul.mubr.f32.vlgmr.msra.gmra.mrb[30].mxu1 %v27559_v18  ;;  %v27771_v18 = vand.u32 4294901760, %v14168_v56 }
0x1384   : > { %22749 = vmatpush3.xpose.msra.mxu1 %v27550_v13  ;;  %22720 = vmatprep.mubr.msk.f32.mxu0 %vm25260_vm5, %v28866_v59  ;;  %v27777_v2 = vsub.f32 %v13716_v10, %v27764_v8  ;;  %v6172_v10 = vcombine.high %v27682_v1, %v27682_v1 }
0x1385   : > { %22723 = vmatprep.subr.mxu0 %v28866_v59  ;;  %22750 = vmatprep.mubr.msk.f32.mxu1 %vm25260_vm5, %v28866_v59 }
0x1386   : > { %22753 = vmatprep.subr.mxu1 %v28866_v59  ;;  %v13789_v34 = vand.u32 4294901760, %v27777_v2 }
0x138a   : > { %22721 = vmatmul.mubr.f32.vlgmr.msra.gmra.mrb[30].mxu0 %v12885_v51  ;;  %v27774_v51 = vand.u32 4294901760, %v14171_v24 }
0x138b   : > { %22724 = vmatpush3.xpose.msra.mxu0 %v12896_v43  ;;  %22751 = vmatmul.mubr.f32.vlgmr.msra.gmra.mrb[30].mxu1 %v13337_v46  ;;  %v27780_v43 = vsub.f32 %v13719_v28, %v27769_v36  ;;  %v27783_v46 = vsub.f32 %v14168_v56, %v27771_v18  ;;  %v5919_v28 = vcombine.high %v27685_v45, %v27685_v45 }
0x138c   : > { %22754 = vmatpush3.xpose.msra.mxu1 %v13348_v6  ;;  %22725 = vmatprep.mubr.msk.f32.mxu0 %vm25260_vm5, %v28866_v59  ;;  %v27787_v6 = vsub.f32 %v14171_v24, %v27774_v51  ;;  %v6221_v56 = vcombine.high %v27693_v61, %v27693_v61  ;;  %v6419_v24 = vrot.slane %v6121_v50, %v26094_v5 }
0x138d   : > { %22728 = vmatprep.subr.mxu0 %v28866_v59  ;;  %22755 = vmatprep.mubr.msk.f32.mxu1 %vm25260_vm5, %v28866_v59  ;;  %v13800_v60 = vand.u32 4294901760, %v27780_v43  ;;  %v14241_v30 = vand.u32 4294901760, %v27783_v46  ;;  %v6499_v61 = vrot.slane %v6219_v42, %v26094_v5 }
0x138e   : > { %22758 = vmatprep.subr.mxu1 %v28866_v59 }
0x138f   : > { %v13801_v39 = vsub.f32 %v27780_v43, %v13800_v60  ;;  %v14242_v29 = vsub.f32 %v27783_v46, %v14241_v30 }
0x1391   : > { %v14243_v3 = vand.u32 4294901760, %v14242_v29 }
0x1392   : > { %22726 = vmatmul.mubr.f32.vlgmr.msra.gmra.mrb[30].mxu0 %v27540_v58 }
0x1393   : > { %22729 = vmatpush3.xpose.msra.mxu0 %v27545_v23  ;;  %22756 = vmatmul.mubr.f32.vlgmr.msra.gmra.mrb[30].mxu1 %v27547_v47  ;;  %v14252_v23 = vand.u32 4294901760, %v27787_v6 }
0x1394   : > { %22759 = vmatpush3.xpose.msra.mxu1 %v27550_v13  ;;  %22730 = vmatprep.mubr.msk.f32.mxu0 %vm25260_vm5, %v28866_v59  ;;  %v13790_v13 = vsub.f32 %v27777_v2, %v13789_v34 }
0x1395   : > { %22760 = vmatprep.mubr.msk.f32.mxu1 %vm25260_vm5, %v28866_v59  ;;  %22763 = vmatprep.subr.mxu0 %v28866_v59  ;;  %v14253_v40 = vsub.f32 %v27787_v6, %v14252_v23 }
0x1396   : > { %22793 = vmatprep.subr.mxu1 %v28866_v59  ;;  %v13791_v38 = vand.u32 4294901760, %v13790_v13  ;;  %v6271_v13 = vcombine.high %v27698_v4, %v27698_v4  ;;  %v6463_v4 = vrot.slane %v6172_v10, %v26094_v5 }
0x1397   : > { %v14254_v35 = vand.u32 4294901760, %v14253_v40 }
0x139a   : > { %22731 = vmatmul.mubr.f32.vlgmr.msra.gmra.mrb[30].mxu0 %v27540_v58  ;;  %v13802_v58 = vand.u32 4294901760, %v13801_v39  ;;  %v6560_v39 = vsel %vm6552_vm13, %v5919_v28, %v6303_v41  ;;  %v14620_v41 = vsel %vm649_vm0, %v27506_v44, 0 }
0x139b   : > { %22761 = vmatmul.mubr.f32.vlgmr.msra.gmra.mrb[30].mxu1 %v27547_v47  ;;  %22764 = vmatpush3.xpose.msra.mxu0 %v27769_v36  ;;  %v5974_v47 = vcombine.high %v27629_v63, %v27629_v63  ;;  %v6072_v63 = vcombine.high %v27649_v20, %v27649_v20  ;;  %v6170_v20 = vcombine.high %v27668_v25, %v27668_v25 }
0x139c   : > { %22794 = vmatpush3.xpose.msra.mxu1 %v27774_v51  ;;  %22765 = vmatprep.mubr.msk.f32.mxu0 %vm25260_vm5, %v28866_v59  ;;  %v6269_v25 = vcombine.high %v27688_v17, %v27688_v17  ;;  %v6423_v17 = vrot.slane %v6123_v12, %v26094_v5  ;;  %v6569_v40 = vsel %vm6561_vm14, %v6560_v39, %v6343_v49  ;;  %v15072_v12 = vsel %vm649_vm0, %v27467_v37, 0 }
0x139d   : > { %22768 = vmatprep.subr.mxu0 %v28866_v59  ;;  %22795 = vmatprep.mubr.msk.f32.mxu1 %vm25260_vm5, %v28866_v59  ;;  %v6299_v33 = vrot.slane %v5974_v47, %v26094_v5  ;;  %v6379_v0 = vrot.slane %v6072_v63, %v26094_v5  ;;  %v6459_v45 = vrot.slane %v6170_v20, %v26094_v5 }
0x139e   : > { %22798 = vmatprep.subr.mxu1 %v28866_v59  ;;  %22766 = vmatmul.mubr.f32.vlgmr.msra.gmra.mrb[32].mxu0 %v13791_v38  ;;  %v6539_v38 = vrot.slane %v6269_v25, %v26094_v5  ;;  %v6543_v47 = vrot.slane %v6271_v13, %v26094_v5  ;;  %v6578_v7 = vsel %vm6570_vm1, %v6569_v40, %v6383_v27  ;;  %v28011_v27 = vand.u32 4294901760, %v26757_v31 }
0x139f   : > { %22769 = vmatpush3.xpose.msra.mxu0 %v13802_v58  ;;  %22796 = vmatmul.mubr.f32.vlgmr.msra.gmra.mrb[32].mxu1 %v14243_v3  ;;  %v6559_v1 = vsel %vm6552_vm13, %v5917_v9, %v6299_v33  ;;  %v6503_v3 = vrot.slane %v6221_v56, %v26094_v5  ;;  %v6587_v54 = vsel %vm6579_vm3, %v6578_v7, %v6423_v17  ;;  %v25263_v17 = vmov -1e+09  }
0x13a0   : > { %22799 = vmatpush3.xpose.msra.mxu1 %v14254_v35  ;;  %22770 = vmatprep.mubr.msk.f32.mxu0 %vm25260_vm5, %v28866_v59  ;;  %v6568_v29 = vsel %vm6561_vm14, %v6559_v1, %v6339_v62  ;;  %v6596_v63 = vsel %vm6588_vm15, %v6587_v54, %v6463_v4  ;;  %v28875_v1 = vlaneseq }
0x13a1   : > { %22773 = vmatprep.subr.mxu0 %v28866_v59  ;;  %22800 = vmatprep.mubr.msk.f32.mxu1 %vm25260_vm5, %v28866_v59  ;;  %v6577_v58 = vsel %vm6570_vm1, %v6568_v29, %v6379_v0  ;;  %v6605_v50 = vsel %vm6597_vm4, %v6596_v63, %v6503_v3 }
0x13a2   : > { %22803 = vmatprep.subr.mxu1 %v28866_v59  ;;  %v6586_v35 = vsel %vm6579_vm3, %v6577_v58, %v6419_v24  ;;  %v27912_v16 = vsel %vm6606_vm2, %v6605_v50, %v6543_v47  ;;  %v6616_v39 = vand.u32 127, %v28875_v1 }
0x13a3   : > { %v6595_v11 = vsel %vm6588_vm15, %v6586_v35, %v6459_v45  ;;  %v15075_v62 = vsel %vm649_vm0, %v27912_v16, 0  ;;  %v6619_v45 = vpop.permute.xlu0 %6618 }
0x13a4   : > { %v6604_v9 = vsel %vm6597_vm4, %v6595_v11, %v6499_v61  ;;  %vm6620_vm6 = vcmp.lt.s32.totalorder %v6616_v39, %v6619_v45 }
0x13a5   : > { %v27908_v33 = vsel %vm6606_vm2, %v6604_v9, %v6539_v38  ;;  %v6621_v29 = vsel %vm6620_vm6, 0.0, %v25263_v17 }
0x13a6   : > { %22771 = vmatmul.mubr.f32.vlgmr.msra.gmra.mrb[32].mxu0 %v27764_v8  ;;  %v14623_v20 = vsel %vm649_vm0, %v27908_v33, 0  ;;  %v11825_v40 = vrot.slane %v6621_v29, %v26065_v19 }
0x13a7   : > { %22774 = vmatpush3.xpose.msra.mxu0 %v27780_v43  ;;  %22801 = vmatmul.mubr.f32.vlgmr.msra.gmra.mrb[32].mxu1 %v27771_v18  ;;  %v27937_v43 = vand.u32 4294901760, %v14623_v20 }
0x13a8   : > { %22804 = vmatpush3.xpose.msra.mxu1 %v27787_v6  ;;  %22775 = vmatprep.mubr.msk.f32.mxu0 %vm25260_vm5, %v28866_v59  ;;  %v11833_v61 = vcombine.high %v11825_v40, %v11825_v40  ;;  %v11841_v4 = vrot.slane %v11825_v40, %v26065_v19 }
0x13a9   : > { %22778 = vmatprep.subr.mxu0 %v28866_v59  ;;  %22805 = vmatprep.mubr.msk.f32.mxu1 %vm25260_vm5, %v28866_v59 }
0x13aa   : > { %22808 = vmatprep.subr.mxu1 %v28866_v59  ;;  %v11855_v38 = vrot.slane %v11833_v61, %v26065_v19  ;;  %v11870_v58 = vrot.slane %v11841_v4, %v26094_v5 }
0x13ac   : > { %v11874_v35 = vrot.slane %v11855_v38, %v26094_v5 }
0x13ae   : > { %22776 = vmatmul.mubr.f32.vlgmr.msra.gmra.mrb[32].mxu0 %v27777_v2  ;;  %v27932_v2 = vand.u32 4294901760, %v14620_v41 }
0x13af   : > { %22779 = vmatpush3.xpose.msra.mxu0 %v27769_v36  ;;  %22806 = vmatmul.mubr.f32.vlgmr.msra.gmra.mrb[32].mxu1 %v27783_v46  ;;  %v27939_v46 = vand.u32 4294901760, %v15072_v12 }
0x13b0   : > { %22809 = vmatpush3.xpose.msra.mxu1 %v27774_v51  ;;  %22780 = vmatprep.mubr.msk.f32.mxu0 %vm25260_vm5, %v28866_v59  ;;  %v14692_v6 = vsub.f32 %v14620_v41, %v27932_v2  ;;  %v11863_v41 = vcombine.high %v11841_v4, %v11841_v4 }
0x13b1   : > { %22783 = vmatprep.subr.mxu0 %v28866_v59  ;;  %22810 = vmatprep.mubr.msk.f32.mxu1 %vm25260_vm5, %v28866_v59 }
0x13b2   : > { %22813 = vmatprep.subr.mxu1 %v28866_v59  ;;  %v14693_v49 = vand.u32 4294901760, %v14692_v6 }
0x13b4   : > { %v14694_v25 = vsub.f32 %v14692_v6, %v14693_v49 }
0x13b6   : > { %22781 = vmatmul.mubr.f32.vlgmr.msra.gmra.mrb[32].mxu0 %v13789_v34  ;;  %v27942_v34 = vand.u32 4294901760, %v15075_v62  ;;  %v14695_v56 = vand.u32 4294901760, %v14694_v25 }
0x13b7   : > { %22784 = vmatpush3.xpose.msra.mxu0 %v13800_v60  ;;  %22811 = vmatmul.mubr.f32.vlgmr.msra.gmra.mrb[32].mxu1 %v14241_v30  ;;  %v14703_v60 = vsub.f32 %v14623_v20, %v27937_v43  ;;  %v15144_v30 = vsub.f32 %v15072_v12, %v27939_v46  ;;  %v11865_v20 = vcombine.high %v11855_v38, %v11855_v38 }
0x13b8   : > { %22814 = vmatpush3.xpose.msra.mxu1 %v14252_v23  ;;  %22785 = vmatprep.mubr.msk.f32.mxu0 %vm25260_vm5, %v28866_v59  ;;  %v15155_v23 = vsub.f32 %v15075_v62, %v27942_v34  ;;  %v11878_v12 = vrot.slane %v11863_v41, %v26094_v5 }
0x13b9   : > { %22788 = vmatprep.subr.mxu0 %v28866_v59  ;;  %22815 = vmatprep.mubr.msk.f32.mxu1 %vm25260_vm5, %v28866_v59  ;;  %v14704_v42 = vand.u32 4294901760, %v14703_v60  ;;  %v15145_v10 = vand.u32 4294901760, %v15144_v30 }
0x13ba   : > { %22818 = vmatprep.subr.mxu1 %v28866_v59  ;;  %v15156_v28 = vand.u32 4294901760, %v15155_v23 }
0x13bb   : > { %v15146_v0 = vsub.f32 %v15144_v30, %v15145_v10 }
0x13bd   : > { %v15147_v13 = vand.u32 4294901760, %v15146_v0 }
0x13be   : > { %22786 = vmatmul.mubr.f32.vlgmr.msra.gmra.mrb[32].mxu0 %v27764_v8 }
0x13bf   : > { %22789 = vmatpush3.xpose.msra.mxu0 %v27769_v36  ;;  %22816 = vmatmul.mubr.f32.vlgmr.msra.gmra.mrb[32].mxu1 %v27771_v18  ;;  %v14705_v36 = vsub.f32 %v14703_v60, %v14704_v42 }
0x13c0   : > { %22819 = vmatpush3.xpose.msra.mxu1 %v27774_v51  ;;  %22790 = vmatprep.mubr.msk.f32.mxu0 %vm25260_vm5, %v28866_v59  ;;  %v15157_v51 = vsub.f32 %v15155_v23, %v15156_v28 }
0x13c1   : > { %22820 = vmatprep.mubr.msk.f32.mxu1 %vm25260_vm5, %v28866_v59  ;;  %22823 = vmatprep.subr.mxu0 %v28866_v59  ;;  %v14706_v24 = vand.u32 4294901760, %v14705_v36 }
0x13c2   : > { %22853 = vmatprep.subr.mxu1 %v28866_v59 }
0x13c6   : > { %22791 = vmatmul.mubr.f32.vlgmr.msra.gmra.mrb[32].mxu0 %v27764_v8  ;;  %v15158_v8 = vand.u32 4294901760, %v15157_v51 }
0x13c7   : > { %22821 = vmatmul.mubr.f32.vlgmr.msra.gmra.mrb[32].mxu1 %v27771_v18  ;;  %22824 = vmatpush3.xpose.msra.mxu0 %v27937_v43  ;;  %v28007_v18 = vand.u32 4294901760, %v27356_v55 }
0x13c8   : > { %22854 = vmatpush3.xpose.msra.mxu1 %v27942_v34  ;;  %22825 = vmatprep.mubr.msk.f32.mxu0 %vm25260_vm5, %v28866_v59 }
0x13c9   : > { %22828 = vmatprep.subr.mxu0 %v28866_v59  ;;  %22855 = vmatprep.mubr.msk.f32.mxu1 %vm25260_vm5, %v28866_v59 }
0x13ca   : > { %22858 = vmatprep.subr.mxu1 %v28866_v59  ;;  %22826 = vmatmul.mubr.f32.vlgmr.msra.gmra.mrb[34].mxu0 %v14695_v56 }
0x13cb   : > { %22829 = vmatpush3.xpose.msra.mxu0 %v14706_v24  ;;  %22856 = vmatmul.mubr.f32.vlgmr.msra.gmra.mrb[34].mxu1 %v15147_v13 }
0x13cc   : > { %22859 = vmatpush3.xpose.msra.mxu1 %v15158_v8  ;;  %22830 = vmatprep.mubr.msk.f32.mxu0 %vm25260_vm5, %v28866_v59 }
0x13cd   : > { %22833 = vmatprep.subr.mxu0 %v28866_v59  ;;  %22860 = vmatprep.mubr.msk.f32.mxu1 %vm25260_vm5, %v28866_v59 }
0x13ce   : > { %22863 = vmatprep.subr.mxu1 %v28866_v59 }
0x13d2   : > { %22831 = vmatmul.mubr.f32.vlgmr.msra.gmra.mrb[34].mxu0 %v27932_v2 }
0x13d3   : > { %22834 = vmatpush3.xpose.msra.mxu0 %v14703_v60  ;;  %22861 = vmatmul.mubr.f32.vlgmr.msra.gmra.mrb[34].mxu1 %v27939_v46 }
0x13d4   : > { %22864 = vmatpush3.xpose.msra.mxu1 %v15155_v23  ;;  %22835 = vmatprep.mubr.msk.f32.mxu0 %vm25260_vm5, %v28866_v59 }
0x13d5   : > { %22838 = vmatprep.subr.mxu0 %v28866_v59  ;;  %22865 = vmatprep.mubr.msk.f32.mxu1 %vm25260_vm5, %v28866_v59 }
0x13d6   : > { %22868 = vmatprep.subr.mxu1 %v28866_v59 }
0x13da   : > { %22836 = vmatmul.mubr.f32.vlgmr.msra.gmra.mrb[34].mxu0 %v14692_v6 }
0x13db   : > { %22839 = vmatpush3.xpose.msra.mxu0 %v27937_v43  ;;  %22866 = vmatmul.mubr.f32.vlgmr.msra.gmra.mrb[34].mxu1 %v15144_v30 }
0x13dc   : > { %22869 = vmatpush3.xpose.msra.mxu1 %v27942_v34  ;;  %22840 = vmatprep.mubr.msk.f32.mxu0 %vm25260_vm5, %v28866_v59 }
0x13dd   : > { %22843 = vmatprep.subr.mxu0 %v28866_v59  ;;  %22870 = vmatprep.mubr.msk.f32.mxu1 %vm25260_vm5, %v28866_v59 }
0x13de   : > { %22873 = vmatprep.subr.mxu1 %v28866_v59 }
0x13e2   : > { %22841 = vmatmul.mubr.f32.vlgmr.msra.gmra.mrb[34].mxu0 %v14693_v49  ;;  %v11818_v49 = vcombine.high %v6621_v29, %v6621_v29 }
0x13e3   : > { %22844 = vmatpush3.xpose.msra.mxu0 %v14704_v42  ;;  %22871 = vmatmul.mubr.f32.vlgmr.msra.gmra.mrb[34].mxu1 %v15145_v10 }
0x13e4   : > { %22874 = vmatpush3.xpose.msra.mxu1 %v15156_v28  ;;  %22845 = vmatprep.mubr.msk.f32.mxu0 %vm25260_vm5, %v28866_v59  ;;  %v11832_v42 = vrot.slane %v11818_v49, %v26065_v19 }
0x13e5   : > { %22848 = vmatprep.subr.mxu0 %v28866_v59  ;;  %22875 = vmatprep.mubr.msk.f32.mxu1 %vm25260_vm5, %v28866_v59 }
0x13e6   : > { %22878 = vmatprep.subr.mxu1 %v28866_v59  ;;  %v11834_v10 = vcombine.high %v11832_v42, %v11832_v42  ;;  %v11848_v28 = vrot.slane %v11832_v42, %v26065_v19 }
0x13e8   : > { %v11862_v25 = vrot.slane %v11834_v10, %v26065_v19  ;;  %v11886_v36 = vrot.slane %v11848_v28, %v26094_v5  ;;  %v11864_v17 = vcombine.high %v11848_v28, %v11848_v28 }
0x13ea   : > { %22846 = vmatmul.mubr.f32.vlgmr.msra.gmra.mrb[34].mxu0 %v27932_v2  ;;  %v11890_v51 = vrot.slane %v11862_v25, %v26094_v5  ;;  %v11866_v29 = vcombine.high %v11862_v25, %v11862_v25  ;;  %v11894_v19 = vrot.slane %v11864_v17, %v26094_v5 }
0x13eb   : > { %22849 = vmatpush3.xpose.msra.mxu0 %v27937_v43  ;;  %22876 = vmatmul.mubr.f32.vlgmr.msra.gmra.mrb[34].mxu1 %v27939_v46 }
0x13ec   : > { %22879 = vmatpush3.xpose.msra.mxu1 %v27942_v34  ;;  %22850 = vmatprep.mubr.msk.f32.mxu0 %vm25260_vm5, %v28866_v59  ;;  %v11898_v61 = vrot.slane %v11866_v29, %v26094_v5 }
0x13ed   : > { %22880 = vmatprep.mubr.msk.f32.mxu1 %vm25260_vm5, %v28866_v59  ;;  %22883 = vmatprep.subr.mxu0 %v28866_v59 }
0x13ee   : > { %22913 = vmatprep.subr.mxu1 %v28866_v59 }
0x13f2   : > { %22851 = vmatmul.mubr.f32.vlgmr.msra.gmra.mrb[34].mxu0 %v27932_v2  ;;  %v11882_v2 = vrot.slane %v11865_v20, %v26094_v5 }
0x13f3   : > { %22881 = vmatmul.mubr.f32.vlgmr.msra.gmra.mrb[34].mxu1 %v27939_v46  ;;  %22884 = vmatpush3.msra.mxu0 %v28007_v18 }
0x13f4   : > { %22914 = vmatpush3.msra.mxu1 %v28011_v27  ;;  %22885 = vmatprep.mubr.msk.f32.mxu0 %vm25260_vm5, %v28866_v59 }
0x13f5   : > { %22888 = vmatprep.subr.mxu0 %v28866_v59  ;;  %22915 = vmatprep.mubr.msk.f32.mxu1 %vm25260_vm5, %v28866_v59 }
0x13f6   : > { %22918 = vmatprep.subr.mxu1 %v28866_v59 }
0x1441   : > { %v12355_v3 = vpop.f32.mrb[28].mxu0 }
0x1442   : > { %v24087_v47 = vadd.f32 %v12355_v3, %v11870_v58  ;;  %v12807_v7 = vpop.f32.mrb[28].mxu1  ;;  %v22672_v11 = vpop.f32.mrb[29].mxu0 }
0x1443   : > { %v24088_v54 = vadd.f32 %v12807_v7, %v11874_v35  ;;  %v22702_v9 = vpop.f32.mrb[29].mxu1 }
0x1444   : > { %v15524_v63 = vsel %vm15523_vm7, %v24087_v47, -inf }
0x1445   : > { %15525 = vmax.xlane.f32.xlu1 %v15524_v63  ;;  %v15527_v50 = vsel %vm15523_vm7, %v24088_v54, -inf }
0x1446   : > { %15528 = vmax.xlane.f32.xlu0 %v15527_v50 }
0x146d   : > { %v13259_v62 = vpop.f32.mrb[30].mxu0 }
0x146e   : > { %v24089_v43 = vadd.f32 %v13259_v62, %v11878_v12  ;;  %v13711_v46 = vpop.f32.mrb[30].mxu1  ;;  %v22732_v34 = vpop.f32.mrb[31].mxu0 }
0x146f   : > { %v24090_v6 = vadd.f32 %v13711_v46, %v11882_v2  ;;  %v22762_v60 = vpop.f32.mrb[31].mxu1 }
0x1470   : > { %v15530_v30 = vsel %vm15523_vm7, %v24089_v43, -inf }
0x1471   : > { %15531 = vmax.xlane.f32.xlu0 %v15530_v30  ;;  %v15533_v23 = vsel %vm15523_vm7, %v24090_v6, -inf }
0x1472   : > { %15534 = vmax.xlane.f32.xlu1 %v15533_v23 }
0x1499   : > { %v14163_v0 = vpop.f32.mrb[32].mxu0 }
0x149a   : > { %v24091_v56 = vadd.f32 %v14163_v0, %v11886_v36  ;;  %v14615_v24 = vpop.f32.mrb[32].mxu1  ;;  %v22792_v13 = vpop.f32.mrb[33].mxu0 }
0x149b   : > { %v24092_v8 = vadd.f32 %v14615_v24, %v11890_v51  ;;  %v22822_v1 = vpop.f32.mrb[33].mxu1 }
0x149c   : > { %v15536_v39 = vsel %vm15523_vm7, %v24091_v56, -inf }
0x149d   : > { %15537 = vmax.xlane.f32.xlu0 %v15536_v39  ;;  %v15539_v45 = vsel %vm15523_vm7, %v24092_v8, -inf }
0x14a1   : > { %15540 = vmax.xlane.f32.xlu0 %v15539_v45 }
0x14c5   : > { %v15067_v40 = vpop.f32.mrb[34].mxu0 }
0x14c6   : > { %v24093_v4 = vadd.f32 %v15067_v40, %v11894_v19  ;;  %v15519_v38 = vpop.f32.mrb[34].mxu1  ;;  %v22852_v58 = vpop.f32.mrb[35].mxu0 }
0x14c7   : > { %v24094_v3 = vadd.f32 %v15519_v38, %v11898_v61  ;;  %v22882_v35 = vpop.f32.mrb[35].mxu1 }
0x14c8   : > { %v15542_v7 = vsel %vm15523_vm7, %v24093_v4, -inf }
0x14c9   : > { %15543 = vmax.xlane.f32.xlu0 %v15542_v7  ;;  %v15545_v11 = vsel %vm15523_vm7, %v24094_v3, -inf }
0x14cd   : > { %15546 = vmax.xlane.f32.xlu0 %v15545_v11  ;;  %v15693_v11 = vsub.f32 %v27356_v55, %v28007_v18 }
0x14d2   : > { %v15526_v9 = vpop.xlane.xlu1 %15525 }
0x14d3   : > { %v15548_v63 = vsub.f32 %v24087_v47, %v15526_v9  ;;  %v15529_v50 = vpop.xlane.xlu0 %15528 }
0x14d4   : > { %v15549_v41 = vsub.f32 %v24088_v54, %v15529_v50 }
0x14d5   : > { %v15556_v20 = vmul.f32 1.442695, %v15548_v63 }
0x14d6   : > { %v15558_v12 = vmul.f32 1.442695, %v15549_v41 }
0x14d7   : > { %24901 = vpow2.f32 %v15556_v20  ;;  %v15694_v20 = vand.u32 4294901760, %v15693_v11 }
0x14d8   : > { %24903 = vpow2.f32 %v15558_v12  ;;  %v16142_v12 = vsub.f32 %v26757_v31, %v28011_v27 }
0x14e1   : > { %v24902_v5 = vpop.eup %24901 }
0x14e2   : > { %v15572_v62 = vsel %vm15523_vm7, %v24902_v5, 0.0  ;;  %v24904_v2 = vpop.eup %24903 }
0x14e3   : > { %15573 = vadd.xlane.f32.xlu1 %v15572_v62  ;;  %v15575_v46 = vsel %vm15523_vm7, %v24904_v2, 0.0 }
0x14e7   : > { %15576 = vadd.xlane.f32.xlu1 %v15575_v46 }
0x14fe   : > { %v15532_v34 = vpop.xlane.xlu0 %15531 }
0x14ff   : > { %v15550_v60 = vsub.f32 %v24089_v43, %v15532_v34  ;;  %v15535_v30 = vpop.xlane.xlu1 %15534  ;;  %v15695_v34 = vsub.f32 %v15693_v11, %v15694_v20 }
0x1500   : > { %v15551_v23 = vsub.f32 %v24090_v6, %v15535_v30 }
0x1501   : > { %v15560_v49 = vmul.f32 1.442695, %v15550_v60  ;;  %v16143_v60 = vand.u32 4294901760, %v16142_v12 }
0x1502   : > { %v15562_v47 = vmul.f32 1.442695, %v15551_v23 }
0x1503   : > { %24905 = vpow2.f32 %v15560_v49 }
0x1504   : > { %24907 = vpow2.f32 %v15562_v47  ;;  %v15696_v47 = vand.u32 4294901760, %v15695_v34 }
0x150d   : > { %v28047_v54 = vpop.eup %24905 }
0x150e   : > { %v15578_v42 = vsel %vm15523_vm7, %v28047_v54, 0.0  ;;  %v28051_v10 = vpop.eup %24907 }
0x150f   : > { %15579 = vadd.xlane.f32.xlu1 %v15578_v42  ;;  %v15581_v28 = vsel %vm15523_vm7, %v28051_v10, 0.0  ;;  %v16144_v42 = vsub.f32 %v16142_v12, %v16143_v60 }
0x1513   : > { %15582 = vadd.xlane.f32.xlu1 %v15581_v28 }
0x152a   : > { %v15538_v25 = vpop.xlane.xlu0 %15537 }
0x152b   : > { %v15552_v43 = vsub.f32 %v24091_v56, %v15538_v25  ;;  %v16145_v25 = vand.u32 4294901760, %v16144_v42 }
0x152d   : > { %v15564_v36 = vmul.f32 1.442695, %v15552_v43 }
0x152e   : > { %v15541_v6 = vpop.xlane.xlu0 %15540 }
0x152f   : > { %24909 = vpow2.f32 %v15564_v36  ;;  %v15553_v0 = vsub.f32 %v24092_v8, %v15541_v6  ;;  %v28116_v6 = vand.u32 4294901760, %v26761_v53 }
0x1531   : > { %v15566_v51 = vmul.f32 1.442695, %v15553_v0 }
0x1533   : > { %24911 = vpow2.f32 %v15566_v51 }
0x1539   : > { %v28055_v24 = vpop.eup %24909 }
0x153a   : > { %v15584_v13 = vsel %vm15523_vm7, %v28055_v24, 0.0 }
0x153b   : > { %15585 = vadd.xlane.f32.xlu0 %v15584_v13  ;;  %v28124_v13 = vsub.f32 %v26761_v53, %v28116_v6 }
0x153d   : > { %v28059_v1 = vpop.eup %24911 }
0x153e   : > { %v15587_v39 = vsel %vm15523_vm7, %v28059_v1, 0.0 }
0x153f   : > { %15588 = vadd.xlane.f32.xlu1 %v15587_v39  ;;  %v28127_v39 = vand.u32 4294901760, %v26766_v21 }
0x1556   : > { %v15544_v45 = vpop.xlane.xlu0 %15543 }
0x1557   : > { %v15554_v56 = vsub.f32 %v24093_v4, %v15544_v45 }
0x1559   : > { %v15568_v17 = vmul.f32 1.442695, %v15554_v56 }
0x155a   : > { %v15547_v29 = vpop.xlane.xlu0 %15546 }
0x155b   : > { %24913 = vpow2.f32 %v15568_v17  ;;  %v15555_v8 = vsub.f32 %v24094_v3, %v15547_v29  ;;  %v16592_v17 = vand.u32 4294901760, %v28124_v13  ;;  %v28143_v29 = vsub.f32 %v26766_v21, %v28127_v39 }
0x155d   : > { %v15570_v19 = vmul.f32 1.442695, %v15555_v8  ;;  %v16593_v21 = vsub.f32 %v28124_v13, %v16592_v17 }
0x155f   : > { %24915 = vpow2.f32 %v15570_v19 }
0x1565   : > { %v28063_v40 = vpop.eup %24913 }
0x1566   : > { %v15590_v61 = vsel %vm15523_vm7, %v28063_v40, 0.0 }
0x1567   : > { %15591 = vadd.xlane.f32.xlu0 %v15590_v61  ;;  %v17041_v61 = vand.u32 4294901760, %v28143_v29 }
0x1569   : > { %v28067_v38 = vpop.eup %24915 }
0x156a   : > { %v15593_v58 = vsel %vm15523_vm7, %v28067_v38, 0.0 }
0x156b   : > { %15594 = vadd.xlane.f32.xlu1 %v15593_v58 }
0x1570   : > { %v15574_v4 = vpop.xlane.xlu1 %15573 }
0x1571   : > { %24917 = vrcp.f32 %v15574_v4 }
0x1574   : > { %v15577_v35 = vpop.xlane.xlu1 %15576 }
0x1575   : > { %24919 = vrcp.f32 %v15577_v35 }
0x157b   : > { %v24918_v3 = vpop.eup %24917 }
0x157c   : > { %v15604_v7 = vmul.f32 %v24918_v3, %v24902_v5  ;;  %v16594_v3 = vand.u32 4294901760, %v16593_v21 }
0x157e   : > { %20130 = vst.msk [vmem:[%s28074_s17] sm:$0xff] %vm15523_vm7, %v15604_v7  ;;  %v15613_v9 = vsel %vm15523_vm7, %v15604_v7, 0  ;;  %v17042_v7 = vsub.f32 %v28143_v29, %v17041_v61 }
0x157f   : > { %v24920_v63 = vpop.eup %24919  ;;  %v28079_v50 = vand.u32 4294901760, %v15613_v9 }
0x1580   : > { %v15605_v41 = vmul.f32 %v24920_v63, %v24904_v2  ;;  %v17043_v63 = vand.u32 4294901760, %v17042_v7 }
0x1581   : > { %v15682_v5 = vsub.f32 %v15613_v9, %v28079_v50 }
0x1582   : > { %20131 = vst.msk [vmem:[%s28074_s17 + $0x8] sm:$0xff] %vm15523_vm7, %v15605_v41  ;;  %v16062_v55 = vsel %vm15523_vm7, %v15605_v41, 0 }
0x1583   : > { %v15683_v62 = vand.u32 4294901760, %v15682_v5  ;;  %v28087_v46 = vand.u32 4294901760, %v16062_v55 }
0x1585   : > { %v15684_v30 = vsub.f32 %v15682_v5, %v15683_v62  ;;  %v16131_v23 = vsub.f32 %v16062_v55, %v28087_v46 }
0x1587   : > { %v15685_v49 = vand.u32 4294901760, %v15684_v30  ;;  %v16132_v2 = vand.u32 4294901760, %v16131_v23 }
0x1589   : > { %22886 = vmatmul.mubr.f32.vlgmr.msra.gmra.mrb[36].mxu0 %v15685_v49  ;;  %v16133_v31 = vsub.f32 %v16131_v23, %v16132_v2 }
0x158a   : > { %22889 = vmatpush3.msra.mxu0 %v15696_v47  ;;  %22890 = vmatprep.mubr.msk.f32.mxu0 %vm25260_vm5, %v28866_v59 }
0x158b   : > { %v16134_v28 = vand.u32 4294901760, %v16133_v31  ;;  %22893 = vmatprep.subr.mxu0 %v28866_v59 }
0x158d   : > { %22916 = vmatmul.mubr.f32.vlgmr.msra.gmra.mrb[36].mxu1 %v16134_v28 }
0x158e   : > { %22919 = vmatpush3.msra.mxu1 %v16145_v25  ;;  %22920 = vmatprep.mubr.msk.f32.mxu1 %vm25260_vm5, %v28866_v59 }
0x158f   : > { %22923 = vmatprep.subr.mxu1 %v28866_v59 }
0x1591   : > { %22891 = vmatmul.mubr.f32.vlgmr.msra.gmra.mrb[36].mxu0 %v28079_v50 }
0x1592   : > { %22894 = vmatpush3.msra.mxu0 %v15693_v11  ;;  %22895 = vmatprep.mubr.msk.f32.mxu0 %vm25260_vm5, %v28866_v59 }
0x1593   : > { %22898 = vmatprep.subr.mxu0 %v28866_v59 }
0x1595   : > { %22921 = vmatmul.mubr.f32.vlgmr.msra.gmra.mrb[36].mxu1 %v28087_v46 }
0x1596   : > { %22924 = vmatpush3.msra.mxu1 %v16142_v12  ;;  %22925 = vmatprep.mubr.msk.f32.mxu1 %vm25260_vm5, %v28866_v59 }
0x1597   : > { %22928 = vmatprep.subr.mxu1 %v28866_v59 }
0x1599   : > { %22896 = vmatmul.mubr.f32.vlgmr.msra.gmra.mrb[36].mxu0 %v15682_v5 }
0x159a   : > { %22899 = vmatpush3.msra.mxu0 %v28007_v18  ;;  %22900 = vmatprep.mubr.msk.f32.mxu0 %vm25260_vm5, %v28866_v59 }
0x159b   : > { %22903 = vmatprep.subr.mxu0 %v28866_v59 }
0x159c   : > { %v15580_v43 = vpop.xlane.xlu1 %15579 }
0x159d   : > { %24921 = vrcp.f32 %v15580_v43  ;;  %22926 = vmatmul.mubr.f32.vlgmr.msra.gmra.mrb[36].mxu1 %v16131_v23 }
0x159e   : > { %22929 = vmatpush3.msra.mxu1 %v28011_v27  ;;  %22930 = vmatprep.mubr.msk.f32.mxu1 %vm25260_vm5, %v28866_v59 }
0x159f   : > { %22933 = vmatprep.subr.mxu1 %v28866_v59 }
0x15a0   : > { %v15583_v36 = vpop.xlane.xlu1 %15582 }
0x15a1   : > { %24923 = vrcp.f32 %v15583_v36  ;;  %22901 = vmatmul.mubr.f32.vlgmr.msra.gmra.mrb[36].mxu0 %v15683_v62  ;;  %v28209_v62 = vand.u32 4294901760, %v27744_v15 }
0x15a2   : > { %22904 = vmatpush3.msra.mxu0 %v15694_v20  ;;  %22905 = vmatprep.mubr.msk.f32.mxu0 %vm25260_vm5, %v28866_v59  ;;  %v28198_v20 = vand.u32 4294901760, %v27740_v32 }
0x15a3   : > { %22908 = vmatprep.subr.mxu0 %v28866_v59  ;;  %v28225_v30 = vsub.f32 %v27744_v15, %v28209_v62 }
0x15a4   : > { %v28206_v55 = vsub.f32 %v27740_v32, %v28198_v20 }
0x15a5   : > { %22931 = vmatmul.mubr.f32.vlgmr.msra.gmra.mrb[36].mxu1 %v16132_v2  ;;  %v17939_v47 = vand.u32 4294901760, %v28225_v30 }
0x15a6   : > { %22934 = vmatpush3.msra.mxu1 %v16143_v60  ;;  %22935 = vmatprep.mubr.msk.f32.mxu1 %vm25260_vm5, %v28866_v59  ;;  %v17490_v60 = vand.u32 4294901760, %v28206_v55 }
0x15a7   : > { %v24922_v0 = vpop.eup %24921  ;;  %22938 = vmatprep.subr.mxu1 %v28866_v59  ;;  %v17940_v36 = vsub.f32 %v28225_v30, %v17939_v47 }
0x15a8   : > { %v15606_v51 = vmul.f32 %v24922_v0, %v28047_v54  ;;  %v17491_v15 = vsub.f32 %v28206_v55, %v17490_v60 }
0x15a9   : > { %22906 = vmatmul.mubr.f32.vlgmr.msra.gmra.mrb[36].mxu0 %v28079_v50 }
0x15aa   : > { %20132 = vst.msk [vmem:[%s28074_s17 + $0x10] sm:$0xff] %vm15523_vm7, %v15606_v51  ;;  %22909 = vmatpush3.msra.mxu0 %v28007_v18  ;;  %22910 = vmatprep.mubr.msk.f32.mxu0 %vm25260_vm5, %v28866_v59  ;;  %v16511_v45 = vsel %vm15523_vm7, %v15606_v51, 0  ;;  %v17492_v43 = vand.u32 4294901760, %v17491_v15  ;;  %v17941_v51 = vand.u32 4294901760, %v17940_v36 }
0x15ab   : > { %v24924_v54 = vpop.eup %24923  ;;  %22943 = vmatprep.subr.mxu0 %v28866_v59  ;;  %v28137_v56 = vand.u32 4294901760, %v16511_v45 }
0x15ac   : > { %v15607_v53 = vmul.f32 %v24924_v54, %v28051_v10 }
0x15ad   : > { %22936 = vmatmul.mubr.f32.vlgmr.msra.gmra.mrb[36].mxu1 %v28087_v46  ;;  %v16580_v18 = vsub.f32 %v16511_v45, %v28137_v56  ;;  %v28280_v45 = vand.u32 4294901760, %v27908_v33 }
0x15ae   : > { %20133 = vst.msk [vmem:[%s28074_s17 + $0x18] sm:$0xff] %vm15523_vm7, %v15607_v53  ;;  %22939 = vmatpush3.msra.mxu1 %v28011_v27  ;;  %22940 = vmatprep.mubr.msk.f32.mxu1 %vm25260_vm5, %v28866_v59  ;;  %v16960_v8 = vsel %vm15523_vm7, %v15607_v53, 0 }
0x15af   : > { %22973 = vmatprep.subr.mxu1 %v28866_v59  ;;  %v16581_v10 = vand.u32 4294901760, %v16580_v18  ;;  %v28154_v19 = vand.u32 4294901760, %v16960_v8  ;;  %v28288_v53 = vsub.f32 %v27908_v33, %v28280_v45 }
0x15b1   : > { %22911 = vmatmul.mubr.f32.vlgmr.msra.gmra.mrb[36].mxu0 %v28079_v50  ;;  %v16582_v58 = vsub.f32 %v16580_v18, %v16581_v10  ;;  %v17029_v4 = vsub.f32 %v16960_v8, %v28154_v19  ;;  %v18388_v8 = vand.u32 4294901760, %v28288_v53 }
0x15b2   : > { %22944 = vmatpush3.msra.mxu0 %v28116_v6  ;;  %22945 = vmatprep.mubr.msk.f32.mxu0 %vm25260_vm5, %v28866_v59 }
0x15b3   : > { %22948 = vmatprep.subr.mxu0 %v28866_v59  ;;  %v16583_v27 = vand.u32 4294901760, %v16582_v58  ;;  %v17030_v35 = vand.u32 4294901760, %v17029_v4  ;;  %v18389_v58 = vsub.f32 %v28288_v53, %v18388_v8 }
0x15b5   : > { %22941 = vmatmul.mubr.f32.vlgmr.msra.gmra.mrb[36].mxu1 %v28087_v46  ;;  %22946 = vmatmul.mubr.f32.vlgmr.msra.gmra.mrb[38].mxu0 %v16583_v27  ;;  %v17031_v11 = vsub.f32 %v17029_v4, %v17030_v35  ;;  %v18390_v7 = vand.u32 4294901760, %v18389_v58 }
0x15b6   : > { %22949 = vmatpush3.msra.mxu0 %v16594_v3  ;;  %22974 = vmatpush3.msra.mxu1 %v28127_v39 }
0x15b7   : > { %22975 = vmatprep.mubr.msk.f32.mxu1 %vm25260_vm5, %v28866_v59  ;;  %22978 = vmatprep.subr.mxu1 %v28866_v59  ;;  %v17032_v9 = vand.u32 4294901760, %v17031_v11 }
0x15b8   : > { %22950 = vmatprep.mubr.msk.f32.mxu0 %vm25260_vm5, %v28866_v59  ;;  %22953 = vmatprep.subr.mxu0 %v28866_v59 }
0x15b9   : > { %22976 = vmatmul.mubr.f32.vlgmr.msra.gmra.mrb[38].mxu1 %v17032_v9 }
0x15ba   : > { %22979 = vmatpush3.msra.mxu1 %v17043_v63  ;;  %22980 = vmatprep.mubr.msk.f32.mxu1 %vm25260_vm5, %v28866_v59 }
0x15bb   : > { %22983 = vmatprep.subr.mxu1 %v28866_v59 }
0x15bd   : > { %22951 = vmatmul.mubr.f32.vlgmr.msra.gmra.mrb[38].mxu0 %v28137_v56 }
0x15be   : > { %22954 = vmatpush3.msra.mxu0 %v28124_v13  ;;  %22955 = vmatprep.mubr.msk.f32.mxu0 %vm25260_vm5, %v28866_v59 }
0x15bf   : > { %22958 = vmatprep.subr.mxu0 %v28866_v59 }
0x15c1   : > { %22981 = vmatmul.mubr.f32.vlgmr.msra.gmra.mrb[38].mxu1 %v28154_v19 }
0x15c2   : > { %22984 = vmatpush3.msra.mxu1 %v28143_v29  ;;  %22985 = vmatprep.mubr.msk.f32.mxu1 %vm25260_vm5, %v28866_v59 }
0x15c3   : > { %22988 = vmatprep.subr.mxu1 %v28866_v59 }
0x15c5   : > { %22956 = vmatmul.mubr.f32.vlgmr.msra.gmra.mrb[38].mxu0 %v16580_v18 }
0x15c6   : > { %22959 = vmatpush3.msra.mxu0 %v28116_v6  ;;  %22960 = vmatprep.mubr.msk.f32.mxu0 %vm25260_vm5, %v28866_v59 }
0x15c7   : > { %22963 = vmatprep.subr.mxu0 %v28866_v59 }
0x15c8   : > { %v15586_v50 = vpop.xlane.xlu0 %15585 }
0x15c9   : > { %24925 = vrcp.f32 %v15586_v50  ;;  %22986 = vmatmul.mubr.f32.vlgmr.msra.gmra.mrb[38].mxu1 %v17029_v4 }
0x15ca   : > { %22989 = vmatpush3.msra.mxu1 %v28127_v39  ;;  %22990 = vmatprep.mubr.msk.f32.mxu1 %vm25260_vm5, %v28866_v59 }
0x15cb   : > { %22993 = vmatprep.subr.mxu1 %v28866_v59 }
0x15cc   : > { %v15589_v41 = vpop.xlane.xlu1 %15588 }
0x15cd   : > { %24927 = vrcp.f32 %v15589_v41  ;;  %22961 = vmatmul.mubr.f32.vlgmr.msra.gmra.mrb[38].mxu0 %v16581_v10  ;;  %v19244_v41 = vld [vmem:[%s556_s11] sm:$0xff] }
0x15ce   : > { %22964 = vmatpush3.msra.mxu0 %v16592_v17  ;;  %22965 = vmatprep.mubr.msk.f32.mxu0 %vm25260_vm5, %v28866_v59  ;;  %v28291_v17 = vand.u32 4294901760, %v27912_v16 }
0x15cf   : > { %22968 = vmatprep.subr.mxu0 %v28866_v59 }
0x15d0   : > { %v18836_v10 = vsub.f32 %v27912_v16, %v28291_v17 }
0x15d1   : > { %22991 = vmatmul.mubr.f32.vlgmr.msra.gmra.mrb[38].mxu1 %v17030_v35 }
0x15d2   : > { %22994 = vmatpush3.msra.mxu1 %v17041_v61  ;;  %22995 = vmatprep.mubr.msk.f32.mxu1 %vm25260_vm5, %v28866_v59  ;;  %v18837_v16 = vand.u32 4294901760, %v18836_v10 }
0x15d3   : > { %v24926_v12 = vpop.eup %24925  ;;  %22998 = vmatprep.subr.mxu1 %v28866_v59 }
0x15d4   : > { %v15608_v5 = vmul.f32 %v24926_v12, %v28055_v24  ;;  %v18838_v11 = vsub.f32 %v18836_v10, %v18837_v16  ;;  %v19285_v12 = vand.u32 4294901760, %v19244_v41 }
0x15d5   : > { %22966 = vmatmul.mubr.f32.vlgmr.msra.gmra.mrb[38].mxu0 %v28137_v56 }
0x15d6   : > { %20134 = vst.msk [vmem:[%s28074_s17 + $0x20] sm:$0xff] %vm15523_vm7, %v15608_v5  ;;  %22969 = vmatpush3.msra.mxu0 %v28116_v6  ;;  %22970 = vmatprep.mubr.msk.f32.mxu0 %vm25260_vm5, %v28866_v59  ;;  %v17409_v46 = vsel %vm15523_vm7, %v15608_v5, 0  ;;  %v18839_v50 = vand.u32 4294901760, %v18838_v11  ;;  %v28427_v58 = vsub.f32 %v19244_v41, %v19285_v12 }
0x15d7   : > { %v24928_v24 = vpop.eup %24927  ;;  %23003 = vmatprep.subr.mxu0 %v28866_v59  ;;  %v28219_v34 = vand.u32 4294901760, %v17409_v46 }
0x15d8   : > { %v15609_v32 = vmul.f32 %v24928_v24, %v28059_v1  ;;  %v28367_v24 = vld [vmem:[%s556_s11 + $0x20] sm:$0xff] }
0x15d9   : > { %22996 = vmatmul.mubr.f32.vlgmr.msra.gmra.mrb[38].mxu1 %v28154_v19  ;;  %v17478_v23 = vsub.f32 %v17409_v46, %v28219_v34  ;;  %v19247_v46 = vld [vmem:[%s556_s11 + $0x18] sm:$0xff] }
0x15da   : > { %20135 = vst.msk [vmem:[%s28074_s17 + $0x28] sm:$0xff] %vm15523_vm7, %v15609_v32  ;;  %22999 = vmatpush3.msra.mxu1 %v28127_v39  ;;  %23000 = vmatprep.mubr.msk.f32.mxu1 %vm25260_vm5, %v28866_v59  ;;  %v17858_v49 = vsel %vm15523_vm7, %v15609_v32, 0  ;;  %v28370_v32 = vld [vmem:[%s556_s11 + $0x28] sm:$0xff] }
0x15db   : > { %23033 = vmatprep.subr.mxu1 %v28866_v59  ;;  %v17479_v1 = vand.u32 4294901760, %v17478_v23  ;;  %v28236_v2 = vand.u32 4294901760, %v17858_v49 }
0x15dd   : > { %22971 = vmatmul.mubr.f32.vlgmr.msra.gmra.mrb[38].mxu0 %v28137_v56  ;;  %v17480_v42 = vsub.f32 %v17478_v23, %v17479_v1  ;;  %v17927_v31 = vsub.f32 %v17858_v49, %v28236_v2 }
0x15de   : > { %23004 = vmatpush3.msra.mxu0 %v28198_v20  ;;  %23005 = vmatprep.mubr.msk.f32.mxu0 %vm25260_vm5, %v28866_v59 }
0x15df   : > { %23008 = vmatprep.subr.mxu0 %v28866_v59  ;;  %v17481_v28 = vand.u32 4294901760, %v17480_v42  ;;  %v17928_v25 = vand.u32 4294901760, %v17927_v31 }
0x15e1   : > { %23001 = vmatmul.mubr.f32.vlgmr.msra.gmra.mrb[38].mxu1 %v28154_v19  ;;  %23006 = vmatmul.mubr.f32.vlgmr.msra.gmra.mrb[40].mxu0 %v17481_v28  ;;  %v17929_v6 = vsub.f32 %v17927_v31, %v17928_v25 }
0x15e2   : > { %23009 = vmatpush3.msra.mxu0 %v17492_v43  ;;  %23034 = vmatpush3.msra.mxu1 %v28209_v62 }
0x15e3   : > { %23035 = vmatprep.mubr.msk.f32.mxu1 %vm25260_vm5, %v28866_v59  ;;  %23038 = vmatprep.subr.mxu1 %v28866_v59  ;;  %v17930_v0 = vand.u32 4294901760, %v17929_v6 }
0x15e4   : > { %23010 = vmatprep.mubr.msk.f32.mxu0 %vm25260_vm5, %v28866_v59  ;;  %23013 = vmatprep.subr.mxu0 %v28866_v59 }
0x15e5   : > { %23036 = vmatmul.mubr.f32.vlgmr.msra.gmra.mrb[40].mxu1 %v17930_v0 }
0x15e6   : > { %23039 = vmatpush3.msra.mxu1 %v17941_v51  ;;  %23040 = vmatprep.mubr.msk.f32.mxu1 %vm25260_vm5, %v28866_v59 }
0x15e7   : > { %23043 = vmatprep.subr.mxu1 %v28866_v59 }
0x15e9   : > { %23011 = vmatmul.mubr.f32.vlgmr.msra.gmra.mrb[40].mxu0 %v28219_v34 }
0x15ea   : > { %23014 = vmatpush3.msra.mxu0 %v28206_v55  ;;  %23015 = vmatprep.mubr.msk.f32.mxu0 %vm25260_vm5, %v28866_v59 }
0x15eb   : > { %23018 = vmatprep.subr.mxu0 %v28866_v59 }
0x15ed   : > { %23041 = vmatmul.mubr.f32.vlgmr.msra.gmra.mrb[40].mxu1 %v28236_v2 }
0x15ee   : > { %23044 = vmatpush3.msra.mxu1 %v28225_v30  ;;  %23045 = vmatprep.mubr.msk.f32.mxu1 %vm25260_vm5, %v28866_v59  ;;  %v28373_v30 = vld [vmem:[%s556_s11 + $0x30] sm:$0xff] }
0x15ef   : > { %23048 = vmatprep.subr.mxu1 %v28866_v59 }
0x15f1   : > { %23016 = vmatmul.mubr.f32.vlgmr.msra.gmra.mrb[40].mxu0 %v17478_v23  ;;  %v28375_v23 = vld [vmem:[%s556_s11 + $0x38] sm:$0xff] }
0x15f2   : > { %23019 = vmatpush3.msra.mxu0 %v28198_v20  ;;  %23020 = vmatprep.mubr.msk.f32.mxu0 %vm25260_vm5, %v28866_v59  ;;  %v19306_v42 = vand.u32 4294901760, %v28375_v23 }
0x15f3   : > { %23023 = vmatprep.subr.mxu0 %v28866_v59 }
0x15f4   : > { %v15592_v13 = vpop.xlane.xlu0 %15591 }
0x15f5   : > { %24929 = vrcp.f32 %v15592_v13  ;;  %23046 = vmatmul.mubr.f32.vlgmr.msra.gmra.mrb[40].mxu1 %v17927_v31 }
0x15f6   : > { %23049 = vmatpush3.msra.mxu1 %v28209_v62  ;;  %23050 = vmatprep.mubr.msk.f32.mxu1 %vm25260_vm5, %v28866_v59 }
0x15f7   : > { %23053 = vmatprep.subr.mxu1 %v28866_v59 }
0x15f8   : > { %v15595_v39 = vpop.xlane.xlu1 %15594 }
0x15f9   : > { %24931 = vrcp.f32 %v15595_v39  ;;  %23021 = vmatmul.mubr.f32.vlgmr.msra.gmra.mrb[40].mxu0 %v17479_v1  ;;  %v19300_v1 = vand.u32 4294901760, %v28370_v32 }
0x15fa   : > { %23024 = vmatpush3.msra.mxu0 %v17490_v60  ;;  %23025 = vmatprep.mubr.msk.f32.mxu0 %vm25260_vm5, %v28866_v59  ;;  %v19297_v60 = vand.u32 4294901760, %v28367_v24 }
0x15fb   : > { %23028 = vmatprep.subr.mxu0 %v28866_v59 }
0x15fc   : > { %v28387_v31 = vpack.c.bf16 %v19300_v1, %v19297_v60 }
0x15fd   : > { %23051 = vmatmul.mubr.f32.vlgmr.msra.gmra.mrb[40].mxu1 %v17928_v25 }
0x15fe   : > { %23054 = vmatpush3.msra.mxu1 %v17939_v47  ;;  %23055 = vmatprep.mubr.msk.f32.mxu1 %vm25260_vm5, %v28866_v59  ;;  %v19303_v47 = vand.u32 4294901760, %v28373_v30 }
0x15ff   : > { %v24930_v54 = vpop.eup %24929  ;;  %23058 = vmatprep.subr.mxu1 %v28866_v59 }
0x1600   : > { %v15610_v56 = vmul.f32 %v24930_v54, %v28063_v40  ;;  %v28397_v43 = vpack.c.bf16 %v19306_v42, %v19303_v47 }
0x1601   : > { %23026 = vmatmul.mubr.f32.vlgmr.msra.gmra.mrb[40].mxu0 %v28219_v34 }
0x1602   : > { %20136 = vst.msk [vmem:[%s28074_s17 + $0x30] sm:$0xff] %vm15523_vm7, %v15610_v56  ;;  %23029 = vmatpush3.msra.mxu0 %v28198_v20  ;;  %23030 = vmatprep.mubr.msk.f32.mxu0 %vm25260_vm5, %v28866_v59  ;;  %v18307_v29 = vsel %vm15523_vm7, %v15610_v56, 0  ;;  %v19245_v20 = vld [vmem:[%s556_s11 + $0x8] sm:$0xff] }
0x1603   : > { %v24932_v40 = vpop.eup %24931  ;;  %23063 = vmatprep.subr.mxu0 %v28866_v59  ;;  %v28301_v18 = vand.u32 4294901760, %v18307_v29  ;;  %v19288_v5 = vand.u32 4294901760, %v19245_v20 }
0x1604   : > { %v15611_v33 = vmul.f32 %v24932_v40, %v28067_v38 }
0x1605   : > { %23056 = vmatmul.mubr.f32.vlgmr.msra.gmra.mrb[40].mxu1 %v28236_v2  ;;  %v18376_v19 = vsub.f32 %v18307_v29, %v28301_v18  ;;  %v28364_v55 = vpack.c.bf16 %v19288_v5, %v19285_v12 }
0x1606   : > { %20137 = vst.msk [vmem:[%s28074_s17 + $0x38] sm:$0xff] %vm15523_vm7, %v15611_v33  ;;  %23059 = vmatpush3.msra.mxu1 %v28209_v62  ;;  %23060 = vmatprep.mubr.msk.f32.mxu1 %vm25260_vm5, %v28866_v59  ;;  %v18756_v21 = vsel %vm15523_vm7, %v15611_v33, 0  ;;  %v19246_v62 = vld [vmem:[%s556_s11 + $0x10] sm:$0xff] }
0x1607   : > { %23093 = vmatprep.subr.mxu1 %v28866_v59  ;;  %v18377_v38 = vand.u32 4294901760, %v18376_v19  ;;  %v18824_v61 = vand.u32 4294901760, %v18756_v21 }
0x1609   : > { %23031 = vmatmul.mubr.f32.vlgmr.msra.gmra.mrb[40].mxu0 %v28219_v34  ;;  %v18378_v4 = vsub.f32 %v18376_v19, %v18377_v38  ;;  %v18825_v27 = vsub.f32 %v18756_v21, %v18824_v61  ;;  %v19291_v34 = vand.u32 4294901760, %v19246_v62 }
0x160a   : > { %23064 = vmatpush3.msra.mxu0 %v28280_v45  ;;  %23065 = vmatprep.mubr.msk.f32.mxu0 %vm25260_vm5, %v28866_v59 }
0x160b   : > { %23068 = vmatprep.subr.mxu0 %v28866_v59  ;;  %v18379_v35 = vand.u32 4294901760, %v18378_v4  ;;  %v18826_v3 = vand.u32 4294901760, %v18825_v27  ;;  %v19440_v4 = vand.u32 4294901760, %v28427_v58 }
0x160d   : > { %23061 = vmatmul.mubr.f32.vlgmr.msra.gmra.mrb[40].mxu1 %v28236_v2  ;;  %23066 = vmatmul.mubr.f32.vlgmr.msra.gmra.mrb[42].mxu0 %v18379_v35  ;;  %v18827_v9 = vsub.f32 %v18825_v27, %v18826_v3  ;;  %v28436_v35 = vsub.f32 %v19246_v62, %v19291_v34  ;;  %v19441_v11 = vsub.f32 %v28427_v58, %v19440_v4 }
0x160e   : > { %23069 = vmatpush3.msra.mxu0 %v18390_v7  ;;  %23094 = vmatpush3.msra.mxu1 %v28291_v17  ;;  %v19467_v62 = vsub.f32 %v28367_v24, %v19297_v60  ;;  %v19481_v24 = vsub.f32 %v28373_v30, %v19303_v47  ;;  %v19488_v60 = vsub.f32 %v28375_v23, %v19306_v42 }
0x160f   : > { %23095 = vmatprep.mubr.msk.f32.mxu1 %vm25260_vm5, %v28866_v59  ;;  %23098 = vmatprep.subr.mxu1 %v28866_v59  ;;  %v18828_v63 = vand.u32 4294901760, %v18827_v9 }
0x1610   : > { %23070 = vmatprep.mubr.msk.f32.mxu0 %vm25260_vm5, %v28866_v59  ;;  %23073 = vmatprep.subr.mxu0 %v28866_v59 }
0x1611   : > { %23096 = vmatmul.mubr.f32.vlgmr.msra.gmra.mrb[42].mxu1 %v18828_v63  ;;  %v19454_v63 = vand.u32 4294901760, %v28436_v35 }
0x1612   : > { %23099 = vmatpush3.msra.mxu1 %v18839_v50  ;;  %23100 = vmatprep.mubr.msk.f32.mxu1 %vm25260_vm5, %v28866_v59 }
0x1613   : > { %23103 = vmatprep.subr.mxu1 %v28866_v59 }
0x1615   : > { %23071 = vmatmul.mubr.f32.vlgmr.msra.gmra.mrb[42].mxu0 %v28301_v18 }
0x1616   : > { %23074 = vmatpush3.msra.mxu0 %v28288_v53  ;;  %23075 = vmatprep.mubr.msk.f32.mxu0 %vm25260_vm5, %v28866_v59 }
0x1617   : > { %23078 = vmatprep.subr.mxu0 %v28866_v59 }
0x1619   : > { %23101 = vmatmul.mubr.f32.vlgmr.msra.gmra.mrb[42].mxu1 %v18824_v61 }
0x161a   : > { %23104 = vmatpush3.msra.mxu1 %v18836_v10  ;;  %23105 = vmatprep.mubr.msk.f32.mxu1 %vm25260_vm5, %v28866_v59 }
0x161b   : > { %23108 = vmatprep.subr.mxu1 %v28866_v59 }
0x161d   : > { %23076 = vmatmul.mubr.f32.vlgmr.msra.gmra.mrb[42].mxu0 %v18376_v19 }
0x161e   : > { %23079 = vmatpush3.msra.mxu0 %v28280_v45  ;;  %23080 = vmatprep.mubr.msk.f32.mxu0 %vm25260_vm5, %v28866_v59 }
0x161f   : > { %23083 = vmatprep.subr.mxu0 %v28866_v59 }
0x1621   : > { %23106 = vmatmul.mubr.f32.vlgmr.msra.gmra.mrb[42].mxu1 %v18825_v27 }
0x1622   : > { %23109 = vmatpush3.msra.mxu1 %v28291_v17  ;;  %23110 = vmatprep.mubr.msk.f32.mxu1 %vm25260_vm5, %v28866_v59 }
0x1623   : > { %23113 = vmatprep.subr.mxu1 %v28866_v59 }
0x1625   : > { %23081 = vmatmul.mubr.f32.vlgmr.msra.gmra.mrb[42].mxu0 %v18377_v38 }
0x1626   : > { %23084 = vmatpush3.msra.mxu0 %v18388_v8  ;;  %23085 = vmatprep.mubr.msk.f32.mxu0 %vm25260_vm5, %v28866_v59 }
0x1627   : > { %23088 = vmatprep.subr.mxu0 %v28866_v59 }
0x1629   : > { %23111 = vmatmul.mubr.f32.vlgmr.msra.gmra.mrb[42].mxu1 %v18826_v3 }
0x162a   : > { %23114 = vmatpush3.msra.mxu1 %v18837_v16  ;;  %23115 = vmatprep.mubr.msk.f32.mxu1 %vm25260_vm5, %v28866_v59  ;;  %v28429_v16 = vsub.f32 %v19245_v20, %v19288_v5  ;;  %v19442_v20 = vand.u32 4294901760, %v19441_v11  ;;  %v19455_v5 = vsub.f32 %v28436_v35, %v19454_v63 }
0x162b   : > { %23118 = vmatprep.subr.mxu1 %v28866_v59 }
0x162c   : > { %v19447_v27 = vand.u32 4294901760, %v28429_v16  ;;  %v28474_v42 = vpack.c.bf16 %v28429_v16, %v28427_v58 }
0x162d   : > { %23086 = vmatmul.mubr.f32.vlgmr.msra.gmra.mrb[42].mxu0 %v28301_v18 }
0x162e   : > { %23089 = vmatpush3.msra.mxu0 %v28280_v45  ;;  %23090 = vmatprep.mubr.msk.f32.mxu0 %vm25260_vm5, %v28866_v59  ;;  %v19448_v9 = vsub.f32 %v28429_v16, %v19447_v27 }
0x162f   : > { %23964 = vmatprep.subr.bf16.mxu0 %v28364_v55 }
0x1630   : > { %v19449_v12 = vand.u32 4294901760, %v19448_v9 }
0x1631   : > { %23116 = vmatmul.mubr.f32.vlgmr.msra.gmra.mrb[42].mxu1 %v18824_v61 }
0x1632   : > { %23119 = vmatpush3.msra.mxu1 %v28291_v17  ;;  %23120 = vmatprep.mubr.msk.f32.mxu1 %vm25260_vm5, %v28866_v59  ;;  %v19294_v59 = vand.u32 4294901760, %v19247_v46  ;;  %vm19259_vm5 = vcmask 523264  }
0x1634   : > { %v28379_v15 = vpack.c.bf16 %v19294_v59, %v19291_v34  ;;  %v28438_v3 = vsub.f32 %v19247_v46, %v19294_v59  ;;  %v19474_v59 = vsub.f32 %v28370_v32, %v19300_v1 }
0x1635   : > { %23091 = vmatmul.mubr.f32.vlgmr.msra.gmra.mrb[42].mxu0 %v28301_v18 }
0x1636   : > { %23966 = vmatpush3.bf16.msra.mxu0 %v28364_v55  ;;  %v19461_v50 = vand.u32 4294901760, %v28438_v3  ;;  %v28470_v23 = vpack.c.bf16 %v28438_v3, %v28436_v35 }
0x1637   : > { %23968 = vmatprep.subr.bf16.mxu0 %v28379_v15 }
0x1638   : > { %v19462_v34 = vsub.f32 %v28438_v3, %v19461_v50 }
0x1639   : > { %23121 = vmatmul.mubr.f32.vlgmr.msra.gmra.mrb[42].mxu1 %v18824_v61 }
0x163a   : > { %23970 = vmatpush3.bf16.msra.mxu0 %v28379_v15 }
0x163b   : > { %23972 = vmatprep.subr.bf16.mxu0 %v28387_v31 }
0x163e   : > { %23974 = vmatpush3.bf16.msra.mxu0 %v28387_v31 }
0x163f   : > { %23976 = vmatprep.subr.bf16.mxu0 %v28397_v43 }
0x1642   : > { %23978 = vmatpush3.bf16.msra.mxu0 %v28397_v43 }
0x1684   : > { %v16057_v49 = vpop.f32.mrb[36].mxu0 }
0x1685   : > { %v22912_v2 = vpop.f32.mrb[37].mxu0  ;;  %19212 = vrot.lane.b32.xlu0 %v16057_v49, %s25264_s12  ;;  %v23979_v49 = vpack.c.bf16 %v19449_v12, %v19442_v20 }
0x1686   : > { %v19456_v2 = vand.u32 4294901760, %v19455_v5 }
0x1687   : > { %23980 = vmatprep.subr.bf16.mxu0 %v23979_v49 }
0x1688   : > { %v16506_v28 = vpop.f32.mrb[36].mxu1 }
0x1689   : > { %v22942_v25 = vpop.f32.mrb[37].mxu1  ;;  %19214 = vrot.lane.b32.xlu1 %v16506_v28, %s25264_s12  ;;  %v19468_v28 = vand.u32 4294901760, %v19467_v62 }
0x168a   : > { %v19463_v25 = vand.u32 4294901760, %v19462_v34 }
0x168c   : > { %v23983_v32 = vpack.c.bf16 %v19463_v25, %v19456_v2  ;;  %v28515_v2 = vpack.c.bf16 %v19461_v50, %v19454_v63 }
0x16b0   : > { %v16955_v36 = vpop.f32.mrb[38].mxu0 }
0x16b1   : > { %v22972_v6 = vpop.f32.mrb[39].mxu0  ;;  %19216 = vrot.lane.b32.xlu1 %v16955_v36, %s25264_s12  ;;  %v19475_v36 = vand.u32 4294901760, %v19474_v59 }
0x16b3   : > { %v19476_v1 = vsub.f32 %v19474_v59, %v19475_v36  ;;  %v28517_v25 = vpack.c.bf16 %v19475_v36, %v19468_v28 }
0x16b4   : > { %v17404_v0 = vpop.f32.mrb[38].mxu1 }
0x16b5   : > { %v23002_v51 = vpop.f32.mrb[39].mxu1  ;;  %19218 = vrot.lane.b32.xlu0 %v17404_v0, %s25264_s12  ;;  %v19469_v0 = vsub.f32 %v19467_v62, %v19468_v28 }
0x16dc   : > { %v17853_v13 = vpop.f32.mrb[40].mxu0 }
0x16dd   : > { %19220 = vrot.lane.b32.xlu1 %v17853_v13, %s25264_s12  ;;  %v23032_v39 = vpop.f32.mrb[41].mxu0  ;;  %v19470_v13 = vand.u32 4294901760, %v19469_v0 }
0x16de   : > { %v19482_v39 = vand.u32 4294901760, %v19481_v24 }
0x16e0   : > { %v18302_v45 = vpop.f32.mrb[40].mxu1 }
0x16e1   : > { %v23062_v54 = vpop.f32.mrb[41].mxu1  ;;  %19222 = vrot.lane.b32.xlu0 %v18302_v45, %s25264_s12  ;;  %v19489_v45 = vand.u32 4294901760, %v19488_v60 }
0x16e2   : > { %v19477_v54 = vand.u32 4294901760, %v19476_v1 }
0x16f7   : > { %v19213_v56 = vpop.permute.xlu0 %19212 }
0x16f8   : > { %v19236_v53 = vsel %vm649_vm0, %v27472_v57, %v19213_v56  ;;  %v19483_v56 = vsub.f32 %v19481_v24, %v19482_v39 }
0x16f9   : > { %v19261_v17 = vsel %vm19259_vm5, %v19236_v53, 0  ;;  %v19490_v53 = vsub.f32 %v19488_v60, %v19489_v45 }
0x16fa   : > { %v28409_v29 = vand.u32 4294901760, %v19261_v17  ;;  %v19484_v30 = vand.u32 4294901760, %v19483_v56 }
0x16fb   : > { %v19215_v40 = vpop.permute.xlu1 %19214  ;;  %v19491_v47 = vand.u32 4294901760, %v19490_v53 }
0x16fc   : > { %v28412_v18 = vsub.f32 %v19261_v17, %v28409_v29  ;;  %v19237_v33 = vsel %vm649_vm0, %v27478_v22, %v19215_v40  ;;  %v23987_v17 = vpack.c.bf16 %v19477_v54, %v19470_v13 }
0x16fd   : > { %v19264_v8 = vsel %vm19259_vm5, %v19237_v33, 0  ;;  %v23991_v40 = vpack.c.bf16 %v19491_v47, %v19484_v30  ;;  %v28476_v33 = vpack.c.bf16 %v19474_v59, %v19467_v62  ;;  %v28509_v59 = vpack.c.bf16 %v19447_v27, %v19440_v4 }
0x16fe   : > { %v28417_v10 = vand.u32 4294901760, %v19264_v8  ;;  %v19359_v19 = vand.u32 4294901760, %v28412_v18 }
0x1700   : > { %v28421_v21 = vsub.f32 %v19264_v8, %v28417_v10  ;;  %v19360_v57 = vsub.f32 %v28412_v18, %v19359_v19  ;;  %v28479_v8 = vpack.c.bf16 %v19488_v60, %v19481_v24 }
0x1702   : > { %v19369_v38 = vand.u32 4294901760, %v28421_v21  ;;  %v19361_v61 = vand.u32 4294901760, %v19360_v57 }
0x1704   : > { %23139 = vmatprep.mubr.f32.mxu0 %v19361_v61  ;;  %v19370_v22 = vsub.f32 %v28421_v21, %v19369_v38 }
0x1706   : > { %v19371_v7 = vand.u32 4294901760, %v19370_v22 }
0x1708   : > { %v18751_v41 = vpop.f32.mrb[42].mxu0  ;;  %23140 = vmatmul.mubr.f32.vlgmr.msra.gmra.mrb[44].mxu0 %v19371_v7 }
0x1709   : > { %19224 = vrot.lane.b32.xlu1 %v18751_v41, %s25264_s12  ;;  %v23092_v46 = vpop.f32.mrb[43].mxu0  ;;  %23982 = vmatpush3.bf16.msra.mxu0 %v23979_v49 }
0x170a   : > { %23984 = vmatprep.subr.bf16.mxu0 %v23983_v32 }
0x170c   : > { %v19200_v6 = vpop.f32.mrb[42].mxu1 }
0x170d   : > { %19226 = vrot.lane.b32.xlu0 %v19200_v6, %s25264_s12  ;;  %v23122_v51 = vpop.f32.mrb[43].mxu1  ;;  %23986 = vmatpush3.bf16.msra.mxu0 %v23983_v32  ;;  %v28519_v6 = vpack.c.bf16 %v19489_v45, %v19482_v39 }
0x170e   : > { %23988 = vmatprep.subr.bf16.mxu0 %v23987_v17 }
0x1711   : > { %23990 = vmatpush3.bf16.msra.mxu0 %v23987_v17 }
0x1712   : > { %23992 = vmatprep.subr.bf16.mxu0 %v23991_v40 }
0x1715   : > { %23994 = vmatpush3.bf16.msra.mxu0 %v23991_v40 }
0x1716   : > { %23996 = vmatprep.subr.bf16.mxu0 %v28474_v42 }
0x1723   : > { %v19217_v57 = vpop.permute.xlu1 %19216 }
0x1724   : > { %v19238_v61 = vsel %vm649_vm0, %v27486_v52, %v19217_v57 }
0x1725   : > { %v19267_v22 = vsel %vm19259_vm5, %v19238_v61, 0 }
0x1726   : > { %v28484_v7 = vand.u32 4294901760, %v19267_v22 }
0x1727   : > { %v19219_v11 = vpop.permute.xlu0 %19218 }
0x1728   : > { %v28487_v9 = vsub.f32 %v19267_v22, %v28484_v7  ;;  %v19239_v41 = vsel %vm649_vm0, %v27492_v26, %v19219_v11 }
0x1729   : > { %v19270_v20 = vsel %vm19259_vm5, %v19239_v41, 0 }
0x172a   : > { %v28492_v12 = vand.u32 4294901760, %v19270_v20  ;;  %v19379_v5 = vand.u32 4294901760, %v28487_v9 }
0x172c   : > { %v28496_v62 = vsub.f32 %v19270_v20, %v28492_v12  ;;  %v19380_v52 = vsub.f32 %v28487_v9, %v19379_v5 }
0x172e   : > { %v19381_v46 = vand.u32 4294901760, %v19380_v52  ;;  %v19389_v34 = vand.u32 4294901760, %v28496_v62 }
0x1730   : > { %23142 = vmatprep.mubr.f32.mxu0 %v19381_v46  ;;  %v19390_v26 = vsub.f32 %v28496_v62, %v19389_v34 }
0x1732   : > { %v19391_v49 = vand.u32 4294901760, %v19390_v26 }
0x1734   : > { %23143 = vmatmul.mubr.f32.gmra.mrb[46].mxu0 %v19391_v49 }
0x174f   : > { %v19221_v0 = vpop.permute.xlu1 %19220 }
0x1750   : > { %v19240_v58 = vsel %vm649_vm0, %v27497_v14, %v19221_v0 }
0x1751   : > { %v19273_v16 = vsel %vm19259_vm5, %v19240_v58, 0 }
0x1752   : > { %v28524_v4 = vand.u32 4294901760, %v19273_v16 }
0x1753   : > { %v19223_v27 = vpop.permute.xlu0 %19222 }
0x1754   : > { %v28527_v24 = vsub.f32 %v19273_v16, %v28524_v4  ;;  %v19241_v35 = vsel %vm649_vm0, %v27502_v48, %v19223_v27 }
0x1755   : > { %v19276_v3 = vsel %vm19259_vm5, %v19241_v35, 0 }
0x1756   : > { %v28532_v63 = vand.u32 4294901760, %v19276_v3  ;;  %v19399_v50 = vand.u32 4294901760, %v28527_v24 }
0x1758   : > { %v28536_v28 = vsub.f32 %v19276_v3, %v28532_v63  ;;  %v19400_v14 = vsub.f32 %v28527_v24, %v19399_v50 }
0x175a   : > { %v19401_v36 = vand.u32 4294901760, %v19400_v14  ;;  %v19409_v60 = vand.u32 4294901760, %v28536_v28 }
0x175c   : > { %23145 = vmatprep.mubr.f32.mxu0 %v19401_v36  ;;  %v19410_v48 = vsub.f32 %v28536_v28, %v19409_v60 }
0x175e   : > { %v19411_v51 = vand.u32 4294901760, %v19410_v48 }
0x1760   : > { %23146 = vmatmul.mubr.f32.gmra.mrb[48].mxu0 %v19411_v51 }
0x177b   : > { %v19225_v32 = vpop.permute.xlu1 %19224 }
0x177c   : > { %v19242_v1 = vsel %vm649_vm0, %v27506_v44, %v19225_v32 }
0x177d   : > { %v19279_v13 = vsel %vm19259_vm5, %v19242_v1, 0 }
0x177e   : > { %v28548_v39 = vand.u32 4294901760, %v19279_v13 }
0x177f   : > { %v19227_v45 = vpop.permute.xlu0 %19226 }
0x1780   : > { %v19418_v54 = vsub.f32 %v19279_v13, %v28548_v39  ;;  %v19243_v56 = vsel %vm649_vm0, %v27467_v37, %v19227_v45 }
0x1781   : > { %v19282_v53 = vsel %vm19259_vm5, %v19243_v56, 0 }
0x1782   : > { %v28554_v17 = vand.u32 4294901760, %v19282_v53  ;;  %v19419_v30 = vand.u32 4294901760, %v19418_v54 }
0x1784   : > { %v19428_v47 = vsub.f32 %v19282_v53, %v28554_v17  ;;  %v19420_v40 = vsub.f32 %v19418_v54, %v19419_v30 }
0x1786   : > { %v19421_v57 = vand.u32 4294901760, %v19420_v40  ;;  %v19429_v44 = vand.u32 4294901760, %v19428_v47 }
0x1788   : > { %23148 = vmatprep.mubr.f32.mxu0 %v19421_v57  ;;  %v19430_v61 = vsub.f32 %v19428_v47, %v19429_v44 }
0x178a   : > { %v19431_v22 = vand.u32 4294901760, %v19430_v61 }
0x178c   : > { %23149 = vmatmul.mubr.f32.gmra.mrb[50].mxu0 %v19431_v22 }
0x178d   : > { %23167 = vmatprep.mubr.f32.mxu0 %v28409_v29 }
0x1790   : > { %23168 = vmatmul.mubr.f32.vlgmr.msra.gmra.mrb[44].mxu0 %v28417_v10 }
0x1791   : > { %23170 = vmatprep.mubr.f32.mxu0 %v28484_v7  ;;  %23998 = vmatpush3.bf16.msra.mxu0 %v28474_v42 }
0x1792   : > { %24000 = vmatprep.subr.bf16.mxu0 %v28470_v23 }
0x1794   : > { %23171 = vmatmul.mubr.f32.gmra.mrb[46].mxu0 %v28492_v12 }
0x1795   : > { %23173 = vmatprep.mubr.f32.mxu0 %v28524_v4  ;;  %24002 = vmatpush3.bf16.msra.mxu0 %v28470_v23 }
0x1796   : > { %24004 = vmatprep.subr.bf16.mxu0 %v28476_v33 }
0x1798   : > { %23174 = vmatmul.mubr.f32.gmra.mrb[48].mxu0 %v28532_v63 }
0x1799   : > { %23176 = vmatprep.mubr.f32.mxu0 %v28548_v39  ;;  %24006 = vmatpush3.bf16.msra.mxu0 %v28476_v33 }
0x179a   : > { %24008 = vmatprep.subr.bf16.mxu0 %v28479_v8 }
0x179c   : > { %23177 = vmatmul.mubr.f32.gmra.mrb[50].mxu0 %v28554_v17 }
0x179d   : > { %24010 = vmatpush3.bf16.msra.mxu0 %v28479_v8  ;;  %23195 = vmatprep.mubr.f32.mxu0 %v28412_v18 }
0x179e   : > { %24012 = vmatprep.subr.bf16.mxu0 %v28364_v55 }
0x17a0   : > { %23196 = vmatmul.mubr.f32.vlgmr.msra.gmra.mrb[44].mxu0 %v28421_v21 }
0x17a1   : > { %23198 = vmatprep.mubr.f32.mxu0 %v28487_v9  ;;  %24014 = vmatpush3.bf16.msra.mxu0 %v28364_v55 }
0x17a2   : > { %24016 = vmatprep.subr.bf16.mxu0 %v28379_v15 }
0x17a4   : > { %23199 = vmatmul.mubr.f32.gmra.mrb[46].mxu0 %v28496_v62 }
0x17a5   : > { %23201 = vmatprep.mubr.f32.mxu0 %v28527_v24  ;;  %24018 = vmatpush3.bf16.msra.mxu0 %v28379_v15 }
0x17a6   : > { %24020 = vmatprep.subr.bf16.mxu0 %v28387_v31 }
0x17a8   : > { %23202 = vmatmul.mubr.f32.gmra.mrb[48].mxu0 %v28536_v28 }
0x17a9   : > { %23204 = vmatprep.mubr.f32.mxu0 %v19418_v54  ;;  %24022 = vmatpush3.bf16.msra.mxu0 %v28387_v31 }
0x17aa   : > { %24024 = vmatprep.subr.bf16.mxu0 %v28397_v43 }
0x17ac   : > { %23205 = vmatmul.mubr.f32.gmra.mrb[50].mxu0 %v19428_v47 }
0x17ad   : > { %24026 = vmatpush3.bf16.msra.mxu0 %v28397_v43  ;;  %23223 = vmatprep.mubr.f32.mxu0 %v19359_v19 }
0x17ae   : > { %24028 = vmatprep.subr.bf16.mxu0 %v28509_v59 }
0x17b0   : > { %23224 = vmatmul.mubr.f32.vlgmr.msra.gmra.mrb[44].mxu0 %v19369_v38 }
0x17b1   : > { %23226 = vmatprep.mubr.f32.mxu0 %v19379_v5  ;;  %24030 = vmatpush3.bf16.msra.mxu0 %v28509_v59 }
0x17b2   : > { %24032 = vmatprep.subr.bf16.mxu0 %v28515_v2 }
0x17b4   : > { %23227 = vmatmul.mubr.f32.gmra.mrb[46].mxu0 %v19389_v34 }
0x17b5   : > { %23229 = vmatprep.mubr.f32.mxu0 %v19399_v50  ;;  %24034 = vmatpush3.bf16.msra.mxu0 %v28515_v2 }
0x17b6   : > { %24036 = vmatprep.subr.bf16.mxu0 %v28517_v25 }
0x17b8   : > { %23230 = vmatmul.mubr.f32.gmra.mrb[48].mxu0 %v19409_v60 }
0x17b9   : > { %23232 = vmatprep.mubr.f32.mxu0 %v19419_v30  ;;  %24038 = vmatpush3.bf16.msra.mxu0 %v28517_v25 }
0x17ba   : > { %24040 = vmatprep.subr.bf16.mxu0 %v28519_v6 }
0x17bc   : > { %23233 = vmatmul.mubr.f32.gmra.mrb[50].mxu0 %v19429_v44 }
0x17bd   : > { %24042 = vmatpush3.bf16.msra.mxu0 %v28519_v6  ;;  %23251 = vmatprep.mubr.f32.mxu0 %v28409_v29 }
0x17be   : > { %24044 = vmatprep.subr.bf16.mxu0 %v28364_v55 }
0x17c0   : > { %23252 = vmatmul.mubr.f32.vlgmr.msra.gmra.mrb[44].mxu0 %v28417_v10 }
0x17c1   : > { %23254 = vmatprep.mubr.f32.mxu0 %v28484_v7  ;;  %24046 = vmatpush3.bf16.msra.mxu0 %v28364_v55 }
0x17c2   : > { %24048 = vmatprep.subr.bf16.mxu0 %v28379_v15 }
0x17c4   : > { %23255 = vmatmul.mubr.f32.gmra.mrb[46].mxu0 %v28492_v12 }
0x17c5   : > { %23257 = vmatprep.mubr.f32.mxu0 %v28524_v4  ;;  %24050 = vmatpush3.bf16.msra.mxu0 %v28379_v15 }
0x17c6   : > { %24052 = vmatprep.subr.bf16.mxu0 %v28387_v31 }
0x17c8   : > { %23258 = vmatmul.mubr.f32.gmra.mrb[48].mxu0 %v28532_v63 }
0x17c9   : > { %23260 = vmatprep.mubr.f32.mxu0 %v28548_v39  ;;  %24054 = vmatpush3.bf16.msra.mxu0 %v28387_v31 }
0x17ca   : > { %24056 = vmatprep.subr.bf16.mxu0 %v28397_v43 }
0x17cc   : > { %23261 = vmatmul.mubr.f32.gmra.mrb[50].mxu0 %v28554_v17 }
0x17cd   : > { %24058 = vmatpush3.bf16.msra.mxu0 %v28397_v43  ;;  %23279 = vmatprep.mubr.f32.mxu0 %v28409_v29 }
0x17d0   : > { %23280 = vmatmul.mubr.f32.vlgmr.msra.gmra.mrb[44].mxu0 %v28417_v10 }
0x17d1   : > { %23282 = vmatprep.mubr.f32.mxu0 %v28484_v7 }
0x17d4   : > { %23283 = vmatmul.mubr.f32.gmra.mrb[46].mxu0 %v28492_v12 }
0x17d5   : > { %23285 = vmatprep.mubr.f32.mxu0 %v28524_v4 }
0x17d8   : > { %23286 = vmatmul.mubr.f32.gmra.mrb[48].mxu0 %v28532_v63 }
0x17d9   : > { %23288 = vmatprep.mubr.f32.mxu0 %v28548_v39 }
0x17dc   : > { %23289 = vmatmul.mubr.f32.gmra.mrb[50].mxu0 %v28554_v17 }
0x17dd   : > { %25150 = shalt.err (!%p25147_p0)
}
0x17de   : > { %s25151_s30 = scalar_lea.hbm %s28636_s5, 1024  ;;  %s25155_s28 = scalar_lea.hbm %s28877_s25, 2048 }
0x17df   : > { %p25152_p1 = scmp.ne.s32.totalorder %s28636_s5, %s25151_s30  ;;  %p25156_p10 = scmp.lt.u32.totalorder %s28636_s5, %s28877_s25 }
0x17e0   : > { %p25157_p9 = scmp.lt.u32.totalorder %s25155_s28, %s25151_s30  ;;  %p25159_p6 = scmp.lt.u32.totalorder %s25151_s30, %s28636_s5 }
0x17e1   : > { %p25153_p12 = pnand %p25152_p1, %p28878_p8 }
0x17e2   : > { %p25158_p4 = por %p25157_p9, %p25156_p10 }
0x17e3   : > { %p25154_p13 = pneg %p25153_p12 }
0x17e4   : > { %p25160_p5 = por %p25159_p6, %p25158_p4 }
0x17e6   : > { %p25161_p3 = pnand %p25160_p5, %p25154_p13 }
0x17e8   : > { %25164 = shalt.err (!%p25161_p3)
}
0x17e9   : > { %s25266_s11 = smov 128   ;;  %s25267_s12 = smov 8  }
0x17ea   : > { %24556 = dma.vmem_to_hbm [thread:$0]  (%p28878_p8), %s28639_s10, 1024, %s28636_s5, %s20144_s21, %s25266_s11, %s25266_s11, %s25267_s12  }
0x17eb   : > { %s28879_s1 = sld [smem:[#allocation44_spill]]  ;;  %s615_s13 = scalar_lea.vmem [#allocation14], %s25661_s2 }
0x17ec   : > { %s28880_s10 = sld [smem:[#allocation45_spill]]  ;;  %s20139_s8 = scalar_lea.sflag [#allocation4], %s25658_s4 }
0x17ed   : > { %s25268_s22 = smov [#allocation14]  }
0x17ee   : > { %s25169_s15 = sshll.u32 %s25268_s22, 4  ;;  %s25170_s15 = int_to_ptr.vmem [resolvable:$false] %s25169_s15 }
0x17ef   : > { %s25171_s28 = scalar_lea.vmem %s25170_s15, 2048 }
0x17f1   : > { %s628_s27 = scalar_lea.vmem %s28879_s1, %s26806_s29  ;;  %s20157_s29 = sshll.u32 %s615_s13, 4  ;;  %s28673_s29 = int_to_ptr.vmem [resolvable:$true] %s20157_s29 }
0x17f2   : > { %v20420_v37 = vld [vmem:[%s628_s27] ss:$0 sm:$0xff]  ;;  %s28680_s21 = scalar_lea.hbm %s28880_s10, %s20433_s20  ;;  %s25165_s30 = scalar_lea.vmem %s28673_s29, 1024 }
0x17f3   : > { %p25166_p7 = scmp.ne.s32.totalorder %s28673_s29, %s25165_s30  ;;  %p25172_p0 = scmp.lt.s32.totalorder %s28673_s29, %s25170_s15 }
0x17f4   : > { %p25173_p1 = scmp.lt.s32.totalorder %s25171_s28, %s25165_s30 }
0x17f5   : > { %p25167_p2 = pnand %p25166_p7, %p28878_p8 }
0x17f6   : > { %p25174_p12 = por %p25173_p1, %p25172_p0 }
0x17f7   : > { %p25168_p11 = pneg %p25167_p2 }
0x17f9   : > { %p25175_p13 = pnand %p25174_p12, %p25168_p11 }
0x18a3   : > { %v23281_v55 = vpop.f32.mrb[44].mxu0 }
0x18a4   : > { %v24095_v15 = vadd.f32 %v23281_v55, %v20420_v37  ;;  %v20076_v31 = vpop.f32.mrb[45].mxu0 }
0x18a5   : > { %v24096_v43 = vadd.f32 %v20420_v37, %v20076_v31 }
0x18a6   : > { %20123 = vst [vmem:[%s615_s13 + $0x8] sm:$0xff] %v24095_v15 }
0x18a7   : > { %20122 = vst [vmem:[%s615_s13] sm:$0xff] %v24096_v43  ;;  %v23284_v29 = vpop.f32.mrb[46].mxu0 }
0x18a8   : > { %v24097_v18 = vadd.f32 %v23284_v29, %v20420_v37  ;;  %v20088_v10 = vpop.f32.mrb[47].mxu0 }
0x18a9   : > { %v24098_v19 = vadd.f32 %v20420_v37, %v20088_v10 }
0x18aa   : > { %20125 = vst [vmem:[%s615_s13 + $0x18] sm:$0xff] %v24097_v18 }
0x18ab   : > { %20124 = vst [vmem:[%s615_s13 + $0x10] sm:$0xff] %v24098_v19  ;;  %v23287_v21 = vpop.f32.mrb[48].mxu0 }
0x18ac   : > { %v24099_v38 = vadd.f32 %v23287_v21, %v20420_v37  ;;  %v20100_v23 = vpop.f32.mrb[49].mxu0 }
0x18ad   : > { %v24100_v42 = vadd.f32 %v20420_v37, %v20100_v23 }
0x18ae   : > { %20127 = vst [vmem:[%s615_s13 + $0x28] sm:$0xff] %v24099_v38 }
0x18af   : > { %20126 = vst [vmem:[%s615_s13 + $0x20] sm:$0xff] %v24100_v42  ;;  %v23290_v33 = vpop.f32.mrb[50].mxu0 }
0x18b0   : > { %v24101_v8 = vadd.f32 %v23290_v33, %v20420_v37  ;;  %v20112_v7 = vpop.f32.mrb[51].mxu0 }
0x18b1   : > { %v24102_v11 = vadd.f32 %v20420_v37, %v20112_v7 }
0x18b2   : > { %20129 = vst [vmem:[%s615_s13 + $0x38] sm:$0xff] %v24101_v8 }
0x18b3   : > { %20128 = vst [vmem:[%s615_s13 + $0x30] sm:$0xff] %v24102_v11 }
0x18b4   : > { %25178 = shalt.err (!%p25175_p13)
}
0x18b5   : > { %s25179_s14 = scalar_lea.hbm %s28680_s21, 1024  ;;  %s25183_s17 = scalar_lea.hbm %s28880_s10, 2048 }
0x18b6   : > { %p25180_p10 = scmp.ne.s32.totalorder %s28680_s21, %s25179_s14  ;;  %p25184_p6 = scmp.lt.u32.totalorder %s28680_s21, %s28880_s10 }
0x18b7   : > { %p25185_p5 = scmp.lt.u32.totalorder %s25183_s17, %s25179_s14  ;;  %p25187_p7 = scmp.lt.u32.totalorder %s25179_s14, %s28680_s21 }
0x18b8   : > { %p25181_p9 = pnand %p25180_p10, %p28878_p8 }
0x18b9   : > { %p25186_p3 = por %p25185_p5, %p25184_p6 }
0x18ba   : > { %p25182_p4 = pneg %p25181_p9 }
0x18bb   : > { %p25188_p2 = por %p25187_p7, %p25186_p3 }
0x18bd   : > { %p25189_p11 = pnand %p25188_p2, %p25182_p4 }
0x18bf   : > { %25192 = shalt.err (!%p25189_p11)
}
0x18c0   : > { %24555 = dma.vmem_to_hbm [thread:$0]  (%p28878_p8), %s28673_s29, 1024, %s28680_s21, %s20139_s8, %s25266_s11, %s25266_s11, %s25267_s12  }
0x18c1 PF: > { %s28881_s1 = sld [smem:[#allocation23_spill]]  ;;  %s28882_s27 = sld [smem:[#allocation27_spill]] }
0x18c2   : > { %p28884_p1 = scmp.ge.s32.totalorder %s25247_s24, 2 }
0x18c7   : > { %s20188_s13 = sand.u32 1, %s28881_s1   ;;  %p28883_p0 = scmp.ne.s32.totalorder %s28882_s27, 0 }
0x18c8   : > { %s20189_s2 = scalar_lea.sflag [#allocation4], %s20188_s13 }
0x18c9   : > { %p24583_p12 = pnand %p28884_p1, %p28883_p0 }
0x18cb   : > { %25226 = dma.done.wait (!%p24583_p12), %s20189_s2, 1024  }
0x18cc   : > { %25228 = vsyncadd (!%p24583_p12), %s20189_s2, 4294966272  ;;  %s20198_s19 = scalar_lea.sflag [#allocation16], %s20188_s13 }
0x18cd   : > { %25230 = dma.done.wait (!%p24583_p12), %s20198_s19, 1024  }
0x18ce   : > { %25232 = vsyncadd (!%p24583_p12), %s20198_s19, 4294966272  ;;  %s28885_s24 = sld [smem:[#allocation29_spill]]  ;;  %s28886_s21 = sld [smem:[#allocation24_spill]] }
0x18cf   : > { %s28887_s4 = sld [smem:[#allocation30_spill]]  ;;  %s28888_s22 = smov %s25243_s23 }
0x18d4   : > { %p34_p8 = scmp.ge.s32.totalorder %s28885_s24, 4  }
0x18d5   : > { %s28889_s23 = smov %s28887_s4 }
0x18d6   :  { %36 = sbr.rel (!%p34_p8) target bundleno = 20 (0x14), region = 180 }
0x18dd   :  { %20203 = vsyncpa [#allocation3], 1 }
0x18de   :  { %20205 = vsyncpa [#allocation3 + $0x1], 1 }
0x18df   :  { %20206 = vsyncpa [#allocation6], 1 }
0x18e0   :  { %20207 = vsyncpa [#allocation9], 1 }
0x18e1   :  { %20209 = vsyncpa [#allocation9 + $0x1], 1 }
0x18e2   :  { %20210 = vsyncpa [#allocation12], 1 }
0x18e3   :  { %20212 = vsyncpa [#allocation12 + $0x1], 1 }
0x18e4   :  { %20213 = vsyncpa [#allocation4], 1 }
0x18e5   :  { %20215 = vsyncpa [#allocation4 + $0x1], 1 }
0x18e6   :  { %20216 = vsyncpa [#allocation16], 1 }
0x18e7   :  { %20218 = vsyncpa [#allocation16 + $0x1], 1 }

</bundles_post_ra>
